<compile_context>
chip_gen: v6e
topology: v6e:2x2x1
jax: 0.10.0
libtpu: 0.0.40
codegen_flags: <defaults>
</compile_context>

<pallas_src>
import math

import jax
import jax.numpy as jnp
from jax.experimental import pallas as pl
from jax.experimental.pallas import tpu as pltpu


_VMEM_LIMIT_BYTES = 48 * 1024 * 1024  # safe on v7x (64 MiB/TC); fine on v5e/v6e (128 MiB)


# ============================================================================
# In-kernel helpers (traced inside the single fused Pallas kernel)
# Layout convention: activations are (2*D, tc) with rows [real(D); imag(D)]
# and tokens on the lane (minor) axis.
# ============================================================================

def _cplx_linear_t(x, w_ref, b_ref):
    """Real-embedded complex linear in transposed form.

    x: (2*Din, tc) f32; w_ref: (2*Dout, 2*Din) bf16 packed as
    [[Wr^T, -Wi^T], [Wi^T, Wr^T]]; b_ref: (2*Dout, 1) f32 packed as
    [br - bi; br + bi].  Matches torch apply_complex(fc_r, fc_i, x):
        real = (xr @ Wr + br) - (xi @ Wi + bi)
        imag = (xi @ Wr + br) + (xr @ Wi + bi)
    """
    y = jnp.dot(w_ref[...], x.astype(jnp.bfloat16),
                preferred_element_type=jnp.float32)
    return y + b_ref[...]


def _complex_ln_t(x, w_ref, b_ref, D):
    """ComplexLN: complex mean, unbiased |x-mean|^2 variance (torch.var), complex affine.

    x: (2*D, tc); w_ref/b_ref: (2*D, 1) packed as [w_r; w_i] / [b_r; b_i].
    Feature reduction is over the row axis (cheap cross-vreg adds).
    """
    xr, xi = x[:D], x[D:]
    mr = jnp.mean(xr, axis=0, keepdims=True)
    mi = jnp.mean(xi, axis=0, keepdims=True)
    dr = xr - mr
    di = xi - mi
    var = jnp.sum(dr * dr + di * di, axis=0, keepdims=True) * (1.0 / (D - 1))
    # NOTE: reference ComplexLN has no epsilon; kept faithful (rsqrt on EUP slot).
    inv_std = jax.lax.rsqrt(var)
    nr = dr * inv_std
    ni = di * inv_std
    w = w_ref[...]
    wr, wi = w[:D], w[D:]
    out_r = nr * wr - ni * wi
    out_i = nr * wi + ni * wr
    return jnp.concatenate([out_r, out_i], axis=0) + b_ref[...]


def _cplx_attention_t(qr, qi, kr, ki, vr, vi, E, H):
    """ComplexAttention for a token tile, tokens on the lane axis.

    Inputs are (E*H, tc) with row index e*H + h (torch .view(B, L, E, H, 1)).
    scores[l, s, h, t] = q[l, h, t] * k[s, h, t]  ('e' axis has size 1).
    Softmax over s is taken on |scores|, so the attention weights are real and
    the second complex_mul reduces to two real weighted sums.
    """
    EH = E * H
    tc = qr.shape[-1]
    q3r, q3i = qr.reshape(E, H, tc), qi.reshape(E, H, tc)
    k3r, k3i = kr.reshape(E, H, tc), ki.reshape(E, H, tc)
    v3r, v3i = vr.reshape(E, H, tc), vi.reshape(E, H, tc)

    qb_r, qb_i = q3r[:, None], q3i[:, None]    # (E_l, 1, H, tc)
    kb_r, kb_i = k3r[None], k3i[None]          # (1, E_s, H, tc)

    # Gauss 3-multiply complex outer product (25% fewer VALU multiplies).
    t1 = qb_r * kb_r
    t2 = qb_i * kb_i
    t3 = (qb_r + qb_i) * (kb_r + kb_i)
    sr = t1 - t2                               # Re(scores)  (E_l, E_s, H, tc)
    si = t3 - t1 - t2                          # Im(scores)
    mag = jnp.sqrt(sr * sr + si * si)          # torch.abs(scores)

    # Softmax over s with deferred normalization (s is a non-minor axis:
    # max/sum are plain cross-vreg VALU reductions).
    m = jnp.max(mag, axis=1, keepdims=True)
    e = jnp.exp(mag - m)                       # unnormalized weights
    denom = jnp.sum(e, axis=1)                 # (E_l, H, tc)
    # TODO(synk): nn.Dropout(0.1) on the attention weights omitted (eval-mode identity).

    acc_r = jnp.sum(e * v3r[None], axis=1)     # (E_l, H, tc)
    acc_i = jnp.sum(e * v3i[None], axis=1)
    inv = pl.reciprocal(denom, approx=True)    # EUP slot, co-issues ~free
    out_r = (acc_r * inv).reshape(EH, tc)      # out.view(B, L, -1): row index e*H + h
    out_i = (acc_i * inv).reshape(EH, tc)
    return jnp.concatenate([out_r, out_i], axis=0)


def _make_block_kernel(n_layers, E, H, d_model):
    EH = E * H

    def kernel(*refs):
        x_ref = refs[0]
        y_ref = refs[-1]
        it = iter(refs[1:-1])

        def take(n):
            return tuple(next(it) for _ in range(n))

        emb_w, emb_b = take(2)
        layer_ps = [take(12) for _ in range(n_layers)]
        proj_w, proj_b = take(2)

        # --- emb ------------------------------------------------------------
        h = _cplx_linear_t(x_ref[...], emb_w, emb_b)
        # TODO(synk): complex_dropout (p=0.2) / nn.Dropout are eval-mode identities
        # here (no RNG mask); training-mode dropout is not implemented.

        # --- encoder layers (ComplexEncoderLayer) ----------------------------
        for (qkv_w, qkv_b, out_w, out_b, ln1_w, ln1_b,
             f1_w, f1_b, f2_w, f2_b, ln2_w, ln2_b) in layer_ps:
            # ComplexAttentionLayer: fused Q/K/V complex projection.
            qkv = _cplx_linear_t(h, qkv_w, qkv_b)     # (2*3*EH, tc)
            qr, kr, vr = qkv[:EH], qkv[EH:2 * EH], qkv[2 * EH:3 * EH]
            qi, ki, vi = qkv[3 * EH:4 * EH], qkv[4 * EH:5 * EH], qkv[5 * EH:]
            a = _cplx_attention_t(qr, qi, kr, ki, vr, vi, E, H)
            a = _cplx_linear_t(a, out_w, out_b)       # out_projection

            # residual + ComplexLN (norm1)
            h = _complex_ln_t(h + a, ln1_w, ln1_b, d_model)

            # feed-forward: complex_relu(Linear1) -> Linear2
            f = _cplx_linear_t(h, f1_w, f1_b)
            f = jnp.maximum(f, 0.0)                   # relu on both planes
            f = _cplx_linear_t(f, f2_w, f2_b)

            # residual + ComplexLN (norm2)
            h = _complex_ln_t(h + f, ln2_w, ln2_b, d_model)

        # --- output projection -----------------------------------------------
        y_ref[...] = _cplx_linear_t(h, proj_w, proj_b)

    return kernel


# ============================================================================
# Wrapper: one fused pallas_call for the whole block
# ============================================================================

def _pick_token_tile(T, E, H, d_model, d_ff, vmem_budget_bytes):
    """Token-lane tile choice.

    Small T: one grid step over the whole token axis (no forced split on
    single-TC v5e/v6e; avoids per-step pipeline overhead).  Large T: lane-dense
    multiples of 128 capped by a live-f32-temporaries estimate, preferring
    >=2 grid steps so v7x's two TensorCores both get work.
    """
    if T <= 256:
        return T, T
    # Rough f32 bytes live per token lane inside the kernel.
    per_lane = 4 * (8 * E * E * H       # attention score/weight temporaries
                    + 8 * 2 * d_model   # h, residual, attn/out/LN slabs
                    + 2 * 2 * d_ff      # FFN hidden (and its relu)
                    + 8 * E * H)        # q/k/v planes + attention accumulators
    cap = (vmem_budget_bytes // (2 * max(per_lane, 1))) // 128 * 128
    tc = max(128, min(1024, cap))
    while tc > 128 and (T + tc - 1) // tc < 2:   # prefer >=2 steps (v7x megacore)
        tc //= 2
    t_pad = ((T + tc - 1) // tc) * tc
    return tc, t_pad


def _comp_encoder_block(x_t, emb, layers, proj, *, n_layers, E, H,
                        d_model, d_ff, tar_len):
    F_in, T = x_t.shape                 # F_in = 2*ori_len, tokens on lanes
    F_out = 2 * tar_len
    tc, t_pad = _pick_token_tile(T, E, H, d_model, d_ff, _VMEM_LIMIT_BYTES)
    if t_pad != T:
        # Padded token lanes never mix with real ones (all ops are per-lane);
        # they are sliced away below.
        x_t = jnp.pad(x_t, ((0, 0), (0, t_pad - T)))
    grid = (t_pad // tc,)

    flat_args = [x_t]
    in_specs = [pl.BlockSpec((F_in, tc), lambda i: (0, i))]

    def add_params(ps):
        for a in ps:
            flat_args.append(a)
            # Full-array block with a constant index: DMA'd into VMEM once and
            # reused by every (parallel) token tile.
            # TODO(synk): at production d_model/d_ff, single-buffer these via
            # pipeline_mode=pl.Buffered(1) and K-tile the big matmuls with an
            # extra "arbitrary" grid axis + f32 VMEM accumulator.
            in_specs.append(pl.BlockSpec(a.shape, lambda i: (0, 0)))

    add_params(emb)
    for lp in layers:
        for name in ("qkv", "out", "ln1", "ffn1", "ffn2", "ln2"):
            add_params(lp[name])
    add_params(proj)

    kernel = _make_block_kernel(n_layers, E, H, d_model)
    y = pl.pallas_call(
        kernel,
        out_shape=jax.ShapeDtypeStruct((F_out, t_pad), jnp.float32),
        grid_spec=pltpu.PrefetchScalarGridSpec(
            num_scalar_prefetch=0,
            grid=grid,
            in_specs=in_specs,
            out_specs=pl.BlockSpec((F_out, tc), lambda i: (0, i)),
        ),
        compiler_params=pltpu.CompilerParams(
            dimension_semantics=("parallel",),
            vmem_limit_bytes=_VMEM_LIMIT_BYTES,
        ),
    )(*flat_args)
    return y[:, :T] if t_pad != T else y


# ============================================================================
# Parameter init & packing (deterministic, mimics the PyTorch module defaults)
# ============================================================================

def _init_complex_linear(key, in_f, out_f):
    """nn.Linear default uniform init for fc_r and fc_i (weights stored as x@W form)."""
    bound = 1.0 / math.sqrt(in_f)
    kwr, kbr, kwi, kbi = jax.random.split(key, 4)
    wr = jax.random.uniform(kwr, (in_f, out_f), jnp.float32, -bound, bound)
    br = jax.random.uniform(kbr, (out_f,), jnp.float32, -bound, bound)
    wi = jax.random.uniform(kwi, (in_f, out_f), jnp.float32, -bound, bound)
    bi = jax.random.uniform(kbi, (out_f,), jnp.float32, -bound, bound)
    return wr, wi, br, bi


def _pack_linear_t(wr, wi, br, bi):
    """Pack a complex linear as a real-embedded, transposed (feature-major) matmul.

    W_T = [[Wr^T, -Wi^T], [Wi^T, Wr^T]] in bf16 (MXU-native), bias combos
    [br - bi; br + bi] in f32, computed once here instead of per grid step.
    """
    top = jnp.concatenate([wr.T, -wi.T], axis=1)
    bot = jnp.concatenate([wi.T, wr.T], axis=1)
    w_t = jnp.concatenate([top, bot], axis=0).astype(jnp.bfloat16)
    b_t = jnp.concatenate([br - bi, br + bi], axis=0).reshape(-1, 1).astype(jnp.float32)
    return w_t, b_t


def _init_complex_ln_t(d):
    """ComplexLN params: w_r = w_i = sqrt(2)/2, b_r = b_i = 0 (torch init), packed (2d, 1)."""
    w = jnp.full((d, 1), math.sqrt(2.0) / 2.0, jnp.float32)
    z = jnp.zeros((d, 1), jnp.float32)
    return (jnp.concatenate([w, w], axis=0), jnp.concatenate([z, z], axis=0))


class CompEncoderBlockPallas:
    """Eval-mode forward of CompEncoderBlock fused into a single Pallas kernel."""

    def __init__(self, configs, key, extended=True):
        seq_len = configs["seq_len"]
        pred_len = configs["pred_len"]
        self.tar_len = (seq_len + pred_len) // 2 + 1
        self.ori_len = (seq_len + pred_len) // 2 + 1 if extended else seq_len // 2 + 1
        self.d_model = configs["fnet_d_model"]
        self.d_ff = configs["fnet_d_ff"]
        self.n_heads = configs["n_heads"]
        self.n_layers = configs["fnet_layers"]
        assert self.d_model % self.n_heads == 0
        self.d_keys = self.d_model // self.n_heads
        EH = self.d_keys * self.n_heads          # == d_model (d_keys == d_values)

        keys = jax.random.split(key, 2 + self.n_layers)
        self.emb = _pack_linear_t(*_init_complex_linear(keys[0], self.ori_len, self.d_model))
        self.proj = _pack_linear_t(*_init_complex_linear(keys[1], self.d_model, self.tar_len))
        self.layers = []
        for li in range(self.n_layers):
            kq, kk, kv, ko, kf1, kf2 = jax.random.split(keys[2 + li], 6)
            q = _init_complex_linear(kq, self.d_model, EH)
            k = _init_complex_linear(kk, self.d_model, EH)
            v = _init_complex_linear(kv, self.d_model, EH)
            # Fused QKV projection: concat along Dout -> one real-embedded matmul.
            qkv = tuple(jnp.concatenate([q[j], k[j], v[j]], axis=-1) for j in range(4))
            self.layers.append({
                "qkv": _pack_linear_t(*qkv),
                "out": _pack_linear_t(*_init_complex_linear(ko, EH, self.d_model)),
                "ln1": _init_complex_ln_t(self.d_model),
                "ffn1": _pack_linear_t(*_init_complex_linear(kf1, self.d_model, self.d_ff)),
                "ffn2": _pack_linear_t(*_init_complex_linear(kf2, self.d_ff, self.d_model)),
                "ln2": _init_complex_ln_t(self.d_model),
            })

    def __call__(self, xr, xi):
        """xr, xi: float32 (B, ori_len, C) — real/imag planes of the complex input."""
        B, lin, C = xr.shape
        assert lin == self.ori_len
        # x.permute(0, 2, 1): attention tokens are the (batch, channel) pairs.
        # Feature-major (transposed) layout: (ori_len, B*C), tokens on lanes.
        # TODO(synk): at production sizes this transpose could be folded into a
        # 3-D BlockSpec / in-kernel XLU transpose to save one HBM round-trip.
        xr_t = xr.transpose(1, 0, 2).reshape(self.ori_len, B * C)
        xi_t = xi.transpose(1, 0, 2).reshape(self.ori_len, B * C)
        x_t = jnp.concatenate([xr_t, xi_t], axis=0)          # (2*ori_len, T)

        y_t = _comp_encoder_block(
            x_t, self.emb, self.layers, self.proj,
            n_layers=self.n_layers, E=self.d_keys, H=self.n_heads,
            d_model=self.d_model, d_ff=self.d_ff, tar_len=self.tar_len)

        yr_t, yi_t = y_t[:self.tar_len], y_t[self.tar_len:]  # (tar_len, T) each
        # final permute(0, 2, 1) back to (B, tar_len, C)
        yr = yr_t.reshape(self.tar_len, B, C).transpose(1, 0, 2)
        yi = yi_t.reshape(self.tar_len, B, C).transpose(1, 0, 2)
        return yr, yi


if __name__ == "__main__":
    configs = dict(seq_len=14, pred_len=2, fnet_d_model=32, fnet_d_ff=64,
                   n_heads=4, fnet_layers=2, complex_dropout=0.2)
    B, C = 2, 8                                   # batch, channels (enc_in)

    block = CompEncoderBlockPallas(configs, jax.random.PRNGKey(42))

    key = jax.random.PRNGKey(0)
    k1, k2 = jax.random.split(key)
    xr = jax.random.normal(k1, (B, block.ori_len, C), jnp.float32)
    xi = jax.random.normal(k2, (B, block.ori_len, C), jnp.float32)

    yr, yi = block(xr, xi)
    jax.block_until_ready((yr, yi))
    assert yr.shape == (B, block.tar_len, C) and yi.shape == (B, block.tar_len, C)
    assert bool(jnp.isfinite(yr).all()) and bool(jnp.isfinite(yi).all())
    print("KERNEL_OK")
</pallas_src>

<mosaic_0001>
module attributes {stable_mosaic.version = 11 : i64} {
  func.func @kernel(%arg0: i32, %arg1: memref<18x16xf32, #tpu.memory_space<vmem>>, %arg2: memref<64x18xbf16, #tpu.memory_space<vmem>>, %arg3: memref<64x1xf32, #tpu.memory_space<vmem>>, %arg4: memref<192x64xbf16, #tpu.memory_space<vmem>>, %arg5: memref<192x1xf32, #tpu.memory_space<vmem>>, %arg6: memref<64x64xbf16, #tpu.memory_space<vmem>>, %arg7: memref<64x1xf32, #tpu.memory_space<vmem>>, %arg8: memref<64x1xf32, #tpu.memory_space<vmem>>, %arg9: memref<64x1xf32, #tpu.memory_space<vmem>>, %arg10: memref<128x64xbf16, #tpu.memory_space<vmem>>, %arg11: memref<128x1xf32, #tpu.memory_space<vmem>>, %arg12: memref<64x128xbf16, #tpu.memory_space<vmem>>, %arg13: memref<64x1xf32, #tpu.memory_space<vmem>>, %arg14: memref<64x1xf32, #tpu.memory_space<vmem>>, %arg15: memref<64x1xf32, #tpu.memory_space<vmem>>, %arg16: memref<192x64xbf16, #tpu.memory_space<vmem>>, %arg17: memref<192x1xf32, #tpu.memory_space<vmem>>, %arg18: memref<64x64xbf16, #tpu.memory_space<vmem>>, %arg19: memref<64x1xf32, #tpu.memory_space<vmem>>, %arg20: memref<64x1xf32, #tpu.memory_space<vmem>>, %arg21: memref<64x1xf32, #tpu.memory_space<vmem>>, %arg22: memref<128x64xbf16, #tpu.memory_space<vmem>>, %arg23: memref<128x1xf32, #tpu.memory_space<vmem>>, %arg24: memref<64x128xbf16, #tpu.memory_space<vmem>>, %arg25: memref<64x1xf32, #tpu.memory_space<vmem>>, %arg26: memref<64x1xf32, #tpu.memory_space<vmem>>, %arg27: memref<64x1xf32, #tpu.memory_space<vmem>>, %arg28: memref<18x64xbf16, #tpu.memory_space<vmem>>, %arg29: memref<18x1xf32, #tpu.memory_space<vmem>>, %arg30: memref<18x16xf32, #tpu.memory_space<vmem>>) attributes {dimension_semantics = [#tpu.dimension_semantics<parallel>], iteration_bounds = array<i64: 1>, scalar_prefetch = 0 : i64, scratch_operands = 0 : i64, tpu.core_type = #tpu.core_type<tc>, window_params = [{transform_indices = @transform_0, window_bounds = array<i64: 18, 16>}, {pipeline_mode = #tpu.pipeline_mode<synchronous>, transform_indices = @transform_1, window_bounds = array<i64: 64, 18>}, {pipeline_mode = #tpu.pipeline_mode<synchronous>, transform_indices = @transform_2, window_bounds = array<i64: 64, 1>}, {pipeline_mode = #tpu.pipeline_mode<synchronous>, transform_indices = @transform_3, window_bounds = array<i64: 192, 64>}, {pipeline_mode = #tpu.pipeline_mode<synchronous>, transform_indices = @transform_4, window_bounds = array<i64: 192, 1>}, {pipeline_mode = #tpu.pipeline_mode<synchronous>, transform_indices = @transform_5, window_bounds = array<i64: 64, 64>}, {pipeline_mode = #tpu.pipeline_mode<synchronous>, transform_indices = @transform_6, window_bounds = array<i64: 64, 1>}, {pipeline_mode = #tpu.pipeline_mode<synchronous>, transform_indices = @transform_7, window_bounds = array<i64: 64, 1>}, {pipeline_mode = #tpu.pipeline_mode<synchronous>, transform_indices = @transform_8, window_bounds = array<i64: 64, 1>}, {pipeline_mode = #tpu.pipeline_mode<synchronous>, transform_indices = @transform_9, window_bounds = array<i64: 128, 64>}, {pipeline_mode = #tpu.pipeline_mode<synchronous>, transform_indices = @transform_10, window_bounds = array<i64: 128, 1>}, {pipeline_mode = #tpu.pipeline_mode<synchronous>, transform_indices = @transform_11, window_bounds = array<i64: 64, 128>}, {pipeline_mode = #tpu.pipeline_mode<synchronous>, transform_indices = @transform_12, window_bounds = array<i64: 64, 1>}, {pipeline_mode = #tpu.pipeline_mode<synchronous>, transform_indices = @transform_13, window_bounds = array<i64: 64, 1>}, {pipeline_mode = #tpu.pipeline_mode<synchronous>, transform_indices = @transform_14, window_bounds = array<i64: 64, 1>}, {pipeline_mode = #tpu.pipeline_mode<synchronous>, transform_indices = @transform_15, window_bounds = array<i64: 192, 64>}, {pipeline_mode = #tpu.pipeline_mode<synchronous>, transform_indices = @transform_16, window_bounds = array<i64: 192, 1>}, {pipeline_mode = #tpu.pipeline_mode<synchronous>, transform_indices = @transform_17, window_bounds = array<i64: 64, 64>}, {pipeline_mode = #tpu.pipeline_mode<synchronous>, transform_indices = @transform_18, window_bounds = array<i64: 64, 1>}, {pipeline_mode = #tpu.pipeline_mode<synchronous>, transform_indices = @transform_19, window_bounds = array<i64: 64, 1>}, {pipeline_mode = #tpu.pipeline_mode<synchronous>, transform_indices = @transform_20, window_bounds = array<i64: 64, 1>}, {pipeline_mode = #tpu.pipeline_mode<synchronous>, transform_indices = @transform_21, window_bounds = array<i64: 128, 64>}, {pipeline_mode = #tpu.pipeline_mode<synchronous>, transform_indices = @transform_22, window_bounds = array<i64: 128, 1>}, {pipeline_mode = #tpu.pipeline_mode<synchronous>, transform_indices = @transform_23, window_bounds = array<i64: 64, 128>}, {pipeline_mode = #tpu.pipeline_mode<synchronous>, transform_indices = @transform_24, window_bounds = array<i64: 64, 1>}, {pipeline_mode = #tpu.pipeline_mode<synchronous>, transform_indices = @transform_25, window_bounds = array<i64: 64, 1>}, {pipeline_mode = #tpu.pipeline_mode<synchronous>, transform_indices = @transform_26, window_bounds = array<i64: 64, 1>}, {pipeline_mode = #tpu.pipeline_mode<synchronous>, transform_indices = @transform_27, window_bounds = array<i64: 18, 64>}, {pipeline_mode = #tpu.pipeline_mode<synchronous>, transform_indices = @transform_28, window_bounds = array<i64: 18, 1>}, {transform_indices = @transform_29, window_bounds = array<i64: 18, 16>}]} {
    %c0 = arith.constant 0 : index
    %c0_0 = arith.constant 0 : index
    %0 = vector.load %arg1[%c0, %c0_0] : memref<18x16xf32, #tpu.memory_space<vmem>>, vector<18x16xf32>
    %c0_1 = arith.constant 0 : index
    %c0_2 = arith.constant 0 : index
    %1 = vector.load %arg2[%c0_1, %c0_2] : memref<64x18xbf16, #tpu.memory_space<vmem>>, vector<64x18xbf16>
    %2 = arith.truncf %0 : vector<18x16xf32> to vector<18x16xbf16>
    %cst = arith.constant dense<0.000000e+00> : vector<64x16xf32>
    %3 = tpu.matmul %1, %2, %cst {dimension_numbers = #tpu.dot_dimension_numbers<[1], [0], [0], [1], [0, 0, 1, 1], [], []>} : vector<64x18xbf16>, vector<18x16xbf16>, vector<64x16xf32> -> vector<64x16xf32>
    %c0_3 = arith.constant 0 : index
    %c0_4 = arith.constant 0 : index
    %4 = vector.load %arg3[%c0_3, %c0_4] : memref<64x1xf32, #tpu.memory_space<vmem>>, vector<64x1xf32>
    %5 = vector.broadcast %4 : vector<64x1xf32> to vector<64x16xf32>
    %6 = arith.addf %3, %5 : vector<64x16xf32>
    %c0_5 = arith.constant 0 : index
    %c0_6 = arith.constant 0 : index
    %7 = vector.load %arg4[%c0_5, %c0_6] : memref<192x64xbf16, #tpu.memory_space<vmem>>, vector<192x64xbf16>
    %8 = arith.truncf %6 : vector<64x16xf32> to vector<64x16xbf16>
    %cst_7 = arith.constant dense<0.000000e+00> : vector<192x16xf32>
    %9 = tpu.matmul %7, %8, %cst_7 {dimension_numbers = #tpu.dot_dimension_numbers<[1], [0], [0], [1], [0, 0, 1, 1], [], []>} : vector<192x64xbf16>, vector<64x16xbf16>, vector<192x16xf32> -> vector<192x16xf32>
    %c0_8 = arith.constant 0 : index
    %c0_9 = arith.constant 0 : index
    %10 = vector.load %arg5[%c0_8, %c0_9] : memref<192x1xf32, #tpu.memory_space<vmem>>, vector<192x1xf32>
    %11 = vector.broadcast %10 : vector<192x1xf32> to vector<192x16xf32>
    %12 = arith.addf %9, %11 : vector<192x16xf32>
    %13 = vector.extract_strided_slice %12 {offsets = [0, 0], sizes = [32, 16], strides = [1, 1]} : vector<192x16xf32> to vector<32x16xf32>
    %14 = vector.extract_strided_slice %12 {offsets = [32, 0], sizes = [32, 16], strides = [1, 1]} : vector<192x16xf32> to vector<32x16xf32>
    %15 = vector.extract_strided_slice %12 {offsets = [64, 0], sizes = [32, 16], strides = [1, 1]} : vector<192x16xf32> to vector<32x16xf32>
    %16 = vector.extract_strided_slice %12 {offsets = [96, 0], sizes = [32, 16], strides = [1, 1]} : vector<192x16xf32> to vector<32x16xf32>
    %17 = vector.extract_strided_slice %12 {offsets = [128, 0], sizes = [32, 16], strides = [1, 1]} : vector<192x16xf32> to vector<32x16xf32>
    %18 = vector.extract_strided_slice %12 {offsets = [160, 0], sizes = [32, 16], strides = [1, 1]} : vector<192x16xf32> to vector<32x16xf32>
    %19 = vector.shape_cast %13 : vector<32x16xf32> to vector<8x4x16xf32>
    %20 = vector.shape_cast %16 : vector<32x16xf32> to vector<8x4x16xf32>
    %21 = vector.shape_cast %14 : vector<32x16xf32> to vector<8x4x16xf32>
    %22 = vector.shape_cast %17 : vector<32x16xf32> to vector<8x4x16xf32>
    %23 = vector.shape_cast %15 : vector<32x16xf32> to vector<8x4x16xf32>
    %24 = vector.shape_cast %18 : vector<32x16xf32> to vector<8x4x16xf32>
    %25 = vector.shape_cast %19 : vector<8x4x16xf32> to vector<8x1x4x16xf32>
    %26 = vector.shape_cast %20 : vector<8x4x16xf32> to vector<8x1x4x16xf32>
    %27 = vector.shape_cast %21 : vector<8x4x16xf32> to vector<1x8x4x16xf32>
    %28 = vector.shape_cast %22 : vector<8x4x16xf32> to vector<1x8x4x16xf32>
    %29 = vector.broadcast %25 : vector<8x1x4x16xf32> to vector<8x8x4x16xf32>
    %30 = vector.broadcast %27 : vector<1x8x4x16xf32> to vector<8x8x4x16xf32>
    %31 = arith.mulf %29, %30 : vector<8x8x4x16xf32>
    %32 = vector.broadcast %26 : vector<8x1x4x16xf32> to vector<8x8x4x16xf32>
    %33 = vector.broadcast %28 : vector<1x8x4x16xf32> to vector<8x8x4x16xf32>
    %34 = arith.mulf %32, %33 : vector<8x8x4x16xf32>
    %35 = arith.addf %25, %26 : vector<8x1x4x16xf32>
    %36 = arith.addf %27, %28 : vector<1x8x4x16xf32>
    %37 = vector.broadcast %35 : vector<8x1x4x16xf32> to vector<8x8x4x16xf32>
    %38 = vector.broadcast %36 : vector<1x8x4x16xf32> to vector<8x8x4x16xf32>
    %39 = arith.mulf %37, %38 : vector<8x8x4x16xf32>
    %40 = arith.subf %31, %34 : vector<8x8x4x16xf32>
    %41 = arith.subf %39, %31 : vector<8x8x4x16xf32>
    %42 = arith.subf %41, %34 : vector<8x8x4x16xf32>
    %43 = arith.mulf %40, %40 : vector<8x8x4x16xf32>
    %44 = arith.mulf %42, %42 : vector<8x8x4x16xf32>
    %45 = arith.addf %43, %44 : vector<8x8x4x16xf32>
    %46 = math.sqrt %45 : vector<8x8x4x16xf32>
    %cst_10 = arith.constant dense<0xFF800000> : vector<8x4x16xf32>
    %47 = vector.multi_reduction <maximumf>, %46, %cst_10 [1] : vector<8x8x4x16xf32> to vector<8x4x16xf32>
    %48 = vector.shape_cast %47 : vector<8x4x16xf32> to vector<8x1x4x16xf32>
    %49 = vector.broadcast %48 : vector<8x1x4x16xf32> to vector<8x8x4x16xf32>
    %50 = arith.subf %46, %49 : vector<8x8x4x16xf32>
    %51 = math.exp %50 : vector<8x8x4x16xf32>
    %cst_11 = arith.constant dense<0.000000e+00> : vector<8x4x16xf32>
    %52 = vector.multi_reduction <add>, %51, %cst_11 [1] : vector<8x8x4x16xf32> to vector<8x4x16xf32>
    %53 = vector.shape_cast %23 : vector<8x4x16xf32> to vector<1x8x4x16xf32>
    %54 = vector.broadcast %53 : vector<1x8x4x16xf32> to vector<8x8x4x16xf32>
    %55 = arith.mulf %51, %54 : vector<8x8x4x16xf32>
    %cst_12 = arith.constant dense<0.000000e+00> : vector<8x4x16xf32>
    %56 = vector.multi_reduction <add>, %55, %cst_12 [1] : vector<8x8x4x16xf32> to vector<8x4x16xf32>
    %57 = vector.shape_cast %24 : vector<8x4x16xf32> to vector<1x8x4x16xf32>
    %58 = vector.broadcast %57 : vector<1x8x4x16xf32> to vector<8x8x4x16xf32>
    %59 = arith.mulf %51, %58 : vector<8x8x4x16xf32>
    %cst_13 = arith.constant dense<0.000000e+00> : vector<8x4x16xf32>
    %60 = vector.multi_reduction <add>, %59, %cst_13 [1] : vector<8x8x4x16xf32> to vector<8x4x16xf32>
    %61 = tpu.reciprocal %52 {approx = true} : vector<8x4x16xf32> -> vector<8x4x16xf32>
    %62 = arith.mulf %56, %61 : vector<8x4x16xf32>
    %63 = vector.shape_cast %62 : vector<8x4x16xf32> to vector<32x16xf32>
    %64 = arith.mulf %60, %61 : vector<8x4x16xf32>
    %65 = vector.shape_cast %64 : vector<8x4x16xf32> to vector<32x16xf32>
    %66 = tpu.concatenate %63, %65 in 0 : vector<32x16xf32>, vector<32x16xf32> -> vector<64x16xf32>
    %c0_14 = arith.constant 0 : index
    %c0_15 = arith.constant 0 : index
    %67 = vector.load %arg6[%c0_14, %c0_15] : memref<64x64xbf16, #tpu.memory_space<vmem>>, vector<64x64xbf16>
    %68 = arith.truncf %66 : vector<64x16xf32> to vector<64x16xbf16>
    %cst_16 = arith.constant dense<0.000000e+00> : vector<64x16xf32>
    %69 = tpu.matmul %67, %68, %cst_16 {dimension_numbers = #tpu.dot_dimension_numbers<[1], [0], [0], [1], [0, 0, 1, 1], [], []>} : vector<64x64xbf16>, vector<64x16xbf16>, vector<64x16xf32> -> vector<64x16xf32>
    %c0_17 = arith.constant 0 : index
    %c0_18 = arith.constant 0 : index
    %70 = vector.load %arg7[%c0_17, %c0_18] : memref<64x1xf32, #tpu.memory_space<vmem>>, vector<64x1xf32>
    %71 = vector.broadcast %70 : vector<64x1xf32> to vector<64x16xf32>
    %72 = arith.addf %69, %71 : vector<64x16xf32>
    %73 = arith.addf %6, %72 : vector<64x16xf32>
    %74 = vector.extract_strided_slice %73 {offsets = [0, 0], sizes = [32, 16], strides = [1, 1]} : vector<64x16xf32> to vector<32x16xf32>
    %75 = vector.extract_strided_slice %73 {offsets = [32, 0], sizes = [32, 16], strides = [1, 1]} : vector<64x16xf32> to vector<32x16xf32>
    %cst_19 = arith.constant dense<0.000000e+00> : vector<16xf32>
    %76 = vector.multi_reduction <add>, %74, %cst_19 [0] : vector<32x16xf32> to vector<16xf32>
    %77 = vector.shape_cast %76 : vector<16xf32> to vector<1x16xf32>
    %cst_20 = arith.constant 3.200000e+01 : f32
    %78 = vector.broadcast %cst_20 : f32 to vector<1x16xf32>
    %79 = arith.divf %77, %78 : vector<1x16xf32>
    %cst_21 = arith.constant dense<0.000000e+00> : vector<16xf32>
    %80 = vector.multi_reduction <add>, %75, %cst_21 [0] : vector<32x16xf32> to vector<16xf32>
    %81 = vector.shape_cast %80 : vector<16xf32> to vector<1x16xf32>
    %cst_22 = arith.constant 3.200000e+01 : f32
    %82 = vector.broadcast %cst_22 : f32 to vector<1x16xf32>
    %83 = arith.divf %81, %82 : vector<1x16xf32>
    %84 = vector.broadcast %79 : vector<1x16xf32> to vector<32x16xf32>
    %85 = arith.subf %74, %84 : vector<32x16xf32>
    %86 = vector.broadcast %83 : vector<1x16xf32> to vector<32x16xf32>
    %87 = arith.subf %75, %86 : vector<32x16xf32>
    %88 = arith.mulf %85, %85 : vector<32x16xf32>
    %89 = arith.mulf %87, %87 : vector<32x16xf32>
    %90 = arith.addf %88, %89 : vector<32x16xf32>
    %cst_23 = arith.constant dense<0.000000e+00> : vector<16xf32>
    %91 = vector.multi_reduction <add>, %90, %cst_23 [0] : vector<32x16xf32> to vector<16xf32>
    %92 = vector.shape_cast %91 : vector<16xf32> to vector<1x16xf32>
    %cst_24 = arith.constant 0.0322580636 : f32
    %93 = vector.broadcast %cst_24 : f32 to vector<1x16xf32>
    %94 = arith.mulf %92, %93 : vector<1x16xf32>
    %95 = math.rsqrt %94 : vector<1x16xf32>
    %96 = vector.broadcast %95 : vector<1x16xf32> to vector<32x16xf32>
    %97 = arith.mulf %85, %96 : vector<32x16xf32>
    %98 = vector.broadcast %95 : vector<1x16xf32> to vector<32x16xf32>
    %99 = arith.mulf %87, %98 : vector<32x16xf32>
    %c0_25 = arith.constant 0 : index
    %c0_26 = arith.constant 0 : index
    %100 = vector.load %arg8[%c0_25, %c0_26] : memref<64x1xf32, #tpu.memory_space<vmem>>, vector<64x1xf32>
    %101 = vector.extract_strided_slice %100 {offsets = [0, 0], sizes = [32, 1], strides = [1, 1]} : vector<64x1xf32> to vector<32x1xf32>
    %102 = vector.extract_strided_slice %100 {offsets = [32, 0], sizes = [32, 1], strides = [1, 1]} : vector<64x1xf32> to vector<32x1xf32>
    %103 = vector.broadcast %101 : vector<32x1xf32> to vector<32x16xf32>
    %104 = arith.mulf %97, %103 : vector<32x16xf32>
    %105 = vector.broadcast %102 : vector<32x1xf32> to vector<32x16xf32>
    %106 = arith.mulf %99, %105 : vector<32x16xf32>
    %107 = arith.subf %104, %106 : vector<32x16xf32>
    %108 = vector.broadcast %102 : vector<32x1xf32> to vector<32x16xf32>
    %109 = arith.mulf %97, %108 : vector<32x16xf32>
    %110 = vector.broadcast %101 : vector<32x1xf32> to vector<32x16xf32>
    %111 = arith.mulf %99, %110 : vector<32x16xf32>
    %112 = arith.addf %109, %111 : vector<32x16xf32>
    %113 = tpu.concatenate %107, %112 in 0 : vector<32x16xf32>, vector<32x16xf32> -> vector<64x16xf32>
    %c0_27 = arith.constant 0 : index
    %c0_28 = arith.constant 0 : index
    %114 = vector.load %arg9[%c0_27, %c0_28] : memref<64x1xf32, #tpu.memory_space<vmem>>, vector<64x1xf32>
    %115 = vector.broadcast %114 : vector<64x1xf32> to vector<64x16xf32>
    %116 = arith.addf %113, %115 : vector<64x16xf32>
    %c0_29 = arith.constant 0 : index
    %c0_30 = arith.constant 0 : index
    %117 = vector.load %arg10[%c0_29, %c0_30] : memref<128x64xbf16, #tpu.memory_space<vmem>>, vector<128x64xbf16>
    %118 = arith.truncf %116 : vector<64x16xf32> to vector<64x16xbf16>
    %cst_31 = arith.constant dense<0.000000e+00> : vector<128x16xf32>
    %119 = tpu.matmul %117, %118, %cst_31 {dimension_numbers = #tpu.dot_dimension_numbers<[1], [0], [0], [1], [0, 0, 1, 1], [], []>} : vector<128x64xbf16>, vector<64x16xbf16>, vector<128x16xf32> -> vector<128x16xf32>
    %c0_32 = arith.constant 0 : index
    %c0_33 = arith.constant 0 : index
    %120 = vector.load %arg11[%c0_32, %c0_33] : memref<128x1xf32, #tpu.memory_space<vmem>>, vector<128x1xf32>
    %121 = vector.broadcast %120 : vector<128x1xf32> to vector<128x16xf32>
    %122 = arith.addf %119, %121 : vector<128x16xf32>
    %cst_34 = arith.constant 0.000000e+00 : f32
    %123 = vector.broadcast %cst_34 : f32 to vector<128x16xf32>
    %124 = arith.maximumf %122, %123 : vector<128x16xf32>
    %c0_35 = arith.constant 0 : index
    %c0_36 = arith.constant 0 : index
    %125 = vector.load %arg12[%c0_35, %c0_36] : memref<64x128xbf16, #tpu.memory_space<vmem>>, vector<64x128xbf16>
    %126 = arith.truncf %124 : vector<128x16xf32> to vector<128x16xbf16>
    %cst_37 = arith.constant dense<0.000000e+00> : vector<64x16xf32>
    %127 = tpu.matmul %125, %126, %cst_37 {dimension_numbers = #tpu.dot_dimension_numbers<[1], [0], [0], [1], [0, 0, 1, 1], [], []>} : vector<64x128xbf16>, vector<128x16xbf16>, vector<64x16xf32> -> vector<64x16xf32>
    %c0_38 = arith.constant 0 : index
    %c0_39 = arith.constant 0 : index
    %128 = vector.load %arg13[%c0_38, %c0_39] : memref<64x1xf32, #tpu.memory_space<vmem>>, vector<64x1xf32>
    %129 = vector.broadcast %128 : vector<64x1xf32> to vector<64x16xf32>
    %130 = arith.addf %127, %129 : vector<64x16xf32>
    %131 = arith.addf %116, %130 : vector<64x16xf32>
    %132 = vector.extract_strided_slice %131 {offsets = [0, 0], sizes = [32, 16], strides = [1, 1]} : vector<64x16xf32> to vector<32x16xf32>
    %133 = vector.extract_strided_slice %131 {offsets = [32, 0], sizes = [32, 16], strides = [1, 1]} : vector<64x16xf32> to vector<32x16xf32>
    %cst_40 = arith.constant dense<0.000000e+00> : vector<16xf32>
    %134 = vector.multi_reduction <add>, %132, %cst_40 [0] : vector<32x16xf32> to vector<16xf32>
    %135 = vector.shape_cast %134 : vector<16xf32> to vector<1x16xf32>
    %cst_41 = arith.constant 3.200000e+01 : f32
    %136 = vector.broadcast %cst_41 : f32 to vector<1x16xf32>
    %137 = arith.divf %135, %136 : vector<1x16xf32>
    %cst_42 = arith.constant dense<0.000000e+00> : vector<16xf32>
    %138 = vector.multi_reduction <add>, %133, %cst_42 [0] : vector<32x16xf32> to vector<16xf32>
    %139 = vector.shape_cast %138 : vector<16xf32> to vector<1x16xf32>
    %cst_43 = arith.constant 3.200000e+01 : f32
    %140 = vector.broadcast %cst_43 : f32 to vector<1x16xf32>
    %141 = arith.divf %139, %140 : vector<1x16xf32>
    %142 = vector.broadcast %137 : vector<1x16xf32> to vector<32x16xf32>
    %143 = arith.subf %132, %142 : vector<32x16xf32>
    %144 = vector.broadcast %141 : vector<1x16xf32> to vector<32x16xf32>
    %145 = arith.subf %133, %144 : vector<32x16xf32>
    %146 = arith.mulf %143, %143 : vector<32x16xf32>
    %147 = arith.mulf %145, %145 : vector<32x16xf32>
    %148 = arith.addf %146, %147 : vector<32x16xf32>
    %cst_44 = arith.constant dense<0.000000e+00> : vector<16xf32>
    %149 = vector.multi_reduction <add>, %148, %cst_44 [0] : vector<32x16xf32> to vector<16xf32>
    %150 = vector.shape_cast %149 : vector<16xf32> to vector<1x16xf32>
    %cst_45 = arith.constant 0.0322580636 : f32
    %151 = vector.broadcast %cst_45 : f32 to vector<1x16xf32>
    %152 = arith.mulf %150, %151 : vector<1x16xf32>
    %153 = math.rsqrt %152 : vector<1x16xf32>
    %154 = vector.broadcast %153 : vector<1x16xf32> to vector<32x16xf32>
    %155 = arith.mulf %143, %154 : vector<32x16xf32>
    %156 = vector.broadcast %153 : vector<1x16xf32> to vector<32x16xf32>
    %157 = arith.mulf %145, %156 : vector<32x16xf32>
    %c0_46 = arith.constant 0 : index
    %c0_47 = arith.constant 0 : index
    %158 = vector.load %arg14[%c0_46, %c0_47] : memref<64x1xf32, #tpu.memory_space<vmem>>, vector<64x1xf32>
    %159 = vector.extract_strided_slice %158 {offsets = [0, 0], sizes = [32, 1], strides = [1, 1]} : vector<64x1xf32> to vector<32x1xf32>
    %160 = vector.extract_strided_slice %158 {offsets = [32, 0], sizes = [32, 1], strides = [1, 1]} : vector<64x1xf32> to vector<32x1xf32>
    %161 = vector.broadcast %159 : vector<32x1xf32> to vector<32x16xf32>
    %162 = arith.mulf %155, %161 : vector<32x16xf32>
    %163 = vector.broadcast %160 : vector<32x1xf32> to vector<32x16xf32>
    %164 = arith.mulf %157, %163 : vector<32x16xf32>
    %165 = arith.subf %162, %164 : vector<32x16xf32>
    %166 = vector.broadcast %160 : vector<32x1xf32> to vector<32x16xf32>
    %167 = arith.mulf %155, %166 : vector<32x16xf32>
    %168 = vector.broadcast %159 : vector<32x1xf32> to vector<32x16xf32>
    %169 = arith.mulf %157, %168 : vector<32x16xf32>
    %170 = arith.addf %167, %169 : vector<32x16xf32>
    %171 = tpu.concatenate %165, %170 in 0 : vector<32x16xf32>, vector<32x16xf32> -> vector<64x16xf32>
    %c0_48 = arith.constant 0 : index
    %c0_49 = arith.constant 0 : index
    %172 = vector.load %arg15[%c0_48, %c0_49] : memref<64x1xf32, #tpu.memory_space<vmem>>, vector<64x1xf32>
    %173 = vector.broadcast %172 : vector<64x1xf32> to vector<64x16xf32>
    %174 = arith.addf %171, %173 : vector<64x16xf32>
    %c0_50 = arith.constant 0 : index
    %c0_51 = arith.constant 0 : index
    %175 = vector.load %arg16[%c0_50, %c0_51] : memref<192x64xbf16, #tpu.memory_space<vmem>>, vector<192x64xbf16>
    %176 = arith.truncf %174 : vector<64x16xf32> to vector<64x16xbf16>
    %cst_52 = arith.constant dense<0.000000e+00> : vector<192x16xf32>
    %177 = tpu.matmul %175, %176, %cst_52 {dimension_numbers = #tpu.dot_dimension_numbers<[1], [0], [0], [1], [0, 0, 1, 1], [], []>} : vector<192x64xbf16>, vector<64x16xbf16>, vector<192x16xf32> -> vector<192x16xf32>
    %c0_53 = arith.constant 0 : index
    %c0_54 = arith.constant 0 : index
    %178 = vector.load %arg17[%c0_53, %c0_54] : memref<192x1xf32, #tpu.memory_space<vmem>>, vector<192x1xf32>
    %179 = vector.broadcast %178 : vector<192x1xf32> to vector<192x16xf32>
    %180 = arith.addf %177, %179 : vector<192x16xf32>
    %181 = vector.extract_strided_slice %180 {offsets = [0, 0], sizes = [32, 16], strides = [1, 1]} : vector<192x16xf32> to vector<32x16xf32>
    %182 = vector.extract_strided_slice %180 {offsets = [32, 0], sizes = [32, 16], strides = [1, 1]} : vector<192x16xf32> to vector<32x16xf32>
    %183 = vector.extract_strided_slice %180 {offsets = [64, 0], sizes = [32, 16], strides = [1, 1]} : vector<192x16xf32> to vector<32x16xf32>
    %184 = vector.extract_strided_slice %180 {offsets = [96, 0], sizes = [32, 16], strides = [1, 1]} : vector<192x16xf32> to vector<32x16xf32>
    %185 = vector.extract_strided_slice %180 {offsets = [128, 0], sizes = [32, 16], strides = [1, 1]} : vector<192x16xf32> to vector<32x16xf32>
    %186 = vector.extract_strided_slice %180 {offsets = [160, 0], sizes = [32, 16], strides = [1, 1]} : vector<192x16xf32> to vector<32x16xf32>
    %187 = vector.shape_cast %181 : vector<32x16xf32> to vector<8x4x16xf32>
    %188 = vector.shape_cast %184 : vector<32x16xf32> to vector<8x4x16xf32>
    %189 = vector.shape_cast %182 : vector<32x16xf32> to vector<8x4x16xf32>
    %190 = vector.shape_cast %185 : vector<32x16xf32> to vector<8x4x16xf32>
    %191 = vector.shape_cast %183 : vector<32x16xf32> to vector<8x4x16xf32>
    %192 = vector.shape_cast %186 : vector<32x16xf32> to vector<8x4x16xf32>
    %193 = vector.shape_cast %187 : vector<8x4x16xf32> to vector<8x1x4x16xf32>
    %194 = vector.shape_cast %188 : vector<8x4x16xf32> to vector<8x1x4x16xf32>
    %195 = vector.shape_cast %189 : vector<8x4x16xf32> to vector<1x8x4x16xf32>
    %196 = vector.shape_cast %190 : vector<8x4x16xf32> to vector<1x8x4x16xf32>
    %197 = vector.broadcast %193 : vector<8x1x4x16xf32> to vector<8x8x4x16xf32>
    %198 = vector.broadcast %195 : vector<1x8x4x16xf32> to vector<8x8x4x16xf32>
    %199 = arith.mulf %197, %198 : vector<8x8x4x16xf32>
    %200 = vector.broadcast %194 : vector<8x1x4x16xf32> to vector<8x8x4x16xf32>
    %201 = vector.broadcast %196 : vector<1x8x4x16xf32> to vector<8x8x4x16xf32>
    %202 = arith.mulf %200, %201 : vector<8x8x4x16xf32>
    %203 = arith.addf %193, %194 : vector<8x1x4x16xf32>
    %204 = arith.addf %195, %196 : vector<1x8x4x16xf32>
    %205 = vector.broadcast %203 : vector<8x1x4x16xf32> to vector<8x8x4x16xf32>
    %206 = vector.broadcast %204 : vector<1x8x4x16xf32> to vector<8x8x4x16xf32>
    %207 = arith.mulf %205, %206 : vector<8x8x4x16xf32>
    %208 = arith.subf %199, %202 : vector<8x8x4x16xf32>
    %209 = arith.subf %207, %199 : vector<8x8x4x16xf32>
    %210 = arith.subf %209, %202 : vector<8x8x4x16xf32>
    %211 = arith.mulf %208, %208 : vector<8x8x4x16xf32>
    %212 = arith.mulf %210, %210 : vector<8x8x4x16xf32>
    %213 = arith.addf %211, %212 : vector<8x8x4x16xf32>
    %214 = math.sqrt %213 : vector<8x8x4x16xf32>
    %cst_55 = arith.constant dense<0xFF800000> : vector<8x4x16xf32>
    %215 = vector.multi_reduction <maximumf>, %214, %cst_55 [1] : vector<8x8x4x16xf32> to vector<8x4x16xf32>
    %216 = vector.shape_cast %215 : vector<8x4x16xf32> to vector<8x1x4x16xf32>
    %217 = vector.broadcast %216 : vector<8x1x4x16xf32> to vector<8x8x4x16xf32>
    %218 = arith.subf %214, %217 : vector<8x8x4x16xf32>
    %219 = math.exp %218 : vector<8x8x4x16xf32>
    %cst_56 = arith.constant dense<0.000000e+00> : vector<8x4x16xf32>
    %220 = vector.multi_reduction <add>, %219, %cst_56 [1] : vector<8x8x4x16xf32> to vector<8x4x16xf32>
    %221 = vector.shape_cast %191 : vector<8x4x16xf32> to vector<1x8x4x16xf32>
    %222 = vector.broadcast %221 : vector<1x8x4x16xf32> to vector<8x8x4x16xf32>
    %223 = arith.mulf %219, %222 : vector<8x8x4x16xf32>
    %cst_57 = arith.constant dense<0.000000e+00> : vector<8x4x16xf32>
    %224 = vector.multi_reduction <add>, %223, %cst_57 [1] : vector<8x8x4x16xf32> to vector<8x4x16xf32>
    %225 = vector.shape_cast %192 : vector<8x4x16xf32> to vector<1x8x4x16xf32>
    %226 = vector.broadcast %225 : vector<1x8x4x16xf32> to vector<8x8x4x16xf32>
    %227 = arith.mulf %219, %226 : vector<8x8x4x16xf32>
    %cst_58 = arith.constant dense<0.000000e+00> : vector<8x4x16xf32>
    %228 = vector.multi_reduction <add>, %227, %cst_58 [1] : vector<8x8x4x16xf32> to vector<8x4x16xf32>
    %229 = tpu.reciprocal %220 {approx = true} : vector<8x4x16xf32> -> vector<8x4x16xf32>
    %230 = arith.mulf %224, %229 : vector<8x4x16xf32>
    %231 = vector.shape_cast %230 : vector<8x4x16xf32> to vector<32x16xf32>
    %232 = arith.mulf %228, %229 : vector<8x4x16xf32>
    %233 = vector.shape_cast %232 : vector<8x4x16xf32> to vector<32x16xf32>
    %234 = tpu.concatenate %231, %233 in 0 : vector<32x16xf32>, vector<32x16xf32> -> vector<64x16xf32>
    %c0_59 = arith.constant 0 : index
    %c0_60 = arith.constant 0 : index
    %235 = vector.load %arg18[%c0_59, %c0_60] : memref<64x64xbf16, #tpu.memory_space<vmem>>, vector<64x64xbf16>
    %236 = arith.truncf %234 : vector<64x16xf32> to vector<64x16xbf16>
    %cst_61 = arith.constant dense<0.000000e+00> : vector<64x16xf32>
    %237 = tpu.matmul %235, %236, %cst_61 {dimension_numbers = #tpu.dot_dimension_numbers<[1], [0], [0], [1], [0, 0, 1, 1], [], []>} : vector<64x64xbf16>, vector<64x16xbf16>, vector<64x16xf32> -> vector<64x16xf32>
    %c0_62 = arith.constant 0 : index
    %c0_63 = arith.constant 0 : index
    %238 = vector.load %arg19[%c0_62, %c0_63] : memref<64x1xf32, #tpu.memory_space<vmem>>, vector<64x1xf32>
    %239 = vector.broadcast %238 : vector<64x1xf32> to vector<64x16xf32>
    %240 = arith.addf %237, %239 : vector<64x16xf32>
    %241 = arith.addf %174, %240 : vector<64x16xf32>
    %242 = vector.extract_strided_slice %241 {offsets = [0, 0], sizes = [32, 16], strides = [1, 1]} : vector<64x16xf32> to vector<32x16xf32>
    %243 = vector.extract_strided_slice %241 {offsets = [32, 0], sizes = [32, 16], strides = [1, 1]} : vector<64x16xf32> to vector<32x16xf32>
    %cst_64 = arith.constant dense<0.000000e+00> : vector<16xf32>
    %244 = vector.multi_reduction <add>, %242, %cst_64 [0] : vector<32x16xf32> to vector<16xf32>
    %245 = vector.shape_cast %244 : vector<16xf32> to vector<1x16xf32>
    %cst_65 = arith.constant 3.200000e+01 : f32
    %246 = vector.broadcast %cst_65 : f32 to vector<1x16xf32>
    %247 = arith.divf %245, %246 : vector<1x16xf32>
    %cst_66 = arith.constant dense<0.000000e+00> : vector<16xf32>
    %248 = vector.multi_reduction <add>, %243, %cst_66 [0] : vector<32x16xf32> to vector<16xf32>
    %249 = vector.shape_cast %248 : vector<16xf32> to vector<1x16xf32>
    %cst_67 = arith.constant 3.200000e+01 : f32
    %250 = vector.broadcast %cst_67 : f32 to vector<1x16xf32>
    %251 = arith.divf %249, %250 : vector<1x16xf32>
    %252 = vector.broadcast %247 : vector<1x16xf32> to vector<32x16xf32>
    %253 = arith.subf %242, %252 : vector<32x16xf32>
    %254 = vector.broadcast %251 : vector<1x16xf32> to vector<32x16xf32>
    %255 = arith.subf %243, %254 : vector<32x16xf32>
    %256 = arith.mulf %253, %253 : vector<32x16xf32>
    %257 = arith.mulf %255, %255 : vector<32x16xf32>
    %258 = arith.addf %256, %257 : vector<32x16xf32>
    %cst_68 = arith.constant dense<0.000000e+00> : vector<16xf32>
    %259 = vector.multi_reduction <add>, %258, %cst_68 [0] : vector<32x16xf32> to vector<16xf32>
    %260 = vector.shape_cast %259 : vector<16xf32> to vector<1x16xf32>
    %cst_69 = arith.constant 0.0322580636 : f32
    %261 = vector.broadcast %cst_69 : f32 to vector<1x16xf32>
    %262 = arith.mulf %260, %261 : vector<1x16xf32>
    %263 = math.rsqrt %262 : vector<1x16xf32>
    %264 = vector.broadcast %263 : vector<1x16xf32> to vector<32x16xf32>
    %265 = arith.mulf %253, %264 : vector<32x16xf32>
    %266 = vector.broadcast %263 : vector<1x16xf32> to vector<32x16xf32>
    %267 = arith.mulf %255, %266 : vector<32x16xf32>
    %c0_70 = arith.constant 0 : index
    %c0_71 = arith.constant 0 : index
    %268 = vector.load %arg20[%c0_70, %c0_71] : memref<64x1xf32, #tpu.memory_space<vmem>>, vector<64x1xf32>
    %269 = vector.extract_strided_slice %268 {offsets = [0, 0], sizes = [32, 1], strides = [1, 1]} : vector<64x1xf32> to vector<32x1xf32>
    %270 = vector.extract_strided_slice %268 {offsets = [32, 0], sizes = [32, 1], strides = [1, 1]} : vector<64x1xf32> to vector<32x1xf32>
    %271 = vector.broadcast %269 : vector<32x1xf32> to vector<32x16xf32>
    %272 = arith.mulf %265, %271 : vector<32x16xf32>
    %273 = vector.broadcast %270 : vector<32x1xf32> to vector<32x16xf32>
    %274 = arith.mulf %267, %273 : vector<32x16xf32>
    %275 = arith.subf %272, %274 : vector<32x16xf32>
    %276 = vector.broadcast %270 : vector<32x1xf32> to vector<32x16xf32>
    %277 = arith.mulf %265, %276 : vector<32x16xf32>
    %278 = vector.broadcast %269 : vector<32x1xf32> to vector<32x16xf32>
    %279 = arith.mulf %267, %278 : vector<32x16xf32>
    %280 = arith.addf %277, %279 : vector<32x16xf32>
    %281 = tpu.concatenate %275, %280 in 0 : vector<32x16xf32>, vector<32x16xf32> -> vector<64x16xf32>
    %c0_72 = arith.constant 0 : index
    %c0_73 = arith.constant 0 : index
    %282 = vector.load %arg21[%c0_72, %c0_73] : memref<64x1xf32, #tpu.memory_space<vmem>>, vector<64x1xf32>
    %283 = vector.broadcast %282 : vector<64x1xf32> to vector<64x16xf32>
    %284 = arith.addf %281, %283 : vector<64x16xf32>
    %c0_74 = arith.constant 0 : index
    %c0_75 = arith.constant 0 : index
    %285 = vector.load %arg22[%c0_74, %c0_75] : memref<128x64xbf16, #tpu.memory_space<vmem>>, vector<128x64xbf16>
    %286 = arith.truncf %284 : vector<64x16xf32> to vector<64x16xbf16>
    %cst_76 = arith.constant dense<0.000000e+00> : vector<128x16xf32>
    %287 = tpu.matmul %285, %286, %cst_76 {dimension_numbers = #tpu.dot_dimension_numbers<[1], [0], [0], [1], [0, 0, 1, 1], [], []>} : vector<128x64xbf16>, vector<64x16xbf16>, vector<128x16xf32> -> vector<128x16xf32>
    %c0_77 = arith.constant 0 : index
    %c0_78 = arith.constant 0 : index
    %288 = vector.load %arg23[%c0_77, %c0_78] : memref<128x1xf32, #tpu.memory_space<vmem>>, vector<128x1xf32>
    %289 = vector.broadcast %288 : vector<128x1xf32> to vector<128x16xf32>
    %290 = arith.addf %287, %289 : vector<128x16xf32>
    %cst_79 = arith.constant 0.000000e+00 : f32
    %291 = vector.broadcast %cst_79 : f32 to vector<128x16xf32>
    %292 = arith.maximumf %290, %291 : vector<128x16xf32>
    %c0_80 = arith.constant 0 : index
    %c0_81 = arith.constant 0 : index
    %293 = vector.load %arg24[%c0_80, %c0_81] : memref<64x128xbf16, #tpu.memory_space<vmem>>, vector<64x128xbf16>
    %294 = arith.truncf %292 : vector<128x16xf32> to vector<128x16xbf16>
    %cst_82 = arith.constant dense<0.000000e+00> : vector<64x16xf32>
    %295 = tpu.matmul %293, %294, %cst_82 {dimension_numbers = #tpu.dot_dimension_numbers<[1], [0], [0], [1], [0, 0, 1, 1], [], []>} : vector<64x128xbf16>, vector<128x16xbf16>, vector<64x16xf32> -> vector<64x16xf32>
    %c0_83 = arith.constant 0 : index
    %c0_84 = arith.constant 0 : index
    %296 = vector.load %arg25[%c0_83, %c0_84] : memref<64x1xf32, #tpu.memory_space<vmem>>, vector<64x1xf32>
    %297 = vector.broadcast %296 : vector<64x1xf32> to vector<64x16xf32>
    %298 = arith.addf %295, %297 : vector<64x16xf32>
    %299 = arith.addf %284, %298 : vector<64x16xf32>
    %300 = vector.extract_strided_slice %299 {offsets = [0, 0], sizes = [32, 16], strides = [1, 1]} : vector<64x16xf32> to vector<32x16xf32>
    %301 = vector.extract_strided_slice %299 {offsets = [32, 0], sizes = [32, 16], strides = [1, 1]} : vector<64x16xf32> to vector<32x16xf32>
    %cst_85 = arith.constant dense<0.000000e+00> : vector<16xf32>
    %302 = vector.multi_reduction <add>, %300, %cst_85 [0] : vector<32x16xf32> to vector<16xf32>
    %303 = vector.shape_cast %302 : vector<16xf32> to vector<1x16xf32>
    %cst_86 = arith.constant 3.200000e+01 : f32
    %304 = vector.broadcast %cst_86 : f32 to vector<1x16xf32>
    %305 = arith.divf %303, %304 : vector<1x16xf32>
    %cst_87 = arith.constant dense<0.000000e+00> : vector<16xf32>
    %306 = vector.multi_reduction <add>, %301, %cst_87 [0] : vector<32x16xf32> to vector<16xf32>
    %307 = vector.shape_cast %306 : vector<16xf32> to vector<1x16xf32>
    %cst_88 = arith.constant 3.200000e+01 : f32
    %308 = vector.broadcast %cst_88 : f32 to vector<1x16xf32>
    %309 = arith.divf %307, %308 : vector<1x16xf32>
    %310 = vector.broadcast %305 : vector<1x16xf32> to vector<32x16xf32>
    %311 = arith.subf %300, %310 : vector<32x16xf32>
    %312 = vector.broadcast %309 : vector<1x16xf32> to vector<32x16xf32>
    %313 = arith.subf %301, %312 : vector<32x16xf32>
    %314 = arith.mulf %311, %311 : vector<32x16xf32>
    %315 = arith.mulf %313, %313 : vector<32x16xf32>
    %316 = arith.addf %314, %315 : vector<32x16xf32>
    %cst_89 = arith.constant dense<0.000000e+00> : vector<16xf32>
    %317 = vector.multi_reduction <add>, %316, %cst_89 [0] : vector<32x16xf32> to vector<16xf32>
    %318 = vector.shape_cast %317 : vector<16xf32> to vector<1x16xf32>
    %cst_90 = arith.constant 0.0322580636 : f32
    %319 = vector.broadcast %cst_90 : f32 to vector<1x16xf32>
    %320 = arith.mulf %318, %319 : vector<1x16xf32>
    %321 = math.rsqrt %320 : vector<1x16xf32>
    %322 = vector.broadcast %321 : vector<1x16xf32> to vector<32x16xf32>
    %323 = arith.mulf %311, %322 : vector<32x16xf32>
    %324 = vector.broadcast %321 : vector<1x16xf32> to vector<32x16xf32>
    %325 = arith.mulf %313, %324 : vector<32x16xf32>
    %c0_91 = arith.constant 0 : index
    %c0_92 = arith.constant 0 : index
    %326 = vector.load %arg26[%c0_91, %c0_92] : memref<64x1xf32, #tpu.memory_space<vmem>>, vector<64x1xf32>
    %327 = vector.extract_strided_slice %326 {offsets = [0, 0], sizes = [32, 1], strides = [1, 1]} : vector<64x1xf32> to vector<32x1xf32>
    %328 = vector.extract_strided_slice %326 {offsets = [32, 0], sizes = [32, 1], strides = [1, 1]} : vector<64x1xf32> to vector<32x1xf32>
    %329 = vector.broadcast %327 : vector<32x1xf32> to vector<32x16xf32>
    %330 = arith.mulf %323, %329 : vector<32x16xf32>
    %331 = vector.broadcast %328 : vector<32x1xf32> to vector<32x16xf32>
    %332 = arith.mulf %325, %331 : vector<32x16xf32>
    %333 = arith.subf %330, %332 : vector<32x16xf32>
    %334 = vector.broadcast %328 : vector<32x1xf32> to vector<32x16xf32>
    %335 = arith.mulf %323, %334 : vector<32x16xf32>
    %336 = vector.broadcast %327 : vector<32x1xf32> to vector<32x16xf32>
    %337 = arith.mulf %325, %336 : vector<32x16xf32>
    %338 = arith.addf %335, %337 : vector<32x16xf32>
    %339 = tpu.concatenate %333, %338 in 0 : vector<32x16xf32>, vector<32x16xf32> -> vector<64x16xf32>
    %c0_93 = arith.constant 0 : index
    %c0_94 = arith.constant 0 : index
    %340 = vector.load %arg27[%c0_93, %c0_94] : memref<64x1xf32, #tpu.memory_space<vmem>>, vector<64x1xf32>
    %341 = vector.broadcast %340 : vector<64x1xf32> to vector<64x16xf32>
    %342 = arith.addf %339, %341 : vector<64x16xf32>
    %c0_95 = arith.constant 0 : index
    %c0_96 = arith.constant 0 : index
    %343 = vector.load %arg28[%c0_95, %c0_96] : memref<18x64xbf16, #tpu.memory_space<vmem>>, vector<18x64xbf16>
    %344 = arith.truncf %342 : vector<64x16xf32> to vector<64x16xbf16>
    %cst_97 = arith.constant dense<0.000000e+00> : vector<18x16xf32>
    %345 = tpu.matmul %343, %344, %cst_97 {dimension_numbers = #tpu.dot_dimension_numbers<[1], [0], [0], [1], [0, 0, 1, 1], [], []>} : vector<18x64xbf16>, vector<64x16xbf16>, vector<18x16xf32> -> vector<18x16xf32>
    %c0_98 = arith.constant 0 : index
    %c0_99 = arith.constant 0 : index
    %346 = vector.load %arg29[%c0_98, %c0_99] : memref<18x1xf32, #tpu.memory_space<vmem>>, vector<18x1xf32>
    %347 = vector.broadcast %346 : vector<18x1xf32> to vector<18x16xf32>
    %348 = arith.addf %345, %347 : vector<18x16xf32>
    %c0_100 = arith.constant 0 : index
    %c0_101 = arith.constant 0 : index
    %349 = vector.load %arg30[%c0_100, %c0_101] : memref<18x16xf32, #tpu.memory_space<vmem>>, vector<18x16xf32>
    tpu.vector_store %arg30[%c0_100, %c0_101], %348 {strides = array<i32>} : memref<18x16xf32, #tpu.memory_space<vmem>>, vector<18x16xf32>,
    return
  }
  func.func @transform_0(%arg0: i32) -> (i32, i32) {
    %c0_i32 = arith.constant 0 : i32
    %c0_i32_0 = arith.constant 0 : i32
    return %c0_i32, %arg0 : i32, i32
  }
  func.func @transform_1(%arg0: i32) -> (i32, i32) {
    %c0_i32 = arith.constant 0 : i32
    %c0_i32_0 = arith.constant 0 : i32
    %c0_i32_1 = arith.constant 0 : i32
    return %c0_i32, %c0_i32_0 : i32, i32
  }
  func.func @transform_2(%arg0: i32) -> (i32, i32) {
    %c0_i32 = arith.constant 0 : i32
    %c0_i32_0 = arith.constant 0 : i32
    %c0_i32_1 = arith.constant 0 : i32
    return %c0_i32, %c0_i32_0 : i32, i32
  }
  func.func @transform_3(%arg0: i32) -> (i32, i32) {
    %c0_i32 = arith.constant 0 : i32
    %c0_i32_0 = arith.constant 0 : i32
    %c0_i32_1 = arith.constant 0 : i32
    return %c0_i32, %c0_i32_0 : i32, i32
  }
  func.func @transform_4(%arg0: i32) -> (i32, i32) {
    %c0_i32 = arith.constant 0 : i32
    %c0_i32_0 = arith.constant 0 : i32
    %c0_i32_1 = arith.constant 0 : i32
    return %c0_i32, %c0_i32_0 : i32, i32
  }
  func.func @transform_5(%arg0: i32) -> (i32, i32) {
    %c0_i32 = arith.constant 0 : i32
    %c0_i32_0 = arith.constant 0 : i32
    %c0_i32_1 = arith.constant 0 : i32
    return %c0_i32, %c0_i32_0 : i32, i32
  }
  func.func @transform_6(%arg0: i32) -> (i32, i32) {
    %c0_i32 = arith.constant 0 : i32
    %c0_i32_0 = arith.constant 0 : i32
    %c0_i32_1 = arith.constant 0 : i32
    return %c0_i32, %c0_i32_0 : i32, i32
  }
  func.func @transform_7(%arg0: i32) -> (i32, i32) {
    %c0_i32 = arith.constant 0 : i32
    %c0_i32_0 = arith.constant 0 : i32
    %c0_i32_1 = arith.constant 0 : i32
    return %c0_i32, %c0_i32_0 : i32, i32
  }
  func.func @transform_8(%arg0: i32) -> (i32, i32) {
    %c0_i32 = arith.constant 0 : i32
    %c0_i32_0 = arith.constant 0 : i32
    %c0_i32_1 = arith.constant 0 : i32
    return %c0_i32, %c0_i32_0 : i32, i32
  }
  func.func @transform_9(%arg0: i32) -> (i32, i32) {
    %c0_i32 = arith.constant 0 : i32
    %c0_i32_0 = arith.constant 0 : i32
    %c0_i32_1 = arith.constant 0 : i32
    return %c0_i32, %c0_i32_0 : i32, i32
  }
  func.func @transform_10(%arg0: i32) -> (i32, i32) {
    %c0_i32 = arith.constant 0 : i32
    %c0_i32_0 = arith.constant 0 : i32
    %c0_i32_1 = arith.constant 0 : i32
    return %c0_i32, %c0_i32_0 : i32, i32
  }
  func.func @transform_11(%arg0: i32) -> (i32, i32) {
    %c0_i32 = arith.constant 0 : i32
    %c0_i32_0 = arith.constant 0 : i32
    %c0_i32_1 = arith.constant 0 : i32
    return %c0_i32, %c0_i32_0 : i32, i32
  }
  func.func @transform_12(%arg0: i32) -> (i32, i32) {
    %c0_i32 = arith.constant 0 : i32
    %c0_i32_0 = arith.constant 0 : i32
    %c0_i32_1 = arith.constant 0 : i32
    return %c0_i32, %c0_i32_0 : i32, i32
  }
  func.func @transform_13(%arg0: i32) -> (i32, i32) {
    %c0_i32 = arith.constant 0 : i32
    %c0_i32_0 = arith.constant 0 : i32
    %c0_i32_1 = arith.constant 0 : i32
    return %c0_i32, %c0_i32_0 : i32, i32
  }
  func.func @transform_14(%arg0: i32) -> (i32, i32) {
    %c0_i32 = arith.constant 0 : i32
    %c0_i32_0 = arith.constant 0 : i32
    %c0_i32_1 = arith.constant 0 : i32
    return %c0_i32, %c0_i32_0 : i32, i32
  }
  func.func @transform_15(%arg0: i32) -> (i32, i32) {
    %c0_i32 = arith.constant 0 : i32
    %c0_i32_0 = arith.constant 0 : i32
    %c0_i32_1 = arith.constant 0 : i32
    return %c0_i32, %c0_i32_0 : i32, i32
  }
  func.func @transform_16(%arg0: i32) -> (i32, i32) {
    %c0_i32 = arith.constant 0 : i32
    %c0_i32_0 = arith.constant 0 : i32
    %c0_i32_1 = arith.constant 0 : i32
    return %c0_i32, %c0_i32_0 : i32, i32
  }
  func.func @transform_17(%arg0: i32) -> (i32, i32) {
    %c0_i32 = arith.constant 0 : i32
    %c0_i32_0 = arith.constant 0 : i32
    %c0_i32_1 = arith.constant 0 : i32
    return %c0_i32, %c0_i32_0 : i32, i32
  }
  func.func @transform_18(%arg0: i32) -> (i32, i32) {
    %c0_i32 = arith.constant 0 : i32
    %c0_i32_0 = arith.constant 0 : i32
    %c0_i32_1 = arith.constant 0 : i32
    return %c0_i32, %c0_i32_0 : i32, i32
  }
  func.func @transform_19(%arg0: i32) -> (i32, i32) {
    %c0_i32 = arith.constant 0 : i32
    %c0_i32_0 = arith.constant 0 : i32
    %c0_i32_1 = arith.constant 0 : i32
    return %c0_i32, %c0_i32_0 : i32, i32
  }
  func.func @transform_20(%arg0: i32) -> (i32, i32) {
    %c0_i32 = arith.constant 0 : i32
    %c0_i32_0 = arith.constant 0 : i32
    %c0_i32_1 = arith.constant 0 : i32
    return %c0_i32, %c0_i32_0 : i32, i32
  }
  func.func @transform_21(%arg0: i32) -> (i32, i32) {
    %c0_i32 = arith.constant 0 : i32
    %c0_i32_0 = arith.constant 0 : i32
    %c0_i32_1 = arith.constant 0 : i32
    return %c0_i32, %c0_i32_0 : i32, i32
  }
  func.func @transform_22(%arg0: i32) -> (i32, i32) {
    %c0_i32 = arith.constant 0 : i32
    %c0_i32_0 = arith.constant 0 : i32
    %c0_i32_1 = arith.constant 0 : i32
    return %c0_i32, %c0_i32_0 : i32, i32
  }
  func.func @transform_23(%arg0: i32) -> (i32, i32) {
    %c0_i32 = arith.constant 0 : i32
    %c0_i32_0 = arith.constant 0 : i32
    %c0_i32_1 = arith.constant 0 : i32
    return %c0_i32, %c0_i32_0 : i32, i32
  }
  func.func @transform_24(%arg0: i32) -> (i32, i32) {
    %c0_i32 = arith.constant 0 : i32
    %c0_i32_0 = arith.constant 0 : i32
    %c0_i32_1 = arith.constant 0 : i32
    return %c0_i32, %c0_i32_0 : i32, i32
  }
  func.func @transform_25(%arg0: i32) -> (i32, i32) {
    %c0_i32 = arith.constant 0 : i32
    %c0_i32_0 = arith.constant 0 : i32
    %c0_i32_1 = arith.constant 0 : i32
    return %c0_i32, %c0_i32_0 : i32, i32
  }
  func.func @transform_26(%arg0: i32) -> (i32, i32) {
    %c0_i32 = arith.constant 0 : i32
    %c0_i32_0 = arith.constant 0 : i32
    %c0_i32_1 = arith.constant 0 : i32
    return %c0_i32, %c0_i32_0 : i32, i32
  }
  func.func @transform_27(%arg0: i32) -> (i32, i32) {
    %c0_i32 = arith.constant 0 : i32
    %c0_i32_0 = arith.constant 0 : i32
    %c0_i32_1 = arith.constant 0 : i32
    return %c0_i32, %c0_i32_0 : i32, i32
  }
  func.func @transform_28(%arg0: i32) -> (i32, i32) {
    %c0_i32 = arith.constant 0 : i32
    %c0_i32_0 = arith.constant 0 : i32
    %c0_i32_1 = arith.constant 0 : i32
    return %c0_i32, %c0_i32_0 : i32, i32
  }
  func.func @transform_29(%arg0: i32) -> (i32, i32) {
    %c0_i32 = arith.constant 0 : i32
    %c0_i32_0 = arith.constant 0 : i32
    return %c0_i32, %arg0 : i32, i32
  }
}

</mosaic_0001>

<bundles_post_ra>
// kernel: tpu_custom_call.1
= control target key start
LH: loop header
LB: loop body
LE: loop exit
PB: predicated region body
PF: predicated region fallthrough
CT: control target
= control target key end

     0   :  { %v8265_v0 = vmov 0   ;;  %s8266_s3 = smov 2   ;;  %s8267_s10 = smov 1   ;;  %vm217_vm0 = vcmask 1040384   ;;  %vm204_vm1 = vcmask 146432   ;;  %vm15484_vm2 = vcmask 523264   ;;  %s15235_s0 = inlined_call_operand.smem [shape: u32[30], index: -1, kind: input, shape index: {}] }
   0x1   :  { %7650 = vset.pattern.permute.xlu1 %v8265_v0  ;;  %7649 = vset.pattern.permute.xlu0 %v8265_v0  ;;  %s8303_s6 = sld [smem:[%s15235_s0 + %s8266_s3]]   ;;  %s8268_s14 = smov 4  }
   0x2   :  { %s1_s9 = sld [smem:[%s15235_s0]]   ;;  %s8269_s18 = smov 3  }
   0x3   :  { %s8313_s13 = sld [smem:[%s15235_s0 + %s8267_s10]]   ;;  %s8270_s22 = smov 15  }
   0x4   :  { %s8321_s17 = sld [smem:[%s15235_s0 + %s8268_s14]]   ;;  %s8271_s26 = smov 6  }
   0x5   :  { %s8343_s21 = sld [smem:[%s15235_s0 + %s8269_s18]]   ;;  %s8272_s30 = smov 7  }
   0x6   :  { %s8354_s25 = sld [smem:[%s15235_s0 + %s8270_s22]]   ;;  %s8273_s4 = smov 8  }
   0x7   :  { %v142_v1 = vld [vmem:[%s8303_s6 + $0x30] sm:$0xff]  ;;  %v140_v2 = vld [vmem:[%s8303_s6 + $0x20] sm:$0xff]  ;;  %v143_v3 = vld [vmem:[%s8303_s6 + $0x38] sm:$0xff]  ;;  %s7154_s29 = sld [smem:[%s15235_s0 + %s8271_s26]]   ;;  %s8274_s8 = smov 10  }
   0x8   :  { %176 = vperm.xlu0 %7649, %v142_v1   ;;  %166 = vperm.xlu1 %7650, %v140_v2   ;;  %v141_v4 = vld [vmem:[%s8303_s6 + $0x28] sm:$0xff]  ;;  %v139_v5 = vld [vmem:[%s8303_s6 + $0x18] sm:$0xff]  ;;  %v125_v6 = vld [vmem:[%s1_s9 + $0x10] sm:$0x3]  ;;  %s7155_s3 = sld [smem:[%s15235_s0 + %s8272_s30]]   ;;  %s8275_s12 = smov 12  }
   0x9   :  { %v123_v7 = vld [vmem:[%s1_s9] sm:$0xff]  ;;  %v124_v8 = vld [vmem:[%s1_s9 + $0x8] sm:$0xff]  ;;  %v135_v9 = vpack.c.bf16 %v125_v6, %v125_v6  ;;  %v138_v12 = vld [vmem:[%s8303_s6 + $0x10] sm:$0xff]  ;;  %s7156_s7 = sld [smem:[%s15235_s0 + %s8273_s4]]   ;;  %s8276_s16 = smov 13  }
   0xa   :  { %v134_v10 = vpack.c.bf16 %v124_v8, %v123_v7  ;;  %v7651_v11 = vld [vmem:[%s8313_s13] sm:$0xff]   ;;  %v137_v14 = vld [vmem:[%s8303_s6 + $0x8] sm:$0xff]  ;;  %v7653_v17 = vld [vmem:[%s8313_s13 + $0x10] sm:$0xff]   ;;  %s8380_s11 = sld [smem:[%s15235_s0 + %s8274_s8]]   ;;  %s8277_s20 = smov 14  }
   0xb   :  { %7618 = vmatprep.subr.msk.bf16.mxu0 %vm217_vm0, %v135_v9  ;;  %v219_v13 = vsel %vm217_vm0, %v135_v9, 0  ;;  %7406 = vmatprep.mubr.msk.bf16.mxu0 %vm204_vm1, %v7651_v11  ;;  %v136_v15 = vld [vmem:[%s8303_s6] sm:$0xff]  ;;  %v7652_v16 = vld [vmem:[%s8313_s13 + $0x8] sm:$0xff]   ;;  %v317_v18 = vld [vmem:[%s8321_s17 + $0x18] sm:$0xff]  ;;  %s8412_s15 = sld [smem:[%s15235_s0 + %s8275_s12]]   ;;  %s8278_s26 = smov 16  }
   0xc   :  { %181 = vperm.xlu0 %7649, %v143_v3   ;;  %171 = vperm.xlu1 %7650, %v141_v4   ;;  %v316_v19 = vld [vmem:[%s8321_s17 + $0x10] sm:$0xff]  ;;  %v318_v21 = vld [vmem:[%s8321_s17 + $0x20] sm:$0xff]  ;;  %v7654_v22 = vld [vmem:[%s8313_s13 + $0x18] sm:$0xff]   ;;  %s8441_s19 = sld [smem:[%s15235_s0 + %s8276_s16]]   ;;  %s8279_s30 = smov 18  }
   0xd   :  { %7403 = vmatpush3.bf16.msra.mxu0 %v219_v13  ;;  %v328_v20 = vld [vmem:[%s8321_s17 + $0x70] sm:$0xff]  ;;  %v330_v23 = vld [vmem:[%s8321_s17 + $0x80] sm:$0xff]  ;;  %v329_v24 = vld [vmem:[%s8321_s17 + $0x78] sm:$0xff]  ;;  %s7162_s24 = sld [smem:[%s15235_s0 + %s8277_s20]]   ;;  %s8280_s4 = smov 19  }
   0xe   :  { %7404 = vmatprep.subr.bf16.mxu0 %v134_v10  ;;  %v315_v25 = vld [vmem:[%s8321_s17 + $0x8] sm:$0xff]  ;;  %v314_v26 = vld [vmem:[%s8321_s17] sm:$0xff]  ;;  %v332_v31 = vld [vmem:[%s8321_s17 + $0x90] sm:$0xff]  ;;  %s8281_s8 = smov 20   ;;  %s8282_s12 = smov 22  }
   0xf   :  { %v326_v27 = vld [vmem:[%s8321_s17 + $0x60] sm:$0xff]  ;;  %v319_v28 = vld [vmem:[%s8321_s17 + $0x28] sm:$0xff]  ;;  %v320_v32 = vld [vmem:[%s8321_s17 + $0x30] sm:$0xff]  ;;  %s8292_s22 = smov 23   ;;  %s8293_s27 = smov 27  }
  0x10   :  { %161 = vperm.xlu1 %7650, %v139_v5   ;;  %156 = vperm.xlu0 %7649, %v138_v12   ;;  %v331_v29 = vld [vmem:[%s8321_s17 + $0x88] sm:$0xff]  ;;  %v333_v33 = vld [vmem:[%s8321_s17 + $0x98] sm:$0xff]  ;;  %v334_v36 = vld [vmem:[%s8321_s17 + $0xa0] sm:$0xff]  ;;  %s8294_s1 = smov 29  }
  0x11   :  { %7405 = vmatpush3.bf16.msra.mxu0 %v134_v10  ;;  %v327_v30 = vld [vmem:[%s8321_s17 + $0x68] sm:$0xff]  ;;  %v321_v34 = vld [vmem:[%s8321_s17 + $0x38] sm:$0xff]  ;;  %v336_v37 = vld [vmem:[%s8321_s17 + $0xb0] sm:$0xff] }
  0x12   :  { %v335_v35 = vld [vmem:[%s8321_s17 + $0xa8] sm:$0xff]  ;;  %v322_v38 = vld [vmem:[%s8321_s17 + $0x40] sm:$0xff]  ;;  %v337_v39 = vld [vmem:[%s8321_s17 + $0xb8] sm:$0xff] }
  0x13   :  { %v323_v40 = vld [vmem:[%s8321_s17 + $0x48] sm:$0xff]  ;;  %v325_v41 = vld [vmem:[%s8321_s17 + $0x58] sm:$0xff]  ;;  %v324_v42 = vld [vmem:[%s8321_s17 + $0x50] sm:$0xff]  ;;  %s8291_s17 = smov 21  }
  0x14   :  { %151 = vperm.xlu1 %7650, %v137_v14   ;;  %146 = vperm.xlu0 %7649, %v136_v15   ;;  %v2666_v43 = vld [vmem:[%s7154_s29 + $0x8] sm:$0xff]  ;;  %v2665_v44 = vld [vmem:[%s7154_s29] sm:$0xff]  ;;  %v2671_v47 = vld [vmem:[%s7154_s29 + $0x30] sm:$0xff]  ;;  %s15121_s20 = sld [smem:[%s15235_s0 + %s8291_s17]]  }
  0x15   :  { %7407 = vmatmul.mubr.msk.bf16.vlgmr.msra.gmra.mxu0 %vm204_vm1, %v7652_v16  ;;  %v2670_v45 = vld [vmem:[%s7154_s29 + $0x28] sm:$0xff]  ;;  %v2669_v46 = vld [vmem:[%s7154_s29 + $0x20] sm:$0xff]  ;;  %v2667_v48 = vld [vmem:[%s7154_s29 + $0x10] sm:$0xff] }
  0x16   :  { %7410 = vmatprep.mubr.msk.bf16.mxu0 %vm204_vm1, %v7653_v17  ;;  %v2672_v49 = vld [vmem:[%s7154_s29 + $0x38] sm:$0xff]  ;;  %v2893_v52 = vld [vmem:[%s7155_s3 + $0x10] sm:$0xff]  ;;  %v2892_v55 = vld [vmem:[%s7155_s3 + $0x8] sm:$0xff] }
  0x17   :  { %v2668_v50 = vld [vmem:[%s7154_s29 + $0x18] sm:$0xff]  ;;  %v2897_v54 = vld [vmem:[%s7155_s3 + $0x30] sm:$0xff]  ;;  %v2891_v56 = vld [vmem:[%s7155_s3] sm:$0xff]  ;;  %s8480_s29 = sld [smem:[%s15235_s0 + %s8278_s26]]  }
  0x18   :  { %355 = vperm.xlu1 %7650, %v317_v18   ;;  %350 = vperm.xlu0 %7649, %v316_v19   ;;  %v2894_v51 = vld [vmem:[%s7155_s3 + $0x18] sm:$0xff]  ;;  %v2896_v57 = vld [vmem:[%s7155_s3 + $0x28] sm:$0xff]  ;;  %v2895_v58 = vld [vmem:[%s7155_s3 + $0x20] sm:$0xff]  ;;  %s15186_s26 = sld [smem:[%s15235_s0 + %s8292_s22]]  }
  0x19   :  { %v2898_v53 = vld [vmem:[%s7155_s3 + $0x38] sm:$0xff]  ;;  %v2969_v60 = vld [vmem:[%s7156_s7 + $0x30] sm:$0xff]  ;;  %v2968_v61 = vld [vmem:[%s7156_s7 + $0x28] sm:$0xff]  ;;  %s8567_s3 = sld [smem:[%s15235_s0 + %s8279_s30]]  }
  0x1a   :  { %v2970_v59 = vld [vmem:[%s7156_s7 + $0x38] sm:$0xff]  ;;  %v2967_v62 = vld [vmem:[%s7156_s7 + $0x20] sm:$0xff]  ;;  %v2965_v0 = vld [vmem:[%s7156_s7 + $0x10] sm:$0xff]  ;;  %s15204_s30 = sld [smem:[%s15235_s0 + %s8293_s27]]  }
  0x1b   :  { %v2966_v63 = vld [vmem:[%s7156_s7 + $0x18] sm:$0xff]  ;;  %v2964_v1 = vld [vmem:[%s7156_s7 + $0x8] sm:$0xff]  ;;  %v2963_v2 = vld [vmem:[%s7156_s7] sm:$0xff]  ;;  %s8601_s7 = sld [smem:[%s15235_s0 + %s8280_s4]]  }
  0x1c   :  { %410 = vperm.xlu1 %7650, %v328_v20   ;;  %360 = vperm.xlu0 %7649, %v318_v21   ;;  %v3054_v3 = vld [vmem:[%s8380_s11 + $0x78] sm:$0xff]  ;;  %v7655_v4 = vld [vmem:[%s8343_s21] sm:$0xff]   ;;  %v3053_v5 = vld [vmem:[%s8380_s11 + $0x70] sm:$0xff]  ;;  %s7177_s4 = sld [smem:[%s15235_s0 + %s8294_s1]]  }
  0x1d   :  { %7411 = vmatmul.mubr.msk.bf16.gmra.mxu0 %vm204_vm1, %v7654_v22  ;;  %7422 = vmatprep.mubr.msk.bf16.mxu1 %vm15484_vm2, %v7655_v4  ;;  %v3052_v6 = vld [vmem:[%s8380_s11 + $0x68] sm:$0xff]  ;;  %v3051_v7 = vld [vmem:[%s8380_s11 + $0x60] sm:$0xff]  ;;  %v3050_v8 = vld [vmem:[%s8380_s11 + $0x58] sm:$0xff] }
  0x1e   :  { %v3049_v9 = vld [vmem:[%s8380_s11 + $0x50] sm:$0xff]  ;;  %v3048_v10 = vld [vmem:[%s8380_s11 + $0x48] sm:$0xff]  ;;  %v3047_v11 = vld [vmem:[%s8380_s11 + $0x40] sm:$0xff] }
  0x1f   :  { %v3046_v14 = vld [vmem:[%s8380_s11 + $0x38] sm:$0xff]  ;;  %v3045_v15 = vld [vmem:[%s8380_s11 + $0x30] sm:$0xff]  ;;  %v3044_v18 = vld [vmem:[%s8380_s11 + $0x28] sm:$0xff] }
  0x20   :  { %420 = vperm.xlu1 %7650, %v330_v23   ;;  %415 = vperm.xlu0 %7649, %v329_v24   ;;  %v3043_v19 = vld [vmem:[%s8380_s11 + $0x20] sm:$0xff]  ;;  %v3042_v22 = vld [vmem:[%s8380_s11 + $0x18] sm:$0xff]  ;;  %v3041_v23 = vld [vmem:[%s8380_s11 + $0x10] sm:$0xff] }
  0x21   :  { %v3617_v4 = vld [vmem:[%s7162_s24 + $0x8] sm:$0xff] }
  0x24   :  { %345 = vperm.xlu1 %7650, %v315_v25   ;;  %340 = vperm.xlu0 %7649, %v314_v26   ;;  %v3040_v26 = vld [vmem:[%s8380_s11 + $0x8] sm:$0xff] }
  0x28   :  { %400 = vperm.xlu1 %7650, %v326_v27   ;;  %365 = vperm.xlu0 %7649, %v319_v28   ;;  %v3039_v27 = vld [vmem:[%s8380_s11] sm:$0xff]  ;;  %s8634_s11 = sld [smem:[%s15235_s0 + %s8281_s8]]  }
  0x2c   :  { %425 = vperm.xlu1 %7650, %v331_v29   ;;  %405 = vperm.xlu0 %7649, %v327_v30   ;;  %v3329_v30 = vld [vmem:[%s8412_s15 + $0x8] sm:$0xff] }
  0x30   :  { %430 = vperm.xlu1 %7650, %v332_v31   ;;  %370 = vperm.xlu0 %7649, %v320_v32   ;;  %v3328_v31 = vld [vmem:[%s8412_s15] sm:$0xff] }
  0x34   :  { %435 = vperm.xlu1 %7650, %v333_v33   ;;  %375 = vperm.xlu0 %7649, %v321_v34   ;;  %v3333_v34 = vld [vmem:[%s8412_s15 + $0x28] sm:$0xff] }
  0x38   :  { %445 = vperm.xlu1 %7650, %v335_v35   ;;  %440 = vperm.xlu0 %7649, %v334_v36   ;;  %v3332_v35 = vld [vmem:[%s8412_s15 + $0x20] sm:$0xff] }
  0x3c   :  { %450 = vperm.xlu1 %7650, %v336_v37   ;;  %380 = vperm.xlu0 %7649, %v322_v38   ;;  %v3334_v38 = vld [vmem:[%s8412_s15 + $0x30] sm:$0xff] }
  0x40   :  { %455 = vperm.xlu1 %7650, %v337_v39   ;;  %385 = vperm.xlu0 %7649, %v323_v40   ;;  %v3330_v39 = vld [vmem:[%s8412_s15 + $0x10] sm:$0xff] }
  0x44   :  { %395 = vperm.xlu1 %7650, %v325_v41   ;;  %390 = vperm.xlu0 %7649, %v324_v42   ;;  %v3335_v42 = vld [vmem:[%s8412_s15 + $0x38] sm:$0xff] }
  0x48   :  { %2680 = vperm.xlu1 %7650, %v2666_v43   ;;  %2675 = vperm.xlu0 %7649, %v2665_v44   ;;  %v3331_v43 = vld [vmem:[%s8412_s15 + $0x18] sm:$0xff]  ;;  %s8664_s15 = sld [smem:[%s15235_s0 + %s8282_s12]]  }
  0x4c   :  { %2700 = vperm.xlu1 %7650, %v2670_v45   ;;  %2695 = vperm.xlu0 %7649, %v2669_v46   ;;  %v3547_v45 = vld [vmem:[%s8441_s19 + $0x18] sm:$0xff] }
  0x50   :  { %2705 = vperm.xlu1 %7650, %v2671_v47   ;;  %2685 = vperm.xlu0 %7649, %v2667_v48   ;;  %v3546_v47 = vld [vmem:[%s8441_s19 + $0x10] sm:$0xff]  ;;  %v3551_v48 = vld [vmem:[%s8441_s19 + $0x38] sm:$0xff] }
  0x54   :  { %2710 = vperm.xlu1 %7650, %v2672_v49   ;;  %2690 = vperm.xlu0 %7649, %v2668_v50   ;;  %v3550_v49 = vld [vmem:[%s8441_s19 + $0x30] sm:$0xff] }
  0x58   :  { %2916 = vperm.xlu1 %7650, %v2894_v51   ;;  %2911 = vperm.xlu0 %7649, %v2893_v52   ;;  %v3545_v52 = vld [vmem:[%s8441_s19 + $0x8] sm:$0xff] }
  0x5c   :  { %2940 = vperm.xlu1 %7650, %v2898_v53   ;;  %2935 = vperm.xlu0 %7649, %v2897_v54   ;;  %v3544_v53 = vld [vmem:[%s8441_s19] sm:$0xff] }
  0x60   :  { %2906 = vperm.xlu1 %7650, %v2892_v55   ;;  %2901 = vperm.xlu0 %7649, %v2891_v56   ;;  %v3549_v55 = vld [vmem:[%s8441_s19 + $0x28] sm:$0xff] }
  0x64   :  { %2930 = vperm.xlu1 %7650, %v2896_v57   ;;  %2925 = vperm.xlu0 %7649, %v2895_v58   ;;  %v3548_v57 = vld [vmem:[%s8441_s19 + $0x20] sm:$0xff]  ;;  %v3623_v58 = vld [vmem:[%s7162_s24 + $0x38] sm:$0xff]  ;;  %s8284_s19 = smov 25  }
  0x65   :  { %s7173_s23 = sld [smem:[%s15235_s0 + %s8284_s19]]  }
  0x68   :  { %3008 = vperm.xlu1 %7650, %v2970_v59   ;;  %3003 = vperm.xlu0 %7649, %v2969_v60   ;;  %v3622_v59 = vld [vmem:[%s7162_s24 + $0x30] sm:$0xff] }
  0x6c   :  { %2998 = vperm.xlu1 %7650, %v2968_v61   ;;  %2993 = vperm.xlu0 %7649, %v2967_v62   ;;  %v3621_v62 = vld [vmem:[%s7162_s24 + $0x28] sm:$0xff] }
  0x70   :  { %2988 = vperm.xlu1 %7650, %v2966_v63   ;;  %2983 = vperm.xlu0 %7649, %v2965_v0   ;;  %v3620_v63 = vld [vmem:[%s7162_s24 + $0x20] sm:$0xff] }
  0x74   :  { %2978 = vperm.xlu1 %7650, %v2964_v1   ;;  %2973 = vperm.xlu0 %7649, %v2963_v2   ;;  %v3619_v1 = vld [vmem:[%s7162_s24 + $0x18] sm:$0xff] }
  0x78   :  { %3132 = vperm.xlu1 %7650, %v3054_v3   ;;  %3127 = vperm.xlu0 %7649, %v3053_v5   ;;  %v3618_v3 = vld [vmem:[%s7162_s24 + $0x10] sm:$0xff]  ;;  %v3616_v5 = vld [vmem:[%s7162_s24] sm:$0xff]  ;;  %s8285_s24 = smov 26  }
  0x79   :  { %s8737_s28 = sld [smem:[%s15235_s0 + %s8285_s24]]  }
  0x7c   :  { %3122 = vperm.xlu1 %7650, %v3052_v6   ;;  %3117 = vperm.xlu0 %7649, %v3051_v7  }
  0x80   :  { %3112 = vperm.xlu1 %7650, %v3050_v8   ;;  %3107 = vperm.xlu0 %7649, %v3049_v9   ;;  %v3703_v8 = vld [vmem:[%s8480_s29 + $0x18] sm:$0xff]  ;;  %v3702_v9 = vld [vmem:[%s8480_s29 + $0x10] sm:$0xff] }
  0x83   :  { %v8392_v12 = vpop.permute.xlu0 %176  ;;  %v8394_v13 = vpop.permute.xlu1 %166 }
  0x84   :  { %3102 = vperm.xlu1 %7650, %v3048_v10   ;;  %3097 = vperm.xlu0 %7649, %v3047_v11   ;;  %v3714_v11 = vld [vmem:[%s8480_s29 + $0x70] sm:$0xff] }
  0x87   :  { %v8398_v16 = vpop.permute.xlu0 %181  ;;  %v8400_v17 = vpop.permute.xlu1 %171 }
  0x88   :  { %3092 = vperm.xlu1 %7650, %v3046_v14   ;;  %3087 = vperm.xlu0 %7649, %v3045_v15   ;;  %v3704_v15 = vld [vmem:[%s8480_s29 + $0x20] sm:$0xff] }
  0x8b   :  { %v8404_v20 = vpop.permute.xlu1 %161  ;;  %v8406_v21 = vpop.permute.xlu0 %156 }
  0x8c   :  { %3082 = vperm.xlu1 %7650, %v3044_v18   ;;  %3077 = vperm.xlu0 %7649, %v3043_v19   ;;  %v3716_v18 = vld [vmem:[%s8480_s29 + $0x80] sm:$0xff]  ;;  %v3715_v19 = vld [vmem:[%s8480_s29 + $0x78] sm:$0xff] }
  0x8f   :  { %v8415_v24 = vpop.permute.xlu1 %151  ;;  %v8417_v25 = vpop.permute.xlu0 %146 }
  0x90   :  { %3072 = vperm.xlu1 %7650, %v3042_v22   ;;  %3067 = vperm.xlu0 %7649, %v3041_v23  }
  0x93   :  { %v8421_v28 = vpop.permute.xlu1 %355  ;;  %v8423_v29 = vpop.permute.xlu0 %350 }
  0x94   :  { %3062 = vperm.xlu1 %7650, %v3040_v26   ;;  %3057 = vperm.xlu0 %7649, %v3039_v27   ;;  %v3701_v26 = vld [vmem:[%s8480_s29 + $0x8] sm:$0xff]  ;;  %v3700_v27 = vld [vmem:[%s8480_s29] sm:$0xff] }
  0x97   :  { %v8427_v32 = vpop.permute.xlu1 %410  ;;  %v8429_v33 = vpop.permute.xlu0 %360 }
  0x98   :  { %3343 = vperm.xlu1 %7650, %v3329_v30   ;;  %3338 = vperm.xlu0 %7649, %v3328_v31   ;;  %v3712_v31 = vld [vmem:[%s8480_s29 + $0x60] sm:$0xff] }
  0x9b   :  { %v8433_v36 = vpop.permute.xlu1 %420  ;;  %v8435_v37 = vpop.permute.xlu0 %415 }
  0x9c   :  { %3363 = vperm.xlu1 %7650, %v3333_v34   ;;  %3358 = vperm.xlu0 %7649, %v3332_v35   ;;  %v3705_v35 = vld [vmem:[%s8480_s29 + $0x28] sm:$0xff] }
  0x9f   :  { %v8444_v40 = vpop.permute.xlu1 %345  ;;  %v8446_v41 = vpop.permute.xlu0 %340 }
  0xa0   :  { %3368 = vperm.xlu1 %7650, %v3334_v38   ;;  %3348 = vperm.xlu0 %7649, %v3330_v39  }
  0xa3   :  { %v8450_v44 = vpop.permute.xlu0 %365  ;;  %v8453_v46 = vpop.permute.xlu1 %400 }
  0xa4   :  { %3373 = vperm.xlu1 %7650, %v3335_v42   ;;  %3353 = vperm.xlu0 %7649, %v3331_v43   ;;  %v3717_v42 = vld [vmem:[%s8480_s29 + $0x88] sm:$0xff] }
  0xa5   :  { %v3713_v43 = vld [vmem:[%s8480_s29 + $0x68] sm:$0xff] }
  0xa7   :  { %v8458_v50 = vpop.permute.xlu0 %405  ;;  %v8460_v51 = vpop.permute.xlu1 %425 }
  0xa8   :  { %3569 = vperm.xlu1 %7650, %v3547_v45   ;;  %3564 = vperm.xlu0 %7649, %v3546_v47  }
  0xab   :  { %v8467_v54 = vpop.permute.xlu0 %370  ;;  %v8470_v56 = vpop.permute.xlu1 %430 }
  0xac   :  { %3593 = vperm.xlu1 %7650, %v3551_v48   ;;  %3588 = vperm.xlu0 %7649, %v3550_v49  }
  0xaf   :  { %v8473_v60 = vpop.permute.xlu0 %375  ;;  %v8475_v61 = vpop.permute.xlu1 %435 }
  0xb0   :  { %3559 = vperm.xlu1 %7650, %v3545_v52   ;;  %3554 = vperm.xlu0 %7649, %v3544_v53   ;;  %v3718_v52 = vld [vmem:[%s8480_s29 + $0x90] sm:$0xff] }
  0xb1   :  { %v3706_v53 = vld [vmem:[%s8480_s29 + $0x30] sm:$0xff] }
  0xb3   :  { %v8482_v0 = vpop.permute.xlu0 %440  ;;  %v8484_v2 = vpop.permute.xlu1 %445 }
  0xb4   :  { %3583 = vperm.xlu1 %7650, %v3549_v55   ;;  %3578 = vperm.xlu0 %7649, %v3548_v57   ;;  %15777 = vst [vmem:[#allocation2_spill] sm:$0xff] %v8482_v0  ;;  %15778 = vst [vmem:[#allocation3_spill] sm:$0xff] %v8484_v2 }
  0xb7   :  { %v8486_v6 = vpop.permute.xlu0 %380  ;;  %v8488_v7 = vpop.permute.xlu1 %450 }
  0xb8   :  { %3661 = vperm.xlu1 %7650, %v3623_v58   ;;  %3656 = vperm.xlu0 %7649, %v3622_v59   ;;  %15779 = vst [vmem:[#allocation4_spill] sm:$0xff] %v8486_v6  ;;  %15780 = vst [vmem:[#allocation5_spill] sm:$0xff] %v8488_v7  ;;  %v3719_v59 = vld [vmem:[%s8480_s29 + $0x98] sm:$0xff] }
  0xbb   :  { %v8492_v10 = vpop.permute.xlu0 %385  ;;  %v8495_v14 = vpop.permute.xlu1 %455 }
  0xbc   :  { %3651 = vperm.xlu1 %7650, %v3621_v62   ;;  %3646 = vperm.xlu0 %7649, %v3620_v63   ;;  %15781 = vst [vmem:[#allocation6_spill] sm:$0xff] %v8492_v10  ;;  %15782 = vst [vmem:[#allocation7_spill] sm:$0xff] %v8495_v14  ;;  %v3707_v63 = vld [vmem:[%s8480_s29 + $0x38] sm:$0xff] }
  0xbf   :  { %v8500_v22 = vpop.permute.xlu0 %390  ;;  %v8502_v23 = vpop.permute.xlu1 %395 }
  0xc0   :  { %3641 = vperm.xlu1 %7650, %v3619_v1   ;;  %3636 = vperm.xlu0 %7649, %v3618_v3   ;;  %15783 = vst [vmem:[#allocation8_spill] sm:$0xff] %v8500_v22  ;;  %15784 = vst [vmem:[#allocation9_spill] sm:$0xff] %v8502_v23 }
  0xc3   :  { %v8506_v30 = vpop.permute.xlu0 %2675  ;;  %v8509_v34 = vpop.permute.xlu1 %2680 }
  0xc4   :  { %3631 = vperm.xlu1 %7650, %v3617_v4   ;;  %3626 = vperm.xlu0 %7649, %v3616_v5   ;;  %15785 = vst [vmem:[#allocation10_spill] sm:$0xff] %v8506_v30  ;;  %15786 = vst [vmem:[#allocation11_spill] sm:$0xff] %v8509_v34 }
  0xc7   :  { %v8514_v45 = vpop.permute.xlu0 %2695  ;;  %v8516_v48 = vpop.permute.xlu1 %2700 }
  0xc8   :  { %3741 = vperm.xlu1 %7650, %v3703_v8   ;;  %3736 = vperm.xlu0 %7649, %v3702_v9   ;;  %15787 = vst [vmem:[#allocation12_spill] sm:$0xff] %v8514_v45  ;;  %15788 = vst [vmem:[#allocation13_spill] sm:$0xff] %v8516_v48  ;;  %v3721_v8 = vld [vmem:[%s8480_s29 + $0xa8] sm:$0xff] }
  0xcb   :  { %v8520_v57 = vpop.permute.xlu0 %2685  ;;  %v8523_v62 = vpop.permute.xlu1 %2705 }
  0xcc   :  { %3796 = vperm.xlu1 %7650, %v3714_v11   ;;  %3746 = vperm.xlu0 %7649, %v3704_v15   ;;  %15789 = vst [vmem:[#allocation14_spill] sm:$0xff] %v8520_v57  ;;  %15790 = vst [vmem:[#allocation15_spill] sm:$0xff] %v8523_v62 }
  0xd0   :  { %3806 = vperm.xlu1 %7650, %v3716_v18   ;;  %3801 = vperm.xlu0 %7649, %v3715_v19   ;;  %v8542_v18 = vpop.permute.xlu0 %2690 }
  0xd1   :  { %15795 = vst [vmem:[#allocation20_spill] sm:$0xff] %v8542_v18 }
  0xd4   :  { %3731 = vperm.xlu1 %7650, %v3701_v26   ;;  %3726 = vperm.xlu0 %7649, %v3700_v27   ;;  %v3708_v27 = vld [vmem:[%s8480_s29 + $0x40] sm:$0xff] }
  0xd5   :  { %v7408_v38 = vpop.f32.mrf.mxu0 }
  0xd7   :  { %v255_v39 = vpop.f32.mrf.mxu0 }
  0xd8   :  { %3786 = vperm.xlu1 %7650, %v3712_v31   ;;  %3751 = vperm.xlu0 %7649, %v3705_v35   ;;  %v8561_v35 = vpop.permute.xlu0 %2911 }
  0xd9   :  { %v7409_v47 = vpop.f32.mrf.mxu0  ;;  %15800 = vst [vmem:[#allocation25_spill] sm:$0xff] %v8561_v35 }
  0xda   :  { %v8547_v19 = vadd.f32 %v7409_v47, %v8404_v20  ;;  %v3711_v47 = vld [vmem:[%s8480_s29 + $0x58] sm:$0xff] }
  0xdb   :  { %v258_v49 = vpop.f32.mrf.mxu0 }
  0xdc   :  { %3811 = vperm.xlu1 %7650, %v3717_v42   ;;  %3791 = vperm.xlu0 %7649, %v3713_v43   ;;  %15797 = vst [vmem:[#allocation22_spill] sm:$0xff] %v8547_v19  ;;  %v8559_v20 = vadd.f32 %v258_v49, %v8415_v24  ;;  %v3723_v42 = vld [vmem:[%s8480_s29 + $0xb8] sm:$0xff]  ;;  %v8572_v24 = vadd.f32 %v255_v39, %v8417_v25  ;;  %v3710_v49 = vld [vmem:[%s8480_s29 + $0x50] sm:$0xff]  ;;  %v7656_v39 = vld [vmem:[%s8343_s21 + $0x8] sm:$0xff]  }
  0xdd   :  { %v7412_v55 = vpop.f32.mrf.mxu0 }
  0xde   :  { %v8527_v3 = vadd.f32 %v7412_v55, %v8392_v12  ;;  %v3720_v12 = vld [vmem:[%s8480_s29 + $0xa0] sm:$0xff]  ;;  %15799 = vst [vmem:[#allocation24_spill] sm:$0xff] %v8559_v20  ;;  %15802 = vst [vmem:[#allocation27_spill] sm:$0xff] %v8572_v24  ;;  %v310_v43 = vpack.c.bf16 %v8559_v20, %v8572_v24  ;;  %v7657_v55 = vld [vmem:[%s8343_s21 + $0x10] sm:$0xff]  }
  0xdf   :  { %v271_v58 = vpop.f32.mrf.mxu0 }
  0xe0   :  { %3816 = vperm.xlu1 %7650, %v3718_v52   ;;  %3756 = vperm.xlu0 %7649, %v3706_v53   ;;  %15791 = vst [vmem:[#allocation16_spill] sm:$0xff] %v8527_v3  ;;  %v8534_v9 = vadd.f32 %v271_v58, %v8394_v13  ;;  %v3722_v13 = vld [vmem:[%s8480_s29 + $0xb0] sm:$0xff]  ;;  %v8579_v52 = vpop.permute.xlu0 %2935  ;;  %v6050_v53 = vld [vmem:[%s8567_s3 + $0x8] sm:$0xff]  ;;  %v6049_v58 = vld [vmem:[%s8567_s3] sm:$0xff] }
  0xe1   :  { %v7413_v1 = vpop.f32.mrf.mxu0  ;;  %15803 = vst [vmem:[#allocation28_spill] sm:$0xff] %v8579_v52 }
  0xe2   :  { %v8530_v4 = vadd.f32 %v7413_v1, %v8398_v16  ;;  %15793 = vst [vmem:[#allocation18_spill] sm:$0xff] %v8534_v9  ;;  %v8544_v16 = vpop.permute.xlu1 %2710 }
  0xe3   :  { %v274_v5 = vpop.f32.mrf.mxu0  ;;  %15796 = vst [vmem:[#allocation21_spill] sm:$0xff] %v8544_v16 }
  0xe4   :  { %15792 = vst [vmem:[#allocation17_spill] sm:$0xff] %v8530_v4  ;;  %3821 = vperm.xlu1 %7650, %v3719_v59   ;;  %3761 = vperm.xlu0 %7649, %v3707_v63   ;;  %v8537_v11 = vadd.f32 %v274_v5, %v8400_v17  ;;  %v313_v15 = vpack.c.bf16 %v8530_v4, %v8527_v3  ;;  %v8588_v59 = vpop.permute.xlu0 %2901  ;;  %v6054_v63 = vld [vmem:[%s8567_s3 + $0x28] sm:$0xff]  ;;  %v6053_v5 = vld [vmem:[%s8567_s3 + $0x20] sm:$0xff] }
  0xe5   :  { %v8553_v17 = vadd.f32 %v7408_v38, %v8406_v21  ;;  %v3709_v38 = vld [vmem:[%s8480_s29 + $0x48] sm:$0xff]  ;;  %15805 = vst [vmem:[#allocation30_spill] sm:$0xff] %v8588_v59  ;;  %s8286_s29 = smov 28  }
  0xe6   :  { %15794 = vst [vmem:[#allocation19_spill] sm:$0xff] %v8537_v11  ;;  %v312_v26 = vpack.c.bf16 %v8537_v11, %v8534_v9  ;;  %7414 = vmatprep.subr.bf16.mxu1 %v313_v15  ;;  %v8569_v21 = vpop.permute.xlu1 %2916  ;;  %s7176_s2 = sld [smem:[%s15235_s0 + %s8286_s29]]  }
  0xe7   :  { %7415 = vmatpush3.bf16.msra.mxu1 %v313_v15  ;;  %15798 = vst [vmem:[#allocation23_spill] sm:$0xff] %v8553_v17  ;;  %v311_v31 = vpack.c.bf16 %v8547_v19, %v8553_v17  ;;  %15801 = vst [vmem:[#allocation26_spill] sm:$0xff] %v8569_v21  ;;  %v6055_v15 = vld [vmem:[%s8567_s3 + $0x30] sm:$0xff] }
  0xe8   :  { %3831 = vperm.xlu1 %7650, %v3721_v8   ;;  %3826 = vperm.xlu0 %7649, %v3720_v12   ;;  %v7658_v8 = vld [vmem:[%s8343_s21 + $0x18] sm:$0xff]   ;;  %v7659_v12 = vld [vmem:[%s8343_s21 + $0x20] sm:$0xff]  }
  0xe9   :  { %7416 = vmatprep.subr.bf16.mxu1 %v312_v26 }
  0xea   :  { %v8581_v25 = vpop.permute.xlu1 %2940 }
  0xeb   :  { %7417 = vmatpush3.bf16.msra.mxu1 %v312_v26  ;;  %15804 = vst [vmem:[#allocation29_spill] sm:$0xff] %v8581_v25  ;;  %v6051_v26 = vld [vmem:[%s8567_s3 + $0x10] sm:$0xff] }
  0xec   :  { %3836 = vperm.xlu1 %7650, %v3722_v13   ;;  %3766 = vperm.xlu0 %7649, %v3708_v27   ;;  %v8604_v13 = vpop.permute.xlu0 %2925 }
  0xed   :  { %7418 = vmatprep.subr.bf16.mxu1 %v311_v31  ;;  %15807 = vst [vmem:[#allocation32_spill] sm:$0xff] %v8604_v13 }
  0xee   :  { %v8592_v1 = vpop.permute.xlu1 %2906 }
  0xef   :  { %7419 = vmatpush3.bf16.msra.mxu1 %v311_v31  ;;  %15806 = vst [vmem:[#allocation31_spill] sm:$0xff] %v8592_v1  ;;  %v6056_v31 = vld [vmem:[%s8567_s3 + $0x38] sm:$0xff] }
  0xf0   :  { %3841 = vperm.xlu1 %7650, %v3723_v42   ;;  %3771 = vperm.xlu0 %7649, %v3709_v38   ;;  %v6052_v42 = vld [vmem:[%s8567_s3 + $0x18] sm:$0xff]  ;;  %v7660_v38 = vld [vmem:[%s8343_s21 + $0x28] sm:$0xff]   ;;  %s8287_s3 = smov 5  }
  0xf1   :  { %7420 = vmatprep.subr.bf16.mxu1 %v310_v43  ;;  %s11207_s6 = sld [smem:[%s15235_s0 + %s8287_s3]]  }
  0xf2   :  { %v8606_v27 = vpop.permute.xlu1 %2930 }
  0xf3   :  { %7421 = vmatpush3.bf16.msra.mxu1 %v310_v43  ;;  %15808 = vst [vmem:[#allocation33_spill] sm:$0xff] %v8606_v27  ;;  %v8613_v43 = vpop.permute.xlu0 %3003 }
  0xf4   :  { %3781 = vperm.xlu1 %7650, %v3711_v47   ;;  %3776 = vperm.xlu0 %7649, %v3710_v49   ;;  %15809 = vst [vmem:[#allocation34_spill] sm:$0xff] %v8613_v43  ;;  %v6276_v47 = vld [vmem:[%s8601_s7 + $0x18] sm:$0xff]  ;;  %v7661_v49 = vld [vmem:[%s8343_s21 + $0x30] sm:$0xff]  }
  0xf6   :  { %7423 = vmatmul.mubr.msk.bf16.vlgmr.msra.gmra.mxu1 %vm15484_vm2, %v7656_v39  ;;  %v8617_v39 = vpop.permute.xlu1 %3008 }
  0xf7   :  { %7426 = vmatprep.mubr.msk.bf16.mxu1 %vm15484_vm2, %v7657_v55  ;;  %15810 = vst [vmem:[#allocation35_spill] sm:$0xff] %v8617_v39  ;;  %v6280_v55 = vld [vmem:[%s8601_s7 + $0x38] sm:$0xff] }
  0xf8   :  { %6064 = vperm.xlu1 %7650, %v6050_v53   ;;  %6059 = vperm.xlu0 %7649, %v6049_v58   ;;  %v6275_v53 = vld [vmem:[%s8601_s7 + $0x10] sm:$0xff] }
  0xf9   :  { %v6279_v58 = vld [vmem:[%s8601_s7 + $0x30] sm:$0xff] }
  0xfc   :  { %6084 = vperm.xlu1 %7650, %v6054_v63   ;;  %6079 = vperm.xlu0 %7649, %v6053_v5   ;;  %v8624_v63 = vpop.permute.xlu0 %2993  ;;  %v8626_v5 = vpop.permute.xlu1 %2998 }
  0xfd   :  { %15811 = vst [vmem:[#allocation36_spill] sm:$0xff] %v8624_v63  ;;  %15812 = vst [vmem:[#allocation37_spill] sm:$0xff] %v8626_v5 }
  0xfe   :  { %7427 = vmatmul.mubr.msk.bf16.gmra.mxu1 %vm15484_vm2, %v7658_v8  ;;  %v7662_v8 = vld [vmem:[%s8343_s21 + $0x38] sm:$0xff]  }
  0xff   :  { %7430 = vmatprep.mubr.msk.bf16.mxu1 %vm15484_vm2, %v7659_v12  ;;  %v7663_v12 = vld [vmem:[%s8343_s21 + $0x40] sm:$0xff]  }
 0x100   :  { %6089 = vperm.xlu1 %7650, %v6055_v15   ;;  %6069 = vperm.xlu0 %7649, %v6051_v26   ;;  %v6274_v15 = vld [vmem:[%s8601_s7 + $0x8] sm:$0xff]  ;;  %v6273_v26 = vld [vmem:[%s8601_s7] sm:$0xff] }
 0x104   :  { %6094 = vperm.xlu1 %7650, %v6056_v31   ;;  %6074 = vperm.xlu0 %7649, %v6052_v42   ;;  %v8638_v31 = vpop.permute.xlu0 %2983  ;;  %v6278_v42 = vld [vmem:[%s8601_s7 + $0x28] sm:$0xff] }
 0x105   :  { %15813 = vst [vmem:[#allocation38_spill] sm:$0xff] %v8638_v31 }
 0x106   :  { %7431 = vmatmul.mubr.msk.bf16.gmra.mxu1 %vm15484_vm2, %v7660_v38  ;;  %v8642_v38 = vpop.permute.xlu1 %2988 }
 0x107   :  { %7434 = vmatprep.mubr.msk.bf16.mxu1 %vm15484_vm2, %v7661_v49  ;;  %15814 = vst [vmem:[#allocation39_spill] sm:$0xff] %v8642_v38  ;;  %v7664_v49 = vld [vmem:[%s8343_s21 + $0x48] sm:$0xff]   ;;  %v6348_v38 = vld [vmem:[%s8634_s11 + $0x18] sm:$0xff] }
 0x108   :  { %6298 = vperm.xlu1 %7650, %v6276_v47   ;;  %6293 = vperm.xlu0 %7649, %v6275_v53   ;;  %v6277_v47 = vld [vmem:[%s8601_s7 + $0x20] sm:$0xff]  ;;  %v6352_v53 = vld [vmem:[%s8634_s11 + $0x38] sm:$0xff]  ;;  %s8288_s7 = smov 9  }
 0x109   :  { %s11836_s10 = sld [smem:[%s15235_s0 + %s8288_s7]]  }
 0x10c   :  { %6322 = vperm.xlu1 %7650, %v6280_v55   ;;  %6317 = vperm.xlu0 %7649, %v6279_v58   ;;  %v7665_v55 = vld [vmem:[%s8343_s21 + $0x50] sm:$0xff]  }
 0x10d   :  { %v6351_v58 = vld [vmem:[%s8634_s11 + $0x30] sm:$0xff] }
 0x10e   :  { %7435 = vmatmul.mubr.msk.bf16.gmra.mxu1 %vm15484_vm2, %v7662_v8  ;;  %v8649_v8 = vpop.permute.xlu0 %2973 }
 0x10f   :  { %7438 = vmatprep.mubr.msk.bf16.mxu1 %vm15484_vm2, %v7663_v12  ;;  %15815 = vst [vmem:[#allocation40_spill] sm:$0xff] %v8649_v8  ;;  %v6350_v12 = vld [vmem:[%s8634_s11 + $0x28] sm:$0xff] }
 0x110   :  { %6288 = vperm.xlu1 %7650, %v6274_v15   ;;  %6283 = vperm.xlu0 %7649, %v6273_v26   ;;  %v8651_v15 = vpop.permute.xlu1 %2978  ;;  %v6349_v26 = vld [vmem:[%s8634_s11 + $0x20] sm:$0xff] }
 0x111   :  { %15816 = vst [vmem:[#allocation41_spill] sm:$0xff] %v8651_v15 }
 0x114   :  { %6312 = vperm.xlu1 %7650, %v6278_v42   ;;  %6307 = vperm.xlu0 %7649, %v6277_v47   ;;  %v7666_v42 = vld [vmem:[%s8343_s21 + $0x58] sm:$0xff]   ;;  %v8658_v47 = vpop.permute.xlu0 %3127  ;;  %s8283_s21 = smov 24  }
 0x115   :  { %15817 = vst [vmem:[#allocation42_spill] sm:$0xff] %v8658_v47  ;;  %v6436_v47 = vld [vmem:[%s8664_s15 + $0x78] sm:$0xff]  ;;  %s7172_s18 = sld [smem:[%s15235_s0 + %s8283_s21]]  }
 0x116   :  { %7439 = vmatmul.mubr.msk.bf16.gmra.mxu1 %vm15484_vm2, %v7664_v49  ;;  %v8666_v49 = vpop.permute.xlu1 %3132 }
 0x117   :  { %7442 = vmatprep.mubr.msk.bf16.mxu1 %vm15484_vm2, %v7665_v55  ;;  %15818 = vst [vmem:[#allocation43_spill] sm:$0xff] %v8666_v49  ;;  %v6346_v55 = vld [vmem:[%s8634_s11 + $0x8] sm:$0xff]  ;;  %v6435_v49 = vld [vmem:[%s8664_s15 + $0x70] sm:$0xff] }
 0x118   :  { %6390 = vperm.xlu1 %7650, %v6352_v53   ;;  %6385 = vperm.xlu0 %7649, %v6351_v58   ;;  %v6347_v53 = vld [vmem:[%s8634_s11 + $0x10] sm:$0xff]  ;;  %v6345_v58 = vld [vmem:[%s8634_s11] sm:$0xff]  ;;  %s8289_s11 = smov 11  }
 0x119   :  { %s11933_s14 = sld [smem:[%s15235_s0 + %s8289_s11]]  }
 0x11b   :  { %v6715_v8 = vld [vmem:[%s7172_s18 + $0x28] sm:$0xff]  ;;  %v6714_v31 = vld [vmem:[%s7172_s18 + $0x20] sm:$0xff] }
 0x11c   :  { %6380 = vperm.xlu1 %7650, %v6350_v12   ;;  %6375 = vperm.xlu0 %7649, %v6349_v26   ;;  %v8672_v12 = vpop.permute.xlu0 %3117  ;;  %v8674_v26 = vpop.permute.xlu1 %3122 }
 0x11d   :  { %15819 = vst [vmem:[#allocation44_spill] sm:$0xff] %v8672_v12  ;;  %15820 = vst [vmem:[#allocation45_spill] sm:$0xff] %v8674_v26  ;;  %v6432_v12 = vld [vmem:[%s8664_s15 + $0x58] sm:$0xff] }
 0x11e   :  { %7443 = vmatmul.mubr.msk.bf16.gmra.mxu1 %vm15484_vm2, %v7666_v42 }
 0x120   :  { %6370 = vperm.xlu1 %7650, %v6348_v38   ;;  %6365 = vperm.xlu0 %7649, %v6347_v53   ;;  %v8678_v15 = vpop.permute.xlu0 %3107  ;;  %v6434_v38 = vld [vmem:[%s8664_s15 + $0x68] sm:$0xff]  ;;  %v8681_v42 = vpop.permute.xlu1 %3112  ;;  %v6433_v53 = vld [vmem:[%s8664_s15 + $0x60] sm:$0xff] }
 0x121   :  { %15821 = vst [vmem:[#allocation46_spill] sm:$0xff] %v8678_v15  ;;  %15822 = vst [vmem:[#allocation47_spill] sm:$0xff] %v8681_v42  ;;  %v6427_v42 = vld [vmem:[%s8664_s15 + $0x30] sm:$0xff] }
 0x124   :  { %6360 = vperm.xlu1 %7650, %v6346_v55   ;;  %6355 = vperm.xlu0 %7649, %v6345_v58   ;;  %v6431_v55 = vld [vmem:[%s8664_s15 + $0x50] sm:$0xff]  ;;  %v8686_v58 = vpop.permute.xlu0 %3097  ;;  %v8688_v26 = vpop.permute.xlu1 %3102 }
 0x125   :  { %15823 = vst [vmem:[#allocation48_spill] sm:$0xff] %v8686_v58  ;;  %15824 = vst [vmem:[#allocation49_spill] sm:$0xff] %v8688_v26  ;;  %v6426_v58 = vld [vmem:[%s8664_s15 + $0x28] sm:$0xff]  ;;  %v6425_v26 = vld [vmem:[%s8664_s15 + $0x20] sm:$0xff] }
 0x128   :  { %6514 = vperm.xlu1 %7650, %v6436_v47   ;;  %6509 = vperm.xlu0 %7649, %v6435_v49   ;;  %v6430_v47 = vld [vmem:[%s8664_s15 + $0x48] sm:$0xff]  ;;  %v6429_v49 = vld [vmem:[%s8664_s15 + $0x40] sm:$0xff]  ;;  %v8692_v15 = vpop.permute.xlu0 %3087 }
 0x129   :  { %15825 = vst [vmem:[#allocation50_spill] sm:$0xff] %v8692_v15 }
 0x12c   :  { %6504 = vperm.xlu1 %7650, %v6434_v38   ;;  %6499 = vperm.xlu0 %7649, %v6433_v53   ;;  %v6428_v38 = vld [vmem:[%s8664_s15 + $0x38] sm:$0xff]  ;;  %v8695_v53 = vpop.permute.xlu1 %3092 }
 0x12d   :  { %15826 = vst [vmem:[#allocation51_spill] sm:$0xff] %v8695_v53  ;;  %v6421_v53 = vld [vmem:[%s8664_s15] sm:$0xff] }
 0x130   :  { %6494 = vperm.xlu1 %7650, %v6432_v12   ;;  %6489 = vperm.xlu0 %7649, %v6431_v55   ;;  %v8700_v12 = vpop.permute.xlu0 %3077  ;;  %v8702_v55 = vpop.permute.xlu1 %3082 }
 0x131   :  { %15827 = vst [vmem:[#allocation52_spill] sm:$0xff] %v8700_v12  ;;  %15828 = vst [vmem:[#allocation53_spill] sm:$0xff] %v8702_v55  ;;  %v6711_v12 = vld [vmem:[%s7172_s18 + $0x8] sm:$0xff] }
 0x134   :  { %6484 = vperm.xlu1 %7650, %v6430_v47   ;;  %6479 = vperm.xlu0 %7649, %v6429_v49   ;;  %v6424_v47 = vld [vmem:[%s8664_s15 + $0x18] sm:$0xff]  ;;  %v6423_v49 = vld [vmem:[%s8664_s15 + $0x10] sm:$0xff]  ;;  %v8709_v15 = vpop.permute.xlu0 %3067 }
 0x135   :  { %15829 = vst [vmem:[#allocation54_spill] sm:$0xff] %v8709_v15  ;;  %v6933_v15 = vld [vmem:[%s7173_s23 + $0x38] sm:$0xff] }
 0x138   :  { %6474 = vperm.xlu1 %7650, %v6428_v38   ;;  %6469 = vperm.xlu0 %7649, %v6427_v42   ;;  %v6422_v42 = vld [vmem:[%s8664_s15 + $0x8] sm:$0xff]  ;;  %v8712_v38 = vpop.permute.xlu1 %3072 }
 0x139   :  { %15830 = vst [vmem:[#allocation55_spill] sm:$0xff] %v8712_v38 }
 0x13c   :  { %6464 = vperm.xlu1 %7650, %v6426_v58   ;;  %6459 = vperm.xlu0 %7649, %v6425_v26   ;;  %v6710_v58 = vld [vmem:[%s7172_s18] sm:$0xff]  ;;  %v8715_v26 = vpop.permute.xlu0 %3057  ;;  %v8717_v55 = vpop.permute.xlu1 %3062 }
 0x13d   :  { %15831 = vst [vmem:[#allocation56_spill] sm:$0xff] %v8715_v26  ;;  %15832 = vst [vmem:[#allocation57_spill] sm:$0xff] %v8717_v55  ;;  %v6717_v26 = vld [vmem:[%s7172_s18 + $0x38] sm:$0xff] }
 0x140   :  { %6454 = vperm.xlu1 %7650, %v6424_v47   ;;  %6449 = vperm.xlu0 %7649, %v6423_v49   ;;  %v8719_v47 = vpop.permute.xlu0 %3338  ;;  %v6716_v49 = vld [vmem:[%s7172_s18 + $0x30] sm:$0xff] }
 0x141   :  { %15833 = vst [vmem:[#allocation58_spill] sm:$0xff] %v8719_v47 }
 0x144   :  { %6444 = vperm.xlu1 %7650, %v6422_v42   ;;  %6439 = vperm.xlu0 %7649, %v6421_v53   ;;  %v8724_v53 = vpop.permute.xlu1 %3343  ;;  %v6712_v42 = vld [vmem:[%s7172_s18 + $0x10] sm:$0xff] }
 0x145   :  { %15834 = vst [vmem:[#allocation59_spill] sm:$0xff] %v8724_v53  ;;  %v6932_v53 = vld [vmem:[%s7173_s23 + $0x30] sm:$0xff] }
 0x148   :  { %6725 = vperm.xlu1 %7650, %v6711_v12   ;;  %6720 = vperm.xlu0 %7649, %v6710_v58   ;;  %v6713_v12 = vld [vmem:[%s7172_s18 + $0x18] sm:$0xff]  ;;  %v8726_v58 = vpop.permute.xlu0 %3358  ;;  %v8728_v55 = vpop.permute.xlu1 %3363 }
 0x149   :  { %15835 = vst [vmem:[#allocation60_spill] sm:$0xff] %v8726_v58  ;;  %15836 = vst [vmem:[#allocation61_spill] sm:$0xff] %v8728_v55  ;;  %v7003_v58 = vld [vmem:[%s8737_s28 + $0x28] sm:$0xff] }
 0x14c   :  { %6745 = vperm.xlu1 %7650, %v6715_v8   ;;  %6740 = vperm.xlu0 %7649, %v6714_v31   ;;  %v6929_v31 = vld [vmem:[%s7173_s23 + $0x18] sm:$0xff]  ;;  %v6928_v8 = vld [vmem:[%s7173_s23 + $0x10] sm:$0xff]  ;;  %v8730_v47 = vpop.permute.xlu0 %3348  ;;  %v8732_v38 = vpop.permute.xlu1 %3368 }
 0x14d   :  { %15837 = vst [vmem:[#allocation62_spill] sm:$0xff] %v8730_v47  ;;  %15838 = vst [vmem:[#allocation63_spill] sm:$0xff] %v8732_v38  ;;  %v7004_v38 = vld [vmem:[%s8737_s28 + $0x30] sm:$0xff] }
 0x150   :  { %6750 = vperm.xlu1 %7650, %v6716_v49   ;;  %6730 = vperm.xlu0 %7649, %v6712_v42   ;;  %v6927_v49 = vld [vmem:[%s7173_s23 + $0x8] sm:$0xff]  ;;  %v8739_v42 = vpop.permute.xlu0 %3353 }
 0x151   :  { %15839 = vst [vmem:[#allocation64_spill] sm:$0xff] %v8739_v42  ;;  %v7063_v42 = vld [vmem:[%s7176_s2 + $0x10] sm:$0x3] }
 0x154   :  { %6755 = vperm.xlu1 %7650, %v6717_v26   ;;  %6735 = vperm.xlu0 %7649, %v6713_v12   ;;  %v6926_v26 = vld [vmem:[%s7173_s23] sm:$0xff]  ;;  %v8741_v12 = vpop.permute.xlu1 %3373 }
 0x155   :  { %15840 = vst [vmem:[#allocation65_spill] sm:$0xff] %v8741_v12  ;;  %v7002_v12 = vld [vmem:[%s8737_s28 + $0x20] sm:$0xff] }
 0x158   :  { %6951 = vperm.xlu1 %7650, %v6929_v31   ;;  %6946 = vperm.xlu0 %7649, %v6928_v8   ;;  %v8743_v31 = vpop.permute.xlu0 %3564  ;;  %v7005_v8 = vld [vmem:[%s8737_s28 + $0x38] sm:$0xff]  ;;  %v8746_v55 = vpop.permute.xlu1 %3569 }
 0x159   :  { %15841 = vst [vmem:[#allocation66_spill] sm:$0xff] %v8743_v31  ;;  %15842 = vst [vmem:[#allocation67_spill] sm:$0xff] %v8746_v55  ;;  %v6998_v31 = vld [vmem:[%s8737_s28] sm:$0xff] }
 0x15c   :  { %6975 = vperm.xlu1 %7650, %v6933_v15   ;;  %6970 = vperm.xlu0 %7649, %v6932_v53   ;;  %v6931_v15 = vld [vmem:[%s7173_s23 + $0x28] sm:$0xff]  ;;  %v6930_v53 = vld [vmem:[%s7173_s23 + $0x20] sm:$0xff] }
 0x160   :  { %6941 = vperm.xlu1 %7650, %v6927_v49   ;;  %6936 = vperm.xlu0 %7649, %v6926_v26   ;;  %v8751_v49 = vpop.permute.xlu0 %3588  ;;  %v8753_v26 = vpop.permute.xlu1 %3593 }
 0x161   :  { %15843 = vst [vmem:[#allocation68_spill] sm:$0xff] %v8751_v49  ;;  %15844 = vst [vmem:[#allocation69_spill] sm:$0xff] %v8753_v26  ;;  %v7062_v26 = vld [vmem:[%s7176_s2 + $0x8] sm:$0xff] }
 0x164   :  { %6965 = vperm.xlu1 %7650, %v6931_v15   ;;  %6960 = vperm.xlu0 %7649, %v6930_v53   ;;  %v7001_v15 = vld [vmem:[%s8737_s28 + $0x18] sm:$0xff]  ;;  %v7000_v53 = vld [vmem:[%s8737_s28 + $0x10] sm:$0xff]  ;;  %v8760_v55 = vpop.permute.xlu0 %3554 }
 0x165   :  { %15845 = vst [vmem:[#allocation70_spill] sm:$0xff] %v8760_v55 }
 0x168   :  { %7043 = vperm.xlu1 %7650, %v7005_v8   ;;  %7038 = vperm.xlu0 %7649, %v7004_v38   ;;  %v6999_v38 = vld [vmem:[%s8737_s28 + $0x8] sm:$0xff]  ;;  %v8763_v8 = vpop.permute.xlu1 %3559 }
 0x169   :  { %15846 = vst [vmem:[#allocation71_spill] sm:$0xff] %v8763_v8 }
 0x16c   :  { %7033 = vperm.xlu1 %7650, %v7003_v58   ;;  %7028 = vperm.xlu0 %7649, %v7002_v12   ;;  %v7061_v58 = vld [vmem:[%s7176_s2] sm:$0xff]  ;;  %v8766_v12 = vpop.permute.xlu0 %3578  ;;  %v8768_v49 = vpop.permute.xlu1 %3583 }
 0x16d   :  { %15847 = vst [vmem:[#allocation72_spill] sm:$0xff] %v8766_v12  ;;  %15848 = vst [vmem:[#allocation73_spill] sm:$0xff] %v8768_v49 }
 0x170   :  { %7023 = vperm.xlu1 %7650, %v7001_v15   ;;  %7018 = vperm.xlu0 %7649, %v7000_v53   ;;  %v8770_v47 = vpop.permute.xlu0 %3656 }
 0x171   :  { %15849 = vst [vmem:[#allocation74_spill] sm:$0xff] %v8770_v47 }
 0x174   :  { %7013 = vperm.xlu1 %7650, %v6999_v38   ;;  %7008 = vperm.xlu0 %7649, %v6998_v31  }
 0x178   :  { %7071 = vperm.xlu1 %7650, %v7062_v26   ;;  %7066 = vperm.xlu0 %7649, %v7061_v58  }
 0x17c   :  { %7076 = vperm.xlu0 %7649, %v7063_v42  }
 0x1b6   :  { %v7424_v15 = vpop.f32.mrf.mxu1 }
 0x1b7   :  { %v8846_v27 = vadd.f32 %v7424_v15, %v8423_v29 }
 0x1b8   :  { %v589_v53 = vpop.f32.mrf.mxu1 }
 0x1b9   :  { %v8773_v8 = vadd.f32 %v589_v53, %v8446_v41  ;;  %v8866_v29 = vcombine.high %v8846_v27, %v8846_v27 }
 0x1ba   :  { %v7425_v55 = vpop.f32.mrf.mxu1 }
 0x1bb   :  { %15850 = vst [vmem:[#allocation75_spill] sm:$0xff] %v8773_v8  ;;  %v8780_v12 = vcombine.high %v8773_v8, %v8773_v8  ;;  %v8852_v11 = vadd.f32 %v7425_v55, %v8421_v28 }
 0x1bc   :  { %v592_v38 = vpop.f32.mrf.mxu1 }
 0x1bd   :  { %v8776_v31 = vadd.f32 %v592_v38, %v8444_v40  ;;  %15852 = vst [vmem:[#allocation77_spill] sm:$0xff] %v8780_v12 }
 0x1be   :  { %v7428_v63 = vpop.f32.mrf.mxu1 }
 0x1bf   :  { %15851 = vst [vmem:[#allocation76_spill] sm:$0xff] %v8776_v31  ;;  %v8784_v26 = vcombine.high %v8776_v31, %v8776_v31  ;;  %v614_v42 = vadd.f32 %v7428_v63, %v8467_v54 }
 0x1c0   :  { %v605_v58 = vpop.f32.mrf.mxu1 }
 0x1c1   :  { %15853 = vst [vmem:[#allocation78_spill] sm:$0xff] %v8784_v26  ;;  %v8788_v47 = vmul.f32 %v614_v42, %v8773_v8  ;;  %v8791_v41 = vmul.f32 %v8780_v12, %v614_v42  ;;  %v8794_v40 = vmul.f32 %v614_v42, %v8776_v31  ;;  %v8797_v53 = vmul.f32 %v8784_v26, %v614_v42 }
 0x1c2   :  { %v7429_v38 = vpop.f32.mrf.mxu1  ;;  %v8800_v49 = vadd.f32 %v605_v58, %v8429_v33  ;;  %v8862_v9 = vcombine.high %v614_v42, %v614_v42  ;;  %v8880_v55 = vmul.f32 %v614_v42, %v8846_v27  ;;  %v8883_v45 = vmul.f32 %v8866_v29, %v614_v42 }
 0x1c3   :  { %v8803_v5 = vadd.f32 %v7429_v38, %v8473_v60  ;;  %v8897_v20 = vmul.f32 %v614_v42, %v8852_v11 }
 0x1c4   :  { %v608_v54 = vpop.f32.mrf.mxu1  ;;  %v8807_v63 = vmul.f32 %v8800_v49, %v8773_v8  ;;  %v8811_v39 = vmul.f32 %v8780_v12, %v8800_v49  ;;  %v8815_v43 = vmul.f32 %v8800_v49, %v8776_v31  ;;  %v8819_v33 = vmul.f32 %v8784_v26, %v8800_v49  ;;  %15865 = vst [vmem:[#allocation90_spill] sm:$0xff] %v8862_v9 }
 0x1c5   :  { %v8825_v60 = vmul.f32 %v8803_v5, %v8773_v8  ;;  %v8829_v38 = vmul.f32 %v8780_v12, %v8803_v5  ;;  %v8833_v59 = vmul.f32 %v8803_v5, %v8776_v31  ;;  %v8837_v13 = vmul.f32 %v8784_v26, %v8803_v5 }
 0x1c6   :  { %v8821_v58 = vpop.f32.mrf.mxu1  ;;  %v8904_v34 = vmul.f32 %v8862_v9, %v8846_v27  ;;  %v8908_v18 = vmul.f32 %v8862_v9, %v8866_v29  ;;  %v8918_v57 = vmul.f32 %v8862_v9, %v8852_v11  ;;  %v8922_v30 = vcombine.high %v8800_v49, %v8800_v49 }
 0x1c7   :  { %15854 = vst [vmem:[#allocation79_spill] sm:$0xff] %v8821_v58  ;;  %15855 = vst [vmem:[#allocation80_spill] sm:$0xff] %v8825_v60  ;;  %v8936_v23 = vmul.f32 %v8866_v29, %v8800_v49  ;;  %v8963_v0 = vmul.f32 %v8800_v49, %v8852_v11  ;;  %v8982_v60 = vadd.f32 %v608_v54, %v8450_v44 }
 0x1c8   :  { %15856 = vst [vmem:[#allocation81_spill] sm:$0xff] %v8829_v38  ;;  %15857 = vst [vmem:[#allocation82_spill] sm:$0xff] %v8833_v59  ;;  %v8839_v21 = vpop.f32.mrf.mxu1  ;;  %v8975_v59 = vmul.f32 %v8866_v29, %v8803_v5  ;;  %v8979_v38 = vmul.f32 %v8803_v5, %v8852_v11  ;;  %v9000_v44 = vmul.f32 %v8922_v30, %v8846_v27 }
 0x1c9   :  { %15858 = vst [vmem:[#allocation83_spill] sm:$0xff] %v8837_v13  ;;  %15859 = vst [vmem:[#allocation84_spill] sm:$0xff] %v8839_v21  ;;  %v8940_v21 = vcombine.high %v8803_v5, %v8803_v5  ;;  %v8971_v13 = vmul.f32 %v8803_v5, %v8846_v27 }
 0x1ca   :  { %v8841_v35 = vpop.f32.mrf.mxu1  ;;  %15870 = vst [vmem:[#allocation95_spill] sm:$0xff] %v8904_v34  ;;  %15871 = vst [vmem:[#allocation96_spill] sm:$0xff] %v8908_v18 }
 0x1cb   :  { %15860 = vst [vmem:[#allocation85_spill] sm:$0xff] %v8841_v35  ;;  %15872 = vst [vmem:[#allocation97_spill] sm:$0xff] %v8918_v57 }
 0x1cc   :  { %v8843_v25 = vpop.f32.mrf.mxu1  ;;  %15873 = vst [vmem:[#allocation98_spill] sm:$0xff] %v8922_v30  ;;  %15876 = vst [vmem:[#allocation101_spill] sm:$0xff] %v8936_v23 }
 0x1cd   :  { %15861 = vst [vmem:[#allocation86_spill] sm:$0xff] %v8843_v25  ;;  %v8926_v25 = vmul.f32 %v8800_v49, %v8846_v27  ;;  %15877 = vst [vmem:[#allocation102_spill] sm:$0xff] %v8940_v21 }
 0x1ce   :  { %v7436_v52 = vpop.f32.mrf.mxu1  ;;  %15879 = vst [vmem:[#allocation104_spill] sm:$0xff] %v8963_v0  ;;  %15881 = vst [vmem:[#allocation106_spill] sm:$0xff] %v8971_v13 }
 0x1cf   :  { %15874 = vst [vmem:[#allocation99_spill] sm:$0xff] %v8926_v25  ;;  %15882 = vst [vmem:[#allocation107_spill] sm:$0xff] %v8975_v59  ;;  %v8985_v0 = vadd.f32 %v7436_v52, %v8427_v32  ;;  %v9004_v32 = vmul.f32 %v8940_v21, %v8846_v27  ;;  %v9012_v52 = vcombine.high %v8982_v60, %v8982_v60 }
 0x1d0   :  { %v637_v1 = vpop.f32.mrf.mxu1  ;;  %15883 = vst [vmem:[#allocation108_spill] sm:$0xff] %v8979_v38  ;;  %15884 = vst [vmem:[#allocation109_spill] sm:$0xff] %v8982_v60 }
 0x1d1   :  { %v8849_v4 = vadd.f32 %v637_v1, %v8453_v46  ;;  %v8877_v1 = vcombine.high %v8852_v11, %v8852_v11  ;;  %15887 = vst [vmem:[#allocation112_spill] sm:$0xff] %v9000_v44  ;;  %15888 = vst [vmem:[#allocation113_spill] sm:$0xff] %v9004_v32 }
 0x1d2   :  { %v7437_v3 = vpop.f32.mrf.mxu1  ;;  %15890 = vst [vmem:[#allocation115_spill] sm:$0xff] %v9012_v52 }
 0x1d3   :  { %15862 = vst [vmem:[#allocation87_spill] sm:$0xff] %v8849_v4  ;;  %v8856_v48 = vcombine.high %v8849_v4, %v8849_v4  ;;  %v8860_v16 = vadd.f32 %v8849_v4, %v8773_v8  ;;  %v8900_v17 = vmul.f32 %v8877_v1, %v614_v42  ;;  %v8932_v35 = vmul.f32 %v8862_v9, %v8877_v1 }
 0x1d4   :  { %v640_v62 = vpop.f32.mrf.mxu1  ;;  %v8967_v7 = vmul.f32 %v8877_v1, %v8800_v49  ;;  %v8996_v38 = vmul.f32 %v8877_v1, %v8803_v5 }
 0x1d5   :  { %15863 = vst [vmem:[#allocation88_spill] sm:$0xff] %v8856_v48  ;;  %15864 = vst [vmem:[#allocation89_spill] sm:$0xff] %v8860_v16  ;;  %v8869_v46 = vadd.f32 %v640_v62, %v8458_v50  ;;  %v8873_v28 = vadd.f32 %v8856_v48, %v8780_v12 }
 0x1d6   :  { %v7440_v15 = vpop.f32.mrf.mxu1  ;;  %15875 = vst [vmem:[#allocation100_spill] sm:$0xff] %v8932_v35  ;;  %15880 = vst [vmem:[#allocation105_spill] sm:$0xff] %v8967_v7  ;;  %v8988_v7 = vadd.f32 %v7437_v3, %v8435_v37  ;;  %v9008_v37 = vmul.f32 %v8922_v30, %v8866_v29 }
 0x1d7   :  { %15866 = vst [vmem:[#allocation91_spill] sm:$0xff] %v8869_v46  ;;  %15867 = vst [vmem:[#allocation92_spill] sm:$0xff] %v8873_v28  ;;  %v8887_v19 = vcombine.high %v8869_v46, %v8869_v46  ;;  %v8891_v50 = vadd.f32 %v8869_v46, %v8776_v31  ;;  %v8894_v62 = vadd.f32 %v7440_v15, %v8470_v56 }
 0x1d8   :  { %15885 = vst [vmem:[#allocation110_spill] sm:$0xff] %v8988_v7  ;;  %15886 = vst [vmem:[#allocation111_spill] sm:$0xff] %v8996_v38 }
 0x1d9   :  { %15868 = vst [vmem:[#allocation93_spill] sm:$0xff] %v8887_v19  ;;  %15869 = vst [vmem:[#allocation94_spill] sm:$0xff] %v8891_v50  ;;  %v800_v24 = vmul.f32 %v8894_v62, %v8849_v4  ;;  %v808_v56 = vmul.f32 %v8856_v48, %v8894_v62  ;;  %v816_v15 = vmul.f32 %v8894_v62, %v8869_v46 }
 0x1da   :  { %v824_v10 = vmul.f32 %v8887_v19, %v8894_v62  ;;  %v8944_v6 = vadd.f32 %v8887_v19, %v8784_v26  ;;  %v8947_v58 = vadd.f32 %v8894_v62, %v614_v42  ;;  %15889 = vst [vmem:[#allocation114_spill] sm:$0xff] %v9008_v37 }
 0x1db   :  { %v944_v22 = vsub.f32 %v8788_v47, %v800_v24  ;;  %v952_v57 = vsub.f32 %v8791_v41, %v808_v56  ;;  %v960_v35 = vsub.f32 %v8794_v40, %v816_v15 }
 0x1dc   :  { %15878 = vst [vmem:[#allocation103_spill] sm:$0xff] %v8944_v6  ;;  %v968_v18 = vsub.f32 %v8797_v53, %v824_v10  ;;  %v880_v34 = vmul.f32 %v8947_v58, %v8860_v16  ;;  %v888_v2 = vmul.f32 %v8947_v58, %v8873_v28  ;;  %v896_v14 = vmul.f32 %v8947_v58, %v8891_v50 }
 0x1dd   :  { %v904_v42 = vmul.f32 %v8947_v58, %v8944_v6 }
 0x1de   :  { %v1008_v23 = vsub.f32 %v880_v34, %v8788_v47  ;;  %v1016_v13 = vsub.f32 %v888_v2, %v8791_v41  ;;  %v1024_v25 = vsub.f32 %v896_v14, %v8794_v40  ;;  %v9016_v47 = vmul.f32 %v8982_v60, %v8773_v8 }
 0x1df   :  { %v1032_v59 = vsub.f32 %v904_v42, %v8797_v53  ;;  %v9020_v41 = vmul.f32 %v8780_v12, %v8982_v60  ;;  %v9024_v40 = vmul.f32 %v8982_v60, %v8776_v31  ;;  %v1152_v53 = vmul.f32 %v960_v35, %v960_v35 }
 0x1e0   :  { %v1072_v2 = vsub.f32 %v1008_v23, %v800_v24  ;;  %v1080_v14 = vsub.f32 %v1016_v13, %v808_v56  ;;  %v1088_v34 = vsub.f32 %v1024_v25, %v816_v15  ;;  %15891 = vst [vmem:[#allocation116_spill] sm:$0xff] %v9016_v47  ;;  %v9028_v23 = vmul.f32 %v8784_v26, %v8982_v60 }
 0x1e1   :  { %v1096_v3 = vsub.f32 %v1032_v59, %v824_v10  ;;  %15892 = vst [vmem:[#allocation117_spill] sm:$0xff] %v9020_v41  ;;  %15893 = vst [vmem:[#allocation118_spill] sm:$0xff] %v9024_v40  ;;  %v9032_v10 = vmul.f32 %v8982_v60, %v8846_v27  ;;  %v9036_v24 = vcombine.high %v8985_v0, %v8985_v0 }
 0x1e2   :  { %15894 = vst [vmem:[#allocation119_spill] sm:$0xff] %v9028_v23  ;;  %v9040_v25 = vcombine.high %v8988_v7, %v8988_v7  ;;  %v1136_v59 = vmul.f32 %v944_v22, %v944_v22  ;;  %v1144_v13 = vmul.f32 %v952_v57, %v952_v57  ;;  %v1160_v54 = vmul.f32 %v968_v18, %v968_v18  ;;  %v653_v57 = vpop.f32.mrf.mxu1 }
 0x1e3   :  { %15895 = vst [vmem:[#allocation120_spill] sm:$0xff] %v9032_v10  ;;  %v1200_v56 = vmul.f32 %v1072_v2, %v1072_v2  ;;  %v1208_v15 = vmul.f32 %v1080_v14, %v1080_v14  ;;  %v1216_v42 = vmul.f32 %v1088_v34, %v1088_v34  ;;  %v1224_v26 = vmul.f32 %v1096_v3, %v1096_v3 }
 0x1e4   :  { %15896 = vst [vmem:[#allocation121_spill] sm:$0xff] %v9040_v25  ;;  %v9044_v31 = vmul.f32 %v8866_v29, %v8982_v60  ;;  %v9048_v12 = vmul.f32 %v8982_v60, %v8852_v11  ;;  %v9052_v8 = vmul.f32 %v8877_v1, %v8982_v60  ;;  %v9056_v22 = vadd.f32 %v8985_v0, %v8846_v27 }
 0x1e5   :  { %v9058_v18 = vadd.f32 %v1200_v56, %v1136_v59  ;;  %v9060_v35 = vadd.f32 %v1208_v15, %v1144_v13  ;;  %v9062_v2 = vadd.f32 %v1216_v42, %v1152_v53  ;;  %v9064_v14 = vadd.f32 %v1224_v26, %v1160_v54 }
 0x1e6   :  { %15897 = vst [vmem:[#allocation122_spill] sm:$0xff] %v9044_v31  ;;  %15898 = vst [vmem:[#allocation123_spill] sm:$0xff] %v9048_v12  ;;  %v9068_v34 = vadd.f32 %v8988_v7, %v8852_v11  ;;  %v9072_v3 = vadd.f32 %v9036_v24, %v8866_v29  ;;  %v912_v37 = vmul.f32 %v8947_v58, %v9056_v22 }
 0x1e7   :  { %15899 = vst [vmem:[#allocation124_spill] sm:$0xff] %v9052_v8  ;;  %15900 = vst [vmem:[#allocation125_spill] sm:$0xff] %v9058_v18  ;;  %v9078_v59 = vmul.f32 %v9012_v52, %v8846_v27  ;;  %v9082_v13 = vadd.f32 %v9040_v25, %v8877_v1  ;;  %v9085_v26 = vadd.f32 %v653_v57, %v8433_v36  ;;  %7713 = vrsqrt.f32 %v9058_v18 }
 0x1e8   :  { %15901 = vst [vmem:[#allocation126_spill] sm:$0xff] %v9060_v35  ;;  %15902 = vst [vmem:[#allocation127_spill] sm:$0xff] %v9062_v2  ;;  %v9089_v53 = vmul.f32 %v9012_v52, %v8866_v29  ;;  %v9093_v54 = vmul.f32 %v8940_v21, %v8866_v29  ;;  %v920_v56 = vmul.f32 %v8947_v58, %v9072_v3  ;;  %7715 = vrsqrt.f32 %v9060_v35 }
 0x1e9   :  { %15903 = vst [vmem:[#allocation128_spill] sm:$0xff] %v9064_v14  ;;  %15904 = vst [vmem:[#allocation129_spill] sm:$0xff] %v9078_v59  ;;  %v928_v27 = vmul.f32 %v8947_v58, %v9068_v34  ;;  %v9101_v15 = vmul.f32 %v8922_v30, %v8852_v11  ;;  %v9105_v36 = vmul.f32 %v9012_v52, %v8852_v11  ;;  %7717 = vrsqrt.f32 %v9062_v2 }
 0x1ea   :  { %15905 = vst [vmem:[#allocation130_spill] sm:$0xff] %v9082_v13  ;;  %15906 = vst [vmem:[#allocation131_spill] sm:$0xff] %v9089_v53  ;;  %v936_v42 = vmul.f32 %v8947_v58, %v9082_v13  ;;  %v796_v29 = vmul.f32 %v9085_v26, %v8849_v4  ;;  %v804_v57 = vmul.f32 %v8856_v48, %v9085_v26 }
 0x1eb   :  { %15907 = vst [vmem:[#allocation132_spill] sm:$0xff] %v9093_v54  ;;  %15908 = vst [vmem:[#allocation133_spill] sm:$0xff] %v9101_v15  ;;  %v9115_v14 = vmul.f32 %v8940_v21, %v8852_v11  ;;  %v1040_v54 = vsub.f32 %v912_v37, %v8880_v55  ;;  %v812_v15 = vmul.f32 %v9085_v26, %v8869_v46 }
 0x1ec   :  { %15909 = vst [vmem:[#allocation134_spill] sm:$0xff] %v9105_v36  ;;  %v820_v36 = vmul.f32 %v8887_v19, %v9085_v26  ;;  %v9124_v58 = vmul.f32 %v8922_v30, %v8877_v1  ;;  %v832_v53 = vmul.f32 %v8894_v62, %v8985_v0  ;;  %v840_v32 = vmul.f32 %v9036_v24, %v8894_v62 }
 0x1ed   :  { %15910 = vst [vmem:[#allocation135_spill] sm:$0xff] %v9115_v14  ;;  %v848_v11 = vmul.f32 %v8894_v62, %v8988_v7  ;;  %v856_v37 = vmul.f32 %v9040_v25, %v8894_v62  ;;  %v1048_v14 = vsub.f32 %v920_v56, %v8883_v45  ;;  %v1056_v59 = vsub.f32 %v928_v27, %v8897_v20 }
 0x1ee   :  { %15911 = vst [vmem:[#allocation136_spill] sm:$0xff] %v9124_v58  ;;  %v9138_v44 = vadd.f32 %v9085_v26, %v8800_v49  ;;  %v940_v58 = vsub.f32 %v8807_v63, %v796_v29  ;;  %v1064_v8 = vsub.f32 %v936_v42, %v8900_v17  ;;  %v948_v12 = vsub.f32 %v8811_v39, %v804_v57 }
 0x1ef   :  { %v956_v31 = vsub.f32 %v8815_v43, %v812_v15  ;;  %v964_v10 = vsub.f32 %v8819_v33, %v820_v36  ;;  %v1104_v38 = vsub.f32 %v1040_v54, %v832_v53  ;;  %v9153_v23 = vcombine.high %v8894_v62, %v8894_v62 }
 0x1f0   :  { %v876_v56 = vmul.f32 %v9138_v44, %v8860_v16  ;;  %v884_v27 = vmul.f32 %v9138_v44, %v8873_v28  ;;  %v892_v49 = vmul.f32 %v9138_v44, %v8891_v50  ;;  %v976_v42 = vsub.f32 %v8880_v55, %v832_v53 }
 0x1f1   :  { %15912 = vst [vmem:[#allocation137_spill] sm:$0xff] %v9153_v23  ;;  %v984_v40 = vsub.f32 %v8883_v45, %v840_v32  ;;  %v900_v54 = vmul.f32 %v9138_v44, %v8944_v6  ;;  %v992_v41 = vsub.f32 %v8897_v20, %v848_v11  ;;  %v1000_v47 = vsub.f32 %v8900_v17, %v856_v37  ;;  %v7441_v45 = vpop.f32.mrf.mxu1 }
 0x1f2   :  { %v1112_v60 = vsub.f32 %v1048_v14, %v840_v32  ;;  %v1120_v30 = vsub.f32 %v1056_v59, %v848_v11  ;;  %v1128_v25 = vsub.f32 %v1064_v8, %v856_v37  ;;  %v1004_v7 = vsub.f32 %v876_v56, %v8807_v63 }
 0x1f3   :  { %v1012_v50 = vsub.f32 %v884_v27, %v8811_v39  ;;  %v1020_v62 = vsub.f32 %v892_v49, %v8815_v43  ;;  %v1232_v28 = vmul.f32 %v1104_v38, %v1104_v38  ;;  %v1028_v55 = vsub.f32 %v900_v54, %v8819_v33  ;;  %v656_v54 = vpop.f32.mrf.mxu1 }
 0x1f4   :  { %v9167_v53 = vmul.f32 %v9012_v52, %v8877_v1  ;;  %v9171_v17 = vmul.f32 %v8940_v21, %v8877_v1  ;;  %v9175_v20 = vadd.f32 %v9153_v23, %v8862_v9  ;;  %v1068_v8 = vsub.f32 %v1004_v7, %v796_v29 }
 0x1f5   :  { %v1076_v39 = vsub.f32 %v1012_v50, %v804_v57  ;;  %v1084_v63 = vsub.f32 %v1020_v62, %v812_v15  ;;  %v1168_v43 = vmul.f32 %v976_v42, %v976_v42  ;;  %v1240_v38 = vmul.f32 %v1112_v60, %v1112_v60 }
 0x1f6   :  { %15913 = vst [vmem:[#allocation138_spill] sm:$0xff] %v9167_v53  ;;  %15914 = vst [vmem:[#allocation139_spill] sm:$0xff] %v9171_v17  ;;  %v1248_v32 = vmul.f32 %v1120_v30, %v1120_v30  ;;  %v1092_v33 = vsub.f32 %v1028_v55, %v820_v36  ;;  %v1176_v14 = vmul.f32 %v984_v40, %v984_v40 }
 0x1f7   :  { %15915 = vst [vmem:[#allocation140_spill] sm:$0xff] %v9175_v20  ;;  %v1184_v59 = vmul.f32 %v992_v41, %v992_v41  ;;  %v1192_v11 = vmul.f32 %v1000_v47, %v1000_v47  ;;  %v1256_v37 = vmul.f32 %v1128_v25, %v1128_v25  ;;  %v9177_v56 = vadd.f32 %v1232_v28, %v1168_v43 }
 0x1f8   :  { %v1132_v27 = vmul.f32 %v940_v58, %v940_v58  ;;  %v1140_v1 = vmul.f32 %v948_v12, %v948_v12  ;;  %v9180_v49 = vadd.f32 %v7441_v45, %v8475_v61  ;;  %v1148_v9 = vmul.f32 %v956_v31, %v956_v31 }
 0x1f9   :  { %15916 = vst [vmem:[#allocation141_spill] sm:$0xff] %v9177_v56  ;;  %v1196_v7 = vmul.f32 %v1068_v8, %v1068_v8  ;;  %v1204_v50 = vmul.f32 %v1076_v39, %v1076_v39  ;;  %v1212_v15 = vmul.f32 %v1084_v63, %v1084_v63  ;;  %v9182_v29 = vadd.f32 %v1240_v38, %v1176_v14  ;;  %v15925_v8 = vld [vmem:[#allocation99_spill] sm:$0xff]  ;;  %v15926_v63 = vld [vmem:[#allocation101_spill] sm:$0xff]  ;;  %v15927_v38 = vld [vmem:[#allocation104_spill] sm:$0xff] }
 0x1fa   :  { %v9184_v30 = vadd.f32 %v1248_v32, %v1184_v59  ;;  %v1156_v60 = vmul.f32 %v964_v10, %v964_v10  ;;  %v1220_v41 = vmul.f32 %v1092_v33, %v1092_v33  ;;  %v908_v61 = vmul.f32 %v9138_v44, %v9056_v22  ;;  %v7444_v10 = vpop.f32.mrf.mxu1  ;;  %v15928_v59 = vld [vmem:[#allocation105_spill] sm:$0xff] }
 0x1fb   :  { %15917 = vst [vmem:[#allocation142_spill] sm:$0xff] %v9182_v29  ;;  %v9187_v28 = vadd.f32 %v1196_v7, %v1132_v27  ;;  %v9189_v47 = vadd.f32 %v1204_v50, %v1140_v1  ;;  %v9191_v12 = vadd.f32 %v1212_v15, %v1148_v9  ;;  %v916_v31 = vmul.f32 %v9138_v44, %v9072_v3  ;;  %v15930_v1 = vld [vmem:[#allocation81_spill] sm:$0xff]  ;;  %v15931_v50 = vld [vmem:[#allocation82_spill] sm:$0xff] }
 0x1fc   :  { %15918 = vst [vmem:[#allocation143_spill] sm:$0xff] %v9184_v30  ;;  %v924_v40 = vmul.f32 %v9138_v44, %v9068_v34  ;;  %v9199_v25 = vadd.f32 %v1220_v41, %v1156_v60  ;;  %v9201_v36 = vadd.f32 %v1256_v37, %v1192_v11  ;;  %v932_v9 = vmul.f32 %v9138_v44, %v9082_v13  ;;  %v669_v14 = vpop.f32.mrf.mxu1  ;;  %v15929_v37 = vld [vmem:[#allocation80_spill] sm:$0xff] }
 0x1fd   :  { %15919 = vst [vmem:[#allocation144_spill] sm:$0xff] %v9187_v28  ;;  %15920 = vst [vmem:[#allocation145_spill] sm:$0xff] %v9189_v47  ;;  %v802_v57 = vmul.f32 %v9180_v49, %v8849_v4  ;;  %v810_v58 = vmul.f32 %v8856_v48, %v9180_v49  ;;  %v818_v42 = vmul.f32 %v9180_v49, %v8869_v46  ;;  %7719 = vrsqrt.f32 %v9177_v56  ;;  %v15932_v60 = vld [vmem:[#allocation92_spill] sm:$0xff]  ;;  %v15937_v56 = vld [vmem:[#allocation5_spill] sm:$0xff] }
 0x1fe   :  { %15921 = vst [vmem:[#allocation146_spill] sm:$0xff] %v9191_v12  ;;  %15922 = vst [vmem:[#allocation147_spill] sm:$0xff] %v9199_v25  ;;  %v826_v62 = vmul.f32 %v8887_v19, %v9180_v49  ;;  %v9218_v55 = vcombine.high %v9085_v26, %v9085_v26  ;;  %v828_v44 = vmul.f32 %v9085_v26, %v8985_v0  ;;  %7721 = vrsqrt.f32 %v9182_v29  ;;  %v15936_v25 = vld [vmem:[#allocation83_spill] sm:$0xff]  ;;  %v7445_v53 = vpop.f32.mrf.mxu1 }
 0x1ff   :  { %15923 = vst [vmem:[#allocation148_spill] sm:$0xff] %v9201_v36  ;;  %v9223_v45 = vadd.f32 %v656_v54, %v8460_v51  ;;  %v1036_v39 = vsub.f32 %v908_v61, %v15925_v8  ;;  %v1044_v43 = vsub.f32 %v916_v31, %v15926_v63  ;;  %v1052_v32 = vsub.f32 %v924_v40, %v15927_v38  ;;  %v15934_v31 = vld [vmem:[#allocation110_spill] sm:$0xff] }
 0x200   :  { %15924 = vst [vmem:[#allocation149_spill] sm:$0xff] %v9218_v55  ;;  %v9230_v33 = vadd.f32 %v9180_v49, %v8803_v5  ;;  %v1060_v11 = vsub.f32 %v932_v9, %v15928_v59  ;;  %v946_v27 = vsub.f32 %v15929_v37, %v802_v57  ;;  %v954_v7 = vsub.f32 %v15930_v1, %v810_v58  ;;  %v15933_v5 = vld [vmem:[#allocation94_spill] sm:$0xff]  ;;  %v15935_v9 = vld [vmem:[#allocation121_spill] sm:$0xff] }
 0x201   :  { %v962_v51 = vsub.f32 %v15931_v50, %v818_v42  ;;  %v836_v54 = vmul.f32 %v9036_v24, %v9085_v26  ;;  %v844_v40 = vmul.f32 %v9085_v26, %v15934_v31  ;;  %v852_v2 = vmul.f32 %v15935_v9, %v9085_v26 }
 0x202   :  { %v882_v15 = vmul.f32 %v9230_v33, %v8860_v16  ;;  %v890_v41 = vmul.f32 %v9230_v33, %v15932_v60  ;;  %v898_v61 = vmul.f32 %v9230_v33, %v15933_v5  ;;  %v906_v35 = vmul.f32 %v9230_v33, %v8944_v6 }
 0x203   :  { %7723 = vrsqrt.f32 %v9184_v30  ;;  %v972_v18 = vsub.f32 %v15925_v8, %v828_v44  ;;  %v970_v12 = vsub.f32 %v15936_v25, %v826_v62  ;;  %v9255_v17 = vadd.f32 %v7444_v10, %v15937_v56  ;;  %v15939_v8 = vld [vmem:[#allocation98_spill] sm:$0xff] }
 0x204   :  { %v1100_v29 = vsub.f32 %v1036_v39, %v828_v44  ;;  %v1108_v20 = vsub.f32 %v1044_v43, %v836_v54  ;;  %v1116_v23 = vsub.f32 %v1052_v32, %v844_v40  ;;  %v1124_v52 = vsub.f32 %v1060_v11, %v852_v2  ;;  %v15941_v56 = vld [vmem:[#allocation2_spill] sm:$0xff]  ;;  %v15943_v44 = vld [vmem:[#allocation7_spill] sm:$0xff]  ;;  %v9272_v43 = vpop.eup %7713 }
 0x205   :  { %15938 = vst [vmem:[#allocation99_spill] sm:$0xff] %v9255_v17  ;;  %v1010_v21 = vsub.f32 %v882_v15, %v15929_v37  ;;  %v1018_v26 = vsub.f32 %v890_v41, %v15930_v1  ;;  %v1026_v9 = vsub.f32 %v898_v61, %v15931_v50  ;;  %v1034_v30 = vsub.f32 %v906_v35, %v15936_v25  ;;  %v9277_v41 = vpop.eup %7715 }
 0x206   :  { %7725 = vrsqrt.f32 %v9201_v36  ;;  %v9264_v13 = vadd.f32 %v9218_v55, %v15939_v8  ;;  %v9267_v10 = vadd.f32 %v669_v14, %v15941_v56  ;;  %v9270_v39 = vadd.f32 %v7445_v53, %v15943_v44  ;;  %15945 = vst [vmem:[#allocation80_spill] sm:$0xff] %v9272_v43  ;;  %15946 = vst [vmem:[#allocation81_spill] sm:$0xff] %v9277_v41  ;;  %v9279_v44 = vpop.eup %7717  ;;  %v15968_v41 = vld [vmem:[#allocation107_spill] sm:$0xff] }
 0x207   :  { %v1074_v32 = vsub.f32 %v1010_v21, %v802_v57  ;;  %v1082_v11 = vsub.f32 %v1018_v26, %v810_v58  ;;  %v1090_v37 = vsub.f32 %v1026_v9, %v818_v42  ;;  %v1098_v1 = vsub.f32 %v1034_v30, %v826_v62  ;;  %15947 = vst [vmem:[#allocation82_spill] sm:$0xff] %v9279_v44  ;;  %v15967_v44 = vld [vmem:[#allocation106_spill] sm:$0xff] }
 0x208   :  { %15940 = vst [vmem:[#allocation101_spill] sm:$0xff] %v9264_v13  ;;  %15942 = vst [vmem:[#allocation104_spill] sm:$0xff] %v9267_v10  ;;  %v980_v35 = vsub.f32 %v15926_v63, %v836_v54  ;;  %v988_v25 = vsub.f32 %v15927_v38, %v844_v40  ;;  %v996_v50 = vsub.f32 %v15928_v59, %v852_v2  ;;  %7727 = vrsqrt.f32 %v9187_v28 }
 0x209   :  { %15944 = vst [vmem:[#allocation105_spill] sm:$0xff] %v9270_v39  ;;  %v1228_v15 = vmul.f32 %v1100_v29, %v1100_v29  ;;  %v1164_v14 = vmul.f32 %v972_v18, %v972_v18  ;;  %v1236_v61 = vmul.f32 %v1108_v20, %v1108_v20  ;;  %v1244_v56 = vmul.f32 %v1116_v23, %v1116_v23 }
 0x20a   :  { %v1252_v53 = vmul.f32 %v1124_v52, %v1124_v52  ;;  %v1138_v43 = vmul.f32 %v946_v27, %v946_v27  ;;  %v1146_v21 = vmul.f32 %v954_v7, %v954_v7  ;;  %v1154_v57 = vmul.f32 %v962_v51, %v962_v51  ;;  %v9281_v30 = vpop.eup %7719 }
 0x20b   :  { %v1162_v58 = vmul.f32 %v970_v12, %v970_v12  ;;  %15948 = vst [vmem:[#allocation110_spill] sm:$0xff] %v9281_v30  ;;  %v1202_v42 = vmul.f32 %v1074_v32, %v1074_v32  ;;  %v1210_v62 = vmul.f32 %v1082_v11, %v1082_v11  ;;  %v1218_v63 = vmul.f32 %v1090_v37, %v1090_v37  ;;  %v9300_v51 = vpop.eup %7721 }
 0x20c   :  { %v1226_v38 = vmul.f32 %v1098_v1, %v1098_v1  ;;  %v1172_v2 = vmul.f32 %v980_v35, %v980_v35  ;;  %v1180_v29 = vmul.f32 %v988_v25, %v988_v25  ;;  %v1188_v59 = vmul.f32 %v996_v50, %v996_v50  ;;  %15957 = vst [vmem:[#allocation154_spill] sm:$0xff] %v9300_v51  ;;  %v15960_v25 = vld [vmem:[#allocation109_spill] sm:$0xff] }
 0x20d   :  { %v9283_v54 = vadd.f32 %v1228_v15, %v1164_v14  ;;  %v9285_v18 = vadd.f32 %v1202_v42, %v1138_v43  ;;  %v9287_v52 = vadd.f32 %v1210_v62, %v1146_v21  ;;  %v9289_v23 = vadd.f32 %v1218_v63, %v1154_v57  ;;  %v15961_v15 = vld [vmem:[#allocation116_spill] sm:$0xff]  ;;  %v15964_v57 = vld [vmem:[#allocation119_spill] sm:$0xff] }
 0x20e   :  { %v9291_v20 = vadd.f32 %v1226_v38, %v1162_v58  ;;  %v9293_v12 = vadd.f32 %v1236_v61, %v1172_v2  ;;  %v9295_v27 = vadd.f32 %v1244_v56, %v1180_v29  ;;  %v9297_v7 = vadd.f32 %v1252_v53, %v1188_v59  ;;  %v15962_v61 = vld [vmem:[#allocation117_spill] sm:$0xff]  ;;  %v15963_v53 = vld [vmem:[#allocation118_spill] sm:$0xff] }
 0x20f   :  { %15949 = vst [vmem:[#allocation83_spill] sm:$0xff] %v9283_v54  ;;  %15950 = vst [vmem:[#allocation5_spill] sm:$0xff] %v9285_v18  ;;  %7729 = vrsqrt.f32 %v9189_v47  ;;  %v798_v40 = vmul.f32 %v9223_v45, %v8849_v4  ;;  %v806_v9 = vmul.f32 %v8856_v48, %v9223_v45  ;;  %v814_v26 = vmul.f32 %v9223_v45, %v8869_v46 }
 0x210   :  { %15951 = vst [vmem:[#allocation2_spill] sm:$0xff] %v9287_v52  ;;  %15952 = vst [vmem:[#allocation7_spill] sm:$0xff] %v9289_v23  ;;  %v9309_v43 = vpop.eup %7723  ;;  %7731 = vrsqrt.f32 %v9283_v54  ;;  %v9314_v32 = vcombine.high %v9180_v49, %v9180_v49  ;;  %v834_v11 = vmul.f32 %v9180_v49, %v8985_v0  ;;  %v822_v37 = vmul.f32 %v8887_v19, %v9223_v45 }
 0x211   :  { %15953 = vst [vmem:[#allocation150_spill] sm:$0xff] %v9291_v20  ;;  %15954 = vst [vmem:[#allocation151_spill] sm:$0xff] %v9293_v12  ;;  %v914_v1 = vmul.f32 %v9230_v33, %v9056_v22  ;;  %v922_v35 = vmul.f32 %v9230_v33, %v9072_v3  ;;  %v870_v50 = vadd.f32 %v9223_v45, %v15960_v25  ;;  %7733 = vrsqrt.f32 %v9293_v12  ;;  %v15966_v20 = vld [vmem:[#allocation130_spill] sm:$0xff]  ;;  %v16029_v12 = vld [vmem:[#allocation136_spill] sm:$0xff] }
 0x212   :  { %15955 = vst [vmem:[#allocation152_spill] sm:$0xff] %v9295_v27  ;;  %15956 = vst [vmem:[#allocation153_spill] sm:$0xff] %v9297_v7  ;;  %v942_v14 = vsub.f32 %v15961_v15, %v798_v40  ;;  %v950_v56 = vsub.f32 %v15962_v61, %v806_v9  ;;  %v958_v21 = vsub.f32 %v15963_v53, %v814_v26  ;;  %7735 = vrsqrt.f32 %v9295_v27 }
 0x213   :  { %15958 = vst [vmem:[#allocation155_spill] sm:$0xff] %v9309_v43  ;;  %15959 = vst [vmem:[#allocation156_spill] sm:$0xff] %v9314_v32  ;;  %v966_v58 = vsub.f32 %v15964_v57, %v822_v37  ;;  %v9331_v42 = vpop.eup %7725  ;;  %v878_v62 = vmul.f32 %v870_v50, %v8860_v16  ;;  %v886_v63 = vmul.f32 %v870_v50, %v15932_v60  ;;  %7737 = vrsqrt.f32 %v9297_v7  ;;  %v15969_v16 = vld [vmem:[#allocation121_spill] sm:$0xff] }
 0x214   :  { %15965 = vst [vmem:[#allocation109_spill] sm:$0xff] %v9331_v42  ;;  %v894_v38 = vmul.f32 %v870_v50, %v15933_v5  ;;  %v902_v2 = vmul.f32 %v870_v50, %v8944_v6  ;;  %v842_v29 = vmul.f32 %v9036_v24, %v9180_v49  ;;  %v850_v59 = vmul.f32 %v9180_v49, %v15934_v31  ;;  %v16025_v43 = vld [vmem:[#allocation133_spill] sm:$0xff] }
 0x215   :  { %v930_v25 = vmul.f32 %v9230_v33, %v9068_v34  ;;  %v938_v23 = vmul.f32 %v9230_v33, %v15966_v20  ;;  %v1042_v52 = vsub.f32 %v914_v1, %v15967_v44  ;;  %v1050_v47 = vsub.f32 %v922_v35, %v15968_v41  ;;  %v15970_v33 = vld [vmem:[#allocation102_spill] sm:$0xff] }
 0x216   :  { %v1006_v18 = vsub.f32 %v878_v62, %v15961_v15  ;;  %v910_v28 = vmul.f32 %v870_v50, %v9056_v22  ;;  %v1014_v6 = vsub.f32 %v886_v63, %v15962_v61  ;;  %v1022_v5 = vsub.f32 %v894_v38, %v15963_v53  ;;  %v15972_v61 = vld [vmem:[#allocation108_spill] sm:$0xff] }
 0x217   :  { %v1030_v60 = vsub.f32 %v902_v2, %v15964_v57  ;;  %v858_v19 = vmul.f32 %v15969_v16, %v9180_v49  ;;  %v9358_v1 = vadd.f32 %v9314_v32, %v15970_v33  ;;  %v978_v15 = vsub.f32 %v15967_v44, %v834_v11  ;;  %v15973_v2 = vld [vmem:[#allocation111_spill] sm:$0xff]  ;;  %v15974_v33 = vld [vmem:[#allocation120_spill] sm:$0xff] }
 0x218   :  { %v1070_v35 = vsub.f32 %v1006_v18, %v798_v40  ;;  %v1078_v62 = vsub.f32 %v1014_v6, %v806_v9  ;;  %v1086_v46 = vsub.f32 %v1022_v5, %v814_v26  ;;  %v1058_v63 = vsub.f32 %v930_v25, %v15972_v61  ;;  %v9367_v18 = vpop.eup %7727 }
 0x219   :  { %15971 = vst [vmem:[#allocation116_spill] sm:$0xff] %v9358_v1  ;;  %v1094_v48 = vsub.f32 %v1030_v60, %v822_v37  ;;  %v918_v53 = vmul.f32 %v870_v50, %v9072_v3  ;;  %v926_v57 = vmul.f32 %v870_v50, %v9068_v34  ;;  %v934_v38 = vmul.f32 %v870_v50, %v15966_v20  ;;  %v15978_v50 = vld [vmem:[#allocation122_spill] sm:$0xff] }
 0x21a   :  { %v1066_v49 = vsub.f32 %v938_v23, %v15973_v2  ;;  %v1106_v4 = vsub.f32 %v1042_v52, %v834_v11  ;;  %v1114_v8 = vsub.f32 %v1050_v47, %v842_v29  ;;  %v1038_v42 = vsub.f32 %v910_v28, %v15974_v33  ;;  %15975 = vst [vmem:[#allocation117_spill] sm:$0xff] %v9367_v18  ;;  %v15979_v52 = vld [vmem:[#allocation123_spill] sm:$0xff]  ;;  %v15980_v11 = vld [vmem:[#allocation124_spill] sm:$0xff] }
 0x21b   :  { %v1134_v44 = vmul.f32 %v942_v14, %v942_v14  ;;  %v1142_v6 = vmul.f32 %v950_v56, %v950_v56  ;;  %v1150_v5 = vmul.f32 %v958_v21, %v958_v21  ;;  %v1198_v60 = vmul.f32 %v1070_v35, %v1070_v35 }
 0x21c   :  { %v9369_v40 = vpop.eup %7729  ;;  %v1158_v9 = vmul.f32 %v966_v58, %v966_v58  ;;  %v1206_v26 = vmul.f32 %v1078_v62, %v1078_v62  ;;  %v1214_v37 = vmul.f32 %v1086_v46, %v1086_v46  ;;  %v1222_v25 = vmul.f32 %v1094_v48, %v1094_v48 }
 0x21d   :  { %15976 = vst [vmem:[#allocation118_spill] sm:$0xff] %v9369_v40  ;;  %v9371_v36 = vpop.eup %7731  ;;  %v1046_v23 = vsub.f32 %v918_v53, %v15978_v50  ;;  %v1054_v47 = vsub.f32 %v926_v57, %v15979_v52  ;;  %v1062_v28 = vsub.f32 %v934_v38, %v15980_v11  ;;  %v9376_v7 = vadd.f32 %v1198_v60, %v1134_v44 }
 0x21e   :  { %15977 = vst [vmem:[#allocation119_spill] sm:$0xff] %v9371_v36  ;;  %v830_v14 = vmul.f32 %v9223_v45, %v8985_v0  ;;  %v9380_v56 = vadd.f32 %v1206_v26, %v1142_v6  ;;  %v9382_v21 = vadd.f32 %v1214_v37, %v1150_v5  ;;  %v9384_v58 = vadd.f32 %v1222_v25, %v1158_v9  ;;  %v9386_v48 = vpop.eup %7733  ;;  %v16032_v36 = vld [vmem:[#allocation139_spill] sm:$0xff] }
 0x21f   :  { %15981 = vst [vmem:[#allocation130_spill] sm:$0xff] %v9376_v7  ;;  %15985 = vst [vmem:[#allocation108_spill] sm:$0xff] %v9386_v48  ;;  %v1122_v46 = vsub.f32 %v1058_v63, %v850_v59  ;;  %v838_v35 = vmul.f32 %v9036_v24, %v9223_v45  ;;  %v846_v62 = vmul.f32 %v9223_v45, %v15934_v31  ;;  %v9396_v5 = vpop.eup %7735  ;;  %7739 = vrsqrt.f32 %v9376_v7 }
 0x220   :  { %15982 = vst [vmem:[#allocation106_spill] sm:$0xff] %v9380_v56  ;;  %15983 = vst [vmem:[#allocation107_spill] sm:$0xff] %v9382_v21  ;;  %v854_v53 = vmul.f32 %v15969_v16, %v9223_v45  ;;  %v986_v57 = vsub.f32 %v15968_v41, %v842_v29  ;;  %v994_v38 = vsub.f32 %v15972_v61, %v850_v59 }
 0x221   :  { %15984 = vst [vmem:[#allocation121_spill] sm:$0xff] %v9384_v58  ;;  %v1130_v44 = vsub.f32 %v1066_v49, %v858_v19  ;;  %v1102_v6 = vsub.f32 %v1038_v42, %v830_v14  ;;  %15986 = vst [vmem:[#allocation111_spill] sm:$0xff] %v9396_v5  ;;  %v1002_v60 = vsub.f32 %v15973_v2, %v858_v19  ;;  %v9403_v42 = vpop.eup %7737  ;;  %v672_v49 = vpop.f32.mrf.mxu1  ;;  %v16026_v5 = vld [vmem:[#allocation134_spill] sm:$0xff] }
 0x222   :  { %v1110_v63 = vsub.f32 %v1046_v23, %v838_v35  ;;  %v1118_v9 = vsub.f32 %v1054_v47, %v846_v62  ;;  %v1126_v26 = vsub.f32 %v1062_v28, %v854_v53  ;;  %v1170_v37 = vmul.f32 %v978_v15, %v978_v15  ;;  %15987 = vst [vmem:[#allocation120_spill] sm:$0xff] %v9403_v42  ;;  %v16024_v42 = vld [vmem:[#allocation132_spill] sm:$0xff] }
 0x223   :  { %v1234_v25 = vmul.f32 %v1106_v4, %v1106_v4  ;;  %v1242_v40 = vmul.f32 %v1114_v8, %v1114_v8  ;;  %v974_v58 = vsub.f32 %v15974_v33, %v830_v14  ;;  %v1250_v21 = vmul.f32 %v1122_v46, %v1122_v46 }
 0x224   :  { %v982_v18 = vsub.f32 %v15978_v50, %v838_v35  ;;  %v990_v41 = vsub.f32 %v15979_v52, %v846_v62  ;;  %v998_v29 = vsub.f32 %v15980_v11, %v854_v53  ;;  %v1178_v59 = vmul.f32 %v986_v57, %v986_v57  ;;  %v15996_v57 = vld [vmem:[#allocation3_spill] sm:$0xff] }
 0x225   :  { %v1258_v61 = vmul.f32 %v1130_v44, %v1130_v44  ;;  %v9407_v19 = vcombine.high %v9223_v45, %v9223_v45  ;;  %v1230_v15 = vmul.f32 %v1102_v6, %v1102_v6  ;;  %v1186_v4 = vmul.f32 %v994_v38, %v994_v38  ;;  %v15993_v45 = vld [vmem:[#allocation115_spill] sm:$0xff] }
 0x226   :  { %v1238_v8 = vmul.f32 %v1110_v63, %v1110_v63  ;;  %v1246_v2 = vmul.f32 %v1118_v9, %v1118_v9  ;;  %v1254_v33 = vmul.f32 %v1126_v26, %v1126_v26  ;;  %v1194_v23 = vmul.f32 %v1002_v60, %v1002_v60  ;;  %v16004_v9 = vld [vmem:[#allocation137_spill] sm:$0xff] }
 0x227   :  { %15988 = vst [vmem:[#allocation122_spill] sm:$0xff] %v9407_v19  ;;  %v9409_v50 = vadd.f32 %v1234_v25, %v1170_v37  ;;  %v9411_v52 = vadd.f32 %v1242_v40, %v1178_v59  ;;  %v1166_v47 = vmul.f32 %v974_v58, %v974_v58  ;;  %v9413_v11 = vadd.f32 %v1250_v21, %v1186_v4 }
 0x228   :  { %v1174_v28 = vmul.f32 %v982_v18, %v982_v18  ;;  %v1182_v14 = vmul.f32 %v990_v41, %v990_v41  ;;  %v1190_v46 = vmul.f32 %v998_v29, %v998_v29  ;;  %v9415_v35 = vadd.f32 %v1258_v61, %v1194_v23 }
 0x229   :  { %15989 = vst [vmem:[#allocation123_spill] sm:$0xff] %v9409_v50  ;;  %15990 = vst [vmem:[#allocation124_spill] sm:$0xff] %v9411_v52  ;;  %v9419_v62 = vadd.f32 %v9407_v19, %v15993_v45  ;;  %v9421_v53 = vadd.f32 %v1230_v15, %v1166_v47  ;;  %v9424_v38 = vadd.f32 %v672_v49, %v15996_v57  ;;  %v16015_v47 = vld [vmem:[#allocation140_spill] sm:$0xff]  ;;  %v16021_v45 = vld [vmem:[#allocation131_spill] sm:$0xff] }
 0x22a   :  { %15991 = vst [vmem:[#allocation157_spill] sm:$0xff] %v9413_v11  ;;  %15992 = vst [vmem:[#allocation158_spill] sm:$0xff] %v9415_v35  ;;  %v9426_v44 = vadd.f32 %v1238_v8, %v1174_v28  ;;  %v9428_v40 = vadd.f32 %v1246_v2, %v1182_v14  ;;  %v9430_v21 = vadd.f32 %v1254_v33, %v1190_v46  ;;  %v16022_v35 = vld [vmem:[#allocation96_spill] sm:$0xff]  ;;  %v16027_v52 = vld [vmem:[#allocation97_spill] sm:$0xff] }
 0x22b   :  { %15994 = vst [vmem:[#allocation159_spill] sm:$0xff] %v9419_v62  ;;  %15995 = vst [vmem:[#allocation160_spill] sm:$0xff] %v9421_v53  ;;  %v9435_v18 = vcombine.high %v9255_v17, %v9255_v17  ;;  %v9439_v58 = vcombine.high %v9267_v10, %v9267_v10  ;;  %v9443_v6 = vcombine.high %v9270_v39, %v9270_v39  ;;  %7741 = vrsqrt.f32 %v9421_v53  ;;  %v16016_v39 = vld [vmem:[#allocation112_spill] sm:$0xff]  ;;  %v16017_v17 = vld [vmem:[#allocation129_spill] sm:$0xff] }
 0x22c   :  { %15997 = vst [vmem:[#allocation3_spill] sm:$0xff] %v9424_v38  ;;  %15998 = vst [vmem:[#allocation161_spill] sm:$0xff] %v9426_v44  ;;  %v829_v60 = vmul.f32 %v9218_v55, %v8985_v0  ;;  %v9449_v63 = vmul.f32 %v9407_v19, %v8985_v0  ;;  %v9453_v26 = vmul.f32 %v16004_v9, %v8985_v0  ;;  %7743 = vrsqrt.f32 %v9426_v44  ;;  %v16020_v10 = vld [vmem:[#allocation114_spill] sm:$0xff]  ;;  %v16028_v44 = vld [vmem:[#allocation135_spill] sm:$0xff] }
 0x22d   :  { %15999 = vst [vmem:[#allocation162_spill] sm:$0xff] %v9428_v40  ;;  %16000 = vst [vmem:[#allocation163_spill] sm:$0xff] %v9430_v21  ;;  %v9457_v37 = vmul.f32 %v9314_v32, %v8985_v0  ;;  %v9461_v25 = vmul.f32 %v9218_v55, %v9036_v24  ;;  %v9466_v41 = vcombine.high %v9424_v38, %v9424_v38  ;;  %7745 = vrsqrt.f32 %v9428_v40  ;;  %v16018_v38 = vld [vmem:[#allocation95_spill] sm:$0xff]  ;;  %v16031_v53 = vld [vmem:[#allocation100_spill] sm:$0xff] }
 0x22e   :  { %16001 = vst [vmem:[#allocation164_spill] sm:$0xff] %v9435_v18  ;;  %16002 = vst [vmem:[#allocation165_spill] sm:$0xff] %v9439_v58  ;;  %v9470_v29 = vmul.f32 %v9407_v19, %v9036_v24  ;;  %v9474_v59 = vmul.f32 %v16004_v9, %v9036_v24  ;;  %v9479_v0 = vmul.f32 %v9314_v32, %v9036_v24  ;;  %7747 = vrsqrt.f32 %v9430_v21  ;;  %v16019_v58 = vld [vmem:[#allocation113_spill] sm:$0xff]  ;;  %v9561_v21 = vpop.eup %7739 }
 0x22f   :  { %16003 = vst [vmem:[#allocation166_spill] sm:$0xff] %v9443_v6  ;;  %16005 = vst [vmem:[#allocation167_spill] sm:$0xff] %v9466_v41  ;;  %v9483_v61 = vmul.f32 %v9218_v55, %v15934_v31  ;;  %v9487_v15 = vmul.f32 %v9407_v19, %v15934_v31  ;;  %v9492_v4 = vmul.f32 %v16004_v9, %v15934_v31 }
 0x230   :  { %16006 = vst [vmem:[#allocation168_spill] sm:$0xff] %v9479_v0  ;;  %v9496_v8 = vmul.f32 %v9314_v32, %v15934_v31  ;;  %v9500_v24 = vmul.f32 %v9218_v55, %v15969_v16  ;;  %v9505_v2 = vmul.f32 %v9407_v19, %v15969_v16  ;;  %v9509_v33 = vmul.f32 %v16004_v9, %v15969_v16 }
 0x231   :  { %16007 = vst [vmem:[#allocation169_spill] sm:$0xff] %v9483_v61  ;;  %16008 = vst [vmem:[#allocation170_spill] sm:$0xff] %v9487_v15  ;;  %v9513_v49 = vmul.f32 %v9314_v32, %v15969_v16  ;;  %v909_v31 = vmul.f32 %v9264_v13, %v9056_v22  ;;  %v911_v23 = vmul.f32 %v9419_v62, %v9056_v22 }
 0x232   :  { %16009 = vst [vmem:[#allocation171_spill] sm:$0xff] %v9492_v4  ;;  %16010 = vst [vmem:[#allocation172_spill] sm:$0xff] %v9496_v8  ;;  %v913_v28 = vmul.f32 %v16015_v47, %v9056_v22  ;;  %v915_v14 = vmul.f32 %v9358_v1, %v9056_v22  ;;  %v917_v46 = vmul.f32 %v9264_v13, %v9072_v3 }
 0x233   :  { %16011 = vst [vmem:[#allocation173_spill] sm:$0xff] %v9500_v24  ;;  %16012 = vst [vmem:[#allocation174_spill] sm:$0xff] %v9505_v2  ;;  %v919_v57 = vmul.f32 %v9419_v62, %v9072_v3  ;;  %v921_v16 = vmul.f32 %v16015_v47, %v9072_v3  ;;  %v923_v7 = vmul.f32 %v9358_v1, %v9072_v3 }
 0x234   :  { %16013 = vst [vmem:[#allocation175_spill] sm:$0xff] %v9509_v33  ;;  %16014 = vst [vmem:[#allocation176_spill] sm:$0xff] %v9513_v49  ;;  %v925_v56 = vmul.f32 %v9264_v13, %v9068_v34  ;;  %v927_v32 = vmul.f32 %v9419_v62, %v9068_v34  ;;  %v929_v22 = vmul.f32 %v16015_v47, %v9068_v34 }
 0x235   :  { %v931_v9 = vmul.f32 %v9358_v1, %v9068_v34  ;;  %v933_v19 = vmul.f32 %v9264_v13, %v15966_v20  ;;  %v935_v55 = vmul.f32 %v9419_v62, %v15966_v20  ;;  %v937_v3 = vmul.f32 %v16015_v47, %v15966_v20  ;;  %16023 = vst [vmem:[#allocation112_spill] sm:$0xff] %v9561_v21 }
 0x236   :  { %v939_v6 = vmul.f32 %v9358_v1, %v15966_v20  ;;  %v973_v18 = vsub.f32 %v16016_v39, %v829_v60  ;;  %v975_v41 = vsub.f32 %v16017_v17, %v9449_v63  ;;  %v977_v34 = vsub.f32 %v16018_v38, %v9453_v26 }
 0x237   :  { %v979_v13 = vsub.f32 %v16019_v58, %v9457_v37  ;;  %v981_v62 = vsub.f32 %v16020_v10, %v9461_v25  ;;  %v983_v47 = vsub.f32 %v16021_v45, %v9470_v29  ;;  %v985_v20 = vsub.f32 %v16022_v35, %v9474_v59 }
 0x238   :  { %v1037_v1 = vsub.f32 %v909_v31, %v16016_v39  ;;  %v987_v11 = vsub.f32 %v16024_v42, %v9479_v0  ;;  %v989_v40 = vsub.f32 %v16025_v43, %v9483_v61  ;;  %v991_v27 = vsub.f32 %v16026_v5, %v9487_v15  ;;  %v16030_v31 = vld [vmem:[#allocation138_spill] sm:$0xff]  ;;  %v9584_v61 = vpop.eup %7741 }
 0x239   :  { %v993_v51 = vsub.f32 %v16027_v52, %v9492_v4  ;;  %v995_v48 = vsub.f32 %v16028_v44, %v9496_v8  ;;  %v997_v39 = vsub.f32 %v16029_v12, %v9500_v24  ;;  %v999_v21 = vsub.f32 %v16030_v31, %v9505_v2 }
 0x23a   :  { %v1039_v30 = vsub.f32 %v911_v23, %v16017_v17  ;;  %v1001_v50 = vsub.f32 %v16031_v53, %v9509_v33  ;;  %v1003_v54 = vsub.f32 %v16032_v36, %v9513_v49  ;;  %v1041_v15 = vsub.f32 %v913_v28, %v16018_v38  ;;  %v9589_v17 = vpop.eup %7743 }
 0x23b   :  { %v1043_v4 = vsub.f32 %v915_v14, %v16019_v58  ;;  %v1045_v8 = vsub.f32 %v917_v46, %v16020_v10  ;;  %v1047_v24 = vsub.f32 %v919_v57, %v16021_v45  ;;  %v1049_v2 = vsub.f32 %v921_v16, %v16022_v35  ;;  %v9595_v58 = vpop.eup %7745 }
 0x23c   :  { %v1101_v0 = vsub.f32 %v1037_v1, %v829_v60  ;;  %v1051_v23 = vsub.f32 %v923_v7, %v16024_v42  ;;  %v1053_v33 = vsub.f32 %v925_v56, %v16025_v43  ;;  %v1055_v49 = vsub.f32 %v927_v32, %v16026_v5  ;;  %v9601_v35 = vpop.eup %7747  ;;  %v16035_v60 = vld [vmem:[#allocation170_spill] sm:$0xff] }
 0x23d   :  { %v1057_v38 = vsub.f32 %v929_v22, %v16027_v52  ;;  %v1059_v28 = vsub.f32 %v931_v9, %v16028_v44  ;;  %v1061_v10 = vsub.f32 %v933_v19, %v16029_v12  ;;  %v1063_v45 = vsub.f32 %v935_v55, %v16030_v31  ;;  %v16033_v55 = vld [vmem:[#allocation168_spill] sm:$0xff] }
 0x23e   :  { %v1103_v1 = vsub.f32 %v1039_v30, %v9449_v63  ;;  %v1065_v7 = vsub.f32 %v937_v3, %v16031_v53  ;;  %v1067_v43 = vsub.f32 %v939_v6, %v16032_v36  ;;  %v1105_v32 = vsub.f32 %v1041_v15, %v9453_v26  ;;  %v16034_v30 = vld [vmem:[#allocation169_spill] sm:$0xff]  ;;  %v16036_v53 = vld [vmem:[#allocation171_spill] sm:$0xff]  ;;  %v16037_v36 = vld [vmem:[#allocation172_spill] sm:$0xff] }
 0x23f   :  { %v1107_v56 = vsub.f32 %v1043_v4, %v9457_v37  ;;  %v1109_v5 = vsub.f32 %v1045_v8, %v9461_v25  ;;  %v1111_v42 = vsub.f32 %v1047_v24, %v9470_v29  ;;  %v1113_v12 = vsub.f32 %v1049_v2, %v9474_v59  ;;  %v16038_v26 = vld [vmem:[#allocation173_spill] sm:$0xff]  ;;  %v16039_v25 = vld [vmem:[#allocation174_spill] sm:$0xff]  ;;  %v16040_v29 = vld [vmem:[#allocation175_spill] sm:$0xff] }
 0x240   :  { %v1229_v19 = vmul.f32 %v1101_v0, %v1101_v0  ;;  %v1115_v52 = vsub.f32 %v1051_v23, %v16033_v55  ;;  %v1117_v44 = vsub.f32 %v1053_v33, %v16034_v30  ;;  %v1119_v63 = vsub.f32 %v1055_v49, %v16035_v60  ;;  %v16041_v59 = vld [vmem:[#allocation176_spill] sm:$0xff] }
 0x241   :  { %v1121_v9 = vsub.f32 %v1057_v38, %v16036_v53  ;;  %v1123_v6 = vsub.f32 %v1059_v28, %v16037_v36  ;;  %v1125_v15 = vsub.f32 %v1061_v10, %v16038_v26  ;;  %v1165_v37 = vmul.f32 %v973_v18, %v973_v18  ;;  %v16045_v30 = vld [vmem:[#allocation160_spill] sm:$0xff]  ;;  %v16047_v36 = vld [vmem:[#allocation110_spill] sm:$0xff] }
 0x242   :  { %v1231_v4 = vmul.f32 %v1103_v1, %v1103_v1  ;;  %v1127_v8 = vsub.f32 %v1063_v45, %v16039_v25  ;;  %v1129_v24 = vsub.f32 %v1065_v7, %v16040_v29  ;;  %v1131_v0 = vsub.f32 %v1067_v43, %v16041_v59 }
 0x243   :  { %v1167_v2 = vmul.f32 %v975_v41, %v975_v41  ;;  %v1169_v14 = vmul.f32 %v977_v34, %v977_v34  ;;  %v1171_v46 = vmul.f32 %v979_v13, %v979_v13  ;;  %v1233_v33 = vmul.f32 %v1105_v32, %v1105_v32 }
 0x244   :  { %v9619_v57 = vadd.f32 %v1229_v19, %v1165_v37  ;;  %v1173_v49 = vmul.f32 %v981_v62, %v981_v62  ;;  %v1175_v16 = vmul.f32 %v983_v47, %v983_v47  ;;  %v1177_v22 = vmul.f32 %v985_v20, %v985_v20  ;;  %v16044_v19 = vld [vmem:[#allocation123_spill] sm:$0xff] }
 0x245   :  { %v1179_v3 = vmul.f32 %v987_v11, %v987_v11  ;;  %v1181_v31 = vmul.f32 %v989_v40, %v989_v40  ;;  %v1183_v23 = vmul.f32 %v991_v27, %v991_v27  ;;  %v1235_v18 = vmul.f32 %v1107_v56, %v1107_v56 }
 0x246   :  { %v9621_v38 = vadd.f32 %v1231_v4, %v1167_v2  ;;  %v1185_v28 = vmul.f32 %v993_v51, %v993_v51  ;;  %v1187_v10 = vmul.f32 %v995_v48, %v995_v48  ;;  %v1189_v45 = vmul.f32 %v997_v39, %v997_v39 }
 0x247   :  { %v1191_v1 = vmul.f32 %v999_v21, %v999_v21  ;;  %v1193_v7 = vmul.f32 %v1001_v50, %v1001_v50  ;;  %v1237_v41 = vmul.f32 %v1109_v5, %v1109_v5  ;;  %v9623_v34 = vadd.f32 %v1233_v33, %v1169_v14  ;;  %v16042_v5 = vld [vmem:[#allocation83_spill] sm:$0xff] }
 0x248   :  { %7749 = vrsqrt.f32 %v9619_v57  ;;  %v1195_v13 = vmul.f32 %v1003_v54, %v1003_v54  ;;  %v1239_v62 = vmul.f32 %v1111_v42, %v1111_v42  ;;  %v1241_v47 = vmul.f32 %v1113_v12, %v1113_v12  ;;  %v16043_v42 = vld [vmem:[#allocation119_spill] sm:$0xff] }
 0x249   :  { %v1243_v20 = vmul.f32 %v1115_v52, %v1115_v52  ;;  %v1245_v11 = vmul.f32 %v1117_v44, %v1117_v44  ;;  %v1247_v40 = vmul.f32 %v1119_v63, %v1119_v63  ;;  %v9626_v27 = vadd.f32 %v1235_v18, %v1171_v46 }
 0x24a   :  { %7751 = vrsqrt.f32 %v9621_v38  ;;  %v1249_v51 = vmul.f32 %v1121_v9, %v1121_v9  ;;  %v1251_v48 = vmul.f32 %v1123_v6, %v1123_v6  ;;  %v1253_v39 = vmul.f32 %v1125_v15, %v1125_v15  ;;  %v16046_v9 = vld [vmem:[#allocation141_spill] sm:$0xff] }
 0x24b   :  { %v1255_v21 = vmul.f32 %v1127_v8, %v1127_v8  ;;  %v1257_v50 = vmul.f32 %v1129_v24, %v1129_v24  ;;  %v1259_v43 = vmul.f32 %v1131_v0, %v1131_v0  ;;  %v9629_v32 = vadd.f32 %v1237_v41, %v1173_v49  ;;  %v16048_v49 = vld [vmem:[#allocation151_spill] sm:$0xff] }
 0x24c   :  { %7753 = vrsqrt.f32 %v9623_v34  ;;  %v9632_v54 = vadd.f32 %v1239_v62, %v1175_v16  ;;  %v9634_v56 = vadd.f32 %v1241_v47, %v1177_v22  ;;  %v1549_v12 = vmul.f32 %v16043_v42, %v16042_v5  ;;  %v16049_v16 = vld [vmem:[#allocation108_spill] sm:$0xff] }
 0x24d   :  { %7755 = vrsqrt.f32 %v16044_v19  ;;  %v9639_v55 = vadd.f32 %v1243_v20, %v1179_v3  ;;  %v9641_v52 = vadd.f32 %v1245_v11, %v1181_v31  ;;  %v1563_v44 = vmul.f32 %v9584_v61, %v16045_v30 }
 0x24e   :  { %7757 = vrsqrt.f32 %v9626_v27  ;;  %v9646_v60 = vadd.f32 %v1247_v40, %v1183_v23  ;;  %v9648_v63 = vadd.f32 %v1249_v51, %v1185_v28  ;;  %v9650_v53 = vadd.f32 %v1251_v48, %v1187_v10  ;;  %v16050_v23 = vld [vmem:[#allocation161_spill] sm:$0xff] }
 0x24f   :  { %v1577_v6 = vmul.f32 %v16047_v36, %v16046_v9  ;;  %v9654_v26 = vadd.f32 %v1253_v39, %v1189_v45  ;;  %v9656_v15 = vadd.f32 %v1255_v21, %v1191_v1  ;;  %vm1550_vm3 = vcmp.eq.f32.partialorder %v16042_v5, inf  ;;  %v16051_v1 = vld [vmem:[#allocation142_spill] sm:$0xff] }
 0x250   :  { %7759 = vrsqrt.f32 %v9629_v32  ;;  %v9660_v61 = vadd.f32 %v1257_v50, %v1193_v7  ;;  %v9662_v37 = vadd.f32 %v1259_v43, %v1195_v13  ;;  %v1551_v4 = vsel %vm1550_vm3, %v16042_v5, %v1549_v12  ;;  %v16052_v7 = vld [vmem:[#allocation154_spill] sm:$0xff]  ;;  %v16053_v13 = vld [vmem:[#allocation124_spill] sm:$0xff] }
 0x251   :  { %vm1564_vm4 = vcmp.eq.f32.partialorder %v16045_v30, inf  ;;  %vm1552_vm5 = vcmp.eq.f32.partialorder %v16042_v5, 0.0  ;;  %v1553_v25 = vand.u32 2147483648, %v16042_v5  ;;  %vm1578_vm6 = vcmp.eq.f32.partialorder %v16046_v9, inf }
 0x252   :  { %v1565_v8 = vsel %vm1564_vm4, %v16045_v30, %v1563_v44  ;;  %vm1557_vm7 = vcmp.eq.f32.partialorder %v9619_v57, inf  ;;  %v1560_v29 = vand.u32 2147483648, %v9619_v57  ;;  %v1567_v24 = vand.u32 2147483648, %v16045_v30  ;;  %v16055_v44 = vld [vmem:[#allocation111_spill] sm:$0xff] }
 0x253   :  { %v1579_v59 = vsel %vm1578_vm6, %v16046_v9, %v1577_v6  ;;  %7761 = vrsqrt.f32 %v9632_v54  ;;  %v9675_v0 = vsel %vm1552_vm5, %v1553_v25, %v1551_v4  ;;  %vm1566_vm8 = vcmp.eq.f32.partialorder %v16045_v30, 0.0  ;;  %v16054_v30 = vld [vmem:[#allocation152_spill] sm:$0xff] }
 0x254   :  { %v1574_v2 = vand.u32 2147483648, %v9621_v38  ;;  %v1581_v14 = vand.u32 2147483648, %v16046_v9  ;;  %v9680_v33 = vsel %vm1566_vm8, %v1567_v24, %v1565_v8  ;;  %vm1571_vm9 = vcmp.eq.f32.partialorder %v9621_v38, inf }
 0x255   :  { %v7750_v46 = vpop.eup %7749  ;;  %vm1580_vm10 = vcmp.eq.f32.partialorder %v16046_v9, 0.0  ;;  %v1605_v22 = vmul.f32 %v16049_v16, %v16048_v49  ;;  %7763 = vrsqrt.f32 %v9634_v56  ;;  %vm1559_vm11 = vcmp.eq.f32.partialorder %v9619_v57, 0.0 }
 0x256   :  { %v9688_v3 = vsel %vm1580_vm10, %v1581_v14, %v1579_v59  ;;  %vm1585_vm12 = vcmp.eq.f32.partialorder %v9623_v34, inf  ;;  %v1588_v31 = vand.u32 2147483648, %v9623_v34  ;;  %v1619_v18 = vmul.f32 %v9589_v17, %v16050_v23 }
 0x257   :  { %v7752_v28 = vpop.eup %7751  ;;  %vm1592_vm13 = vcmp.eq.f32.partialorder %v16044_v19, inf  ;;  %v1595_v10 = vand.u32 2147483648, %v16044_v19  ;;  %v1602_v45 = vand.u32 2147483648, %v9626_v27  ;;  %v1633_v41 = vmul.f32 %v16052_v7, %v16051_v1 }
 0x258   :  { %7765 = vrsqrt.f32 %v16053_v13  ;;  %v1556_v62 = vmul.f32 %v7750_v46, %v9619_v57  ;;  %vm1573_vm14 = vcmp.eq.f32.partialorder %v9621_v38, 0.0  ;;  %vm1606_vm15 = vcmp.eq.f32.partialorder %v16048_v49, inf }
 0x259   :  { %vm1608_vm0 = vcmp.eq.f32.partialorder %v16048_v49, 0.0  ;;  %v1609_v17 = vand.u32 2147483648, %v16048_v49  ;;  %v7754_v47 = vpop.eup %7753  ;;  %vm1587_vm1 = vcmp.eq.f32.partialorder %v9623_v34, 0.0  ;;  %vm1599_vm3 = vcmp.eq.f32.partialorder %v9626_v27, inf }
 0x25a   :  { %v1607_v20 = vsel %vm1606_vm15, %v16048_v49, %v1605_v22  ;;  %v1616_v11 = vand.u32 2147483648, %v9629_v32  ;;  %vm1620_vm4 = vcmp.eq.f32.partialorder %v16050_v23, inf  ;;  %7767 = vrsqrt.f32 %v9639_v55  ;;  %v7756_v40 = vpop.eup %7755 }
 0x25b   :  { %v1570_v51 = vmul.f32 %v7752_v28, %v9621_v38  ;;  %vm1594_vm5 = vcmp.eq.f32.partialorder %v16044_v19, 0.0  ;;  %vm1613_vm6 = vcmp.eq.f32.partialorder %v9629_v32, inf  ;;  %v1621_v48 = vsel %vm1620_vm4, %v16050_v23, %v1619_v18  ;;  %v7758_v39 = vpop.eup %7757 }
 0x25c   :  { %vm1622_vm8 = vcmp.eq.f32.partialorder %v16050_v23, 0.0  ;;  %vm1634_vm10 = vcmp.eq.f32.partialorder %v16051_v1, inf  ;;  %v1584_v21 = vmul.f32 %v7754_v47, %v9623_v34  ;;  %v1623_v50 = vand.u32 2147483648, %v16050_v23 }
 0x25d   :  { %v1635_v43 = vsel %vm1634_vm10, %v16051_v1, %v1633_v41  ;;  %v1637_v5 = vand.u32 2147483648, %v16051_v1  ;;  %v1558_v42 = vsel %vm1557_vm7, %v9619_v57, %v1556_v62  ;;  %v1591_v12 = vmul.f32 %v7756_v40, %v16044_v19  ;;  %v7760_v36 = vpop.eup %7759 }
 0x25e   :  { %vm1601_vm15 = vcmp.eq.f32.partialorder %v9626_v27, 0.0  ;;  %v1661_v9 = vmul.f32 %v16055_v44, %v16054_v30  ;;  %7769 = vrsqrt.f32 %v9641_v52  ;;  %v9731_v6 = vsel %vm1608_vm0, %v1609_v17, %v1607_v20 }
 0x25f   :  { %vm1615_vm4 = vcmp.eq.f32.partialorder %v9629_v32, 0.0  ;;  %v9734_v4 = vsel %vm1622_vm8, %v1623_v50, %v1621_v48  ;;  %v1630_v25 = vand.u32 2147483648, %v9632_v54  ;;  %vm1636_vm7 = vcmp.eq.f32.partialorder %v16051_v1, 0.0  ;;  %v16056_v1 = vld [vmem:[#allocation162_spill] sm:$0xff] }
 0x260   :  { %v1572_v8 = vsel %vm1571_vm9, %v9621_v38, %v1570_v51  ;;  %v1598_v24 = vmul.f32 %v7758_v39, %v9626_v27  ;;  %vm1627_vm10 = vcmp.eq.f32.partialorder %v9632_v54, inf  ;;  %v9743_v59 = vsel %vm1636_vm7, %v1637_v5, %v1635_v43  ;;  %v7762_v22 = vpop.eup %7761 }
 0x261   :  { %v1644_v14 = vand.u32 2147483648, %v9634_v56  ;;  %v9750_v46 = vsel %vm1559_vm11, %v1560_v29, %v1558_v42  ;;  %v1586_v49 = vsel %vm1585_vm12, %v9623_v34, %v1584_v21  ;;  %v1612_v16 = vmul.f32 %v7760_v36, %v9629_v32 }
 0x262   :  { %vm1641_vm9 = vcmp.eq.f32.partialorder %v9634_v56, inf  ;;  %vm1662_vm0 = vcmp.eq.f32.partialorder %v16054_v30, inf  ;;  %v1593_v23 = vsel %vm1592_vm13, %v16044_v19, %v1591_v12  ;;  %vm1648_vm8 = vcmp.eq.f32.partialorder %v16053_v13, inf  ;;  %v7764_v41 = vpop.eup %7763  ;;  %v16057_v19 = vld [vmem:[#allocation143_spill] sm:$0xff] }
 0x263   :  { %v1651_v57 = vand.u32 2147483648, %v16053_v13  ;;  %v1663_v29 = vsel %vm1662_vm0, %v16054_v30, %v1661_v9  ;;  %7771 = vrsqrt.f32 %v9646_v60  ;;  %v9769_v18 = vsel %vm1573_vm14, %v1574_v2, %v1572_v8 }
 0x264   :  { %vm1629_vm11 = vcmp.eq.f32.partialorder %v9632_v54, 0.0  ;;  %vm1655_vm12 = vcmp.eq.f32.partialorder %v9639_v55, inf  ;;  %v1665_v28 = vand.u32 2147483648, %v16054_v30  ;;  %v1675_v7 = vmul.f32 %v9595_v58, %v16056_v1 }
 0x265   :  { %v9780_v62 = vsel %vm1587_vm1, %v1588_v31, %v1586_v49  ;;  %v1600_v38 = vsel %vm1599_vm3, %v9626_v27, %v1598_v24  ;;  %vm1643_vm13 = vcmp.eq.f32.partialorder %v9634_v56, 0.0  ;;  %v1658_v2 = vand.u32 2147483648, %v9639_v55  ;;  %v7766_v47 = vpop.eup %7765  ;;  %v16059_v27 = vld [vmem:[#allocation157_spill] sm:$0xff] }
 0x266   :  { %vm1664_vm14 = vcmp.eq.f32.partialorder %v16054_v30, 0.0  ;;  %v9792_v58 = vsel %vm1594_vm5, %v1595_v10, %v1593_v23  ;;  %v1614_v34 = vsel %vm1613_vm6, %v9629_v32, %v1612_v16  ;;  %v1626_v31 = vmul.f32 %v7762_v22, %v9632_v54  ;;  %v16058_v10 = vld [vmem:[#allocation155_spill] sm:$0xff]  ;;  %v16060_v16 = vld [vmem:[#allocation153_spill] sm:$0xff]  ;;  %v16061_v22 = vld [vmem:[#allocation120_spill] sm:$0xff] }
 0x267   :  { %vm1650_vm1 = vcmp.eq.f32.partialorder %v16053_v13, 0.0  ;;  %v9799_v17 = vsel %vm1664_vm14, %v1665_v28, %v1663_v29  ;;  %v1640_v20 = vmul.f32 %v7764_v41, %v9634_v56  ;;  %vm1657_vm3 = vcmp.eq.f32.partialorder %v9639_v55, 0.0  ;;  %v7768_v50 = vpop.eup %7767 }
 0x268   :  { %vm1669_vm7 = vcmp.eq.f32.partialorder %v9641_v52, inf  ;;  %vm1676_vm5 = vcmp.eq.f32.partialorder %v16056_v1, inf  ;;  %v1689_v40 = vmul.f32 %v16058_v10, %v16057_v19  ;;  %7773 = vrsqrt.f32 %v9648_v63 }
 0x269   :  { %v9812_v51 = vsel %vm1601_vm15, %v1602_v45, %v1600_v38  ;;  %v1647_v48 = vmul.f32 %v7766_v47, %v16053_v13  ;;  %v1672_v39 = vand.u32 2147483648, %v9641_v52  ;;  %v1677_v21 = vsel %vm1676_vm5, %v16056_v1, %v1675_v7  ;;  %v16062_v7 = vld [vmem:[#allocation163_spill] sm:$0xff] }
 0x26a   :  { %v9821_v43 = vsel %vm1615_vm4, %v1616_v11, %v1614_v34  ;;  %vm1678_vm6 = vcmp.eq.f32.partialorder %v16056_v1, 0.0  ;;  %v1679_v5 = vand.u32 2147483648, %v16056_v1  ;;  %7775 = vrsqrt.f32 %v16059_v27  ;;  %v16063_v34 = vld [vmem:[#allocation148_spill] sm:$0xff] }
 0x26b   :  { %v1628_v45 = vsel %vm1627_vm10, %v9632_v54, %v1626_v31  ;;  %v1654_v42 = vmul.f32 %v7768_v50, %v9639_v55  ;;  %vm1671_vm15 = vcmp.eq.f32.partialorder %v9641_v52, 0.0  ;;  %vm1683_vm0 = vcmp.eq.f32.partialorder %v9646_v60, inf  ;;  %v7770_v30 = vpop.eup %7769  ;;  %v16064_v31 = vld [vmem:[#allocation109_spill] sm:$0xff] }
 0x26c   :  { %vm1690_vm14 = vcmp.eq.f32.partialorder %v16057_v19, inf  ;;  %v1642_v32 = vsel %vm1641_vm9, %v9634_v56, %v1640_v20  ;;  %v9836_v11 = vsel %vm1678_vm6, %v1679_v5, %v1677_v21  ;;  %7777 = vrsqrt.f32 %v9650_v53 }
 0x26d   :  { %v1691_v12 = vsel %vm1690_vm14, %v16057_v19, %v1689_v40  ;;  %v1649_v44 = vsel %vm1648_vm8, %v16053_v13, %v1647_v48  ;;  %v1686_v9 = vand.u32 2147483648, %v9646_v60  ;;  %vm1692_vm4 = vcmp.eq.f32.partialorder %v16057_v19, 0.0 }
 0x26e   :  { %v1693_v36 = vand.u32 2147483648, %v16057_v19  ;;  %v9850_v8 = vsel %vm1629_vm11, %v1630_v25, %v1628_v45  ;;  %v1656_v24 = vsel %vm1655_vm12, %v9639_v55, %v1654_v42  ;;  %v1668_v49 = vmul.f32 %v7770_v30, %v9641_v52 }
 0x26f   :  { %vm1685_vm10 = vcmp.eq.f32.partialorder %v9646_v60, 0.0  ;;  %v1717_v23 = vmul.f32 %v16061_v22, %v16060_v16  ;;  %v9863_v29 = vsel %vm1643_vm13, %v1644_v14, %v1642_v32  ;;  %vm1697_vm9 = vcmp.eq.f32.partialorder %v9648_v63, inf }
 0x270   :  { %v9865_v54 = vsel %vm1692_vm4, %v1693_v36, %v1691_v12  ;;  %7779 = vrsqrt.f32 %v9654_v26  ;;  %v9871_v25 = vsel %vm1650_vm1, %v1651_v57, %v1649_v44  ;;  %vm1699_vm8 = vcmp.eq.f32.partialorder %v9648_v63, 0.0  ;;  %v7772_v14 = vpop.eup %7771  ;;  %v16065_v12 = vld [vmem:[#allocation158_spill] sm:$0xff] }
 0x271   :  { %v1700_v28 = vand.u32 2147483648, %v9648_v63  ;;  %v1707_v1 = vand.u32 2147483648, %v16059_v27  ;;  %v1731_v56 = vmul.f32 %v9601_v35, %v16062_v7  ;;  %v9880_v41 = vsel %vm1657_vm3, %v1658_v2, %v1656_v24 }
 0x272   :  { %v1670_v13 = vsel %vm1669_vm7, %v9641_v52, %v1668_v49  ;;  %vm1704_vm11 = vcmp.eq.f32.partialorder %v16059_v27, inf  ;;  %v1714_v57 = vand.u32 2147483648, %v9650_v53  ;;  %vm1718_vm12 = vcmp.eq.f32.partialorder %v16060_v16, inf }
 0x273   :  { %v1682_v38 = vmul.f32 %v7772_v14, %v9646_v60  ;;  %vm1706_vm13 = vcmp.eq.f32.partialorder %v16059_v27, 0.0  ;;  %v1719_v35 = vsel %vm1718_vm12, %v16060_v16, %v1717_v23  ;;  %vm1732_vm1 = vcmp.eq.f32.partialorder %v16062_v7, inf }
 0x274   :  { %7781 = vrsqrt.f32 %v9656_v15  ;;  %vm1711_vm3 = vcmp.eq.f32.partialorder %v9650_v53, inf  ;;  %vm1720_vm7 = vcmp.eq.f32.partialorder %v16060_v16, 0.0  ;;  %v1721_v55 = vand.u32 2147483648, %v16060_v16 }
 0x275   :  { %v1733_v2 = vsel %vm1732_vm1, %v16062_v7, %v1731_v56  ;;  %v1745_v47 = vmul.f32 %v16064_v31, %v16063_v34  ;;  %v9901_v20 = vsel %vm1671_vm15, %v1672_v39, %v1670_v13  ;;  %v1684_v19 = vsel %vm1683_vm0, %v9646_v60, %v1682_v38  ;;  %v7774_v48 = vpop.eup %7773 }
 0x276   :  { %vm1713_vm5 = vcmp.eq.f32.partialorder %v9650_v53, 0.0  ;;  %v1728_v10 = vand.u32 2147483648, %v9654_v26  ;;  %v1735_v40 = vand.u32 2147483648, %v16062_v7  ;;  %v9909_v21 = vsel %vm1720_vm7, %v1721_v55, %v1719_v35 }
 0x277   :  { %vm1734_vm6 = vcmp.eq.f32.partialorder %v16062_v7, 0.0  ;;  %vm1746_vm14 = vcmp.eq.f32.partialorder %v16063_v34, inf  ;;  %7783 = vrsqrt.f32 %v9660_v61  ;;  %v1696_v52 = vmul.f32 %v7774_v48, %v9648_v63  ;;  %v7776_v45 = vpop.eup %7775 }
 0x278   :  { %vm1725_vm15 = vcmp.eq.f32.partialorder %v9654_v26, inf  ;;  %v9916_v39 = vsel %vm1734_vm6, %v1735_v40, %v1733_v2  ;;  %v1742_v50 = vand.u32 2147483648, %v9656_v15  ;;  %v1747_v5 = vsel %vm1746_vm14, %v16063_v34, %v1745_v47 }
 0x279   :  { %v9922_v42 = vsel %vm1685_vm10, %v1686_v9, %v1684_v19  ;;  %vm1727_vm0 = vcmp.eq.f32.partialorder %v9654_v26, 0.0  ;;  %vm1748_vm4 = vcmp.eq.f32.partialorder %v16063_v34, 0.0  ;;  %v1749_v32 = vand.u32 2147483648, %v16063_v34  ;;  %v7778_v60 = vpop.eup %7777 }
 0x27a   :  { %7785 = vrsqrt.f32 %v16065_v12  ;;  %v1698_v30 = vsel %vm1697_vm9, %v9648_v63, %v1696_v52  ;;  %v1703_v44 = vmul.f32 %v7776_v45, %v16059_v27  ;;  %v1756_v36 = vand.u32 2147483648, %v9660_v61  ;;  %v16066_v63 = vld [vmem:[#allocation75_spill] sm:$0xff] }
 0x27b   :  { %7787 = vrsqrt.f32 %v9662_v37  ;;  %v9936_v9 = vsel %vm1699_vm8, %v1700_v28, %v1698_v30  ;;  %vm1739_vm10 = vcmp.eq.f32.partialorder %v9656_v15, inf  ;;  %v9939_v24 = vsel %vm1748_vm4, %v1749_v32, %v1747_v5  ;;  %v16067_v28 = vld [vmem:[#allocation98_spill] sm:$0xff] }
 0x27c   :  { %v1763_v49 = vand.u32 2147483648, %v16065_v12  ;;  %v1770_v16 = vand.u32 2147483648, %v9662_v37  ;;  %v1705_v22 = vsel %vm1704_vm11, %v16059_v27, %v1703_v44  ;;  %v1710_v23 = vmul.f32 %v7778_v60, %v9650_v53 }
 0x27d   :  { %vm1741_vm9 = vcmp.eq.f32.partialorder %v9656_v15, 0.0  ;;  %vm1772_vm12 = vcmask 125952   ;;  %v9950_v7 = vmul.f32 %v16067_v28, %v16066_v63  ;;  %v9954_v56 = vsel %vm1706_vm13, %v1707_v1, %v1705_v22  ;;  %v7780_v35 = vpop.eup %7779 }
 0x27e   :  { %v1833_v14 = vsel %vm1772_vm12, %v9675_v0, -inf  ;;  %v1834_v13 = vsel %vm1772_vm12, %v9750_v46, -inf  ;;  %v1836_v38 = vsel %vm1772_vm12, %v9680_v33, -inf  ;;  %v1712_v55 = vsel %vm1711_vm3, %v9650_v53, %v1710_v23 }
 0x27f   :  { %vm1753_vm8 = vcmp.eq.f32.partialorder %v9660_v61, inf  ;;  %v1835_v2 = vmax.f32 %v1833_v14, %v1834_v13  ;;  %v1838_v27 = vsel %vm1772_vm12, %v9769_v18, -inf  ;;  %v1840_v1 = vsel %vm1772_vm12, %v9688_v3, -inf }
 0x280   :  { %v9972_v34 = vsel %vm1713_vm5, %v1714_v57, %v1712_v55  ;;  %v1724_v31 = vmul.f32 %v7780_v35, %v9654_v26  ;;  %vm1755_vm11 = vcmp.eq.f32.partialorder %v9660_v61, 0.0  ;;  %v1842_v47 = vsel %vm1772_vm12, %v9780_v62, -inf }
 0x281   :  { %v1844_v19 = vsel %vm1772_vm12, %v9792_v58, -inf  ;;  %vm1760_vm13 = vcmp.eq.f32.partialorder %v16065_v12, inf  ;;  %v1837_v40 = vmax.f32 %v1835_v2, %v1836_v38  ;;  %v1846_v48 = vsel %vm1772_vm12, %v9812_v51, -inf  ;;  %v7782_v52 = vpop.eup %7781 }
 0x282   :  { %v1848_v53 = vsel %vm1772_vm12, %v9731_v6, -inf  ;;  %v1849_v57 = vsel %vm1772_vm12, %v9821_v43, -inf  ;;  %v1726_v5 = vsel %vm1725_vm15, %v9654_v26, %v1724_v31  ;;  %vm1762_vm1 = vcmp.eq.f32.partialorder %v16065_v12, 0.0 }
 0x283   :  { %vm1767_vm3 = vcmp.eq.f32.partialorder %v9662_v37, inf  ;;  %v1850_v45 = vmax.f32 %v1848_v53, %v1849_v57  ;;  %v1851_v32 = vsel %vm1772_vm12, %v9734_v4, -inf  ;;  %v1853_v30 = vsel %vm1772_vm12, %v9850_v8, -inf }
 0x284   :  { %v9998_v44 = vsel %vm1727_vm0, %v1728_v10, %v1726_v5  ;;  %v1738_v60 = vmul.f32 %v7782_v52, %v9656_v15  ;;  %vm1769_vm7 = vcmp.eq.f32.partialorder %v9662_v37, 0.0  ;;  %v1839_v22 = vmax.f32 %v1837_v40, %v1838_v27  ;;  %v7784_v10 = vpop.eup %7783 }
 0x285   :  { %v1855_v23 = vsel %vm1772_vm12, %v9743_v59, -inf  ;;  %v1852_v14 = vmax.f32 %v1850_v45, %v1851_v32  ;;  %v1857_v13 = vsel %vm1772_vm12, %v9863_v29, -inf  ;;  %v1859_v38 = vsel %vm1772_vm12, %v9871_v25, -inf }
 0x286   :  { %v1861_v26 = vsel %vm1772_vm12, %v9880_v41, -inf  ;;  %v1740_v35 = vsel %vm1739_vm10, %v9656_v15, %v1738_v60  ;;  %v1841_v55 = vmax.f32 %v1839_v22, %v1840_v1  ;;  %v1863_v2 = vsel %vm1772_vm12, %v9799_v17, -inf }
 0x287   :  { %v1864_v27 = vsel %vm1772_vm12, %v9901_v20, -inf  ;;  %v10021_v31 = vsel %vm1741_vm9, %v1742_v50, %v1740_v35  ;;  %v1752_v40 = vmul.f32 %v7784_v10, %v9660_v61  ;;  %v1854_v53 = vmax.f32 %v1852_v14, %v1853_v30  ;;  %v7786_v52 = vpop.eup %7785 }
 0x288   :  { %v1865_v57 = vmax.f32 %v1863_v2, %v1864_v27  ;;  %v1843_v5 = vmax.f32 %v1841_v55, %v1842_v47  ;;  %v1866_v1 = vsel %vm1772_vm12, %v9836_v11, -inf  ;;  %v1868_v45 = vsel %vm1772_vm12, %v9922_v42, -inf  ;;  %v7788_v60 = vpop.eup %7787 }
 0x289   :  { %v1870_v32 = vsel %vm1772_vm12, %v9865_v54, -inf  ;;  %v1754_v15 = vsel %vm1753_vm8, %v9660_v61, %v1752_v40  ;;  %v1759_v50 = vmul.f32 %v7786_v52, %v16065_v12  ;;  %v1856_v30 = vmax.f32 %v1854_v53, %v1855_v23 }
 0x28a   :  { %v1867_v22 = vmax.f32 %v1865_v57, %v1866_v1  ;;  %v10038_v47 = vsel %vm1755_vm11, %v1756_v36, %v1754_v15  ;;  %v1766_v14 = vmul.f32 %v7788_v60, %v9662_v37  ;;  %v1845_v10 = vmax.f32 %v1843_v5, %v1844_v19 }
 0x28b   :  { %v1872_v35 = vsel %vm1772_vm12, %v9936_v9, -inf  ;;  %v1761_v55 = vsel %vm1760_vm13, %v16065_v12, %v1759_v50  ;;  %v1858_v2 = vmax.f32 %v1856_v30, %v1857_v13  ;;  %v1874_v23 = vsel %vm1772_vm12, %v9954_v56, -inf }
 0x28c   :  { %v1869_v27 = vmax.f32 %v1867_v22, %v1868_v45  ;;  %v10052_v61 = vsel %vm1762_vm1, %v1763_v49, %v1761_v55  ;;  %v1768_v36 = vsel %vm1767_vm3, %v9662_v37, %v1766_v14  ;;  %v1847_v19 = vmax.f32 %v1845_v10, %v1846_v48 }
 0x28d   :  { %v1876_v40 = vsel %vm1772_vm12, %v9972_v34, -inf  ;;  %v10063_v13 = vsel %vm1769_vm7, %v1770_v16, %v1768_v36  ;;  %v1860_v53 = vmax.f32 %v1858_v2, %v1859_v38  ;;  %v1878_v12 = vsel %vm1772_vm12, %v9909_v21, -inf }
 0x28e   :  { %v1871_v57 = vmax.f32 %v1869_v27, %v1870_v32  ;;  %v1879_v49 = vsel %vm1772_vm12, %v9998_v44, -inf  ;;  %v1881_v48 = vsel %vm1772_vm12, %v9916_v39, -inf  ;;  %v1883_v52 = vsel %vm1772_vm12, %v10021_v31, -inf }
 0x28f   :  { %v1885_v5 = vsel %vm1772_vm12, %v9939_v24, -inf  ;;  %v10075_v37 = vmax.f32 %v1860_v53, %v1861_v26  ;;  %v1880_v38 = vmax.f32 %v1878_v12, %v1879_v49  ;;  %v1887_v1 = vsel %vm1772_vm12, %v10038_v47, -inf }
 0x290   :  { %v1873_v16 = vmax.f32 %v1871_v57, %v1872_v35  ;;  %v1889_v45 = vsel %vm1772_vm12, %v10052_v61, -inf  ;;  %v1891_v32 = vsel %vm1772_vm12, %v10063_v13, -inf  ;;  %v1925_v60 = vsub.f32 %v9675_v0, %v1847_v19 }
 0x291   :  { %v1926_v15 = vsub.f32 %v9750_v46, %v1847_v19  ;;  %v1882_v30 = vmax.f32 %v1880_v38, %v1881_v48  ;;  %v1927_v26 = vsub.f32 %v9680_v33, %v1847_v19  ;;  %v1928_v22 = vsub.f32 %v9769_v18, %v1847_v19 }
 0x292   :  { %v1875_v50 = vmax.f32 %v1873_v16, %v1874_v23  ;;  %v1929_v14 = vsub.f32 %v9688_v3, %v1847_v19  ;;  %v1930_v10 = vsub.f32 %v9780_v62, %v1847_v19  ;;  %v1931_v35 = vsub.f32 %v9792_v58, %v1847_v19 }
 0x293   :  { %v1932_v55 = vsub.f32 %v9812_v51, %v1847_v19  ;;  %v1884_v27 = vmax.f32 %v1882_v30, %v1883_v52  ;;  %v1933_v0 = vsub.f32 %v9731_v6, %v10075_v37  ;;  %v1934_v46 = vsub.f32 %v9821_v43, %v10075_v37 }
 0x294   :  { %v1877_v2 = vmax.f32 %v1875_v50, %v1876_v40  ;;  %v1935_v33 = vsub.f32 %v9734_v4, %v10075_v37  ;;  %v1936_v3 = vsub.f32 %v9850_v8, %v10075_v37  ;;  %v1937_v18 = vsub.f32 %v9743_v59, %v10075_v37 }
 0x295   :  { %v1938_v62 = vsub.f32 %v9863_v29, %v10075_v37  ;;  %v1886_v58 = vmax.f32 %v1884_v27, %v1885_v5  ;;  %v1939_v51 = vsub.f32 %v9871_v25, %v10075_v37  ;;  %v1940_v6 = vsub.f32 %v9880_v41, %v10075_v37 }
 0x296   :  { %v1941_v43 = vsub.f32 %v9799_v17, %v1877_v2  ;;  %v1942_v4 = vsub.f32 %v9901_v20, %v1877_v2  ;;  %v1943_v23 = vsub.f32 %v9836_v11, %v1877_v2  ;;  %v1944_v8 = vsub.f32 %v9922_v42, %v1877_v2  ;;  %v16068_v17 = vld [vmem:[#allocation115_spill] sm:$0xff] }
 0x297   :  { %v1945_v59 = vsub.f32 %v9865_v54, %v1877_v2  ;;  %v1888_v36 = vmax.f32 %v1886_v58, %v1887_v1  ;;  %v1946_v29 = vsub.f32 %v9936_v9, %v1877_v2  ;;  %v1947_v19 = vsub.f32 %v9954_v56, %v1877_v2 }
 0x298   :  { %v1948_v25 = vsub.f32 %v9972_v34, %v1877_v2  ;;  %v2021_v40 = vmul.f32 1.442695, %v1925_v60  ;;  %v2023_v53 = vmul.f32 1.442695, %v1926_v15  ;;  %v2025_v41 = vmul.f32 1.442695, %v1927_v26 }
 0x299   :  { %v10117_v57 = vmul.f32 %v16068_v17, %v16066_v63  ;;  %v1890_v20 = vmax.f32 %v1888_v36, %v1889_v45  ;;  %v2027_v11 = vmul.f32 1.442695, %v1928_v22  ;;  %v2029_v12 = vmul.f32 1.442695, %v1929_v14 }
 0x29a   :  { %v2031_v42 = vmul.f32 1.442695, %v1930_v10  ;;  %7789 = vpow2.f32 %v2021_v40  ;;  %v2033_v54 = vmul.f32 1.442695, %v1931_v35  ;;  %v2035_v49 = vmul.f32 1.442695, %v1932_v55 }
 0x29b   :  { %v2037_v48 = vmul.f32 1.442695, %v1933_v0  ;;  %v1892_v9 = vmax.f32 %v1890_v20, %v1891_v32  ;;  %7791 = vpow2.f32 %v2023_v53  ;;  %v2039_v56 = vmul.f32 1.442695, %v1934_v46  ;;  %v16069_v46 = vld [vmem:[#allocation90_spill] sm:$0xff]  ;;  %v16077_v20 = vld [vmem:[#allocation165_spill] sm:$0xff] }
 0x29c   :  { %v2041_v52 = vmul.f32 1.442695, %v1935_v33  ;;  %7793 = vpow2.f32 %v2025_v41  ;;  %v2043_v34 = vmul.f32 1.442695, %v1936_v3  ;;  %v2045_v5 = vmul.f32 1.442695, %v1937_v18 }
 0x29d   :  { %v2047_v37 = vmul.f32 1.442695, %v1938_v62  ;;  %v1949_v16 = vsub.f32 %v9909_v21, %v1892_v9  ;;  %v1950_v38 = vsub.f32 %v9998_v44, %v1892_v9  ;;  %v1951_v1 = vsub.f32 %v9916_v39, %v1892_v9  ;;  %v16070_v3 = vld [vmem:[#allocation102_spill] sm:$0xff]  ;;  %v16071_v62 = vld [vmem:[#allocation77_spill] sm:$0xff] }
 0x29e   :  { %v1952_v45 = vsub.f32 %v10021_v31, %v1892_v9  ;;  %v1953_v60 = vsub.f32 %v9939_v24, %v1892_v9  ;;  %v1954_v15 = vsub.f32 %v10038_v47, %v1892_v9  ;;  %v1955_v32 = vsub.f32 %v10052_v61, %v1892_v9 }
 0x29f   :  { %v1956_v50 = vsub.f32 %v10063_v13, %v1892_v9  ;;  %7795 = vpow2.f32 %v2027_v11  ;;  %v2049_v30 = vmul.f32 1.442695, %v1939_v51  ;;  %v2051_v26 = vmul.f32 1.442695, %v1940_v6 }
 0x2a0   :  { %v2053_v22 = vmul.f32 1.442695, %v1941_v43  ;;  %7797 = vpow2.f32 %v2029_v12  ;;  %v2055_v21 = vmul.f32 1.442695, %v1942_v4  ;;  %v2057_v14 = vmul.f32 1.442695, %v1943_v23 }
 0x2a1   :  { %v10127_v44 = vmul.f32 1.442695, %v1944_v8  ;;  %7799 = vpow2.f32 %v2031_v42  ;;  %v10129_v39 = vmul.f32 1.442695, %v1945_v59  ;;  %v10131_v31 = vmul.f32 1.442695, %v1946_v29 }
 0x2a2   :  { %v10133_v24 = vmul.f32 1.442695, %v1947_v19  ;;  %7801 = vpow2.f32 %v2033_v54  ;;  %v10135_v47 = vmul.f32 1.442695, %v1948_v25  ;;  %v10137_v61 = vmul.f32 1.442695, %v1949_v16 }
 0x2a3   :  { %v10139_v13 = vmul.f32 1.442695, %v1950_v38  ;;  %7803 = vpow2.f32 %v2035_v49  ;;  %v10141_v10 = vmul.f32 1.442695, %v1951_v1  ;;  %v10143_v35 = vmul.f32 1.442695, %v1952_v45 }
 0x2a4   :  { %v10145_v55 = vmul.f32 1.442695, %v1953_v60  ;;  %7805 = vpow2.f32 %v2037_v48  ;;  %v10147_v2 = vmul.f32 1.442695, %v1954_v15  ;;  %v10149_v27 = vmul.f32 1.442695, %v1955_v32 }
 0x2a5   :  { %v10151_v0 = vmul.f32 1.442695, %v1956_v50  ;;  %7807 = vpow2.f32 %v2039_v56  ;;  %v10155_v33 = vmul.f32 %v16069_v46, %v16066_v63  ;;  %v10159_v18 = vmul.f32 %v16070_v3, %v16066_v63  ;;  %v16073_v63 = vld [vmem:[#allocation76_spill] sm:$0xff]  ;;  %v16078_v12 = vld [vmem:[#allocation78_spill] sm:$0xff]  ;;  %v16079_v48 = vld [vmem:[#allocation3_spill] sm:$0xff] }
 0x2a6   :  { %v10163_v58 = vmul.f32 %v16067_v28, %v16071_v62  ;;  %7809 = vpow2.f32 %v2041_v52  ;;  %v10167_v51 = vmul.f32 %v16068_v17, %v16071_v62  ;;  %v10171_v6 = vmul.f32 %v16069_v46, %v16071_v62  ;;  %v16075_v19 = vld [vmem:[#allocation104_spill] sm:$0xff]  ;;  %v16082_v45 = vld [vmem:[#allocation167_spill] sm:$0xff] }
 0x2a7   :  { %v10175_v43 = vmul.f32 %v16070_v3, %v16071_v62  ;;  %v10177_v4 = vpop.eup %7789  ;;  %7811 = vpow2.f32 %v2043_v34  ;;  %v10181_v23 = vmul.f32 %v16067_v28, %v16073_v63  ;;  %v10185_v8 = vmul.f32 %v16068_v17, %v16073_v63  ;;  %v16086_v62 = vld [vmem:[#allocation164_spill] sm:$0xff] }
 0x2a8   :  { %16072 = vst [vmem:[#allocation129_spill] sm:$0xff] %v10177_v4  ;;  %v10189_v59 = vmul.f32 %v16069_v46, %v16073_v63  ;;  %v10191_v36 = vpop.eup %7791  ;;  %7813 = vpow2.f32 %v2045_v5  ;;  %v2145_v29 = vsel %vm1772_vm12, %v10177_v4, 0.0  ;;  %v2445_v25 = vmul.f32 %v10177_v4, %v16075_v19 }
 0x2a9   :  { %16074 = vst [vmem:[#allocation95_spill] sm:$0xff] %v10191_v36  ;;  %v10199_v40 = vmul.f32 %v16070_v3, %v16073_v63  ;;  %v10201_v53 = vpop.eup %7793  ;;  %7815 = vpow2.f32 %v2047_v37  ;;  %v2146_v41 = vsel %vm1772_vm12, %v10191_v36, 0.0  ;;  %v2446_v11 = vmul.f32 %v10191_v36, %v16077_v20 }
 0x2aa   :  { %16076 = vst [vmem:[#allocation113_spill] sm:$0xff] %v10201_v53  ;;  %v10209_v42 = vmul.f32 %v16067_v28, %v16078_v12  ;;  %7817 = vpow2.f32 %v2049_v30  ;;  %v2147_v54 = vadd.f32 %v2146_v41, %v2145_v29  ;;  %v2148_v49 = vsel %vm1772_vm12, %v10201_v53, 0.0  ;;  %v16084_v30 = vld [vmem:[#allocation99_spill] sm:$0xff]  ;;  %v16088_v41 = vld [vmem:[#allocation105_spill] sm:$0xff] }
 0x2ab   :  { %v2447_v9 = vmul.f32 %v10201_v53, %v16079_v48  ;;  %7819 = vpow2.f32 %v2051_v26  ;;  %v2537_v56 = vsel %vm1772_vm12, %v2445_v25, 0.0  ;;  %v2538_v52 = vsel %vm1772_vm12, %v2446_v11, 0.0 }
 0x2ac   :  { %v10219_v34 = vmul.f32 %v16068_v17, %v16078_v12  ;;  %v10221_v5 = vpop.eup %7795  ;;  %7821 = vpow2.f32 %v2053_v22  ;;  %v2149_v28 = vadd.f32 %v2148_v49, %v2147_v54  ;;  %v2539_v37 = vadd.f32 %v2538_v52, %v2537_v56  ;;  %v16090_v49 = vld [vmem:[#allocation166_spill] sm:$0xff] }
 0x2ad   :  { %16080 = vst [vmem:[#allocation114_spill] sm:$0xff] %v10221_v5  ;;  %v2540_v16 = vsel %vm1772_vm12, %v2447_v9, 0.0  ;;  %v10224_v38 = vpop.eup %7797  ;;  %7823 = vpow2.f32 %v2055_v21  ;;  %v2150_v1 = vsel %vm1772_vm12, %v10221_v5, 0.0  ;;  %v2448_v60 = vmul.f32 %v10221_v5, %v16082_v45 }
 0x2ae   :  { %16081 = vst [vmem:[#allocation131_spill] sm:$0xff] %v10224_v38  ;;  %v10232_v17 = vmul.f32 %v16069_v46, %v16078_v12  ;;  %v10234_v15 = vpop.eup %7799  ;;  %7825 = vpow2.f32 %v2057_v14  ;;  %v2151_v32 = vadd.f32 %v2150_v1, %v2149_v28  ;;  %v2152_v50 = vsel %vm1772_vm12, %v10224_v38, 0.0 }
 0x2af   :  { %16083 = vst [vmem:[#allocation96_spill] sm:$0xff] %v10234_v15  ;;  %v2449_v26 = vmul.f32 %v10224_v38, %v16084_v30  ;;  %v10240_v22 = vpop.eup %7801  ;;  %7827 = vpow2.f32 %v10127_v44  ;;  %v2154_v21 = vsel %vm1772_vm12, %v10234_v15, 0.0  ;;  %v10247_v46 = vmul.f32 %v10234_v15, %v16086_v62 }
 0x2b0   :  { %16085 = vst [vmem:[#allocation132_spill] sm:$0xff] %v10240_v22  ;;  %v2541_v63 = vadd.f32 %v2540_v16, %v2539_v37  ;;  %v10249_v14 = vpop.eup %7803  ;;  %7829 = vpow2.f32 %v10129_v39  ;;  %v2153_v29 = vadd.f32 %v2152_v50, %v2151_v32  ;;  %v2156_v25 = vsel %vm1772_vm12, %v10240_v22, 0.0 }
 0x2b1   :  { %16087 = vst [vmem:[#allocation133_spill] sm:$0xff] %v10249_v14  ;;  %v10256_v11 = vmul.f32 %v10240_v22, %v16088_v41  ;;  %v10258_v44 = vpop.eup %7805  ;;  %7831 = vpow2.f32 %v10131_v31  ;;  %v2158_v54 = vsel %vm1772_vm12, %v10249_v14, 0.0  ;;  %v10265_v9 = vmul.f32 %v10249_v14, %v16090_v49 }
 0x2b2   :  { %16089 = vst [vmem:[#allocation134_spill] sm:$0xff] %v10258_v44  ;;  %v2542_v39 = vsel %vm1772_vm12, %v2448_v60, 0.0  ;;  %v10268_v56 = vpop.eup %7807  ;;  %7833 = vpow2.f32 %v10133_v24  ;;  %v2155_v52 = vadd.f32 %v2154_v21, %v2153_v29  ;;  %v2160_v28 = vsel %vm1772_vm12, %v10258_v44, 0.0 }
 0x2b3   :  { %16091 = vst [vmem:[#allocation97_spill] sm:$0xff] %v10268_v56  ;;  %v10275_v31 = vmul.f32 %v10258_v44, %v16075_v19  ;;  %v10277_v37 = vpop.eup %7809  ;;  %7835 = vpow2.f32 %v10135_v47  ;;  %v2161_v16 = vsel %vm1772_vm12, %v10268_v56, 0.0  ;;  %v10284_v1 = vmul.f32 %v10268_v56, %v16077_v20 }
 0x2b4   :  { %16092 = vst [vmem:[#allocation135_spill] sm:$0xff] %v10277_v37  ;;  %v2543_v24 = vadd.f32 %v2542_v39, %v2541_v63  ;;  %v10286_v60 = vpop.eup %7811  ;;  %7837 = vpow2.f32 %v10137_v61  ;;  %v2157_v32 = vadd.f32 %v2156_v25, %v2155_v52  ;;  %v2162_v50 = vadd.f32 %v2161_v16, %v2160_v28 }
 0x2b5   :  { %16093 = vst [vmem:[#allocation136_spill] sm:$0xff] %v10286_v60  ;;  %v2163_v21 = vsel %vm1772_vm12, %v10277_v37, 0.0  ;;  %v10291_v29 = vpop.eup %7813  ;;  %7839 = vpow2.f32 %v10139_v13  ;;  %v2165_v47 = vsel %vm1772_vm12, %v10286_v60, 0.0  ;;  %v10298_v56 = vmul.f32 %v10277_v37, %v16079_v48 }
 0x2b6   :  { %16094 = vst [vmem:[#allocation138_spill] sm:$0xff] %v10291_v29  ;;  %v10302_v63 = vmul.f32 %v10286_v60, %v16082_v45  ;;  %v10304_v61 = vpop.eup %7815  ;;  %7841 = vpow2.f32 %v10141_v10  ;;  %v10307_v25 = vadd.f32 %v2158_v54, %v2157_v32  ;;  %v2164_v39 = vadd.f32 %v2163_v21, %v2162_v50 }
 0x2b7   :  { %16095 = vst [vmem:[#allocation100_spill] sm:$0xff] %v10304_v61  ;;  %v2167_v13 = vsel %vm1772_vm12, %v10291_v29, 0.0  ;;  %v10311_v52 = vpop.eup %7817  ;;  %7843 = vpow2.f32 %v10143_v35  ;;  %v2169_v28 = vsel %vm1772_vm12, %v10304_v61, 0.0  ;;  %v10318_v16 = vmul.f32 %v10291_v29, %v16084_v30 }
 0x2b8   :  { %16096 = vst [vmem:[#allocation139_spill] sm:$0xff] %v10311_v52  ;;  %v10322_v10 = vmul.f32 %v10304_v61, %v16086_v62  ;;  %v10324_v54 = vpop.eup %7819  ;;  %7845 = vpow2.f32 %v10145_v55  ;;  %v2166_v32 = vadd.f32 %v2165_v47, %v2164_v39  ;;  %v2171_v50 = vsel %vm1772_vm12, %v10311_v52, 0.0 }
 0x2b9   :  { %16097 = vst [vmem:[#allocation168_spill] sm:$0xff] %v10324_v54  ;;  %v10331_v35 = vmul.f32 %v10311_v52, %v16088_v41  ;;  %v10333_v21 = vpop.eup %7821  ;;  %7847 = vpow2.f32 %v10147_v2  ;;  %v2173_v61 = vsel %vm1772_vm12, %v10324_v54, 0.0  ;;  %v10340_v29 = vmul.f32 %v10324_v54, %v16090_v49 }
 0x2ba   :  { %16098 = vst [vmem:[#allocation169_spill] sm:$0xff] %v10333_v21  ;;  %v2544_v55 = vsel %vm1772_vm12, %v2449_v26, 0.0  ;;  %v10343_v47 = vpop.eup %7823  ;;  %7849 = vpow2.f32 %v10149_v27  ;;  %v2168_v39 = vadd.f32 %v2167_v13, %v2166_v32  ;;  %v2175_v52 = vsel %vm1772_vm12, %v10333_v21, 0.0 }
 0x2bb   :  { %16099 = vst [vmem:[#allocation170_spill] sm:$0xff] %v10343_v47  ;;  %v10350_v2 = vmul.f32 %v10333_v21, %v16075_v19  ;;  %v10352_v60 = vpop.eup %7825  ;;  %7851 = vpow2.f32 %v10151_v0  ;;  %v2176_v54 = vsel %vm1772_vm12, %v10343_v47, 0.0  ;;  %v10359_v26 = vmul.f32 %v10343_v47, %v16077_v20 }
 0x2bc   :  { %16100 = vst [vmem:[#allocation171_spill] sm:$0xff] %v10352_v60  ;;  %v2545_v27 = vadd.f32 %v2544_v55, %v2543_v24  ;;  %v10361_v13 = vpop.eup %7827  ;;  %v2170_v32 = vadd.f32 %v2169_v28, %v2168_v39  ;;  %v2177_v37 = vadd.f32 %v2176_v54, %v2175_v52  ;;  %v2178_v21 = vsel %vm1772_vm12, %v10352_v60, 0.0 }
 0x2bd   :  { %16101 = vst [vmem:[#allocation172_spill] sm:$0xff] %v10361_v13  ;;  %v10367_v44 = vmul.f32 %v10352_v60, %v16079_v48  ;;  %v10369_v0 = vpop.eup %7829  ;;  %v2180_v14 = vsel %vm1772_vm12, %v10361_v13, 0.0  ;;  %v10375_v47 = vmul.f32 %v10361_v13, %v16082_v45  ;;  %v2546_v24 = vsel %vm1772_vm12, %v10247_v46, 0.0 }
 0x2be   :  { %16102 = vst [vmem:[#allocation173_spill] sm:$0xff] %v10369_v0  ;;  %v2548_v52 = vsel %vm1772_vm12, %v10256_v11, 0.0  ;;  %v10381_v28 = vpop.eup %7831  ;;  %v2172_v54 = vadd.f32 %v2171_v50, %v2170_v32  ;;  %v2179_v55 = vadd.f32 %v2178_v21, %v2177_v37  ;;  %v2182_v39 = vsel %vm1772_vm12, %v10369_v0, 0.0 }
 0x2bf   :  { %16103 = vst [vmem:[#allocation174_spill] sm:$0xff] %v10381_v28  ;;  %v10387_v60 = vmul.f32 %v10369_v0, %v16084_v30  ;;  %v10389_v22 = vpop.eup %7833  ;;  %v2184_v13 = vsel %vm1772_vm12, %v10381_v28, 0.0  ;;  %v10395_v46 = vmul.f32 %v10381_v28, %v16086_v62  ;;  %v2547_v11 = vadd.f32 %v2546_v24, %v2545_v27 }
 0x2c0   :  { %16104 = vst [vmem:[#allocation175_spill] sm:$0xff] %v10389_v22  ;;  %v2550_v37 = vsel %vm1772_vm12, %v10265_v9, 0.0  ;;  %v10399_v50 = vpop.eup %7835  ;;  %v10401_v21 = vadd.f32 %v2173_v61, %v2172_v54  ;;  %v2181_v32 = vadd.f32 %v2180_v14, %v2179_v55  ;;  %v2186_v0 = vsel %vm1772_vm12, %v10389_v22, 0.0 }
 0x2c1   :  { %16105 = vst [vmem:[#allocation176_spill] sm:$0xff] %v10399_v50  ;;  %v2467_v15 = vmul.f32 %v10389_v22, %v16088_v41  ;;  %v10407_v38 = vpop.eup %7837  ;;  %v2188_v28 = vsel %vm1772_vm12, %v10399_v50, 0.0  ;;  %v2468_v27 = vmul.f32 %v10399_v50, %v16090_v49  ;;  %v2549_v9 = vadd.f32 %v2548_v52, %v2547_v11 }
 0x2c2   :  { %16106 = vst [vmem:[#allocation83_spill] sm:$0xff] %v10407_v38  ;;  %v2552_v61 = vsel %vm1772_vm12, %v10275_v31, 0.0  ;;  %v10415_v24 = vpop.eup %7839  ;;  %v2183_v14 = vadd.f32 %v2182_v39, %v2181_v32  ;;  %v2190_v54 = vsel %vm1772_vm12, %v10407_v38, 0.0  ;;  %v2469_v55 = vmul.f32 %v10407_v38, %v16075_v19 }
 0x2c3   :  { %16107 = vst [vmem:[#allocation119_spill] sm:$0xff] %v10415_v24  ;;  %v2553_v22 = vsel %vm1772_vm12, %v10284_v1, 0.0  ;;  %v10423_v5 = vpop.eup %7841  ;;  %v2191_v52 = vsel %vm1772_vm12, %v10415_v24, 0.0  ;;  %v2470_v31 = vmul.f32 %v10415_v24, %v16077_v20  ;;  %v10429_v11 = vadd.f32 %v2550_v37, %v2549_v9 }
 0x2c4   :  { %16108 = vst [vmem:[#allocation123_spill] sm:$0xff] %v10423_v5  ;;  %v2554_v39 = vadd.f32 %v2553_v22, %v2552_v61  ;;  %v10431_v32 = vpop.eup %7843  ;;  %v2185_v50 = vadd.f32 %v2184_v13, %v2183_v14  ;;  %v2192_v53 = vadd.f32 %v2191_v52, %v2190_v54  ;;  %v2193_v38 = vsel %vm1772_vm12, %v10423_v5, 0.0 }
 0x2c5   :  { %16109 = vst [vmem:[#allocation160_spill] sm:$0xff] %v10431_v32  ;;  %v2471_v1 = vmul.f32 %v10423_v5, %v16079_v48  ;;  %v10437_v19 = vpop.eup %7845  ;;  %v2195_v36 = vsel %vm1772_vm12, %v10431_v32, 0.0  ;;  %v2472_v37 = vmul.f32 %v10431_v32, %v16082_v45  ;;  %v2555_v22 = vsel %vm1772_vm12, %v10298_v56, 0.0 }
 0x2c6   :  { %16110 = vst [vmem:[#allocation141_spill] sm:$0xff] %v10437_v19  ;;  %v2557_v13 = vsel %vm1772_vm12, %v10302_v63, 0.0  ;;  %v10447_v9 = vpop.eup %7847  ;;  %v2187_v61 = vadd.f32 %v2186_v0, %v2185_v50  ;;  %v2194_v14 = vadd.f32 %v2193_v38, %v2192_v53  ;;  %v2197_v54 = vsel %vm1772_vm12, %v10437_v19, 0.0 }
 0x2c7   :  { %16111 = vst [vmem:[#allocation110_spill] sm:$0xff] %v10447_v9  ;;  %v2473_v52 = vmul.f32 %v10437_v19, %v16084_v30  ;;  %v10453_v5 = vpop.eup %7849  ;;  %v2199_v32 = vsel %vm1772_vm12, %v10447_v9, 0.0  ;;  %v2474_v56 = vmul.f32 %v10447_v9, %v16086_v62  ;;  %v2556_v24 = vadd.f32 %v2555_v22, %v2554_v39 }
 0x2c8   :  { %16112 = vst [vmem:[#allocation151_spill] sm:$0xff] %v10453_v5  ;;  %v2559_v63 = vsel %vm1772_vm12, %v10318_v16, 0.0  ;;  %v10461_v0 = vpop.eup %7851  ;;  %v2189_v53 = vadd.f32 %v2188_v28, %v2187_v61  ;;  %v2196_v38 = vadd.f32 %v2195_v36, %v2194_v14  ;;  %v2201_v50 = vsel %vm1772_vm12, %v10453_v5, 0.0 }
 0x2c9   :  { %16113 = vst [vmem:[#allocation108_spill] sm:$0xff] %v10461_v0  ;;  %v2475_v19 = vmul.f32 %v10453_v5, %v16088_v41  ;;  %v2203_v30 = vsel %vm1772_vm12, %v10461_v0, 0.0  ;;  %v2476_v9 = vmul.f32 %v10461_v0, %v16090_v49  ;;  %v2558_v39 = vadd.f32 %v2557_v13, %v2556_v24 }
 0x2ca   :  { %v2561_v16 = vsel %vm1772_vm12, %v10322_v10, 0.0  ;;  %v2198_v22 = vadd.f32 %v2197_v54, %v2196_v38  ;;  %v2563_v36 = vsel %vm1772_vm12, %v10331_v35, 0.0  ;;  %v2565_v28 = vsel %vm1772_vm12, %v10340_v29, 0.0 }
 0x2cb   :  { %v2567_v61 = vsel %vm1772_vm12, %v10350_v2, 0.0  ;;  %v2560_v14 = vadd.f32 %v2559_v63, %v2558_v39  ;;  %v2568_v5 = vsel %vm1772_vm12, %v10359_v26, 0.0  ;;  %v2570_v24 = vsel %vm1772_vm12, %v10367_v44, 0.0 }
 0x2cc   :  { %v2572_v10 = vsel %vm1772_vm12, %v10375_v47, 0.0  ;;  %v2200_v13 = vadd.f32 %v2199_v32, %v2198_v22  ;;  %v2569_v54 = vadd.f32 %v2568_v5, %v2567_v61  ;;  %v2574_v35 = vsel %vm1772_vm12, %v10387_v60, 0.0 }
 0x2cd   :  { %v2576_v29 = vsel %vm1772_vm12, %v10395_v46, 0.0  ;;  %v2562_v38 = vadd.f32 %v2561_v16, %v2560_v14  ;;  %v2578_v2 = vsel %vm1772_vm12, %v2467_v15, 0.0  ;;  %v2580_v63 = vsel %vm1772_vm12, %v2468_v27, 0.0 }
 0x2ce   :  { %v2582_v26 = vsel %vm1772_vm12, %v2469_v55, 0.0  ;;  %v2202_v39 = vadd.f32 %v2201_v50, %v2200_v13  ;;  %v2571_v44 = vadd.f32 %v2570_v24, %v2569_v54  ;;  %v2583_v0 = vsel %vm1772_vm12, %v2470_v31, 0.0  ;;  %v16128_v54 = vld [vmem:[#allocation91_spill] sm:$0xff] }
 0x2cf   :  { %v2585_v47 = vsel %vm1772_vm12, %v2471_v1, 0.0  ;;  %v2564_v5 = vadd.f32 %v2563_v36, %v2562_v38  ;;  %v2584_v32 = vadd.f32 %v2583_v0, %v2582_v26  ;;  %v2587_v60 = vsel %vm1772_vm12, %v2472_v37, 0.0  ;;  %v16115_v37 = vld [vmem:[#allocation149_spill] sm:$0xff] }
 0x2d0   :  { %v2589_v22 = vsel %vm1772_vm12, %v2473_v52, 0.0  ;;  %v2204_v46 = vadd.f32 %v2203_v30, %v2202_v39  ;;  %v2573_v16 = vadd.f32 %v2572_v10, %v2571_v44  ;;  %v2591_v15 = vsel %vm1772_vm12, %v2474_v56, 0.0  ;;  %v16114_v30 = vld [vmem:[#allocation87_spill] sm:$0xff]  ;;  %v16133_v44 = vld [vmem:[#allocation93_spill] sm:$0xff] }
 0x2d1   :  { %v2593_v27 = vsel %vm1772_vm12, %v2475_v19, 0.0  ;;  %v10498_v61 = vadd.f32 %v2565_v28, %v2564_v5  ;;  %v2586_v55 = vadd.f32 %v2585_v47, %v2584_v32  ;;  %v2595_v50 = vsel %vm1772_vm12, %v2476_v9, 0.0  ;;  %v16117_v19 = vld [vmem:[#allocation122_spill] sm:$0xff]  ;;  %v16119_v9 = vld [vmem:[#allocation137_spill] sm:$0xff] }
 0x2d2   :  { %7853 = vrcp.f32 %v10307_v25  ;;  %v2575_v31 = vadd.f32 %v2574_v35, %v2573_v16  ;;  %v10505_v1 = vmul.f32 %v16070_v3, %v16078_v12  ;;  %v10509_v52 = vmul.f32 %v16115_v37, %v16114_v30  ;;  %v16123_v12 = vld [vmem:[#allocation88_spill] sm:$0xff] }
 0x2d3   :  { %7855 = vrcp.f32 %v10401_v21  ;;  %v2588_v56 = vadd.f32 %v2587_v60, %v2586_v55  ;;  %v10513_v0 = vmul.f32 %v16117_v19, %v16114_v30  ;;  %v10517_v25 = vmul.f32 %v16119_v9, %v16114_v30  ;;  %v16121_v21 = vld [vmem:[#allocation156_spill] sm:$0xff]  ;;  %v16140_v55 = vld [vmem:[#allocation159_spill] sm:$0xff] }
 0x2d4   :  { %16116 = vst [vmem:[#allocation161_spill] sm:$0xff] %v10509_v52  ;;  %7857 = vrcp.f32 %v2189_v53  ;;  %v2577_v36 = vadd.f32 %v2576_v29, %v2575_v31  ;;  %v10521_v3 = vmul.f32 %v16121_v21, %v16114_v30  ;;  %v10525_v28 = vmul.f32 %v16115_v37, %v16123_v12  ;;  %v16141_v30 = vld [vmem:[#allocation140_spill] sm:$0xff] }
 0x2d5   :  { %16118 = vst [vmem:[#allocation142_spill] sm:$0xff] %v10513_v0  ;;  %16120 = vst [vmem:[#allocation154_spill] sm:$0xff] %v10517_v25  ;;  %7859 = vrcp.f32 %v2204_v46  ;;  %v2590_v14 = vadd.f32 %v2589_v22, %v2588_v56  ;;  %v10529_v53 = vmul.f32 %v16117_v19, %v16123_v12  ;;  %v10533_v24 = vmul.f32 %v16119_v9, %v16123_v12  ;;  %v16138_v22 = vld [vmem:[#allocation89_spill] sm:$0xff] }
 0x2d6   :  { %16122 = vst [vmem:[#allocation124_spill] sm:$0xff] %v10521_v3  ;;  %16124 = vst [vmem:[#allocation152_spill] sm:$0xff] %v10525_v28  ;;  %v10537_v10 = vmul.f32 %v16121_v21, %v16123_v12  ;;  %v2579_v13 = vadd.f32 %v2578_v2, %v2577_v36  ;;  %v10541_v35 = vmul.f32 %v16115_v37, %v16128_v54  ;;  %v16139_v46 = vld [vmem:[#allocation101_spill] sm:$0xff] }
 0x2d7   :  { %16125 = vst [vmem:[#allocation111_spill] sm:$0xff] %v10529_v53  ;;  %16126 = vst [vmem:[#allocation162_spill] sm:$0xff] %v10533_v24  ;;  %v10545_v29 = vmul.f32 %v16117_v19, %v16128_v54  ;;  %v10549_v38 = vmul.f32 %v16119_v9, %v16128_v54  ;;  %v2592_v26 = vadd.f32 %v2591_v15, %v2590_v14  ;;  %v16144_v14 = vld [vmem:[#allocation94_spill] sm:$0xff] }
 0x2d8   :  { %16127 = vst [vmem:[#allocation143_spill] sm:$0xff] %v10537_v10  ;;  %16129 = vst [vmem:[#allocation155_spill] sm:$0xff] %v10541_v35  ;;  %v10553_v39 = vmul.f32 %v16121_v21, %v16128_v54  ;;  %v10557_v2 = vmul.f32 %v16115_v37, %v16133_v44  ;;  %v10561_v47 = vmul.f32 %v16117_v19, %v16133_v44  ;;  %v16143_v19 = vld [vmem:[#allocation92_spill] sm:$0xff] }
 0x2d9   :  { %16130 = vst [vmem:[#allocation157_spill] sm:$0xff] %v10545_v29  ;;  %16131 = vst [vmem:[#allocation153_spill] sm:$0xff] %v10549_v38  ;;  %v2581_v5 = vadd.f32 %v2580_v63, %v2579_v13  ;;  %v10565_v32 = vmul.f32 %v16119_v9, %v16133_v44  ;;  %v10569_v60 = vmul.f32 %v16121_v21, %v16133_v44  ;;  %v16142_v63 = vld [vmem:[#allocation116_spill] sm:$0xff] }
 0x2da   :  { %16132 = vst [vmem:[#allocation120_spill] sm:$0xff] %v10553_v39  ;;  %16134 = vst [vmem:[#allocation163_spill] sm:$0xff] %v10557_v2  ;;  %v877_v16 = vmul.f32 %v16139_v46, %v16138_v22  ;;  %v2594_v15 = vadd.f32 %v2593_v27, %v2592_v26  ;;  %v879_v31 = vmul.f32 %v16140_v55, %v16138_v22 }
 0x2db   :  { %16135 = vst [vmem:[#allocation148_spill] sm:$0xff] %v10561_v47  ;;  %16136 = vst [vmem:[#allocation109_spill] sm:$0xff] %v10565_v32  ;;  %v881_v37 = vmul.f32 %v16141_v30, %v16138_v22  ;;  %v883_v56 = vmul.f32 %v16142_v63, %v16138_v22  ;;  %v885_v9 = vmul.f32 %v16139_v46, %v16143_v19  ;;  %v16145_v22 = vld [vmem:[#allocation103_spill] sm:$0xff] }
 0x2dc   :  { %16137 = vst [vmem:[#allocation158_spill] sm:$0xff] %v10569_v60  ;;  %v887_v36 = vmul.f32 %v16140_v55, %v16143_v19  ;;  %v889_v21 = vmul.f32 %v16141_v30, %v16143_v19  ;;  %v891_v27 = vmul.f32 %v16142_v63, %v16143_v19  ;;  %v2596_v12 = vadd.f32 %v2595_v50, %v2594_v15 }
 0x2dd   :  { %v893_v13 = vmul.f32 %v16139_v46, %v16144_v14  ;;  %v895_v54 = vmul.f32 %v16140_v55, %v16144_v14  ;;  %v897_v26 = vmul.f32 %v16141_v30, %v16144_v14  ;;  %v899_v44 = vmul.f32 %v16142_v63, %v16144_v14 }
 0x2de   :  { %v901_v49 = vmul.f32 %v16139_v46, %v16145_v22  ;;  %v903_v41 = vmul.f32 %v16140_v55, %v16145_v22  ;;  %v905_v50 = vmul.f32 %v16141_v30, %v16145_v22  ;;  %v907_v15 = vmul.f32 %v16142_v63, %v16145_v22 }
 0x2df   :  { %v941_v19 = vsub.f32 %v9950_v7, %v10509_v52  ;;  %v943_v62 = vsub.f32 %v10117_v57, %v10513_v0  ;;  %v945_v14 = vsub.f32 %v10155_v33, %v10517_v25  ;;  %v10609_v45 = vpop.eup %7853  ;;  %v947_v46 = vsub.f32 %v10159_v18, %v10521_v3 }
 0x2e0   :  { %16146 = vst [vmem:[#allocation75_spill] sm:$0xff] %v10609_v45  ;;  %v949_v55 = vsub.f32 %v10163_v58, %v10525_v28  ;;  %v951_v30 = vsub.f32 %v10167_v51, %v10529_v53  ;;  %v953_v63 = vsub.f32 %v10171_v6, %v10533_v24  ;;  %v10619_v22 = vpop.eup %7855  ;;  %v2617_v48 = vmul.f32 %v10609_v45, %v10429_v11 }
 0x2e1   :  { %16147 = vst [vmem:[#allocation98_spill] sm:$0xff] %v10619_v22  ;;  %v955_v20 = vsub.f32 %v10175_v43, %v10537_v10  ;;  %v957_v4 = vsub.f32 %v10181_v23, %v10541_v35  ;;  %v959_v28 = vsub.f32 %v10185_v8, %v10545_v29  ;;  %v10629_v3 = vpop.eup %7857  ;;  %v2618_v53 = vmul.f32 %v10619_v22, %v10498_v61 }
 0x2e2   :  { %16148 = vst [vmem:[#allocation115_spill] sm:$0xff] %v10629_v3  ;;  %v961_v24 = vsub.f32 %v10189_v59, %v10549_v38  ;;  %v963_v11 = vsub.f32 %v10199_v40, %v10553_v39  ;;  %v965_v45 = vsub.f32 %v10209_v42, %v10557_v2  ;;  %v10639_v10 = vpop.eup %7859  ;;  %v2619_v35 = vmul.f32 %v10629_v3, %v2581_v5 }
 0x2e3   :  { %16149 = vst [vmem:[#allocation90_spill] sm:$0xff] %v10639_v10  ;;  %v967_v29 = vsub.f32 %v10219_v34, %v10561_v47  ;;  %v969_v25 = vsub.f32 %v10232_v17, %v10565_v32  ;;  %v971_v61 = vsub.f32 %v10505_v1, %v10569_v60  ;;  %v2620_v22 = vmul.f32 %v10639_v10, %v2596_v12 }
 0x2e4   :  { %v2647_v38 = vcombine.low %v2617_v48, %v2618_v53  ;;  %v1005_v39 = vsub.f32 %v877_v16, %v9950_v7  ;;  %v1007_v2 = vsub.f32 %v879_v31, %v10117_v57  ;;  %v1009_v0 = vsub.f32 %v881_v37, %v10155_v33 }
 0x2e5   :  { %v1011_v5 = vsub.f32 %v883_v56, %v10159_v18  ;;  %v1013_v3 = vsub.f32 %v885_v9, %v10163_v58  ;;  %v1015_v47 = vsub.f32 %v887_v36, %v10167_v51  ;;  %v2648_v52 = vcombine.low %v2619_v35, %v2620_v22  ;;  %v16155_v56 = vld [vmem:[#allocation111_spill] sm:$0xff]  ;;  %v16160_v9 = vld [vmem:[#allocation153_spill] sm:$0xff]  ;;  %v16161_v36 = vld [vmem:[#allocation120_spill] sm:$0xff] }
 0x2e6   :  { %v1017_v32 = vsub.f32 %v889_v21, %v10171_v6  ;;  %v1019_v60 = vsub.f32 %v891_v27, %v10175_v43  ;;  %v1021_v12 = vsub.f32 %v893_v13, %v10181_v23  ;;  %v1023_v48 = vsub.f32 %v895_v54, %v10185_v8  ;;  %v16150_v6 = vld [vmem:[#allocation161_spill] sm:$0xff]  ;;  %v16151_v43 = vld [vmem:[#allocation142_spill] sm:$0xff]  ;;  %v16153_v8 = vld [vmem:[#allocation124_spill] sm:$0xff] }
 0x2e7   :  { %v1025_v7 = vsub.f32 %v897_v26, %v10189_v59  ;;  %v1027_v57 = vsub.f32 %v899_v44, %v10199_v40  ;;  %v1029_v33 = vsub.f32 %v901_v49, %v10209_v42  ;;  %v2664_v18 = vpack.c.bf16 %v2648_v52, %v2647_v38  ;;  %v16152_v23 = vld [vmem:[#allocation154_spill] sm:$0xff]  ;;  %v16154_v59 = vld [vmem:[#allocation152_spill] sm:$0xff]  ;;  %v16159_v38 = vld [vmem:[#allocation157_spill] sm:$0xff] }
 0x2e8   :  { %v1031_v58 = vsub.f32 %v903_v41, %v10219_v34  ;;  %v1033_v51 = vsub.f32 %v905_v50, %v10232_v17  ;;  %v1035_v53 = vsub.f32 %v907_v15, %v10505_v1  ;;  %v1069_v35 = vsub.f32 %v1005_v39, %v16150_v6  ;;  %v16156_v49 = vld [vmem:[#allocation162_spill] sm:$0xff]  ;;  %v16157_v34 = vld [vmem:[#allocation143_spill] sm:$0xff]  ;;  %v16163_v13 = vld [vmem:[#allocation148_spill] sm:$0xff] }
 0x2e9   :  { %v1071_v16 = vsub.f32 %v1007_v2, %v16151_v43  ;;  %v1073_v31 = vsub.f32 %v1009_v0, %v16152_v23  ;;  %v1075_v37 = vsub.f32 %v1011_v5, %v16153_v8  ;;  %7446 = vmatprep.subr.bf16.mxu0 %v2664_v18  ;;  %v1077_v40 = vsub.f32 %v1013_v3, %v16154_v59  ;;  %v16158_v17 = vld [vmem:[#allocation155_spill] sm:$0xff]  ;;  %v16164_v3 = vld [vmem:[#allocation109_spill] sm:$0xff] }
 0x2ea   :  { %v1079_v42 = vsub.f32 %v1015_v47, %v16155_v56  ;;  %v1081_v52 = vsub.f32 %v1017_v32, %v16156_v49  ;;  %v1083_v41 = vsub.f32 %v1019_v60, %v16157_v34  ;;  %7447 = vmatpush3.bf16.msra.mxu0 %v2664_v18  ;;  %v1085_v1 = vsub.f32 %v1021_v12, %v16158_v17  ;;  %v16162_v21 = vld [vmem:[#allocation163_spill] sm:$0xff]  ;;  %v16165_v47 = vld [vmem:[#allocation158_spill] sm:$0xff] }
 0x2eb   :  { %v1087_v39 = vsub.f32 %v1023_v48, %v16159_v38  ;;  %v1089_v2 = vsub.f32 %v1025_v7, %v16160_v9  ;;  %v1091_v0 = vsub.f32 %v1027_v57, %v16161_v36  ;;  %v1093_v27 = vsub.f32 %v1029_v33, %v16162_v21  ;;  %v16167_v38 = vld [vmem:[#allocation128_spill] sm:$0xff] }
 0x2ec   :  { %v1095_v54 = vsub.f32 %v1031_v58, %v16163_v13  ;;  %v1097_v26 = vsub.f32 %v1033_v51, %v16164_v3  ;;  %v1099_v44 = vsub.f32 %v1035_v53, %v16165_v47  ;;  %v1133_v32 = vmul.f32 %v941_v19, %v941_v19  ;;  %v16169_v9 = vld [vmem:[#allocation8_spill] sm:$0xff]  ;;  %v16175_v3 = vld [vmem:[#allocation85_spill] sm:$0xff]  ;;  %v16177_v47 = vld [vmem:[#allocation6_spill] sm:$0xff] }
 0x2ed   :  { %v1135_v50 = vmul.f32 %v943_v62, %v943_v62  ;;  %v1137_v60 = vmul.f32 %v945_v14, %v945_v14  ;;  %v1139_v15 = vmul.f32 %v947_v46, %v947_v46  ;;  %v1141_v22 = vmul.f32 %v949_v55, %v949_v55  ;;  %v16172_v21 = vld [vmem:[#allocation4_spill] sm:$0xff] }
 0x2ee   :  { %v1143_v5 = vmul.f32 %v951_v30, %v951_v30  ;;  %v1145_v12 = vmul.f32 %v953_v63, %v953_v63  ;;  %v1147_v48 = vmul.f32 %v955_v20, %v955_v20  ;;  %v1149_v18 = vmul.f32 %v957_v4, %v957_v4 }
 0x2ef   :  { %v1151_v7 = vmul.f32 %v959_v28, %v959_v28  ;;  %v1153_v6 = vmul.f32 %v961_v24, %v961_v24  ;;  %v1155_v57 = vmul.f32 %v963_v11, %v963_v11  ;;  %v1157_v43 = vmul.f32 %v965_v45, %v965_v45 }
 0x2f0   :  { %v1159_v33 = vmul.f32 %v967_v29, %v967_v29  ;;  %v1161_v23 = vmul.f32 %v969_v25, %v969_v25  ;;  %v1163_v58 = vmul.f32 %v971_v61, %v971_v61  ;;  %v1197_v8 = vmul.f32 %v1069_v35, %v1069_v35 }
 0x2f1   :  { %v1199_v51 = vmul.f32 %v1071_v16, %v1071_v16  ;;  %v1201_v59 = vmul.f32 %v1073_v31, %v1073_v31  ;;  %v1203_v53 = vmul.f32 %v1075_v37, %v1075_v37  ;;  %v1205_v19 = vmul.f32 %v1077_v40, %v1077_v40 }
 0x2f2   :  { %v1207_v62 = vmul.f32 %v1079_v42, %v1079_v42  ;;  %v1209_v14 = vmul.f32 %v1081_v52, %v1081_v52  ;;  %v1211_v46 = vmul.f32 %v1083_v41, %v1083_v41  ;;  %v1213_v55 = vmul.f32 %v1085_v1, %v1085_v1  ;;  %v16166_v1 = vld [vmem:[#allocation106_spill] sm:$0xff] }
 0x2f3   :  { %v1215_v30 = vmul.f32 %v1087_v39, %v1087_v39  ;;  %v1217_v63 = vmul.f32 %v1089_v2, %v1089_v2  ;;  %v1219_v20 = vmul.f32 %v1091_v0, %v1091_v0  ;;  %v1221_v4 = vmul.f32 %v1093_v27, %v1093_v27  ;;  %v16168_v39 = vld [vmem:[#allocation146_spill] sm:$0xff]  ;;  %v16170_v2 = vld [vmem:[#allocation79_spill] sm:$0xff]  ;;  %v16173_v27 = vld [vmem:[#allocation84_spill] sm:$0xff] }
 0x2f4   :  { %v1223_v28 = vmul.f32 %v1095_v54, %v1095_v54  ;;  %v1225_v24 = vmul.f32 %v1097_v26, %v1097_v26  ;;  %v1227_v11 = vmul.f32 %v1099_v44, %v1099_v44  ;;  %v10681_v45 = vadd.f32 %v1197_v8, %v1133_v32  ;;  %v16171_v0 = vld [vmem:[#allocation147_spill] sm:$0xff]  ;;  %v16174_v54 = vld [vmem:[#allocation9_spill] sm:$0xff]  ;;  %v16178_v44 = vld [vmem:[#allocation86_spill] sm:$0xff] }
 0x2f5   :  { %v10683_v25 = vadd.f32 %v1199_v51, %v1135_v50  ;;  %v10685_v29 = vadd.f32 %v1201_v59, %v1137_v60  ;;  %v10687_v61 = vadd.f32 %v1203_v53, %v1139_v15  ;;  %v10689_v35 = vadd.f32 %v1205_v19, %v1141_v22  ;;  %v16179_v50 = vld [vmem:[#allocation144_spill] sm:$0xff]  ;;  %v16180_v60 = vld [vmem:[#allocation117_spill] sm:$0xff] }
 0x2f6   :  { %v10691_v16 = vadd.f32 %v1207_v62, %v1143_v5  ;;  %v10693_v31 = vadd.f32 %v1209_v14, %v1145_v12  ;;  %v10695_v37 = vadd.f32 %v1211_v46, %v1147_v48  ;;  %v10697_v40 = vadd.f32 %v1213_v55, %v1149_v18  ;;  %v16181_v22 = vld [vmem:[#allocation5_spill] sm:$0xff]  ;;  %v16182_v5 = vld [vmem:[#allocation130_spill] sm:$0xff]  ;;  %v16183_v12 = vld [vmem:[#allocation112_spill] sm:$0xff] }
 0x2f7   :  { %v10699_v56 = vadd.f32 %v1215_v30, %v1151_v7  ;;  %v10701_v42 = vadd.f32 %v1217_v63, %v1153_v6  ;;  %v10703_v49 = vadd.f32 %v1219_v20, %v1155_v57  ;;  %v10705_v52 = vadd.f32 %v1221_v4, %v1157_v43  ;;  %v16185_v7 = vld [vmem:[#allocation107_spill] sm:$0xff]  ;;  %v16186_v6 = vld [vmem:[#allocation125_spill] sm:$0xff]  ;;  %v16187_v57 = vld [vmem:[#allocation80_spill] sm:$0xff] }
 0x2f8   :  { %v10707_v34 = vadd.f32 %v1223_v28, %v1159_v33  ;;  %v10709_v41 = vadd.f32 %v1225_v24, %v1161_v23  ;;  %v10711_v17 = vadd.f32 %v1227_v11, %v1163_v58  ;;  %7861 = vrsqrt.f32 %v16166_v1  ;;  %v16189_v8 = vld [vmem:[#allocation121_spill] sm:$0xff]  ;;  %v16191_v11 = vld [vmem:[#allocation118_spill] sm:$0xff] }
 0x2f9   :  { %7863 = vrsqrt.f32 %v16167_v38  ;;  %v10720_v36 = vadd.f32 %v16170_v2, %v16169_v9  ;;  %v10725_v13 = vadd.f32 %v16173_v27, %v16172_v21  ;;  %v10729_v26 = vadd.f32 %v16175_v3, %v16174_v54  ;;  %v16190_v24 = vld [vmem:[#allocation145_spill] sm:$0xff] }
 0x2fa   :  { %7865 = vrsqrt.f32 %v10681_v45  ;;  %v10734_v32 = vadd.f32 %v16178_v44, %v16177_v47  ;;  %v1325_v15 = vmul.f32 %v16180_v60, %v16179_v50  ;;  %v1339_v48 = vmul.f32 %v16183_v12, %v16182_v5  ;;  %v16193_v60 = vld [vmem:[#allocation81_spill] sm:$0xff] }
 0x2fb   :  { %7867 = vrsqrt.f32 %v16168_v39  ;;  %16176 = vst [vmem:[#allocation102_spill] sm:$0xff] %v10729_v26  ;;  %v10744_v18 = vcombine.high %v10720_v36, %v10720_v36  ;;  %v1353_v43 = vmul.f32 %v16187_v57, %v16186_v6  ;;  %v10751_v33 = vcombine.high %v10725_v13, %v10725_v13 }
 0x2fc   :  { %7869 = vrsqrt.f32 %v10683_v25  ;;  %v10755_v23 = vcombine.high %v10729_v26, %v10729_v26  ;;  %vm1326_vm5 = vcmp.eq.f32.partialorder %v16179_v50, inf  ;;  %v10761_v58 = vcombine.high %v10734_v32, %v10734_v32 }
 0x2fd   :  { %7871 = vrsqrt.f32 %v16171_v0  ;;  %16184 = vst [vmem:[#allocation77_spill] sm:$0xff] %v10744_v18  ;;  %v1327_v51 = vsel %vm1326_vm5, %v16179_v50, %v1325_v15  ;;  %vm1340_vm6 = vcmp.eq.f32.partialorder %v16182_v5, inf  ;;  %vm1328_vm14 = vcmp.eq.f32.partialorder %v16179_v50, 0.0 }
 0x2fe   :  { %7873 = vrsqrt.f32 %v10685_v29  ;;  %16188 = vst [vmem:[#allocation76_spill] sm:$0xff] %v10755_v23  ;;  %v1329_v59 = vand.u32 2147483648, %v16179_v50  ;;  %v1341_v53 = vsel %vm1340_vm6, %v16182_v5, %v1339_v48  ;;  %vm1354_vm15 = vcmp.eq.f32.partialorder %v16186_v6, inf  ;;  %v16192_v50 = vld [vmem:[#allocation126_spill] sm:$0xff] }
 0x2ff   :  { %7875 = vrsqrt.f32 %v16181_v22  ;;  %vm1333_vm0 = vcmp.eq.f32.partialorder %v10681_v45, inf  ;;  %v1336_v62 = vand.u32 2147483648, %v10681_v45  ;;  %v1343_v14 = vand.u32 2147483648, %v16182_v5 }
 0x300   :  { %7877 = vrsqrt.f32 %v10687_v61  ;;  %v1355_v46 = vsel %vm1354_vm15, %v16186_v6, %v1353_v43  ;;  %v10777_v30 = vsel %vm1328_vm14, %v1329_v59, %v1327_v51  ;;  %vm1342_vm4 = vcmp.eq.f32.partialorder %v16182_v5, 0.0  ;;  %v16194_v5 = vld [vmem:[#allocation2_spill] sm:$0xff] }
 0x301   :  { %7879 = vrsqrt.f32 %v16185_v7  ;;  %v1350_v63 = vand.u32 2147483648, %v10683_v25  ;;  %v1357_v20 = vand.u32 2147483648, %v16186_v6  ;;  %v10782_v28 = vsel %vm1342_vm4, %v1343_v14, %v1341_v53 }
 0x302   :  { %7881 = vrsqrt.f32 %v10689_v35  ;;  %vm1347_vm10 = vcmp.eq.f32.partialorder %v10683_v25, inf  ;;  %vm1356_vm9 = vcmp.eq.f32.partialorder %v16186_v6, 0.0  ;;  %v1381_v9 = vmul.f32 %v16191_v11, %v16190_v24 }
 0x303   :  { %7883 = vrsqrt.f32 %v16189_v8  ;;  %vm1335_vm8 = vcmp.eq.f32.partialorder %v10681_v45, 0.0  ;;  %v10790_v21 = vsel %vm1356_vm9, %v1357_v20, %v1355_v46  ;;  %vm1361_vm11 = vcmp.eq.f32.partialorder %v10685_v29, inf }
 0x304   :  { %7885 = vrsqrt.f32 %v10691_v16  ;;  %v1364_v27 = vand.u32 2147483648, %v10685_v29  ;;  %vm1368_vm13 = vcmp.eq.f32.partialorder %v16181_v22, inf  ;;  %v1371_v47 = vand.u32 2147483648, %v16181_v22 }
 0x305   :  { %v7862_v19 = vpop.eup %7861  ;;  %7887 = vrsqrt.f32 %v10693_v31  ;;  %v1378_v44 = vand.u32 2147483648, %v10687_v61  ;;  %v1409_v15 = vmul.f32 %v16193_v60, %v16192_v50  ;;  %vm1349_vm1 = vcmp.eq.f32.partialorder %v10683_v25, 0.0 }
 0x306   :  { %v10775_v55 = vpop.eup %7863  ;;  %v1395_v54 = vmul.f32 %v7862_v19, %v16166_v1  ;;  %7889 = vrsqrt.f32 %v16194_v5  ;;  %vm1382_vm3 = vcmp.eq.f32.partialorder %v16190_v24, inf  ;;  %vm1384_vm7 = vcmp.eq.f32.partialorder %v16190_v24, 0.0 }
 0x307   :  { %v7866_v4 = vpop.eup %7865  ;;  %v1385_v6 = vand.u32 2147483648, %v16190_v24  ;;  %vm1363_vm5 = vcmp.eq.f32.partialorder %v10685_v29, 0.0  ;;  %vm1375_vm6 = vcmp.eq.f32.partialorder %v10687_v61, inf  ;;  %v1383_v43 = vsel %vm1382_vm3, %v16190_v24, %v1381_v9 }
 0x308   :  { %v7868_v2 = vpop.eup %7867  ;;  %v1332_v48 = vmul.f32 %v7866_v4, %v10681_v45  ;;  %vm1396_vm14 = vcmp.eq.f32.partialorder %v16166_v1, inf  ;;  %7891 = vrsqrt.f32 %v10695_v37  ;;  %vm1370_vm15 = vcmp.eq.f32.partialorder %v16181_v22, 0.0 }
 0x309   :  { %v7870_v3 = vpop.eup %7869  ;;  %vm1389_vm4 = vcmp.eq.f32.partialorder %v10689_v35, inf  ;;  %v1397_v19 = vsel %vm1396_vm14, %v16166_v1, %v1395_v54  ;;  %vm1398_vm9 = vcmp.eq.f32.partialorder %v16166_v1, 0.0  ;;  %vm1410_vm2 = vcmp.eq.f32.partialorder %v16192_v50, inf }
 0x30a   :  { %v10801_v12 = vpop.eup %7871  ;;  %v1346_v53 = vmul.f32 %v7870_v3, %v10683_v25  ;;  %v1399_v20 = vand.u32 2147483648, %v16166_v1  ;;  %v1411_v4 = vsel %vm1410_vm2, %v16192_v50, %v1409_v15  ;;  %v1413_v11 = vand.u32 2147483648, %v16192_v50 }
 0x30b   :  { %v7874_v57 = vpop.eup %7873  ;;  %v1334_v3 = vsel %vm1333_vm0, %v10681_v45, %v1332_v48  ;;  %vm1377_vm3 = vcmp.eq.f32.partialorder %v10687_v61, 0.0  ;;  %v1437_v60 = vmul.f32 %v7868_v2, %v16168_v39  ;;  %7893 = vrsqrt.f32 %v10697_v40 }
 0x30c   :  { %v7876_v59 = vpop.eup %7875  ;;  %v1360_v46 = vmul.f32 %v7874_v57, %v10685_v29  ;;  %v10833_v51 = vsel %vm1384_vm7, %v1385_v6, %v1383_v43  ;;  %vm1391_vm2 = vcmp.eq.f32.partialorder %v10689_v35, 0.0  ;;  %v10838_v15 = vsel %vm1398_vm9, %v1399_v20, %v1397_v19 }
 0x30d   :  { %v7878_v14 = vpop.eup %7877  ;;  %v1367_v54 = vmul.f32 %v7876_v59, %v16181_v22  ;;  %v1406_v48 = vand.u32 2147483648, %v10691_v16  ;;  %vm1412_vm0 = vcmp.eq.f32.partialorder %v16192_v50, 0.0  ;;  %v1348_v2 = vsel %vm1347_vm10, %v10683_v25, %v1346_v53 }
 0x30e   :  { %v7880_v9 = vpop.eup %7879  ;;  %v1374_v24 = vmul.f32 %v7878_v14, %v10687_v61  ;;  %vm1403_vm7 = vcmp.eq.f32.partialorder %v10691_v16, inf  ;;  %v10849_v6 = vsel %vm1412_vm0, %v1413_v11, %v1411_v4  ;;  %v1420_v1 = vand.u32 2147483648, %v10693_v31 }
 0x30f   :  { %v7882_v57 = vpop.eup %7881  ;;  %v10856_v43 = vsel %vm1335_vm8, %v1336_v62, %v1334_v3  ;;  %v1362_v50 = vsel %vm1361_vm11, %v10685_v29, %v1360_v46  ;;  %vm1417_vm10 = vcmp.eq.f32.partialorder %v10693_v31, inf  ;;  %vm1438_vm14 = vcmp.eq.f32.partialorder %v16168_v39, inf }
 0x310   :  { %v10842_v59 = vpop.eup %7883  ;;  %v1388_v53 = vmul.f32 %v7882_v57, %v10689_v35  ;;  %v1369_v14 = vsel %vm1368_vm13, %v16181_v22, %v1367_v54  ;;  %vm1424_vm9 = vcmp.eq.f32.partialorder %v16194_v5, inf  ;;  %v1427_v45 = vand.u32 2147483648, %v16194_v5  ;;  %v16196_v22 = vld [vmem:[#allocation82_spill] sm:$0xff] }
 0x311   :  { %v7886_v19 = vpop.eup %7885  ;;  %v1439_v62 = vsel %vm1438_vm14, %v16168_v39, %v1437_v60  ;;  %7895 = vrsqrt.f32 %v10699_v56  ;;  %v10875_v46 = vsel %vm1349_vm1, %v1350_v63, %v1348_v2  ;;  %vm1405_vm8 = vcmp.eq.f32.partialorder %v10691_v16, 0.0 }
 0x312   :  { %vm1431_vm11 = vcmp.eq.f32.partialorder %v10695_v37, inf  ;;  %v1441_v20 = vand.u32 2147483648, %v16168_v39  ;;  %v1451_v4 = vmul.f32 %v7880_v9, %v16185_v7  ;;  %v7888_v11 = vpop.eup %7887  ;;  %v10885_v3 = vsel %vm1363_vm5, %v1364_v27, %v1362_v50 }
 0x313   :  { %v1376_v25 = vsel %vm1375_vm6, %v10687_v61, %v1374_v24  ;;  %vm1419_vm13 = vcmp.eq.f32.partialorder %v10693_v31, 0.0  ;;  %v1434_v63 = vand.u32 2147483648, %v10695_v37  ;;  %vm1440_vm1 = vcmp.eq.f32.partialorder %v16168_v39, 0.0  ;;  %v7890_v60 = vpop.eup %7889  ;;  %v16195_v39 = vld [vmem:[#allocation127_spill] sm:$0xff] }
 0x314   :  { %v10897_v9 = vsel %vm1370_vm15, %v1371_v47, %v1369_v14  ;;  %v1390_v29 = vsel %vm1389_vm4, %v10689_v35, %v1388_v53  ;;  %v1402_v27 = vmul.f32 %v7886_v19, %v10691_v16  ;;  %vm1426_vm5 = vcmp.eq.f32.partialorder %v16194_v5, 0.0  ;;  %v16198_v61 = vld [vmem:[#allocation7_spill] sm:$0xff] }
 0x315   :  { %v10904_v54 = vsel %vm1440_vm1, %v1441_v20, %v1439_v62  ;;  %v1416_v57 = vmul.f32 %v7888_v11, %v10693_v31  ;;  %vm1433_vm6 = vcmp.eq.f32.partialorder %v10695_v37, 0.0  ;;  %vm1445_vm0 = vcmp.eq.f32.partialorder %v10697_v40, inf  ;;  %v7892_v19 = vpop.eup %7891 }
 0x316   :  { %vm1452_vm15 = vcmp.eq.f32.partialorder %v16185_v7, inf  ;;  %v1465_v47 = vmul.f32 %v16196_v22, %v16195_v39  ;;  %7897 = vrsqrt.f32 %v10701_v42  ;;  %v10917_v2 = vsel %vm1377_vm3, %v1378_v44, %v1376_v25 }
 0x317   :  { %v1423_v24 = vmul.f32 %v7890_v60, %v16194_v5  ;;  %v1448_v50 = vand.u32 2147483648, %v10697_v40  ;;  %v1453_v53 = vsel %vm1452_vm15, %v16185_v7, %v1451_v4  ;;  %v16197_v14 = vand.u32 2147483648, %v10689_v35 }
 0x318   :  { %vm1454_vm4 = vcmp.eq.f32.partialorder %v16185_v7, 0.0  ;;  %v1455_v20 = vand.u32 2147483648, %v16185_v7  ;;  %7899 = vrsqrt.f32 %v16198_v61  ;;  %v1404_v44 = vsel %vm1403_vm7, %v10691_v16, %v1402_v27  ;;  %v7894_v25 = vpop.eup %7893 }
 0x319   :  { %v10926_v62 = vsel %vm1391_vm2, %v16197_v14, %v1390_v29  ;;  %v1430_v11 = vmul.f32 %v7892_v19, %v10695_v37  ;;  %vm1447_vm3 = vcmp.eq.f32.partialorder %v10697_v40, 0.0  ;;  %vm1459_vm14 = vcmp.eq.f32.partialorder %v10699_v56, inf }
 0x31a   :  { %vm1466_vm1 = vcmp.eq.f32.partialorder %v16195_v39, inf  ;;  %v1418_v35 = vsel %vm1417_vm10, %v10693_v31, %v1416_v57  ;;  %v10941_v4 = vsel %vm1454_vm4, %v1455_v20, %v1453_v53  ;;  %7901 = vrsqrt.f32 %v10703_v49 }
 0x31b   :  { %v1467_v7 = vsel %vm1466_vm1, %v16195_v39, %v1465_v47  ;;  %v1425_v29 = vsel %vm1424_vm9, %v16194_v5, %v1423_v24  ;;  %v1462_v27 = vand.u32 2147483648, %v10699_v56  ;;  %vm1468_vm2 = vcmp.eq.f32.partialorder %v16195_v39, 0.0 }
 0x31c   :  { %v1469_v60 = vand.u32 2147483648, %v16195_v39  ;;  %v10955_v57 = vsel %vm1405_vm8, %v1406_v48, %v1404_v44  ;;  %v1432_v22 = vsel %vm1431_vm11, %v10695_v37, %v1430_v11  ;;  %v1444_v47 = vmul.f32 %v7894_v25, %v10697_v40 }
 0x31d   :  { %vm1461_vm7 = vcmp.eq.f32.partialorder %v10699_v56, 0.0  ;;  %v1493_v24 = vmul.f32 %v10801_v12, %v16171_v0  ;;  %v10968_v39 = vsel %vm1419_vm13, %v1420_v1, %v1418_v35  ;;  %vm1473_vm10 = vcmp.eq.f32.partialorder %v10701_v42, inf }
 0x31e   :  { %v10970_v16 = vsel %vm1468_vm2, %v1469_v60, %v1467_v7  ;;  %7903 = vrsqrt.f32 %v10705_v52  ;;  %v10976_v48 = vsel %vm1426_vm5, %v1427_v45, %v1425_v29  ;;  %vm1475_vm9 = vcmp.eq.f32.partialorder %v10701_v42, 0.0  ;;  %v7896_v1 = vpop.eup %7895 }
 0x31f   :  { %v1476_v12 = vand.u32 2147483648, %v10701_v42  ;;  %v1483_v53 = vand.u32 2147483648, %v16198_v61  ;;  %v1507_v31 = vmul.f32 %v10842_v59, %v16189_v8  ;;  %v10985_v19 = vsel %vm1433_vm6, %v1434_v63, %v1432_v22 }
 0x320   :  { %v1446_v5 = vsel %vm1445_vm0, %v10697_v40, %v1444_v47  ;;  %vm1480_vm8 = vcmp.eq.f32.partialorder %v16198_v61, inf  ;;  %v1490_v45 = vand.u32 2147483648, %v10703_v49  ;;  %vm1494_vm11 = vcmp.eq.f32.partialorder %v16171_v0, inf  ;;  %v16199_v47 = vld [vmem:[#allocation150_spill] sm:$0xff] }
 0x321   :  { %v1458_v14 = vmul.f32 %v7896_v1, %v10699_v56  ;;  %vm1482_vm13 = vcmp.eq.f32.partialorder %v16198_v61, 0.0  ;;  %v1495_v59 = vsel %vm1494_vm11, %v16171_v0, %v1493_v24  ;;  %vm1508_vm5 = vcmp.eq.f32.partialorder %v16189_v8, inf }
 0x322   :  { %7905 = vrsqrt.f32 %v10707_v34  ;;  %vm1487_vm6 = vcmp.eq.f32.partialorder %v10703_v49, inf  ;;  %vm1496_vm0 = vcmp.eq.f32.partialorder %v16171_v0, 0.0  ;;  %v1497_v37 = vand.u32 2147483648, %v16171_v0 }
 0x323   :  { %v1509_v63 = vsel %vm1508_vm5, %v16189_v8, %v1507_v31  ;;  %v1521_v20 = vmul.f32 %v10775_v55, %v16167_v38  ;;  %v11006_v44 = vsel %vm1447_vm3, %v1448_v50, %v1446_v5  ;;  %v1460_v11 = vsel %vm1459_vm14, %v10699_v56, %v1458_v14  ;;  %v7898_v0 = vpop.eup %7897 }
 0x324   :  { %vm1489_vm15 = vcmp.eq.f32.partialorder %v10703_v49, 0.0  ;;  %v1504_v35 = vand.u32 2147483648, %v10705_v52  ;;  %v1511_v7 = vand.u32 2147483648, %v16189_v8  ;;  %v11014_v25 = vsel %vm1496_vm0, %v1497_v37, %v1495_v59 }
 0x325   :  { %vm1510_vm4 = vcmp.eq.f32.partialorder %v16189_v8, 0.0  ;;  %vm1522_vm1 = vcmp.eq.f32.partialorder %v16167_v38, inf  ;;  %7907 = vrsqrt.f32 %v10709_v41  ;;  %v1472_v40 = vmul.f32 %v7898_v0, %v10701_v42  ;;  %v7900_v60 = vpop.eup %7899 }
 0x326   :  { %vm1501_vm3 = vcmp.eq.f32.partialorder %v10705_v52, inf  ;;  %v11021_v55 = vsel %vm1510_vm4, %v1511_v7, %v1509_v63  ;;  %v1518_v50 = vand.u32 2147483648, %v10707_v34  ;;  %v1523_v29 = vsel %vm1522_vm1, %v16167_v38, %v1521_v20 }
 0x327   :  { %v11027_v22 = vsel %vm1461_vm7, %v1462_v27, %v1460_v11  ;;  %vm1503_vm14 = vcmp.eq.f32.partialorder %v10705_v52, 0.0  ;;  %vm1524_vm2 = vcmp.eq.f32.partialorder %v16167_v38, 0.0  ;;  %v1525_v8 = vand.u32 2147483648, %v16167_v38  ;;  %v7902_v56 = vpop.eup %7901 }
 0x328   :  { %7909 = vrsqrt.f32 %v16199_v47  ;;  %v1474_v24 = vsel %vm1473_vm10, %v10701_v42, %v1472_v40  ;;  %v1479_v31 = vmul.f32 %v7900_v60, %v16198_v61  ;;  %vm1515_vm7 = vcmp.eq.f32.partialorder %v10707_v34, inf }
 0x329   :  { %7911 = vrsqrt.f32 %v10711_v17  ;;  %v11041_v27 = vsel %vm1475_vm9, %v1476_v12, %v1474_v24  ;;  %v11044_v38 = vsel %vm1524_vm2, %v1525_v8, %v1523_v29  ;;  %v1486_v37 = vmul.f32 %v7902_v56, %v10703_v49 }
 0x32a   :  { %v1481_v59 = vsel %vm1480_vm8, %v16198_v61, %v1479_v31  ;;  %vm1517_vm10 = vcmp.eq.f32.partialorder %v10707_v34, 0.0  ;;  %v1773_v42 = vsel %vm1772_vm12, %v10777_v30, -inf  ;;  %v1774_v12 = vsel %vm1772_vm12, %v10856_v43, -inf }
 0x32b   :  { %v11059_v63 = vsel %vm1482_vm13, %v1483_v53, %v1481_v59  ;;  %v1775_v20 = vmax.f32 %v1773_v42, %v1774_v12  ;;  %v1776_v11 = vsel %vm1772_vm12, %v10782_v28, -inf  ;;  %v1778_v7 = vsel %vm1772_vm12, %v10875_v46, -inf  ;;  %v7904_v0 = vpop.eup %7903 }
 0x32c   :  { %v1488_v40 = vsel %vm1487_vm6, %v10703_v49, %v1486_v37  ;;  %vm1529_vm9 = vcmp.eq.f32.partialorder %v10709_v41, inf  ;;  %v1780_v29 = vsel %vm1772_vm12, %v10790_v21, -inf  ;;  %v1782_v61 = vsel %vm1772_vm12, %v10885_v3, -inf }
 0x32d   :  { %v1784_v53 = vsel %vm1772_vm12, %v10897_v9, -inf  ;;  %v11077_v60 = vsel %vm1489_vm15, %v1490_v45, %v1488_v40  ;;  %v1500_v8 = vmul.f32 %v7904_v0, %v10705_v52  ;;  %vm1531_vm8 = vcmp.eq.f32.partialorder %v10709_v41, 0.0 }
 0x32e   :  { %v1777_v24 = vmax.f32 %v1775_v20, %v1776_v11  ;;  %v1786_v31 = vsel %vm1772_vm12, %v10917_v2, -inf  ;;  %vm1536_vm11 = vcmp.eq.f32.partialorder %v16199_v47, inf  ;;  %v1788_v56 = vsel %vm1772_vm12, %v10833_v51, -inf }
 0x32f   :  { %v1789_v59 = vsel %vm1772_vm12, %v10926_v62, -inf  ;;  %v1791_v49 = vsel %vm1772_vm12, %v10838_v15, -inf  ;;  %v1793_v45 = vsel %vm1772_vm12, %v10955_v57, -inf  ;;  %v7906_v37 = vpop.eup %7905  ;;  %v1502_v42 = vsel %vm1501_vm3, %v10705_v52, %v1500_v8 }
 0x330   :  { %vm1538_vm13 = vcmp.eq.f32.partialorder %v16199_v47, 0.0  ;;  %vm1543_vm5 = vcmp.eq.f32.partialorder %v10711_v17, inf  ;;  %v1779_v12 = vmax.f32 %v1777_v24, %v1778_v7  ;;  %v1790_v20 = vmax.f32 %v1788_v56, %v1789_v59 }
 0x331   :  { %v1795_v11 = vsel %vm1772_vm12, %v10849_v6, -inf  ;;  %v11101_v0 = vsel %vm1503_vm14, %v1504_v35, %v1502_v42  ;;  %v1514_v40 = vmul.f32 %v7906_v37, %v10707_v34  ;;  %vm1545_vm6 = vcmp.eq.f32.partialorder %v10711_v17, 0.0 }
 0x332   :  { %v1797_v8 = vsel %vm1772_vm12, %v10968_v39, -inf  ;;  %v1799_v14 = vsel %vm1772_vm12, %v10976_v48, -inf  ;;  %v1781_v5 = vmax.f32 %v1779_v12, %v1780_v29  ;;  %v1792_v7 = vmax.f32 %v1790_v20, %v1791_v49  ;;  %v7908_v35 = vpop.eup %7907 }
 0x333   :  { %v1801_v24 = vsel %vm1772_vm12, %v10985_v19, -inf  ;;  %v1803_v52 = vsel %vm1772_vm12, %v10904_v54, -inf  ;;  %v1516_v56 = vsel %vm1515_vm7, %v10707_v34, %v1514_v40  ;;  %v1804_v59 = vsel %vm1772_vm12, %v11006_v44, -inf }
 0x334   :  { %v1806_v37 = vsel %vm1772_vm12, %v10941_v4, -inf  ;;  %v1808_v29 = vsel %vm1772_vm12, %v11027_v22, -inf  ;;  %v11126_v49 = vsel %vm1517_vm10, %v1518_v50, %v1516_v56  ;;  %v1528_v42 = vmul.f32 %v7908_v35, %v10709_v41 }
 0x335   :  { %v1783_v12 = vmax.f32 %v1781_v5, %v1782_v61  ;;  %v1794_v20 = vmax.f32 %v1792_v7, %v1793_v45  ;;  %v7910_v40 = vpop.eup %7909  ;;  %v1805_v1 = vmax.f32 %v1803_v52, %v1804_v59  ;;  %v1810_v10 = vsel %vm1772_vm12, %v10970_v16, -inf }
 0x336   :  { %v1812_v23 = vsel %vm1772_vm12, %v11041_v27, -inf  ;;  %v1814_v26 = vsel %vm1772_vm12, %v11059_v63, -inf  ;;  %v7912_v18 = vpop.eup %7911  ;;  %v1530_v34 = vsel %vm1529_vm9, %v10709_v41, %v1528_v42  ;;  %v1535_v50 = vmul.f32 %v7910_v40, %v16199_v47 }
 0x337   :  { %v1785_v5 = vmax.f32 %v1783_v12, %v1784_v53  ;;  %v1796_v61 = vmax.f32 %v1794_v20, %v1795_v11  ;;  %v16200_v45 = vand.u32 2147483648, %v10709_v41  ;;  %v1542_v52 = vmul.f32 %v7912_v18, %v10711_v17 }
 0x338   :  { %v1807_v35 = vmax.f32 %v1805_v1, %v1806_v37  ;;  %v1816_v56 = vsel %vm1772_vm12, %v11077_v60, -inf  ;;  %v1537_v59 = vsel %vm1536_vm11, %v16199_v47, %v1535_v50  ;;  %v1818_v11 = vsel %vm1772_vm12, %v11014_v25, -inf }
 0x339   :  { %v11143_v7 = vsel %vm1531_vm8, %v16200_v45, %v1530_v34  ;;  %v11151_v42 = vmax.f32 %v1785_v5, %v1786_v31  ;;  %v1798_v53 = vmax.f32 %v1796_v61, %v1797_v8  ;;  %v16201_v41 = vand.u32 2147483648, %v16199_v47 }
 0x33a   :  { %v1544_v18 = vsel %vm1543_vm5, %v10711_v17, %v1542_v52  ;;  %v1809_v1 = vmax.f32 %v1807_v35, %v1808_v29  ;;  %v1819_v37 = vsel %vm1772_vm12, %v11101_v0, -inf  ;;  %v16202_v31 = vand.u32 2147483648, %v10711_v17 }
 0x33b   :  { %v11159_v12 = vsel %vm1538_vm13, %v16201_v41, %v1537_v59  ;;  %v1800_v20 = vmax.f32 %v1798_v53, %v1799_v14  ;;  %v1820_v40 = vmax.f32 %v1818_v11, %v1819_v37  ;;  %v1821_v47 = vsel %vm1772_vm12, %v11021_v55, -inf }
 0x33c   :  { %v11170_v8 = vsel %vm1545_vm6, %v16202_v31, %v1544_v18  ;;  %v1811_v34 = vmax.f32 %v1809_v1, %v1810_v10  ;;  %v1823_v50 = vsel %vm1772_vm12, %v11126_v49, -inf  ;;  %v1825_v29 = vsel %vm1772_vm12, %v11044_v38, -inf }
 0x33d   :  { %v1827_v5 = vsel %vm1772_vm12, %v11143_v7, -inf  ;;  %v11180_v61 = vmax.f32 %v1800_v20, %v1801_v24  ;;  %v1822_v17 = vmax.f32 %v1820_v40, %v1821_v47  ;;  %v1829_v14 = vsel %vm1772_vm12, %v11159_v12, -inf }
 0x33e   :  { %v1831_v45 = vsel %vm1772_vm12, %v11170_v8, -inf  ;;  %v1813_v52 = vmax.f32 %v1811_v34, %v1812_v23  ;;  %v1893_v10 = vsub.f32 %v10777_v30, %v11151_v42  ;;  %v1894_v35 = vsub.f32 %v10856_v43, %v11151_v42 }
 0x33f   :  { %v1895_v59 = vsub.f32 %v10782_v28, %v11151_v42  ;;  %v1824_v53 = vmax.f32 %v1822_v17, %v1823_v50  ;;  %v1896_v24 = vsub.f32 %v10875_v46, %v11151_v42  ;;  %v1897_v11 = vsub.f32 %v10790_v21, %v11151_v42 }
 0x340   :  { %v1898_v41 = vsub.f32 %v10885_v3, %v11151_v42  ;;  %v1815_v23 = vmax.f32 %v1813_v52, %v1814_v26  ;;  %v1899_v30 = vsub.f32 %v10897_v9, %v11151_v42  ;;  %v1900_v43 = vsub.f32 %v10917_v2, %v11151_v42 }
 0x341   :  { %v1901_v28 = vsub.f32 %v10833_v51, %v11180_v61  ;;  %v1826_v21 = vmax.f32 %v1824_v53, %v1825_v29  ;;  %v1902_v46 = vsub.f32 %v10926_v62, %v11180_v61  ;;  %v1903_v26 = vsub.f32 %v10838_v15, %v11180_v61  ;;  %v7667_v29 = vld [vmem:[%s11207_s6] sm:$0xff]  }
 0x342   :  { %v1904_v3 = vsub.f32 %v10955_v57, %v11180_v61  ;;  %v1817_v9 = vmax.f32 %v1815_v23, %v1816_v56  ;;  %v1905_v51 = vsub.f32 %v10849_v6, %v11180_v61  ;;  %v1906_v2 = vsub.f32 %v10968_v39, %v11180_v61 }
 0x343   :  { %v1907_v42 = vsub.f32 %v10976_v48, %v11180_v61  ;;  %v1828_v18 = vmax.f32 %v1826_v21, %v1827_v5  ;;  %v1908_v62 = vsub.f32 %v10985_v19, %v11180_v61  ;;  %v1957_v1 = vmul.f32 1.442695, %v1893_v10 }
 0x344   :  { %v1959_v37 = vmul.f32 1.442695, %v1894_v35  ;;  %v1909_v15 = vsub.f32 %v10904_v54, %v1817_v9  ;;  %v1910_v57 = vsub.f32 %v11006_v44, %v1817_v9  ;;  %v1911_v56 = vsub.f32 %v10941_v4, %v1817_v9 }
 0x345   :  { %v1912_v6 = vsub.f32 %v11027_v22, %v1817_v9  ;;  %v1830_v31 = vmax.f32 %v1828_v18, %v1829_v14  ;;  %v1913_v39 = vsub.f32 %v10970_v16, %v1817_v9  ;;  %v1914_v20 = vsub.f32 %v11041_v27, %v1817_v9 }
 0x346   :  { %v1915_v48 = vsub.f32 %v11059_v63, %v1817_v9  ;;  %v1916_v40 = vsub.f32 %v11077_v60, %v1817_v9  ;;  %7913 = vpow2.f32 %v1957_v1  ;;  %v1961_v19 = vmul.f32 1.442695, %v1895_v59 }
 0x347   :  { %v1963_v47 = vmul.f32 1.442695, %v1896_v24  ;;  %v1832_v54 = vmax.f32 %v1830_v31, %v1831_v45  ;;  %7915 = vpow2.f32 %v1959_v37  ;;  %v1965_v44 = vmul.f32 1.442695, %v1897_v11 }
 0x348   :  { %v1967_v34 = vmul.f32 1.442695, %v1898_v41  ;;  %7917 = vpow2.f32 %v1961_v19  ;;  %v1969_v4 = vmul.f32 1.442695, %v1899_v30  ;;  %v1971_v22 = vmul.f32 1.442695, %v1900_v43 }
 0x349   :  { %v1973_v50 = vmul.f32 1.442695, %v1901_v28  ;;  %v1917_v16 = vsub.f32 %v11014_v25, %v1832_v54  ;;  %v1918_v27 = vsub.f32 %v11101_v0, %v1832_v54  ;;  %v1919_v63 = vsub.f32 %v11021_v55, %v1832_v54  ;;  %v16212_v19 = vld [vmem:[#allocation77_spill] sm:$0xff] }
 0x34a   :  { %v1920_v60 = vsub.f32 %v11126_v49, %v1832_v54  ;;  %v1921_v5 = vsub.f32 %v11044_v38, %v1832_v54  ;;  %v1922_v61 = vsub.f32 %v11143_v7, %v1832_v54  ;;  %v1923_v17 = vsub.f32 %v11159_v12, %v1832_v54 }
 0x34b   :  { %v1924_v14 = vsub.f32 %v11170_v8, %v1832_v54  ;;  %7919 = vpow2.f32 %v1963_v47  ;;  %v1975_v45 = vmul.f32 1.442695, %v1902_v46  ;;  %v1977_v52 = vmul.f32 1.442695, %v1903_v26  ;;  %v16204_v26 = vld [vmem:[#allocation129_spill] sm:$0xff]  ;;  %v16213_v47 = vld [vmem:[#allocation96_spill] sm:$0xff] }
 0x34c   :  { %v1979_v10 = vmul.f32 1.442695, %v1904_v3  ;;  %vm16203_vm0 = vcmask 523264   ;;  %7921 = vpow2.f32 %v1965_v44  ;;  %v1981_v25 = vmul.f32 1.442695, %v1905_v51  ;;  %v16205_v51 = vld [vmem:[#allocation95_spill] sm:$0xff] }
 0x34d   :  { %7454 = vmatprep.mubr.msk.bf16.mxu0 %vm16203_vm0, %v7667_v29  ;;  %v1983_v55 = vmul.f32 1.442695, %v1906_v2  ;;  %v1985_v0 = vmul.f32 1.442695, %v1907_v42  ;;  %7923 = vpow2.f32 %v1967_v34  ;;  %v1987_v49 = vmul.f32 1.442695, %v1908_v62  ;;  %vm16301_vm15 = vmmov %vm16203_vm0 }
 0x34e   :  { %v1989_v35 = vmul.f32 1.442695, %v1909_v15  ;;  %v1991_v38 = vmul.f32 1.442695, %v1910_v57  ;;  %7925 = vpow2.f32 %v1969_v4  ;;  %v1993_v7 = vmul.f32 1.442695, %v1911_v56  ;;  %vm16302_vm4 = vmmov %vm16203_vm0 }
 0x34f   :  { %v1995_v59 = vmul.f32 1.442695, %v1912_v6  ;;  %v1997_v12 = vmul.f32 1.442695, %v1913_v39  ;;  %7927 = vpow2.f32 %v1971_v22  ;;  %v11241_v8 = vmul.f32 1.442695, %v1914_v20  ;;  %vm16303_vm1 = vmmov %vm16203_vm0 }
 0x350   :  { %v11243_v53 = vmul.f32 1.442695, %v1915_v48  ;;  %v11245_v24 = vmul.f32 1.442695, %v1916_v40  ;;  %7929 = vpow2.f32 %v1973_v50  ;;  %v11247_v11 = vmul.f32 1.442695, %v1917_v16  ;;  %vm16304_vm3 = vmmov %vm16203_vm0 }
 0x351   :  { %v11249_v41 = vmul.f32 1.442695, %v1918_v27  ;;  %v11251_v23 = vmul.f32 1.442695, %v1919_v63  ;;  %7931 = vpow2.f32 %v1975_v45  ;;  %v11253_v30 = vmul.f32 1.442695, %v1920_v60  ;;  %vm16337_vm2 = vmmov %vm16203_vm0 }
 0x352   :  { %v11255_v43 = vmul.f32 1.442695, %v1921_v5  ;;  %v11257_v28 = vmul.f32 1.442695, %v1922_v61  ;;  %7933 = vpow2.f32 %v1977_v52  ;;  %v11259_v21 = vmul.f32 1.442695, %v1923_v17  ;;  %vm16338_vm7 = vmmov %vm16203_vm0 }
 0x353   :  { %v11261_v46 = vmul.f32 1.442695, %v1924_v14  ;;  %v11265_v3 = vmul.f32 %v16204_v26, %v10725_v13  ;;  %v11267_v9 = vpop.eup %7913  ;;  %7935 = vpow2.f32 %v1979_v10  ;;  %v11271_v2 = vmul.f32 %v16205_v51, %v10751_v33  ;;  %v16206_v42 = vld [vmem:[#allocation113_spill] sm:$0xff]  ;;  %v16207_v62 = vld [vmem:[#allocation114_spill] sm:$0xff]  ;;  %v16208_v57 = vld [vmem:[#allocation104_spill] sm:$0xff] }
 0x354   :  { %v11275_v18 = vmul.f32 %v16206_v42, %v10734_v32  ;;  %v11279_v1 = vmul.f32 %v16207_v62, %v10761_v58  ;;  %v11281_v37 = vpop.eup %7915  ;;  %7937 = vpow2.f32 %v1981_v25  ;;  %v2085_v15 = vsel %vm1772_vm12, %v11267_v9, 0.0  ;;  %v16209_v6 = vld [vmem:[#allocation131_spill] sm:$0xff]  ;;  %v16211_v48 = vld [vmem:[#allocation165_spill] sm:$0xff]  ;;  %v16215_v27 = vld [vmem:[#allocation102_spill] sm:$0xff] }
 0x355   :  { %v2413_v56 = vmul.f32 %v11267_v9, %v16208_v57  ;;  %v11289_v31 = vmul.f32 %v16209_v6, %v10720_v36  ;;  %v11291_v39 = vpop.eup %7917  ;;  %7939 = vpow2.f32 %v1983_v55  ;;  %v2086_v20 = vsel %vm1772_vm12, %v11281_v37, 0.0  ;;  %v16214_v4 = vld [vmem:[#allocation3_spill] sm:$0xff]  ;;  %v16216_v63 = vld [vmem:[#allocation132_spill] sm:$0xff]  ;;  %v16221_v55 = vld [vmem:[#allocation133_spill] sm:$0xff] }
 0x356   :  { %16210 = vst [vmem:[#allocation78_spill] sm:$0xff] %v11291_v39  ;;  %v2414_v40 = vmul.f32 %v11281_v37, %v16211_v48  ;;  %v11299_v54 = vmul.f32 %v16213_v47, %v16212_v19  ;;  %7941 = vpow2.f32 %v1985_v0  ;;  %v2087_v44 = vadd.f32 %v2086_v20, %v2085_v15  ;;  %v16219_v52 = vld [vmem:[#allocation167_spill] sm:$0xff]  ;;  %v16220_v25 = vld [vmem:[#allocation76_spill] sm:$0xff]  ;;  %v16227_v47 = vld [vmem:[#allocation105_spill] sm:$0xff] }
 0x357   :  { %v2088_v34 = vsel %vm1772_vm12, %v11291_v39, 0.0  ;;  %v2415_v22 = vmul.f32 %v11291_v39, %v16214_v4  ;;  %7943 = vpow2.f32 %v1987_v49  ;;  %v2477_v50 = vsel %vm1772_vm12, %v2413_v56, 0.0  ;;  %v16223_v51 = vld [vmem:[#allocation99_spill] sm:$0xff]  ;;  %v16225_v15 = vld [vmem:[#allocation164_spill] sm:$0xff]  ;;  %vm16339_vm10 = vmmov %vm16203_vm0 }
 0x358   :  { %v2478_v16 = vsel %vm1772_vm12, %v2414_v40, 0.0  ;;  %v11309_v60 = vmul.f32 %v16216_v63, %v16215_v27  ;;  %v11311_v29 = vpop.eup %7919  ;;  %7945 = vpow2.f32 %v1989_v35  ;;  %v2089_v5 = vadd.f32 %v2088_v34, %v2087_v44  ;;  %vm16340_vm9 = vmmov %vm16203_vm0 }
 0x359   :  { %16217 = vst [vmem:[#allocation87_spill] sm:$0xff] %v11311_v29  ;;  %v2479_v61 = vadd.f32 %v2478_v16, %v2477_v50  ;;  %v2480_v17 = vsel %vm1772_vm12, %v2415_v22, 0.0  ;;  %v11314_v14 = vpop.eup %7921  ;;  %7947 = vpow2.f32 %v1991_v38  ;;  %v2090_v45 = vsel %vm1772_vm12, %v11311_v29, 0.0  ;;  %v16229_v22 = vld [vmem:[#allocation166_spill] sm:$0xff]  ;;  %vm16341_vm8 = vmmov %vm16203_vm0 }
 0x35a   :  { %16218 = vst [vmem:[#allocation149_spill] sm:$0xff] %v11314_v14  ;;  %v2416_v10 = vmul.f32 %v11311_v29, %v16219_v52  ;;  %v11322_v0 = vmul.f32 %v16221_v55, %v16220_v25  ;;  %v11324_v49 = vpop.eup %7923  ;;  %7949 = vpow2.f32 %v1993_v7  ;;  %v2091_v35 = vadd.f32 %v2090_v45, %v2089_v5  ;;  %vm16342_vm11 = vmmov %vm16203_vm0 }
 0x35b   :  { %16222 = vst [vmem:[#allocation122_spill] sm:$0xff] %v11324_v49  ;;  %v2092_v26 = vsel %vm1772_vm12, %v11314_v14, 0.0  ;;  %v2417_v38 = vmul.f32 %v11314_v14, %v16223_v51  ;;  %v11330_v42 = vpop.eup %7925  ;;  %7951 = vpow2.f32 %v1995_v59  ;;  %v2094_v62 = vsel %vm1772_vm12, %v11324_v49, 0.0  ;;  %vm16343_vm13 = vmmov %vm16203_vm0 }
 0x35c   :  { %16224 = vst [vmem:[#allocation137_spill] sm:$0xff] %v11330_v42  ;;  %v11336_v56 = vmul.f32 %v11324_v49, %v16225_v15  ;;  %v2481_v6 = vadd.f32 %v2480_v17, %v2479_v61  ;;  %v11338_v20 = vpop.eup %7927  ;;  %7953 = vpow2.f32 %v1997_v12  ;;  %v2093_v7 = vadd.f32 %v2092_v26, %v2091_v35  ;;  %vm16360_vm5 = vmmov %vm16203_vm0 }
 0x35d   :  { %16226 = vst [vmem:[#allocation156_spill] sm:$0xff] %v11338_v20  ;;  %v2096_v40 = vsel %vm1772_vm12, %v11330_v42, 0.0  ;;  %v11344_v44 = vmul.f32 %v11330_v42, %v16227_v47  ;;  %v11346_v59 = vpop.eup %7929  ;;  %7955 = vpow2.f32 %v11241_v8  ;;  %v2098_v34 = vsel %vm1772_vm12, %v11338_v20, 0.0  ;;  %vm16386_vm6 = vmmov %vm16203_vm0 }
 0x35e   :  { %16228 = vst [vmem:[#allocation88_spill] sm:$0xff] %v11346_v59  ;;  %v11353_v50 = vmul.f32 %v11338_v20, %v16229_v22  ;;  %v2482_v12 = vsel %vm1772_vm12, %v2416_v10, 0.0  ;;  %v11356_v16 = vpop.eup %7931  ;;  %7957 = vpow2.f32 %v11243_v53  ;;  %v2095_v63 = vadd.f32 %v2094_v62, %v2093_v7 }
 0x35f   :  { %16230 = vst [vmem:[#allocation91_spill] sm:$0xff] %v11356_v16  ;;  %v2100_v5 = vsel %vm1772_vm12, %v11346_v59, 0.0  ;;  %v11363_v8 = vmul.f32 %v11346_v59, %v16208_v57  ;;  %v11365_v61 = vpop.eup %7933  ;;  %7959 = vpow2.f32 %v11245_v24  ;;  %v2101_v17 = vsel %vm1772_vm12, %v11356_v16, 0.0 }
 0x360   :  { %16231 = vst [vmem:[#allocation93_spill] sm:$0xff] %v11365_v61  ;;  %v11372_v45 = vmul.f32 %v11356_v16, %v16211_v48  ;;  %v2483_v53 = vadd.f32 %v2482_v12, %v2481_v6  ;;  %v11374_v10 = vpop.eup %7935  ;;  %7961 = vpow2.f32 %v11247_v11  ;;  %v2097_v55 = vadd.f32 %v2096_v40, %v2095_v63 }
 0x361   :  { %16232 = vst [vmem:[#allocation89_spill] sm:$0xff] %v11374_v10  ;;  %v2102_v35 = vadd.f32 %v2101_v17, %v2100_v5  ;;  %v2103_v26 = vsel %vm1772_vm12, %v11365_v61, 0.0  ;;  %v11379_v62 = vpop.eup %7937  ;;  %7963 = vpow2.f32 %v11249_v41  ;;  %v2105_v24 = vsel %vm1772_vm12, %v11374_v10, 0.0 }
 0x362   :  { %16233 = vst [vmem:[#allocation101_spill] sm:$0xff] %v11379_v62  ;;  %v11386_v7 = vmul.f32 %v11365_v61, %v16214_v4  ;;  %v11390_v6 = vmul.f32 %v11374_v10, %v16219_v52  ;;  %v11392_v11 = vpop.eup %7939  ;;  %7965 = vpow2.f32 %v11251_v23  ;;  %v11395_v40 = vadd.f32 %v2098_v34, %v2097_v55 }
 0x363   :  { %16234 = vst [vmem:[#allocation159_spill] sm:$0xff] %v11392_v11  ;;  %v2104_v12 = vadd.f32 %v2103_v26, %v2102_v35  ;;  %v2107_v41 = vsel %vm1772_vm12, %v11379_v62, 0.0  ;;  %v11399_v63 = vpop.eup %7941  ;;  %7967 = vpow2.f32 %v11253_v30  ;;  %v2109_v5 = vsel %vm1772_vm12, %v11392_v11, 0.0 }
 0x364   :  { %16235 = vst [vmem:[#allocation140_spill] sm:$0xff] %v11399_v63  ;;  %v11406_v17 = vmul.f32 %v11379_v62, %v16223_v51  ;;  %v11410_v23 = vmul.f32 %v11392_v11, %v16225_v15  ;;  %v11412_v34 = vpop.eup %7943  ;;  %7969 = vpow2.f32 %v11255_v43  ;;  %v2111_v35 = vsel %vm1772_vm12, %v11399_v63, 0.0 }
 0x365   :  { %16236 = vst [vmem:[#allocation116_spill] sm:$0xff] %v11412_v34  ;;  %v2106_v55 = vadd.f32 %v2105_v24, %v2104_v12  ;;  %v11419_v30 = vmul.f32 %v11399_v63, %v16227_v47  ;;  %v11421_v26 = vpop.eup %7945  ;;  %7971 = vpow2.f32 %v11257_v28  ;;  %v2113_v11 = vsel %vm1772_vm12, %v11412_v34, 0.0 }
 0x366   :  { %16237 = vst [vmem:[#allocation92_spill] sm:$0xff] %v11421_v26  ;;  %v11428_v62 = vmul.f32 %v11412_v34, %v16229_v22  ;;  %v2484_v43 = vsel %vm1772_vm12, %v2417_v38, 0.0  ;;  %v11431_v24 = vpop.eup %7947  ;;  %7973 = vpow2.f32 %v11259_v21  ;;  %v2115_v63 = vsel %vm1772_vm12, %v11421_v26, 0.0 }
 0x367   :  { %16238 = vst [vmem:[#allocation94_spill] sm:$0xff] %v11431_v24  ;;  %v2108_v12 = vadd.f32 %v2107_v41, %v2106_v55  ;;  %v11438_v28 = vmul.f32 %v11421_v26, %v16208_v57  ;;  %v11440_v10 = vpop.eup %7949  ;;  %7975 = vpow2.f32 %v11261_v46  ;;  %v2116_v34 = vsel %vm1772_vm12, %v11431_v24, 0.0 }
 0x368   :  { %16239 = vst [vmem:[#allocation103_spill] sm:$0xff] %v11440_v10  ;;  %v11447_v38 = vmul.f32 %v11431_v24, %v16211_v48  ;;  %v2485_v21 = vadd.f32 %v2484_v43, %v2483_v53  ;;  %v11449_v41 = vpop.eup %7951  ;;  %v2117_v61 = vadd.f32 %v2116_v34, %v2115_v63  ;;  %v2118_v26 = vsel %vm1772_vm12, %v11440_v10, 0.0 }
 0x369   :  { %16240 = vst [vmem:[#allocation161_spill] sm:$0xff] %v11449_v41  ;;  %v2110_v55 = vadd.f32 %v2109_v5, %v2108_v12  ;;  %v11455_v16 = vmul.f32 %v11440_v10, %v16214_v4  ;;  %v11457_v46 = vpop.eup %7953  ;;  %v2120_v59 = vsel %vm1772_vm12, %v11449_v41, 0.0  ;;  %v11463_v24 = vmul.f32 %v11449_v41, %v16219_v52 }
 0x36a   :  { %16241 = vst [vmem:[#allocation142_spill] sm:$0xff] %v11457_v46  ;;  %v2486_v53 = vsel %vm1772_vm12, %v11336_v56, 0.0  ;;  %v2488_v63 = vsel %vm1772_vm12, %v11344_v44, 0.0  ;;  %v11469_v5 = vpop.eup %7955  ;;  %v2119_v43 = vadd.f32 %v2118_v26, %v2117_v61  ;;  %v2122_v12 = vsel %vm1772_vm12, %v11457_v46, 0.0 }
 0x36b   :  { %16242 = vst [vmem:[#allocation154_spill] sm:$0xff] %v11469_v5  ;;  %v2112_v34 = vadd.f32 %v2111_v35, %v2110_v55  ;;  %v11475_v10 = vmul.f32 %v11457_v46, %v16223_v51  ;;  %v11477_v20 = vpop.eup %7957  ;;  %v2124_v41 = vsel %vm1772_vm12, %v11469_v5, 0.0  ;;  %v11483_v56 = vmul.f32 %v11469_v5, %v16225_v15 }
 0x36c   :  { %16243 = vst [vmem:[#allocation124_spill] sm:$0xff] %v11477_v20  ;;  %v2487_v44 = vadd.f32 %v2486_v53, %v2485_v21  ;;  %v2490_v61 = vsel %vm1772_vm12, %v11353_v50, 0.0  ;;  %v11487_v35 = vpop.eup %7959  ;;  %v2121_v55 = vadd.f32 %v2120_v59, %v2119_v43  ;;  %v2126_v46 = vsel %vm1772_vm12, %v11477_v20, 0.0 }
 0x36d   :  { %16244 = vst [vmem:[#allocation152_spill] sm:$0xff] %v11487_v35  ;;  %v11489_v26 = vadd.f32 %v2113_v11, %v2112_v34  ;;  %v2435_v42 = vmul.f32 %v11477_v20, %v16227_v47  ;;  %v11495_v49 = vpop.eup %7961  ;;  %v2128_v5 = vsel %vm1772_vm12, %v11487_v35, 0.0  ;;  %v2436_v21 = vmul.f32 %v11487_v35, %v16229_v22 }
 0x36e   :  { %16245 = vst [vmem:[#allocation111_spill] sm:$0xff] %v11495_v49  ;;  %v2489_v50 = vadd.f32 %v2488_v63, %v2487_v44  ;;  %v2492_v11 = vsel %vm1772_vm12, %v11363_v8, 0.0  ;;  %v11503_v53 = vpop.eup %7963  ;;  %v2123_v59 = vadd.f32 %v2122_v12, %v2121_v55  ;;  %v2130_v34 = vsel %vm1772_vm12, %v11495_v49, 0.0 }
 0x36f   :  { %v2437_v43 = vmul.f32 %v11495_v49, %v16208_v57  ;;  %v2493_v20 = vsel %vm1772_vm12, %v11372_v45, 0.0  ;;  %v11511_v14 = vpop.eup %7965  ;;  %v2131_v63 = vsel %vm1772_vm12, %v11503_v53, 0.0  ;;  %v2438_v8 = vmul.f32 %v11503_v53, %v16211_v48 }
 0x370   :  { %v11517_v44 = vadd.f32 %v2490_v61, %v2489_v50  ;;  %v2494_v12 = vadd.f32 %v2493_v20, %v2492_v11  ;;  %v11519_v55 = vpop.eup %7967  ;;  %v2125_v35 = vadd.f32 %v2124_v41, %v2123_v59  ;;  %v2132_v29 = vadd.f32 %v2131_v63, %v2130_v34 }
 0x371   :  { %v2133_v57 = vsel %vm1772_vm12, %v11511_v14, 0.0  ;;  %v2439_v45 = vmul.f32 %v11511_v14, %v16214_v4  ;;  %v11525_v49 = vpop.eup %7969  ;;  %v2135_v39 = vsel %vm1772_vm12, %v11519_v55, 0.0  ;;  %v2440_v48 = vmul.f32 %v11519_v55, %v16219_v52 }
 0x372   :  { %16246 = vst [vmem:[#allocation162_spill] sm:$0xff] %v11525_v49  ;;  %v2495_v20 = vsel %vm1772_vm12, %v11386_v7, 0.0  ;;  %v2497_v41 = vsel %vm1772_vm12, %v11390_v6, 0.0  ;;  %v11535_v61 = vpop.eup %7971  ;;  %v2127_v50 = vadd.f32 %v2126_v46, %v2125_v35  ;;  %v2134_v11 = vadd.f32 %v2133_v57, %v2132_v29 }
 0x373   :  { %v2137_v4 = vsel %vm1772_vm12, %v11525_v49, 0.0  ;;  %v2441_v59 = vmul.f32 %v11525_v49, %v16223_v51  ;;  %v11541_v34 = vpop.eup %7973  ;;  %v2139_v52 = vsel %vm1772_vm12, %v11535_v61, 0.0  ;;  %v2442_v7 = vmul.f32 %v11535_v61, %v16225_v15 }
 0x374   :  { %v2496_v63 = vadd.f32 %v2495_v20, %v2494_v12  ;;  %v2499_v6 = vsel %vm1772_vm12, %v11406_v17, 0.0  ;;  %v11549_v46 = vpop.eup %7975  ;;  %v2129_v29 = vadd.f32 %v2128_v5, %v2127_v50  ;;  %v2136_v35 = vadd.f32 %v2135_v39, %v2134_v11 }
 0x375   :  { %v2141_v57 = vsel %vm1772_vm12, %v11541_v34, 0.0  ;;  %v2443_v51 = vmul.f32 %v11541_v34, %v16227_v47  ;;  %v2143_v49 = vsel %vm1772_vm12, %v11549_v46, 0.0  ;;  %v2444_v15 = vmul.f32 %v11549_v46, %v16229_v22 }
 0x376   :  { %v2498_v12 = vadd.f32 %v2497_v41, %v2496_v63  ;;  %v2501_v17 = vsel %vm1772_vm12, %v11410_v23, 0.0  ;;  %v2138_v20 = vadd.f32 %v2137_v4, %v2136_v35  ;;  %v2503_v39 = vsel %vm1772_vm12, %v11419_v30, 0.0 }
 0x377   :  { %v2505_v5 = vsel %vm1772_vm12, %v11428_v62, 0.0  ;;  %v2507_v47 = vsel %vm1772_vm12, %v11438_v28, 0.0  ;;  %v2508_v11 = vsel %vm1772_vm12, %v11447_v38, 0.0  ;;  %v2510_v22 = vsel %vm1772_vm12, %v11455_v16, 0.0 }
 0x378   :  { %v2500_v50 = vadd.f32 %v2499_v6, %v2498_v12  ;;  %v2512_v23 = vsel %vm1772_vm12, %v11463_v24, 0.0  ;;  %v2140_v41 = vadd.f32 %v2139_v52, %v2138_v20  ;;  %v2509_v4 = vadd.f32 %v2508_v11, %v2507_v47 }
 0x379   :  { %v2514_v30 = vsel %vm1772_vm12, %v11475_v10, 0.0  ;;  %v2516_v62 = vsel %vm1772_vm12, %v11483_v56, 0.0  ;;  %v2518_v28 = vsel %vm1772_vm12, %v2435_v42, 0.0  ;;  %v2520_v6 = vsel %vm1772_vm12, %v2436_v21, 0.0 }
 0x37a   :  { %v2502_v63 = vadd.f32 %v2501_v17, %v2500_v50  ;;  %v2522_v38 = vsel %vm1772_vm12, %v2437_v43, 0.0  ;;  %v2142_v35 = vadd.f32 %v2141_v57, %v2140_v41  ;;  %v2511_v16 = vadd.f32 %v2510_v22, %v2509_v4  ;;  %v16253_v4 = vld [vmem:[#allocation139_spill] sm:$0xff] }
 0x37b   :  { %v2523_v12 = vsel %vm1772_vm12, %v2438_v8, 0.0  ;;  %v2525_v24 = vsel %vm1772_vm12, %v2439_v45, 0.0  ;;  %v2527_v10 = vsel %vm1772_vm12, %v2440_v48, 0.0  ;;  %v2529_v47 = vsel %vm1772_vm12, %v2441_v59, 0.0  ;;  %v16247_v45 = vld [vmem:[#allocation134_spill] sm:$0xff] }
 0x37c   :  { %v2504_v52 = vadd.f32 %v2503_v39, %v2502_v63  ;;  %v2524_v20 = vadd.f32 %v2523_v12, %v2522_v38  ;;  %v2144_v56 = vadd.f32 %v2143_v49, %v2142_v35  ;;  %v2513_v17 = vadd.f32 %v2512_v23, %v2511_v16  ;;  %v16248_v49 = vld [vmem:[#allocation97_spill] sm:$0xff] }
 0x37d   :  { %v2531_v42 = vsel %vm1772_vm12, %v2442_v7, 0.0  ;;  %v2533_v21 = vsel %vm1772_vm12, %v2443_v51, 0.0  ;;  %v2535_v57 = vsel %vm1772_vm12, %v2444_v15, 0.0  ;;  %7977 = vrcp.f32 %v11395_v40  ;;  %v16249_v7 = vld [vmem:[#allocation135_spill] sm:$0xff]  ;;  %v16251_v40 = vld [vmem:[#allocation138_spill] sm:$0xff]  ;;  %v16255_v38 = vld [vmem:[#allocation169_spill] sm:$0xff] }
 0x37e   :  { %v11586_v50 = vadd.f32 %v2505_v5, %v2504_v52  ;;  %v2526_v43 = vadd.f32 %v2525_v24, %v2524_v20  ;;  %v2515_v8 = vadd.f32 %v2514_v30, %v2513_v17  ;;  %7979 = vrcp.f32 %v11489_v26  ;;  %v16250_v5 = vld [vmem:[#allocation136_spill] sm:$0xff]  ;;  %v16257_v24 = vld [vmem:[#allocation171_spill] sm:$0xff] }
 0x37f   :  { %v2257_v48 = vmul.f32 %v16247_v45, %v10725_v13  ;;  %v2258_v59 = vmul.f32 %v16248_v49, %v10751_v33  ;;  %7981 = vrcp.f32 %v2129_v29  ;;  %v2259_v51 = vmul.f32 %v16249_v7, %v10734_v32  ;;  %v16252_v26 = vld [vmem:[#allocation100_spill] sm:$0xff]  ;;  %v16261_v45 = vld [vmem:[#allocation175_spill] sm:$0xff] }
 0x380   :  { %v2528_v39 = vadd.f32 %v2527_v10, %v2526_v43  ;;  %v2260_v11 = vmul.f32 %v16250_v5, %v10761_v58  ;;  %v2517_v15 = vadd.f32 %v2516_v62, %v2515_v8  ;;  %7983 = vrcp.f32 %v2144_v56  ;;  %v16254_v29 = vld [vmem:[#allocation168_spill] sm:$0xff]  ;;  %v16256_v62 = vld [vmem:[#allocation170_spill] sm:$0xff]  ;;  %v16259_v56 = vld [vmem:[#allocation173_spill] sm:$0xff] }
 0x381   :  { %v2261_v22 = vmul.f32 %v16251_v40, %v10720_v36  ;;  %v2262_v23 = vmul.f32 %v16252_v26, %v16212_v19  ;;  %v2263_v30 = vmul.f32 %v16253_v4, %v16215_v27  ;;  %v2264_v63 = vmul.f32 %v16254_v29, %v16220_v25  ;;  %v16258_v20 = vld [vmem:[#allocation172_spill] sm:$0xff]  ;;  %v16260_v43 = vld [vmem:[#allocation174_spill] sm:$0xff]  ;;  %v16263_v5 = vld [vmem:[#allocation83_spill] sm:$0xff] }
 0x382   :  { %v2530_v41 = vadd.f32 %v2529_v47, %v2528_v39  ;;  %v2265_v35 = vmul.f32 %v16255_v38, %v10725_v13  ;;  %v2519_v16 = vadd.f32 %v2518_v28, %v2517_v15  ;;  %v2266_v12 = vmul.f32 %v16256_v62, %v10751_v33  ;;  %v16262_v39 = vld [vmem:[#allocation176_spill] sm:$0xff]  ;;  %v16264_v40 = vld [vmem:[#allocation119_spill] sm:$0xff]  ;;  %v16267_v62 = vld [vmem:[#allocation141_spill] sm:$0xff] }
 0x383   :  { %v2267_v52 = vmul.f32 %v16257_v24, %v10734_v32  ;;  %v2268_v10 = vmul.f32 %v16258_v20, %v10761_v58  ;;  %v2269_v17 = vmul.f32 %v16259_v56, %v10720_v36  ;;  %v2270_v8 = vmul.f32 %v16260_v43, %v16212_v19  ;;  %v16266_v29 = vld [vmem:[#allocation160_spill] sm:$0xff]  ;;  %v16269_v20 = vld [vmem:[#allocation151_spill] sm:$0xff] }
 0x384   :  { %v2532_v47 = vadd.f32 %v2531_v42, %v2530_v41  ;;  %v2271_v49 = vmul.f32 %v16261_v45, %v16215_v27  ;;  %v2521_v28 = vadd.f32 %v2520_v6, %v2519_v16  ;;  %v2272_v7 = vmul.f32 %v16262_v39, %v16220_v25  ;;  %v16265_v41 = vld [vmem:[#allocation123_spill] sm:$0xff]  ;;  %v16268_v6 = vld [vmem:[#allocation110_spill] sm:$0xff]  ;;  %v16270_v43 = vld [vmem:[#allocation108_spill] sm:$0xff] }
 0x385   :  { %v2273_v15 = vmul.f32 %v16263_v5, %v10725_v13  ;;  %v2274_v26 = vmul.f32 %v16264_v40, %v10751_v33  ;;  %v2275_v4 = vmul.f32 %v16265_v41, %v10734_v32  ;;  %v2276_v38 = vmul.f32 %v16266_v29, %v10761_v58 }
 0x386   :  { %v2534_v42 = vadd.f32 %v2533_v21, %v2532_v47  ;;  %v2277_v24 = vmul.f32 %v16267_v62, %v10720_v36  ;;  %v2278_v16 = vmul.f32 %v16268_v6, %v16212_v19  ;;  %v11637_v56 = vmul.f32 %v16269_v20, %v16215_v27 }
 0x387   :  { %v11641_v45 = vmul.f32 %v16270_v43, %v16220_v25  ;;  %v2341_v21 = vsel %vm1772_vm12, %v11265_v3, 0.0  ;;  %v2342_v39 = vsel %vm1772_vm12, %v11271_v2, 0.0  ;;  %v2344_v5 = vsel %vm1772_vm12, %v11275_v18, 0.0 }
 0x388   :  { %v2536_v47 = vadd.f32 %v2535_v57, %v2534_v42  ;;  %v2346_v40 = vsel %vm1772_vm12, %v11279_v1, 0.0  ;;  %v2343_v41 = vadd.f32 %v2342_v39, %v2341_v21  ;;  %v2348_v29 = vsel %vm1772_vm12, %v11289_v31, 0.0 }
 0x389   :  { %v2350_v62 = vsel %vm1772_vm12, %v11299_v54, 0.0  ;;  %v2352_v3 = vsel %vm1772_vm12, %v11309_v60, 0.0  ;;  %v2354_v57 = vsel %vm1772_vm12, %v11322_v0, 0.0  ;;  %v2356_v2 = vsel %vm1772_vm12, %v2257_v48, 0.0 }
 0x38a   :  { %v2357_v18 = vsel %vm1772_vm12, %v2258_v59, 0.0  ;;  %v2359_v42 = vsel %vm1772_vm12, %v2259_v51, 0.0  ;;  %v11662_v1 = vpop.eup %7977  ;;  %v2345_v6 = vadd.f32 %v2344_v5, %v2343_v41  ;;  %v2361_v31 = vsel %vm1772_vm12, %v2260_v11, 0.0 }
 0x38b   :  { %16271 = vst [vmem:[#allocation143_spill] sm:$0xff] %v11662_v1  ;;  %v2358_v20 = vadd.f32 %v2357_v18, %v2356_v2  ;;  %v2363_v54 = vsel %vm1772_vm12, %v2261_v22, 0.0  ;;  %v11666_v43 = vpop.eup %7979  ;;  %v2613_v60 = vmul.f32 %v11662_v1, %v11517_v44  ;;  %v2365_v0 = vsel %vm1772_vm12, %v2262_v23, 0.0 }
 0x38c   :  { %v2367_v48 = vsel %vm1772_vm12, %v2263_v30, 0.0  ;;  %v2369_v59 = vsel %vm1772_vm12, %v2264_v63, 0.0  ;;  %v11673_v51 = vpop.eup %7981  ;;  %v2614_v21 = vmul.f32 %v11666_v43, %v11586_v50  ;;  %v2347_v39 = vadd.f32 %v2346_v40, %v2345_v6 }
 0x38d   :  { %v2360_v11 = vadd.f32 %v2359_v42, %v2358_v20  ;;  %v2371_v22 = vsel %vm1772_vm12, %v2265_v35, 0.0  ;;  %v11678_v5 = vpop.eup %7983  ;;  %v2615_v41 = vmul.f32 %v11673_v51, %v2521_v28  ;;  %v2372_v44 = vsel %vm1772_vm12, %v2266_v12, 0.0 }
 0x38e   :  { %v2374_v23 = vsel %vm1772_vm12, %v2267_v52, 0.0  ;;  %v2376_v30 = vsel %vm1772_vm12, %v2268_v10, 0.0  ;;  %v2616_v63 = vmul.f32 %v11678_v5, %v2536_v47  ;;  %v2645_v2 = vcombine.low %v2613_v60, %v2614_v21 }
 0x38f   :  { %v2349_v18 = vadd.f32 %v2348_v29, %v2347_v39  ;;  %v2362_v1 = vadd.f32 %v2361_v31, %v2360_v11  ;;  %v2373_v50 = vadd.f32 %v2372_v44, %v2371_v22  ;;  %v2378_v40 = vsel %vm1772_vm12, %v2269_v17, 0.0  ;;  %v16275_v44 = vld [vmem:[#allocation149_spill] sm:$0xff] }
 0x390   :  { %v2380_v35 = vsel %vm1772_vm12, %v2270_v8, 0.0  ;;  %v2382_v42 = vsel %vm1772_vm12, %v2271_v49, 0.0  ;;  %v2646_v6 = vcombine.low %v2615_v41, %v2616_v63  ;;  %v2384_v12 = vsel %vm1772_vm12, %v2272_v7, 0.0  ;;  %v16277_v63 = vld [vmem:[#allocation98_spill] sm:$0xff] }
 0x391   :  { %v2351_v28 = vadd.f32 %v2350_v62, %v2349_v18  ;;  %v2364_v20 = vadd.f32 %v2363_v54, %v2362_v1  ;;  %v2375_v52 = vadd.f32 %v2374_v23, %v2373_v50  ;;  %v2386_v10 = vsel %vm1772_vm12, %v2273_v15, 0.0  ;;  %v16276_v23 = vld [vmem:[#allocation122_spill] sm:$0xff]  ;;  %v16279_v18 = vld [vmem:[#allocation156_spill] sm:$0xff] }
 0x392   :  { %v2387_v47 = vsel %vm1772_vm12, %v2274_v26, 0.0  ;;  %v2389_v29 = vsel %vm1772_vm12, %v2275_v4, 0.0  ;;  %v2663_v31 = vpack.c.bf16 %v2646_v6, %v2645_v2  ;;  %v2391_v8 = vsel %vm1772_vm12, %v2276_v38, 0.0 }
 0x393   :  { %v2353_v60 = vadd.f32 %v2352_v3, %v2351_v28  ;;  %v2366_v21 = vadd.f32 %v2365_v0, %v2364_v20  ;;  %v2388_v17 = vadd.f32 %v2387_v47, %v2386_v10  ;;  %v2377_v39 = vadd.f32 %v2376_v30, %v2375_v52  ;;  %v16272_v0 = vld [vmem:[#allocation75_spill] sm:$0xff]  ;;  %v16282_v52 = vld [vmem:[#allocation93_spill] sm:$0xff] }
 0x394   :  { %v2393_v49 = vsel %vm1772_vm12, %v2277_v24, 0.0  ;;  %v2395_v62 = vsel %vm1772_vm12, %v2278_v16, 0.0  ;;  %7448 = vmatprep.subr.bf16.mxu0 %v2663_v31  ;;  %v2397_v15 = vsel %vm1772_vm12, %v11637_v56, 0.0  ;;  %v2399_v4 = vsel %vm1772_vm12, %v11641_v45, 0.0  ;;  %v16274_v56 = vld [vmem:[#allocation87_spill] sm:$0xff] }
 0x395   :  { %v2355_v7 = vadd.f32 %v2354_v57, %v2353_v60  ;;  %v2368_v1 = vadd.f32 %v2367_v48, %v2366_v21  ;;  %v2390_v54 = vadd.f32 %v2389_v29, %v2388_v17  ;;  %7449 = vmatpush3.bf16.msra.mxu0 %v2663_v31  ;;  %v2379_v26 = vadd.f32 %v2378_v40, %v2377_v39  ;;  %v16273_v48 = vld [vmem:[#allocation78_spill] sm:$0xff]  ;;  %v16281_v28 = vld [vmem:[#allocation91_spill] sm:$0xff]  ;;  %v16283_v31 = vld [vmem:[#allocation89_spill] sm:$0xff] }
 0x396   :  { %v2217_v3 = vmul.f32 %v11267_v9, %v10725_v13  ;;  %v2218_v38 = vmul.f32 %v11281_v37, %v10751_v33  ;;  %v2219_v11 = vmul.f32 %v16273_v48, %v10734_v32  ;;  %v2220_v41 = vmul.f32 %v16274_v56, %v10761_v58  ;;  %v16284_v21 = vld [vmem:[#allocation101_spill] sm:$0xff]  ;;  %v16291_v48 = vld [vmem:[#allocation115_spill] sm:$0xff] }
 0x397   :  { %v2370_v24 = vadd.f32 %v2369_v59, %v2368_v1  ;;  %v2392_v16 = vadd.f32 %v2391_v8, %v2390_v54  ;;  %v2609_v57 = vmul.f32 %v16272_v0, %v2355_v7  ;;  %v2381_v22 = vadd.f32 %v2380_v35, %v2379_v26  ;;  %v16278_v59 = vld [vmem:[#allocation137_spill] sm:$0xff]  ;;  %v16280_v35 = vld [vmem:[#allocation88_spill] sm:$0xff] }
 0x398   :  { %v2221_v45 = vmul.f32 %v16275_v44, %v10720_v36  ;;  %v2222_v9 = vmul.f32 %v16276_v23, %v16212_v19  ;;  %v11715_v2 = vmul.f32 %v16278_v59, %v16215_v27  ;;  %v11719_v50 = vmul.f32 %v16279_v18, %v16220_v25  ;;  %v16287_v1 = vld [vmem:[#allocation116_spill] sm:$0xff]  ;;  %v16292_v56 = vld [vmem:[#allocation161_spill] sm:$0xff]  ;;  %v16293_v23 = vld [vmem:[#allocation142_spill] sm:$0xff] }
 0x399   :  { %v2394_v30 = vadd.f32 %v2393_v49, %v2392_v16  ;;  %v2610_v37 = vmul.f32 %v16277_v63, %v2370_v24  ;;  %v2383_v40 = vadd.f32 %v2382_v42, %v2381_v22  ;;  %v2225_v6 = vmul.f32 %v16280_v35, %v10725_v13  ;;  %v16285_v42 = vld [vmem:[#allocation159_spill] sm:$0xff]  ;;  %v16286_v49 = vld [vmem:[#allocation140_spill] sm:$0xff]  ;;  %v16289_v16 = vld [vmem:[#allocation94_spill] sm:$0xff] }
 0x39a   :  { %v2226_v20 = vmul.f32 %v16281_v28, %v10751_v33  ;;  %v2227_v10 = vmul.f32 %v16282_v52, %v10734_v32  ;;  %v2228_v60 = vmul.f32 %v16283_v31, %v10761_v58  ;;  %v2229_v17 = vmul.f32 %v16284_v21, %v10720_v36  ;;  %v16288_v26 = vld [vmem:[#allocation92_spill] sm:$0xff]  ;;  %v16294_v63 = vld [vmem:[#allocation154_spill] sm:$0xff]  ;;  %v16297_v28 = vld [vmem:[#allocation111_spill] sm:$0xff] }
 0x39b   :  { %v2396_v47 = vadd.f32 %v2395_v62, %v2394_v30  ;;  %v2631_v29 = vcombine.low %v2609_v57, %v2610_v37  ;;  %v2385_v39 = vadd.f32 %v2384_v12, %v2383_v40  ;;  %v2230_v8 = vmul.f32 %v16285_v42, %v16212_v19  ;;  %v16290_v12 = vld [vmem:[#allocation103_spill] sm:$0xff]  ;;  %v16295_v59 = vld [vmem:[#allocation124_spill] sm:$0xff]  ;;  %v16298_v21 = vld [vmem:[#allocation162_spill] sm:$0xff] }
 0x39c   :  { %v11735_v7 = vmul.f32 %v16286_v49, %v16215_v27  ;;  %v11739_v54 = vmul.f32 %v16287_v1, %v16220_v25  ;;  %v2233_v24 = vmul.f32 %v16288_v26, %v10725_v13  ;;  %v2234_v0 = vmul.f32 %v16289_v16, %v10751_v33  ;;  %v16296_v40 = vld [vmem:[#allocation152_spill] sm:$0xff]  ;;  %v16299_v42 = vld [vmem:[#allocation90_spill] sm:$0xff] }
 0x39d   :  { %v2398_v62 = vadd.f32 %v2397_v15, %v2396_v47  ;;  %v2235_v57 = vmul.f32 %v16290_v12, %v10734_v32  ;;  %v2611_v22 = vmul.f32 %v16291_v48, %v2385_v39  ;;  %v2236_v44 = vmul.f32 %v16292_v56, %v10761_v58 }
 0x39e   :  { %v2237_v30 = vmul.f32 %v16293_v23, %v10720_v36  ;;  %v2238_v15 = vmul.f32 %v16294_v63, %v16212_v19  ;;  %v11756_v18 = vmul.f32 %v16295_v59, %v16215_v27  ;;  %v11760_v35 = vmul.f32 %v16296_v40, %v16220_v25 }
 0x39f   :  { %v2400_v37 = vadd.f32 %v2399_v4, %v2398_v62  ;;  %v2241_v52 = vmul.f32 %v16297_v28, %v10725_v13  ;;  %v2242_v47 = vmul.f32 %v11503_v53, %v10751_v33  ;;  %v2243_v31 = vmul.f32 %v11511_v14, %v10734_v32 }
 0x3a0   :  { %v2244_v4 = vmul.f32 %v11519_v55, %v10761_v58  ;;  %v2245_v39 = vmul.f32 %v16298_v21, %v10720_v36  ;;  %v2246_v1 = vmul.f32 %v11535_v61, %v16212_v19  ;;  %v11777_v13 = vmul.f32 %v11541_v34, %v16215_v27 }
 0x3a1   :  { %v2612_v49 = vmul.f32 %v16299_v42, %v2400_v37  ;;  %v11781_v33 = vmul.f32 %v11549_v46, %v16220_v25  ;;  %v2281_v32 = vsel %vm1772_vm12, %v2217_v3, 0.0  ;;  %v2282_v58 = vsel %vm1772_vm12, %v2218_v38, 0.0 }
 0x3a2   :  { %v2283_v53 = vadd.f32 %v2282_v58, %v2281_v32  ;;  %v2284_v36 = vsel %vm1772_vm12, %v2219_v11, 0.0  ;;  %v2296_v55 = vsel %vm1772_vm12, %v2225_v6, 0.0  ;;  %v2297_v19 = vsel %vm1772_vm12, %v2226_v20, 0.0 }
 0x3a3   :  { %v2632_v14 = vcombine.low %v2611_v22, %v2612_v49  ;;  %v2298_v27 = vadd.f32 %v2297_v19, %v2296_v55  ;;  %v2286_v34 = vsel %vm1772_vm12, %v2220_v41, 0.0  ;;  %v2299_v25 = vsel %vm1772_vm12, %v2227_v10, 0.0 }
 0x3a4   :  { %v2285_v62 = vadd.f32 %v2284_v36, %v2283_v53  ;;  %v2311_v38 = vsel %vm1772_vm12, %v2233_v24, 0.0  ;;  %v2288_v26 = vsel %vm1772_vm12, %v2221_v45, 0.0  ;;  %v2301_v11 = vsel %vm1772_vm12, %v2228_v60, 0.0 }
 0x3a5   :  { %v2662_v61 = vpack.c.bf16 %v2632_v14, %v2631_v29  ;;  %v2300_v3 = vadd.f32 %v2299_v25, %v2298_v27  ;;  %v2312_v6 = vsel %vm1772_vm12, %v2234_v0, 0.0  ;;  %v2290_v29 = vsel %vm1772_vm12, %v2222_v9, 0.0  ;;  %v16300_v14 = vld [vmem:[#allocation143_spill] sm:$0xff] }
 0x3a6   :  { %v2287_v46 = vadd.f32 %v2286_v34, %v2285_v62  ;;  %v2313_v12 = vadd.f32 %v2312_v6, %v2311_v38  ;;  %v2303_v41 = vsel %vm1772_vm12, %v2229_v17, 0.0  ;;  %v2314_v10 = vsel %vm1772_vm12, %v2235_v57, 0.0  ;;  %v7668_v25 = vld [vmem:[%s11207_s6 + $0x8] sm:$0xff]  }
 0x3a7   :  { %7450 = vmatprep.subr.bf16.mxu0 %v2662_v61  ;;  %v2302_v16 = vadd.f32 %v2301_v11, %v2300_v3  ;;  %v2326_v48 = vsel %vm1772_vm12, %v2241_v52, 0.0  ;;  %v2327_v24 = vsel %vm1772_vm12, %v2242_v47, 0.0  ;;  %v2292_v60 = vsel %vm1772_vm12, %v11715_v2, 0.0 }
 0x3a8   :  { %7451 = vmatpush3.bf16.msra.mxu0 %v2662_v61  ;;  %v2289_v20 = vadd.f32 %v2288_v26, %v2287_v46  ;;  %v2315_v45 = vadd.f32 %v2314_v10, %v2313_v12  ;;  %v2328_v23 = vadd.f32 %v2327_v24, %v2326_v48  ;;  %v2305_v0 = vsel %vm1772_vm12, %v2230_v8, 0.0  ;;  %v16305_v46 = vld [vmem:[#allocation10_spill] sm:$0xff]  ;;  %v16310_v24 = vld [vmem:[#allocation23_spill] sm:$0xff] }
 0x3a9   :  { %v2304_v56 = vadd.f32 %v2303_v41, %v2302_v16  ;;  %v2316_v9 = vsel %vm1772_vm12, %v2236_v44, 0.0  ;;  %v2329_v63 = vsel %vm1772_vm12, %v2243_v31, 0.0  ;;  %v2294_v40 = vsel %vm1772_vm12, %v11719_v50, 0.0  ;;  %v16306_v26 = vld [vmem:[#allocation14_spill] sm:$0xff]  ;;  %v16308_v16 = vld [vmem:[#allocation20_spill] sm:$0xff]  ;;  %v16309_v41 = vld [vmem:[#allocation11_spill] sm:$0xff] }
 0x3aa   :  { %v2291_v22 = vadd.f32 %v2290_v29, %v2289_v20  ;;  %v2317_v57 = vadd.f32 %v2316_v9, %v2315_v45  ;;  %v2330_v59 = vadd.f32 %v2329_v63, %v2328_v23  ;;  %v2307_v28 = vsel %vm1772_vm12, %v11735_v7, 0.0  ;;  %v16307_v20 = vld [vmem:[#allocation27_spill] sm:$0xff] }
 0x3ab   :  { %v2306_v37 = vadd.f32 %v2305_v0, %v2304_v56  ;;  %v2318_v52 = vsel %vm1772_vm12, %v2237_v30, 0.0  ;;  %v2331_v2 = vsel %vm1772_vm12, %v2244_v4, 0.0  ;;  %v2309_v31 = vsel %vm1772_vm12, %v11739_v54, 0.0  ;;  %v16311_v56 = vld [vmem:[#allocation24_spill] sm:$0xff]  ;;  %v16312_v0 = vld [vmem:[#allocation22_spill] sm:$0xff] }
 0x3ac   :  { %v2293_v17 = vadd.f32 %v2292_v60, %v2291_v22  ;;  %v2319_v21 = vadd.f32 %v2318_v52, %v2317_v57  ;;  %v2332_v44 = vadd.f32 %v2331_v2, %v2330_v59  ;;  %v2320_v42 = vsel %vm1772_vm12, %v2238_v15, 0.0 }
 0x3ad   :  { %v2308_v8 = vadd.f32 %v2307_v28, %v2306_v37  ;;  %v2333_v49 = vsel %vm1772_vm12, %v2245_v39, 0.0  ;;  %v2322_v30 = vsel %vm1772_vm12, %v11756_v18, 0.0  ;;  %v2335_v4 = vsel %vm1772_vm12, %v2246_v1, 0.0  ;;  %v16314_v28 = vld [vmem:[#allocation15_spill] sm:$0xff] }
 0x3ae   :  { %v2295_v47 = vadd.f32 %v2294_v40, %v2293_v17  ;;  %v2321_v50 = vadd.f32 %v2320_v42, %v2319_v21  ;;  %v2334_v58 = vadd.f32 %v2333_v49, %v2332_v44  ;;  %v2324_v15 = vsel %vm1772_vm12, %v11760_v35, 0.0  ;;  %v7669_v35 = vld [vmem:[%s11207_s6 + $0x10] sm:$0xff]   ;;  %v16315_v21 = vld [vmem:[#allocation18_spill] sm:$0xff]  ;;  %v16317_v49 = vld [vmem:[#allocation13_spill] sm:$0xff] }
 0x3af   :  { %v2310_v32 = vadd.f32 %v2309_v31, %v2308_v8  ;;  %v2337_v39 = vsel %vm1772_vm12, %v11777_v13, 0.0  ;;  %v2339_v18 = vsel %vm1772_vm12, %v11781_v33, 0.0  ;;  %v7670_v13 = vld [vmem:[%s11207_s6 + $0x18] sm:$0xff]   ;;  %vm15689_vm14 = vcmask 130048   ;;  %v16313_v17 = vld [vmem:[#allocation12_spill] sm:$0xff] }
 0x3b0   :  { %v2605_v7 = vmul.f32 %v16300_v14, %v2295_v47  ;;  %v2323_v53 = vadd.f32 %v2322_v30, %v2321_v50  ;;  %v2336_v36 = vadd.f32 %v2335_v4, %v2334_v58  ;;  %v16316_v31 = vld [vmem:[#allocation21_spill] sm:$0xff]  ;;  %v16318_v58 = vld [vmem:[#allocation16_spill] sm:$0xff] }
 0x3b1   :  { %v2606_v54 = vmul.f32 %v11666_v43, %v2310_v32 }
 0x3b2   :  { %v2325_v55 = vadd.f32 %v2324_v15, %v2323_v53  ;;  %v2338_v19 = vadd.f32 %v2337_v39, %v2336_v36  ;;  %v16320_v36 = vld [vmem:[#allocation17_spill] sm:$0xff] }
 0x3b3   :  { %v2629_v61 = vcombine.low %v2605_v7, %v2606_v54  ;;  %v16319_v7 = vld [vmem:[#allocation19_spill] sm:$0xff] }
 0x3b4   :  { %v2340_v1 = vadd.f32 %v2339_v18, %v2338_v19  ;;  %v2607_v62 = vmul.f32 %v11673_v51, %v2325_v55  ;;  %v7671_v51 = vld [vmem:[%s11836_s10] sm:$0xff]  }
 0x3b6   :  { %v2608_v27 = vmul.f32 %v11678_v5, %v2340_v1 }
 0x3b8   :  { %v2630_v34 = vcombine.low %v2607_v62, %v2608_v27 }
 0x3ba   :  { %v2661_v43 = vpack.c.bf16 %v2630_v34, %v2629_v61 }
 0x3bc   :  { %7452 = vmatprep.subr.bf16.mxu0 %v2661_v43 }
 0x3bd   :  { %7453 = vmatpush3.bf16.msra.mxu0 %v2661_v43 }
 0x3c0   :  { %7455 = vmatmul.mubr.msk.bf16.vlgmr.msra.gmra.mxu0 %vm16301_vm15, %v7668_v25  ;;  %vm16387_vm15 = vmmov %vm16203_vm0 }
 0x3c1   :  { %7458 = vmatprep.mubr.msk.bf16.mxu0 %vm16302_vm4, %v7669_v35  ;;  %vm16388_vm4 = vmmov %vm16203_vm0 }
 0x3c8   :  { %7459 = vmatmul.mubr.msk.bf16.gmra.mxu0 %vm16303_vm1, %v7670_v13  ;;  %vm16389_vm1 = vmmov %vm16203_vm0 }
 0x3c9   :  { %7470 = vmatprep.mubr.msk.bf16.mxu0 %vm16304_vm3, %v7671_v51  ;;  %vm16390_vm3 = vmmov %vm16203_vm0 }
 0x480   :  { %v7456_v5 = vpop.f32.mrf.mxu0 }
 0x481   :  { %v2788_v11 = vadd.f32 %v7456_v5, %v16306_v26 }
 0x482   :  { %v2779_v33 = vpop.f32.mrf.mxu0 }
 0x483   :  { %v2780_v3 = vadd.f32 %v2779_v33, %v16305_v46  ;;  %v2812_v22 = vadd.f32 %v2788_v11, %v16310_v24 }
 0x484   :  { %v7457_v38 = vpop.f32.mrf.mxu0 }
 0x485   :  { %v2810_v29 = vadd.f32 %v2780_v3, %v16307_v20  ;;  %v2791_v12 = vadd.f32 %v7457_v38, %v16308_v16  ;;  %v2822_v40 = vsel %vm15689_vm14, %v2812_v22, 0.0 }
 0x486   :  { %v2782_v6 = vpop.f32.mrf.mxu0 }
 0x487   :  { %v2783_v10 = vadd.f32 %v2782_v6, %v16309_v41  ;;  %v2819_v60 = vsel %vm15689_vm14, %v2810_v29, 0.0  ;;  %v2813_v9 = vadd.f32 %v2791_v12, %v16312_v0 }
 0x488   :  { %v7460_v48 = vpop.f32.mrf.mxu0 }
 0x489   :  { %v2811_v45 = vadd.f32 %v2783_v10, %v16311_v56  ;;  %v2804_v52 = vadd.f32 %v7460_v48, %v16314_v28  ;;  %v2824_v8 = vsel %vm15689_vm14, %v2813_v9, 0.0 }
 0x48a   :  { %v2795_v23 = vpop.f32.mrf.mxu0 }
 0x48b   :  { %v2820_v63 = vsel %vm15689_vm14, %v2811_v45, 0.0  ;;  %v2796_v37 = vadd.f32 %v2795_v23, %v16313_v17  ;;  %v2816_v14 = vadd.f32 %v2804_v52, %v16318_v58 }
 0x48c   :  { %v2821_v57 = vadd.f32 %v2820_v63, %v2819_v60  ;;  %v7461_v59 = vpop.f32.mrf.mxu0 }
 0x48d   :  { %v2814_v44 = vadd.f32 %v2796_v37, %v16315_v21  ;;  %v2807_v42 = vadd.f32 %v7461_v59, %v16316_v31  ;;  %v2837_v19 = vsel %vm15689_vm14, %v2816_v14, 0.0 }
 0x48e   :  { %v2823_v2 = vadd.f32 %v2822_v40, %v2821_v57  ;;  %v2798_v47 = vpop.f32.mrf.mxu0 }
 0x48f   :  { %v2799_v32 = vadd.f32 %v2798_v47, %v16317_v49  ;;  %v2834_v53 = vsel %vm15689_vm14, %v2814_v44, 0.0  ;;  %v2817_v54 = vadd.f32 %v2807_v42, %v16320_v36  ;;  %v16321_v36 = vld [vmem:[#allocation33_spill] sm:$0xff] }
 0x490   :  { %v2825_v50 = vadd.f32 %v2824_v8, %v2823_v2 }
 0x491   :  { %v2815_v30 = vadd.f32 %v2799_v32, %v16319_v7  ;;  %v2839_v1 = vsel %vm15689_vm14, %v2817_v54, 0.0 }
 0x492   :  { %v2826_v4 = vrot.slane %v2825_v50, 4 }
 0x493   :  { %v2835_v15 = vsel %vm15689_vm14, %v2815_v30, 0.0 }
 0x494   :  { %v2827_v39 = vadd.f32 %v2826_v4, %v2825_v50  ;;  %v2836_v55 = vadd.f32 %v2835_v15, %v2834_v53  ;;  %v16322_v15 = vld [vmem:[#allocation31_spill] sm:$0xff] }
 0x496   :  { %v2828_v61 = vrot.slane %v2827_v39, 2  ;;  %v2838_v18 = vadd.f32 %v2837_v19, %v2836_v55  ;;  %v16323_v55 = vld [vmem:[#allocation28_spill] sm:$0xff] }
 0x498   :  { %v2829_v62 = vadd.f32 %v2828_v61, %v2827_v39  ;;  %v2840_v27 = vadd.f32 %v2839_v1, %v2838_v18  ;;  %v16324_v61 = vld [vmem:[#allocation29_spill] sm:$0xff] }
 0x499   :  { %v16325_v1 = vld [vmem:[#allocation25_spill] sm:$0xff] }
 0x49a   :  { %v2830_v34 = vrot.slane %v2829_v62, 1  ;;  %v2841_v43 = vrot.slane %v2840_v27, 4 }
 0x49c   :  { %v2842_v25 = vadd.f32 %v2841_v43, %v2840_v27  ;;  %v2831_v35 = vadd.f32 %v2830_v34, %v2829_v62  ;;  %v16326_v27 = vld [vmem:[#allocation26_spill] sm:$0xff]  ;;  %v16327_v43 = vld [vmem:[#allocation32_spill] sm:$0xff] }
 0x49e   :  { %v2843_v13 = vrot.slane %v2842_v25, 2  ;;  %v2833_v5 = vmul.f32 0.03125, %v2831_v35 }
 0x4a0   :  { %v2844_v51 = vadd.f32 %v2843_v13, %v2842_v25  ;;  %v2849_v3 = vsub.f32 %v2811_v45, %v2833_v5  ;;  %v2848_v38 = vsub.f32 %v2810_v29, %v2833_v5  ;;  %v2850_v26 = vsub.f32 %v2812_v22, %v2833_v5  ;;  %v16328_v13 = vld [vmem:[#allocation30_spill] sm:$0xff] }
 0x4a1   :  { %v2851_v6 = vsub.f32 %v2813_v9, %v2833_v5 }
 0x4a2   :  { %v2845_v33 = vrot.slane %v2844_v51, 1  ;;  %v2857_v10 = vmul.f32 %v2849_v3, %v2849_v3  ;;  %v2856_v48 = vmul.f32 %v2848_v38, %v2848_v38  ;;  %v2858_v24 = vmul.f32 %v2850_v26, %v2850_v26 }
 0x4a3   :  { %v2859_v63 = vmul.f32 %v2851_v6, %v2851_v6 }
 0x4a4   :  { %v2846_v46 = vadd.f32 %v2845_v33, %v2844_v51 }
 0x4a6   :  { %v2847_v11 = vmul.f32 0.03125, %v2846_v46 }
 0x4a8   :  { %v2852_v20 = vsub.f32 %v2814_v44, %v2847_v11  ;;  %v2853_v16 = vsub.f32 %v2815_v30, %v2847_v11  ;;  %v2854_v12 = vsub.f32 %v2816_v14, %v2847_v11  ;;  %v2855_v41 = vsub.f32 %v2817_v54, %v2847_v11 }
 0x4aa   :  { %v2860_v56 = vmul.f32 %v2852_v20, %v2852_v20  ;;  %v2861_v23 = vmul.f32 %v2853_v16, %v2853_v16  ;;  %v2862_v60 = vmul.f32 %v2854_v12, %v2854_v12  ;;  %v2863_v0 = vmul.f32 %v2855_v41, %v2855_v41 }
 0x4ac   :  { %v2864_v17 = vadd.f32 %v2860_v56, %v2856_v48  ;;  %v2865_v37 = vadd.f32 %v2861_v23, %v2857_v10  ;;  %v2866_v57 = vadd.f32 %v2862_v60, %v2858_v24  ;;  %v2867_v45 = vadd.f32 %v2863_v0, %v2859_v63  ;;  %v16330_v48 = vld [vmem:[#allocation35_spill] sm:$0xff]  ;;  %v16331_v56 = vld [vmem:[#allocation37_spill] sm:$0xff]  ;;  %v16332_v0 = vld [vmem:[#allocation36_spill] sm:$0xff] }
 0x4ae   :  { %v2868_v29 = vsel %vm15689_vm14, %v2864_v17, 0.0  ;;  %v2869_v22 = vsel %vm15689_vm14, %v2865_v37, 0.0  ;;  %v2871_v59 = vsel %vm15689_vm14, %v2866_v57, 0.0  ;;  %v2873_v28 = vsel %vm15689_vm14, %v2867_v45, 0.0  ;;  %v16333_v57 = vld [vmem:[#allocation38_spill] sm:$0xff] }
 0x4af   :  { %v2870_v9 = vadd.f32 %v2869_v22, %v2868_v29  ;;  %v16334_v22 = vld [vmem:[#allocation39_spill] sm:$0xff] }
 0x4b1   :  { %v2872_v40 = vadd.f32 %v2871_v59, %v2870_v9 }
 0x4b3   :  { %v2874_v52 = vadd.f32 %v2873_v28, %v2872_v40 }
 0x4b5   :  { %v2875_v2 = vrot.slane %v2874_v52, 4 }
 0x4b7   :  { %v2876_v47 = vadd.f32 %v2875_v2, %v2874_v52  ;;  %v16335_v52 = vld [vmem:[#allocation40_spill] sm:$0xff] }
 0x4b9   :  { %v2877_v8 = vrot.slane %v2876_v47, 2 }
 0x4bb   :  { %v2878_v21 = vadd.f32 %v2877_v8, %v2876_v47  ;;  %v16336_v47 = vld [vmem:[#allocation41_spill] sm:$0xff] }
 0x4bd   :  { %v2879_v44 = vrot.slane %v2878_v21, 1 }
 0x4bf   :  { %v2880_v31 = vadd.f32 %v2879_v44, %v2878_v21  ;;  %v7672_v44 = vld [vmem:[%s11836_s10 + $0x8] sm:$0xff]  }
 0x4c1   :  { %v2881_v42 = vmul.f32 0.032258064, %v2880_v31  ;;  %v7673_v31 = vld [vmem:[%s11836_s10 + $0x10] sm:$0xff]  }
 0x4c3   :  { %7985 = vrsqrt.f32 %v2881_v42  ;;  %v7674_v42 = vld [vmem:[%s11836_s10 + $0x18] sm:$0xff]  }
 0x4d0   :  { %v7986_v49 = vpop.eup %7985 }
 0x4d1   :  { %v2888_v32 = vmul.f32 %v7986_v49, %v2853_v16  ;;  %v2885_v50 = vmul.f32 %v7986_v49, %v2850_v26  ;;  %v2886_v58 = vmul.f32 %v7986_v49, %v2851_v6  ;;  %v2889_v14 = vmul.f32 %v7986_v49, %v2854_v12 }
 0x4d2   :  { %v2890_v7 = vmul.f32 %v7986_v49, %v2855_v41  ;;  %v2883_v30 = vmul.f32 %v7986_v49, %v2848_v38  ;;  %v2884_v4 = vmul.f32 %v7986_v49, %v2849_v3  ;;  %v2887_v53 = vmul.f32 %v7986_v49, %v2852_v20  ;;  %v16329_v41 = vld [vmem:[#allocation34_spill] sm:$0xff] }
 0x4d3   :  { %v2944_v54 = vmul.f32 %v16321_v36, %v2888_v32  ;;  %v2956_v39 = vmul.f32 %v16322_v15, %v2888_v32  ;;  %v2953_v19 = vmul.f32 %v16323_v55, %v2885_v50  ;;  %v2954_v18 = vmul.f32 %v16324_v61, %v2886_v58  ;;  %v7675_v49 = vld [vmem:[%s11836_s10 + $0x20] sm:$0xff]   ;;  %v7676_v32 = vld [vmem:[%s11836_s10 + $0x28] sm:$0xff]  }
 0x4d4   :  { %v2957_v62 = vmul.f32 %v16325_v1, %v2889_v14  ;;  %v2958_v34 = vmul.f32 %v16326_v27, %v2890_v7  ;;  %v2951_v25 = vmul.f32 %v16327_v43, %v2883_v30  ;;  %v2952_v35 = vmul.f32 %v16321_v36, %v2884_v4 }
 0x4d5   :  { %v2955_v51 = vmul.f32 %v16328_v13, %v2887_v53  ;;  %v2921_v5 = vmul.f32 %v16325_v1, %v2885_v50  ;;  %v2922_v33 = vmul.f32 %v16326_v27, %v2886_v58  ;;  %v2945_v46 = vmul.f32 %v16323_v55, %v2889_v14  ;;  %v7677_v50 = vld [vmem:[%s11836_s10 + $0x30] sm:$0xff]   ;;  %v7678_v58 = vld [vmem:[%s11836_s10 + $0x38] sm:$0xff]   ;;  %v7679_v14 = vld [vmem:[%s11933_s14] sm:$0xff]  }
 0x4d6   :  { %v2961_v3 = vadd.f32 %v2957_v62, %v2953_v19  ;;  %v2962_v38 = vadd.f32 %v2958_v34, %v2954_v18  ;;  %v2960_v26 = vadd.f32 %v2956_v39, %v2952_v35  ;;  %v2946_v11 = vmul.f32 %v16324_v61, %v2890_v7  ;;  %7502 = vmatprep.mubr.bf16.mxu1 %v7679_v14  ;;  %v16344_v27 = vld [vmem:[#allocation42_spill] sm:$0xff] }
 0x4d7   :  { %v2959_v6 = vadd.f32 %v2955_v51, %v2951_v25  ;;  %v2949_v20 = vsub.f32 %v2921_v5, %v2945_v46  ;;  %v2919_v16 = vmul.f32 %v16328_v13, %v2883_v30  ;;  %v2920_v12 = vmul.f32 %v16322_v15, %v2884_v4  ;;  %v16345_v25 = vld [vmem:[#allocation44_spill] sm:$0xff]  ;;  %v16346_v13 = vld [vmem:[#allocation43_spill] sm:$0xff] }
 0x4d8   :  { %v11884_v10 = vadd.f32 %v16329_v41, %v2961_v3  ;;  %v11887_v24 = vadd.f32 %v16330_v48, %v2962_v38  ;;  %v11890_v23 = vadd.f32 %v16331_v56, %v2960_v26  ;;  %v2950_v60 = vsub.f32 %v2922_v33, %v2946_v11  ;;  %v16347_v33 = vld [vmem:[#allocation47_spill] sm:$0xff]  ;;  %v16348_v26 = vld [vmem:[#allocation45_spill] sm:$0xff] }
 0x4d9   :  { %v11893_v63 = vadd.f32 %v16332_v0, %v2959_v6  ;;  %v2943_v17 = vmul.f32 %v16327_v43, %v2887_v53  ;;  %v11899_v45 = vadd.f32 %v16333_v57, %v2949_v20  ;;  %v2948_v40 = vsub.f32 %v2920_v12, %v2944_v54  ;;  %v16349_v6 = vld [vmem:[#allocation46_spill] sm:$0xff]  ;;  %v16350_v56 = vld [vmem:[#allocation49_spill] sm:$0xff] }
 0x4da   :  { %v3038_v37 = vpack.c.bf16 %v11887_v24, %v11884_v10  ;;  %v11904_v9 = vadd.f32 %v16334_v22, %v2950_v60 }
 0x4db   :  { %v3037_v29 = vpack.c.bf16 %v11890_v23, %v11893_v63  ;;  %v2947_v59 = vsub.f32 %v2919_v16, %v2943_v17  ;;  %v11912_v8 = vadd.f32 %v16336_v47, %v2948_v40 }
 0x4dc   :  { %7462 = vmatprep.subr.bf16.mxu0 %v3038_v37  ;;  %v3036_v28 = vpack.c.bf16 %v11904_v9, %v11899_v45 }
 0x4dd   :  { %7463 = vmatpush3.bf16.msra.mxu0 %v3038_v37  ;;  %v11909_v2 = vadd.f32 %v16335_v52, %v2947_v59  ;;  %v16351_v37 = vld [vmem:[#allocation48_spill] sm:$0xff] }
 0x4de   :  { %7464 = vmatprep.subr.bf16.mxu0 %v3037_v29 }
 0x4df   :  { %v3035_v21 = vpack.c.bf16 %v11912_v8, %v11909_v2 }
 0x4e1   :  { %7465 = vmatpush3.bf16.msra.mxu0 %v3037_v29  ;;  %v16352_v29 = vld [vmem:[#allocation51_spill] sm:$0xff] }
 0x4e2   :  { %7466 = vmatprep.subr.bf16.mxu0 %v3036_v28 }
 0x4e5   :  { %7467 = vmatpush3.bf16.msra.mxu0 %v3036_v28  ;;  %v16353_v28 = vld [vmem:[#allocation50_spill] sm:$0xff] }
 0x4e6   :  { %7468 = vmatprep.subr.bf16.mxu0 %v3035_v21 }
 0x4e9   :  { %7469 = vmatpush3.bf16.msra.mxu0 %v3035_v21 }
 0x4ec   :  { %7471 = vmatmul.mubr.msk.bf16.vlgmr.msra.gmra.mxu0 %vm16337_vm2, %v7672_v44  ;;  %v16354_v44 = vld [vmem:[#allocation53_spill] sm:$0xff]  ;;  %vm16391_vm2 = vmmov %vm16203_vm0 }
 0x4ed   :  { %7474 = vmatprep.mubr.msk.bf16.mxu0 %vm16338_vm7, %v7673_v31  ;;  %vm16392_vm7 = vmmov %vm16203_vm0 }
 0x4f4   :  { %7475 = vmatmul.mubr.msk.bf16.gmra.mxu0 %vm16339_vm10, %v7674_v42  ;;  %vm16393_vm10 = vmmov %vm16203_vm0 }
 0x4f5   :  { %7478 = vmatprep.mubr.msk.bf16.mxu0 %vm16340_vm9, %v7675_v49  ;;  %vm16394_vm9 = vmmov %vm16203_vm0 }
 0x4fc   :  { %7479 = vmatmul.mubr.msk.bf16.gmra.mxu0 %vm16341_vm8, %v7676_v32  ;;  %v16355_v32 = vld [vmem:[#allocation52_spill] sm:$0xff]  ;;  %vm16395_vm8 = vmmov %vm16203_vm0 }
 0x4fd   :  { %7482 = vmatprep.mubr.msk.bf16.mxu0 %vm16342_vm11, %v7677_v50 }
 0x504   :  { %7483 = vmatmul.mubr.msk.bf16.gmra.mxu0 %vm16343_vm13, %v7678_v58  ;;  %v16356_v58 = vld [vmem:[#allocation55_spill] sm:$0xff] }
 0x5ac   :  { %v7472_v7 = vpop.f32.mrf.mxu0 }
 0x5ae   :  { %v3233_v30 = vpop.f32.mrf.mxu0 }
 0x5b0   :  { %v7473_v4 = vpop.f32.mrf.mxu0 }
 0x5b1   :  { %v3245_v14 = vadd.f32 %v7473_v4, %v16356_v58 }
 0x5b2   :  { %v3236_v53 = vpop.f32.mrf.mxu0 }
 0x5b4   :  { %v7476_v36 = vpop.f32.mrf.mxu0 }
 0x5b5   :  { %v3258_v52 = vadd.f32 %v7476_v36, %v16353_v28  ;;  %v3299_v36 = vmax.f32 %v3245_v14, 0.0  ;;  %v16366_v28 = vld [vmem:[#allocation63_spill] sm:$0xff] }
 0x5b6   :  { %v3249_v54 = vpop.f32.mrf.mxu0 }
 0x5b7   :  { %v3302_v49 = vmax.f32 %v3258_v52, 0.0  ;;  %v3250_v50 = vadd.f32 %v3249_v54, %v16355_v32 }
 0x5b8   :  { %v7477_v15 = vpop.f32.mrf.mxu0 }
 0x5b9   :  { %v3261_v22 = vadd.f32 %v7477_v15, %v16352_v29  ;;  %v16365_v29 = vld [vmem:[#allocation60_spill] sm:$0xff] }
 0x5ba   :  { %v3252_v39 = vpop.f32.mrf.mxu0 }
 0x5bb   :  { %v3303_v21 = vmax.f32 %v3261_v22, 0.0  ;;  %v3253_v31 = vadd.f32 %v3252_v39, %v16354_v44  ;;  %v16367_v44 = vld [vmem:[#allocation65_spill] sm:$0xff] }
 0x5bc   :  { %v7480_v55 = vpop.f32.mrf.mxu0 }
 0x5bd   :  { %v3274_v20 = vadd.f32 %v7480_v55, %v16349_v6  ;;  %v3323_v55 = vpack.c.bf16 %v3303_v21, %v3302_v49  ;;  %v3301_v15 = vmax.f32 %v3253_v31, 0.0 }
 0x5be   :  { %v3265_v19 = vpop.f32.mrf.mxu0 }
 0x5bf   :  { %v3306_v17 = vmax.f32 %v3274_v20, 0.0  ;;  %v3266_v57 = vadd.f32 %v3265_v19, %v16351_v37  ;;  %v16357_v19 = vld [vmem:[#allocation54_spill] sm:$0xff]  ;;  %v16363_v20 = vld [vmem:[#allocation64_spill] sm:$0xff] }
 0x5c0   :  { %v7481_v61 = vpop.f32.mrf.mxu0 }
 0x5c1   :  { %v3277_v46 = vadd.f32 %v7481_v61, %v16347_v33  ;;  %v3304_v47 = vmax.f32 %v3266_v57, 0.0  ;;  %v3242_v61 = vadd.f32 %v7472_v7, %v16357_v19  ;;  %v16361_v33 = vld [vmem:[#allocation58_spill] sm:$0xff] }
 0x5c2   :  { %v3268_v18 = vpop.f32.mrf.mxu0 }
 0x5c3   :  { %v3307_v48 = vmax.f32 %v3277_v46, 0.0  ;;  %v3269_v60 = vadd.f32 %v3268_v18, %v16350_v56  ;;  %v3300_v18 = vmax.f32 %v3250_v50, 0.0 }
 0x5c4   :  { %v7484_v1 = vpop.f32.mrf.mxu0 }
 0x5c5   :  { %v3290_v34 = vadd.f32 %v7484_v1, %v16344_v27  ;;  %v3325_v59 = vpack.c.bf16 %v3307_v48, %v3306_v17  ;;  %v3305_v40 = vmax.f32 %v3269_v60, 0.0  ;;  %v16358_v1 = vld [vmem:[#allocation57_spill] sm:$0xff]  ;;  %v3322_v39 = vpack.c.bf16 %v3301_v15, %v3300_v18 }
 0x5c6   :  { %v3281_v62 = vpop.f32.mrf.mxu0  ;;  %v3298_v27 = vmax.f32 %v3242_v61, 0.0 }
 0x5c7   :  { %v3282_v35 = vadd.f32 %v3281_v62, %v16345_v25  ;;  %v3310_v3 = vmax.f32 %v3290_v34, 0.0  ;;  %v3324_v42 = vpack.c.bf16 %v3305_v40, %v3304_v47  ;;  %v3237_v62 = vadd.f32 %v3236_v53, %v16358_v1  ;;  %v16359_v34 = vld [vmem:[#allocation56_spill] sm:$0xff] }
 0x5c8   :  { %v7485_v43 = vpop.f32.mrf.mxu0  ;;  %v3234_v54 = vadd.f32 %v3233_v30, %v16359_v34  ;;  %v3321_v4 = vpack.c.bf16 %v3299_v36, %v3298_v27  ;;  %v7681_v53 = vld [vmem:[%s11933_s14 + $0x10] sm:$0xff]  }
 0x5c9   :  { %v3293_v51 = vadd.f32 %v7485_v43, %v16346_v13  ;;  %v3308_v16 = vmax.f32 %v3282_v35, 0.0  ;;  %v3297_v43 = vmax.f32 %v3237_v62, 0.0  ;;  %v7680_v35 = vld [vmem:[%s11933_s14 + $0x8] sm:$0xff]   ;;  %v7682_v13 = vld [vmem:[%s11933_s14 + $0x18] sm:$0xff]  }
 0x5ca   :  { %v3284_v5 = vpop.f32.mrf.mxu0  ;;  %v3296_v25 = vmax.f32 %v3234_v54, 0.0 }
 0x5cb   :  { %v3311_v38 = vmax.f32 %v3293_v51, 0.0  ;;  %v3285_v11 = vadd.f32 %v3284_v5, %v16348_v26  ;;  %v7683_v51 = vld [vmem:[%s8354_s25] sm:$0xff]  }
 0x5cc   :  { %v3320_v7 = vpack.c.bf16 %v3297_v43, %v3296_v25  ;;  %7518 = vmatprep.mubr.msk.bf16.mxu0 %vm16360_vm5, %v7683_v51 }
 0x5cd   :  { %v3327_v12 = vpack.c.bf16 %v3311_v38, %v3310_v3  ;;  %v3309_v41 = vmax.f32 %v3285_v11, 0.0  ;;  %v16362_v38 = vld [vmem:[#allocation62_spill] sm:$0xff] }
 0x5cf   :  { %v3326_v0 = vpack.c.bf16 %v3309_v41, %v3308_v16  ;;  %7486 = vmatprep.subr.bf16.mxu1 %v3327_v12 }
 0x5d0   :  { %7487 = vmatpush3.bf16.msra.mxu1 %v3327_v12  ;;  %v16364_v12 = vld [vmem:[#allocation59_spill] sm:$0xff] }
 0x5d1   :  { %7488 = vmatprep.subr.bf16.mxu1 %v3326_v0 }
 0x5d4   :  { %7489 = vmatpush3.bf16.msra.mxu1 %v3326_v0 }
 0x5d5   :  { %7490 = vmatprep.subr.bf16.mxu1 %v3325_v59 }
 0x5d8   :  { %7491 = vmatpush3.bf16.msra.mxu1 %v3325_v59 }
 0x5d9   :  { %7492 = vmatprep.subr.bf16.mxu1 %v3324_v42 }
 0x5dc   :  { %7493 = vmatpush3.bf16.msra.mxu1 %v3324_v42  ;;  %v16368_v42 = vld [vmem:[#allocation61_spill] sm:$0xff] }
 0x5dd   :  { %7494 = vmatprep.subr.bf16.mxu1 %v3323_v55 }
 0x5e0   :  { %7495 = vmatpush3.bf16.msra.mxu1 %v3323_v55 }
 0x5e1   :  { %7496 = vmatprep.subr.bf16.mxu1 %v3322_v39 }
 0x5e4   :  { %7497 = vmatpush3.bf16.msra.mxu1 %v3322_v39 }
 0x5e5   :  { %7498 = vmatprep.subr.bf16.mxu1 %v3321_v4 }
 0x5e8   :  { %7499 = vmatpush3.bf16.msra.mxu1 %v3321_v4 }
 0x5e9   :  { %7500 = vmatprep.subr.bf16.mxu1 %v3320_v7 }
 0x5ec   :  { %7501 = vmatpush3.bf16.msra.mxu1 %v3320_v7 }
 0x5ef   :  { %7503 = vmatmul.mubr.bf16.vlgmr.msra.gmra.mxu1 %v7680_v35 }
 0x5f0   :  { %7506 = vmatprep.mubr.bf16.mxu1 %v7681_v53 }
 0x5f7   :  { %7507 = vmatmul.mubr.bf16.gmra.mxu1 %v7682_v13 }
 0x6af   :  { %v7504_v30 = vpop.f32.mrf.mxu1 }
 0x6b0   :  { %v3443_v26 = vadd.f32 %v7504_v30, %v16362_v38 }
 0x6b1   :  { %v3434_v5 = vpop.f32.mrf.mxu1 }
 0x6b2   :  { %v3435_v46 = vadd.f32 %v3434_v5, %v16361_v33  ;;  %v3467_v56 = vadd.f32 %v3443_v26, %v11899_v45 }
 0x6b3   :  { %v7505_v3 = vpop.f32.mrf.mxu1 }
 0x6b4   :  { %v3465_v6 = vadd.f32 %v3435_v46, %v11909_v2  ;;  %v3446_v16 = vadd.f32 %v7505_v3, %v16363_v20  ;;  %v3476_v40 = vsel %vm15689_vm14, %v3467_v56, 0.0 }
 0x6b5   :  { %v3437_v11 = vpop.f32.mrf.mxu1 }
 0x6b6   :  { %v3438_v41 = vadd.f32 %v3437_v11, %v16364_v12  ;;  %v3473_v17 = vsel %vm15689_vm14, %v3465_v6, 0.0  ;;  %v3468_v37 = vadd.f32 %v3446_v16, %v11904_v9 }
 0x6b7   :  { %v7508_v48 = vpop.f32.mrf.mxu1 }
 0x6b8   :  { %v3466_v60 = vadd.f32 %v3438_v41, %v11912_v8  ;;  %v3459_v52 = vadd.f32 %v7508_v48, %v16366_v28  ;;  %v3478_v45 = vsel %vm15689_vm14, %v3468_v37, 0.0 }
 0x6b9   :  { %v3450_v0 = vpop.f32.mrf.mxu1 }
 0x6ba   :  { %v3474_v57 = vsel %vm15689_vm14, %v3466_v60, 0.0  ;;  %v3451_v22 = vadd.f32 %v3450_v0, %v16365_v29  ;;  %v3471_v32 = vadd.f32 %v3459_v52, %v11884_v10 }
 0x6bb   :  { %v3475_v59 = vadd.f32 %v3474_v57, %v3473_v17  ;;  %v7509_v2 = vpop.f32.mrf.mxu1 }
 0x6bc   :  { %v3469_v8 = vadd.f32 %v3451_v22, %v11893_v63  ;;  %v3462_v31 = vadd.f32 %v7509_v2, %v16367_v44  ;;  %v3490_v63 = vsel %vm15689_vm14, %v3471_v32, 0.0 }
 0x6bd   :  { %v3477_v47 = vadd.f32 %v3476_v40, %v3475_v59  ;;  %v3453_v21 = vpop.f32.mrf.mxu1 }
 0x6be   :  { %v3454_v9 = vadd.f32 %v3453_v21, %v16368_v42  ;;  %v3487_v14 = vsel %vm15689_vm14, %v3469_v8, 0.0  ;;  %v3472_v55 = vadd.f32 %v3462_v31, %v11887_v24 }
 0x6bf   :  { %v3479_v49 = vadd.f32 %v3478_v45, %v3477_v47 }
 0x6c0   :  { %v3470_v50 = vadd.f32 %v3454_v9, %v11890_v23  ;;  %v3492_v1 = vsel %vm15689_vm14, %v3472_v55, 0.0 }
 0x6c1   :  { %v3480_v58 = vrot.slane %v3479_v49, 4 }
 0x6c2   :  { %v3488_v15 = vsel %vm15689_vm14, %v3470_v50, 0.0 }
 0x6c3   :  { %v3481_v19 = vadd.f32 %v3480_v58, %v3479_v49  ;;  %v3489_v61 = vadd.f32 %v3488_v15, %v3487_v14  ;;  %v3647_v15 = vpop.permute.xlu0 %3646 }
 0x6c5   :  { %v3482_v18 = vrot.slane %v3481_v19, 2  ;;  %v3491_v36 = vadd.f32 %v3490_v63, %v3489_v61  ;;  %v16370_v63 = vld [vmem:[#allocation71_spill] sm:$0xff] }
 0x6c7   :  { %v3483_v62 = vadd.f32 %v3482_v18, %v3481_v19  ;;  %v3493_v39 = vadd.f32 %v3492_v1, %v3491_v36  ;;  %v16369_v19 = vld [vmem:[#allocation73_spill] sm:$0xff]  ;;  %v16371_v36 = vld [vmem:[#allocation68_spill] sm:$0xff] }
 0x6c9   :  { %v3484_v10 = vrot.slane %v3483_v62, 1  ;;  %v3494_v27 = vrot.slane %v3493_v39, 4 }
 0x6cb   :  { %v3495_v23 = vadd.f32 %v3494_v27, %v3493_v39  ;;  %v3485_v34 = vadd.f32 %v3484_v10, %v3483_v62  ;;  %v16372_v62 = vld [vmem:[#allocation69_spill] sm:$0xff]  ;;  %v16373_v10 = vld [vmem:[#allocation66_spill] sm:$0xff] }
 0x6cd   :  { %v3496_v54 = vrot.slane %v3495_v23, 2  ;;  %v3486_v43 = vmul.f32 0.03125, %v3485_v34 }
 0x6cf   :  { %v3497_v4 = vadd.f32 %v3496_v54, %v3495_v23  ;;  %v3502_v7 = vsub.f32 %v3466_v60, %v3486_v43  ;;  %v3501_v35 = vsub.f32 %v3465_v6, %v3486_v43  ;;  %v3503_v53 = vsub.f32 %v3467_v56, %v3486_v43  ;;  %v16374_v23 = vld [vmem:[#allocation67_spill] sm:$0xff]  ;;  %v16375_v54 = vld [vmem:[#allocation72_spill] sm:$0xff] }
 0x6d0   :  { %v3504_v51 = vsub.f32 %v3468_v37, %v3486_v43 }
 0x6d1   :  { %v3498_v24 = vrot.slane %v3497_v4, 1  ;;  %v3510_v3 = vmul.f32 %v3502_v7, %v3502_v7  ;;  %v3509_v38 = vmul.f32 %v3501_v35, %v3501_v35  ;;  %v3511_v26 = vmul.f32 %v3503_v53, %v3503_v53 }
 0x6d2   :  { %v3512_v41 = vmul.f32 %v3504_v51, %v3504_v51 }
 0x6d3   :  { %v3499_v25 = vadd.f32 %v3498_v24, %v3497_v4  ;;  %v16376_v24 = vld [vmem:[#allocation70_spill] sm:$0xff] }
 0x6d5   :  { %v3500_v13 = vmul.f32 0.03125, %v3499_v25 }
 0x6d7   :  { %v3505_v30 = vsub.f32 %v3469_v8, %v3500_v13  ;;  %v3506_v5 = vsub.f32 %v3470_v50, %v3500_v13  ;;  %v3507_v33 = vsub.f32 %v3471_v32, %v3500_v13  ;;  %v3508_v46 = vsub.f32 %v3472_v55, %v3500_v13  ;;  %v3662_v8 = vpop.permute.xlu1 %3661 }
 0x6d9   :  { %v3513_v11 = vmul.f32 %v3505_v30, %v3505_v30  ;;  %v3514_v20 = vmul.f32 %v3506_v5, %v3506_v5  ;;  %v3515_v16 = vmul.f32 %v3507_v33, %v3507_v33  ;;  %v3516_v12 = vmul.f32 %v3508_v46, %v3508_v46 }
 0x6db   :  { %v3517_v48 = vadd.f32 %v3513_v11, %v3509_v38  ;;  %v3518_v0 = vadd.f32 %v3514_v20, %v3510_v3  ;;  %v3519_v17 = vadd.f32 %v3515_v16, %v3511_v26  ;;  %v3520_v60 = vadd.f32 %v3516_v12, %v3512_v41  ;;  %v3652_v55 = vpop.permute.xlu1 %3651  ;;  %v16377_v26 = vld [vmem:[#allocation74_spill] sm:$0xff] }
 0x6dd   :  { %v3521_v6 = vsel %vm15689_vm14, %v3517_v48, 0.0  ;;  %v3522_v56 = vsel %vm15689_vm14, %v3518_v0, 0.0  ;;  %v3524_v57 = vsel %vm15689_vm14, %v3519_v17, 0.0  ;;  %v3526_v22 = vsel %vm15689_vm14, %v3520_v60, 0.0  ;;  %v3637_v48 = vpop.permute.xlu0 %3636 }
 0x6de   :  { %v3523_v37 = vadd.f32 %v3522_v56, %v3521_v6 }
 0x6df   :  { %v3642_v41 = vpop.permute.xlu1 %3641 }
 0x6e0   :  { %v3525_v29 = vadd.f32 %v3524_v57, %v3523_v37 }
 0x6e2   :  { %v3527_v59 = vadd.f32 %v3526_v22, %v3525_v29 }
 0x6e3   :  { %v3632_v22 = vpop.permute.xlu1 %3631 }
 0x6e4   :  { %v3528_v2 = vrot.slane %v3527_v59, 4 }
 0x6e6   :  { %v3529_v40 = vadd.f32 %v3528_v2, %v3527_v59  ;;  %v3627_v59 = vpop.permute.xlu0 %3626 }
 0x6e8   :  { %v3530_v28 = vrot.slane %v3529_v40, 2 }
 0x6ea   :  { %v3531_v52 = vadd.f32 %v3530_v28, %v3529_v40 }
 0x6ec   :  { %v3532_v47 = vrot.slane %v3531_v52, 1 }
 0x6ee   :  { %v3533_v21 = vadd.f32 %v3532_v47, %v3531_v52  ;;  %v7684_v47 = vld [vmem:[%s8354_s25 + $0x8] sm:$0xff]  }
 0x6f0   :  { %v3534_v45 = vmul.f32 0.032258064, %v3533_v21  ;;  %v7685_v21 = vld [vmem:[%s8354_s25 + $0x10] sm:$0xff]  }
 0x6f2   :  { %7987 = vrsqrt.f32 %v3534_v45  ;;  %v7686_v45 = vld [vmem:[%s8354_s25 + $0x18] sm:$0xff]  }
 0x6ff   :  { %v7988_v44 = vpop.eup %7987 }
 0x700   :  { %v3541_v31 = vmul.f32 %v7988_v44, %v3506_v5  ;;  %v3538_v42 = vmul.f32 %v7988_v44, %v3503_v53  ;;  %v3539_v9 = vmul.f32 %v7988_v44, %v3504_v51  ;;  %v3542_v49 = vmul.f32 %v7988_v44, %v3507_v33 }
 0x701   :  { %v3543_v32 = vmul.f32 %v7988_v44, %v3508_v46  ;;  %v3536_v50 = vmul.f32 %v7988_v44, %v3501_v35  ;;  %v3537_v58 = vmul.f32 %v7988_v44, %v3502_v7  ;;  %v3540_v14 = vmul.f32 %v7988_v44, %v3505_v30  ;;  %v7688_v44 = vld [vmem:[%s8354_s25 + $0x28] sm:$0xff]  }
 0x702   :  { %v3597_v61 = vmul.f32 %v16369_v19, %v3541_v31  ;;  %v3609_v18 = vmul.f32 %v16370_v63, %v3541_v31  ;;  %v3606_v1 = vmul.f32 %v16371_v36, %v3538_v42  ;;  %v3607_v39 = vmul.f32 %v16372_v62, %v3539_v9  ;;  %v7689_v31 = vld [vmem:[%s8354_s25 + $0x30] sm:$0xff]  }
 0x703   :  { %v3610_v27 = vmul.f32 %v16373_v10, %v3542_v49  ;;  %v3611_v34 = vmul.f32 %v16374_v23, %v3543_v32  ;;  %v3604_v4 = vmul.f32 %v16375_v54, %v3536_v50  ;;  %v3605_v43 = vmul.f32 %v16369_v19, %v3537_v58 }
 0x704   :  { %v3608_v25 = vmul.f32 %v16376_v24, %v3540_v14  ;;  %v3574_v7 = vmul.f32 %v16373_v10, %v3538_v42  ;;  %v3575_v35 = vmul.f32 %v16374_v23, %v3539_v9  ;;  %v3598_v53 = vmul.f32 %v16371_v36, %v3542_v49  ;;  %v7690_v42 = vld [vmem:[%s8354_s25 + $0x38] sm:$0xff]   ;;  %v7691_v9 = vld [vmem:[%s8354_s25 + $0x40] sm:$0xff]   ;;  %v7692_v49 = vld [vmem:[%s8354_s25 + $0x48] sm:$0xff]  }
 0x705   :  { %v3614_v13 = vadd.f32 %v3610_v27, %v3606_v1  ;;  %v3615_v51 = vadd.f32 %v3611_v34, %v3607_v39  ;;  %v3613_v30 = vadd.f32 %v3609_v18, %v3605_v43  ;;  %v3599_v5 = vmul.f32 %v16372_v62, %v3543_v32  ;;  %v7693_v32 = vld [vmem:[%s8354_s25 + $0x50] sm:$0xff]  }
 0x706   :  { %v3612_v33 = vadd.f32 %v3608_v25, %v3604_v4  ;;  %v3602_v46 = vsub.f32 %v3574_v7, %v3598_v53  ;;  %v3572_v3 = vmul.f32 %v16376_v24, %v3536_v50  ;;  %v3573_v38 = vmul.f32 %v16370_v63, %v3537_v58  ;;  %v7694_v50 = vld [vmem:[%s8354_s25 + $0x58] sm:$0xff]   ;;  %v3737_v58 = vpop.permute.xlu0 %3736 }
 0x707   :  { %v12001_v11 = vadd.f32 %v16377_v26, %v3614_v13  ;;  %v12003_v20 = vadd.f32 %v3662_v8, %v3615_v51  ;;  %v12005_v16 = vadd.f32 %v3652_v55, %v3613_v30  ;;  %v3603_v12 = vsub.f32 %v3575_v35, %v3599_v5  ;;  %v7687_v8 = vld [vmem:[%s8354_s25 + $0x20] sm:$0xff]   ;;  %s8290_s25 = smov 17  }
 0x708   :  { %v12007_v0 = vadd.f32 %v3647_v15, %v3612_v33  ;;  %v3596_v17 = vmul.f32 %v16375_v54, %v3540_v14  ;;  %v12012_v6 = vadd.f32 %v3637_v48, %v3602_v46  ;;  %v3601_v29 = vsub.f32 %v3573_v38, %v3597_v61  ;;  %v3742_v15 = vpop.permute.xlu1 %3741  ;;  %s14466_s16 = sld [smem:[%s15235_s0 + %s8290_s25]]  }
 0x709   :  { %16378 = vst [vmem:[#allocation155_spill] sm:$0xff] %v12001_v11  ;;  %16379 = vst [vmem:[#allocation157_spill] sm:$0xff] %v12003_v20  ;;  %v3699_v60 = vpack.c.bf16 %v12003_v20, %v12001_v11  ;;  %v12016_v37 = vadd.f32 %v3642_v41, %v3603_v12 }
 0x70a   :  { %16380 = vst [vmem:[#allocation153_spill] sm:$0xff] %v12005_v16  ;;  %16381 = vst [vmem:[#allocation120_spill] sm:$0xff] %v12007_v0  ;;  %v3698_v56 = vpack.c.bf16 %v12005_v16, %v12007_v0  ;;  %v3600_v57 = vsub.f32 %v3572_v3, %v3596_v17  ;;  %v12022_v28 = vadd.f32 %v3632_v22, %v3601_v29  ;;  %v3747_v14 = vpop.permute.xlu0 %3746 }
 0x70b   :  { %16382 = vst [vmem:[#allocation163_spill] sm:$0xff] %v12012_v6  ;;  %7510 = vmatprep.subr.bf16.mxu0 %v3699_v60  ;;  %16383 = vst [vmem:[#allocation148_spill] sm:$0xff] %v12016_v37  ;;  %v3697_v2 = vpack.c.bf16 %v12016_v37, %v12012_v6 }
 0x70c   :  { %7511 = vmatpush3.bf16.msra.mxu0 %v3699_v60  ;;  %v12020_v40 = vadd.f32 %v3627_v59, %v3600_v57  ;;  %16385 = vst [vmem:[#allocation158_spill] sm:$0xff] %v12022_v28  ;;  %v12050_v61 = vpop.permute.xlu1 %3796 }
 0x70d   :  { %7512 = vmatprep.subr.bf16.mxu0 %v3698_v56 }
 0x70e   :  { %16384 = vst [vmem:[#allocation109_spill] sm:$0xff] %v12020_v40  ;;  %v3696_v52 = vpack.c.bf16 %v12022_v28, %v12020_v40  ;;  %v12048_v55 = vpop.permute.xlu0 %3801 }
 0x710   :  { %7513 = vmatpush3.bf16.msra.mxu0 %v3698_v56  ;;  %v12054_v18 = vpop.permute.xlu1 %3806 }
 0x711   :  { %7514 = vmatprep.subr.bf16.mxu0 %v3697_v2 }
 0x712   :  { %v3727_v19 = vpop.permute.xlu0 %3726 }
 0x714   :  { %7515 = vmatpush3.bf16.msra.mxu0 %v3697_v2  ;;  %v3732_v10 = vpop.permute.xlu1 %3731 }
 0x715   :  { %7516 = vmatprep.subr.bf16.mxu0 %v3696_v52 }
 0x716   :  { %v12052_v63 = vpop.permute.xlu0 %3751 }
 0x718   :  { %7517 = vmatpush3.bf16.msra.mxu0 %v3696_v52  ;;  %v3787_v22 = vpop.permute.xlu1 %3786 }
 0x71a   :  { %v3792_v36 = vpop.permute.xlu0 %3791 }
 0x71b   :  { %7519 = vmatmul.mubr.msk.bf16.vlgmr.msra.gmra.mxu0 %vm16386_vm6, %v7684_v47 }
 0x71c   :  { %7522 = vmatprep.mubr.msk.bf16.mxu0 %vm16203_vm0, %v7685_v21  ;;  %v12126_v47 = vpop.permute.xlu1 %3811 }
 0x71e   :  { %v3757_v23 = vpop.permute.xlu0 %3756 }
 0x722   :  { %v3762_v51 = vpop.permute.xlu0 %3761 }
 0x723   :  { %7523 = vmatmul.mubr.msk.bf16.gmra.mxu0 %vm16387_vm15, %v7686_v45 }
 0x724   :  { %7526 = vmatprep.mubr.msk.bf16.mxu0 %vm16388_vm4, %v7687_v8 }
 0x72b   :  { %7527 = vmatmul.mubr.msk.bf16.gmra.mxu0 %vm16389_vm1, %v7688_v44 }
 0x72c   :  { %7530 = vmatprep.mubr.msk.bf16.mxu0 %vm16390_vm3, %v7689_v31 }
 0x733   :  { %7531 = vmatmul.mubr.msk.bf16.gmra.mxu0 %vm16391_vm2, %v7690_v42 }
 0x734   :  { %7534 = vmatprep.mubr.msk.bf16.mxu0 %vm16392_vm7, %v7691_v9 }
 0x73b   :  { %7535 = vmatmul.mubr.msk.bf16.gmra.mxu0 %vm16393_vm10, %v7692_v49 }
 0x73c   :  { %7538 = vmatprep.mubr.msk.bf16.mxu0 %vm16394_vm9, %v7693_v32 }
 0x743   :  { %7539 = vmatmul.mubr.msk.bf16.gmra.mxu0 %vm16395_vm8, %v7694_v50 }
 0x7db   :  { %v7520_v1 = vpop.f32.mrf.mxu0 }
 0x7dc   :  { %v12130_v8 = vadd.f32 %v7520_v1, %v3737_v58 }
 0x7dd   :  { %v3974_v62 = vpop.f32.mrf.mxu0 }
 0x7de   :  { %v12056_v27 = vadd.f32 %v3974_v62, %v3727_v19 }
 0x7df   :  { %v7521_v39 = vpop.f32.mrf.mxu0 }
 0x7e0   :  { %16396 = vst [vmem:[#allocation106_spill] sm:$0xff] %v12056_v27  ;;  %v12062_v43 = vcombine.high %v12056_v27, %v12056_v27  ;;  %v12132_v44 = vadd.f32 %v7521_v39, %v3742_v15  ;;  %v12152_v15 = vcombine.high %v12130_v8, %v12130_v8 }
 0x7e1   :  { %v3977_v34 = vpop.f32.mrf.mxu0 }
 0x7e2   :  { %v12058_v54 = vadd.f32 %v3977_v34, %v3732_v10  ;;  %16398 = vst [vmem:[#allocation146_spill] sm:$0xff] %v12062_v43  ;;  %v12156_v19 = vcombine.high %v12132_v44, %v12132_v44 }
 0x7e3   :  { %v7524_v4 = vpop.f32.mrf.mxu0 }
 0x7e4   :  { %16397 = vst [vmem:[#allocation128_spill] sm:$0xff] %v12058_v54  ;;  %v12066_v24 = vcombine.high %v12058_v54, %v12058_v54  ;;  %v3999_v25 = vadd.f32 %v7524_v4, %v3757_v23 }
 0x7e5   :  { %v3990_v7 = vpop.f32.mrf.mxu0 }
 0x7e6   :  { %16399 = vst [vmem:[#allocation8_spill] sm:$0xff] %v12066_v24  ;;  %v12069_v35 = vmul.f32 %v3999_v25, %v12056_v27  ;;  %v12072_v53 = vmul.f32 %v12062_v43, %v3999_v25  ;;  %v12075_v13 = vmul.f32 %v3999_v25, %v12058_v54  ;;  %v12078_v30 = vmul.f32 %v12066_v24, %v3999_v25 }
 0x7e7   :  { %v7525_v5 = vpop.f32.mrf.mxu0  ;;  %v12080_v33 = vadd.f32 %v3990_v7, %v3747_v14  ;;  %v12142_v49 = vcombine.high %v3999_v25, %v3999_v25  ;;  %v3817_v14 = vpop.permute.xlu1 %3816  ;;  %v12159_v62 = vmul.f32 %v3999_v25, %v12130_v8  ;;  %v12172_v23 = vmul.f32 %v12152_v15, %v3999_v25 }
 0x7e8   :  { %v12082_v46 = vadd.f32 %v7525_v5, %v3762_v51  ;;  %v12175_v34 = vmul.f32 %v3999_v25, %v12132_v44  ;;  %v12178_v4 = vmul.f32 %v12156_v19, %v3999_v25 }
 0x7e9   :  { %v12084_v3 = vpop.f32.mrf.mxu0  ;;  %v12088_v38 = vmul.f32 %v12080_v33, %v12056_v27  ;;  %v12092_v26 = vmul.f32 %v12062_v43, %v12080_v33  ;;  %v12096_v12 = vmul.f32 %v12080_v33, %v12058_v54  ;;  %v12100_v41 = vmul.f32 %v12066_v24, %v12080_v33  ;;  %16411 = vst [vmem:[#allocation130_spill] sm:$0xff] %v12142_v49 }
 0x7ea   :  { %v12106_v17 = vmul.f32 %v12082_v46, %v12056_v27  ;;  %v12110_v60 = vmul.f32 %v12062_v43, %v12082_v46  ;;  %v12114_v56 = vmul.f32 %v12082_v46, %v12058_v54  ;;  %v12118_v57 = vmul.f32 %v12066_v24, %v12082_v46 }
 0x7eb   :  { %v12102_v48 = vpop.f32.mrf.mxu0  ;;  %v12182_v7 = vmul.f32 %v12142_v49, %v12130_v8  ;;  %v12206_v20 = vmul.f32 %v12142_v49, %v12156_v19  ;;  %v12210_v16 = vmul.f32 %v12080_v33, %v12130_v8  ;;  %v12214_v11 = vcombine.high %v12082_v46, %v12082_v46 }
 0x7ec   :  { %16400 = vst [vmem:[#allocation79_spill] sm:$0xff] %v12102_v48  ;;  %16401 = vst [vmem:[#allocation147_spill] sm:$0xff] %v12106_v17 }
 0x7ed   :  { %16402 = vst [vmem:[#allocation4_spill] sm:$0xff] %v12110_v60  ;;  %16403 = vst [vmem:[#allocation84_spill] sm:$0xff] %v12114_v56  ;;  %v12120_v29 = vpop.f32.mrf.mxu0  ;;  %v12257_v56 = vmul.f32 %v12082_v46, %v12132_v44  ;;  %v12261_v60 = vadd.f32 %v12084_v3, %v12052_v63 }
 0x7ee   :  { %16404 = vst [vmem:[#allocation9_spill] sm:$0xff] %v12118_v57  ;;  %16405 = vst [vmem:[#allocation85_spill] sm:$0xff] %v12120_v29  ;;  %v12253_v57 = vmul.f32 %v12152_v15, %v12082_v46 }
 0x7ef   :  { %v12122_v59 = vpop.f32.mrf.mxu0  ;;  %16416 = vst [vmem:[#allocation121_spill] sm:$0xff] %v12182_v7  ;;  %16420 = vst [vmem:[#allocation81_spill] sm:$0xff] %v12206_v20  ;;  %v12237_v20 = vmul.f32 %v12152_v15, %v12080_v33  ;;  %v12249_v7 = vmul.f32 %v12082_v46, %v12130_v8  ;;  %v12288_v3 = vcombine.high %v12261_v60, %v12261_v60 }
 0x7f0   :  { %16406 = vst [vmem:[#allocation6_spill] sm:$0xff] %v12122_v59  ;;  %16421 = vst [vmem:[#allocation2_spill] sm:$0xff] %v12214_v11 }
 0x7f1   :  { %v12124_v2 = vpop.f32.mrf.mxu0  ;;  %16423 = vst [vmem:[#allocation82_spill] sm:$0xff] %v12237_v20  ;;  %16426 = vst [vmem:[#allocation129_spill] sm:$0xff] %v12249_v7 }
 0x7f2   :  { %16407 = vst [vmem:[#allocation86_spill] sm:$0xff] %v12124_v2  ;;  %16427 = vst [vmem:[#allocation95_spill] sm:$0xff] %v12253_v57  ;;  %v12272_v57 = vmul.f32 %v12156_v19, %v12082_v46 }
 0x7f3   :  { %v7532_v52 = vpop.f32.mrf.mxu0  ;;  %16428 = vst [vmem:[#allocation113_spill] sm:$0xff] %v12257_v56  ;;  %16429 = vst [vmem:[#allocation114_spill] sm:$0xff] %v12261_v60 }
 0x7f4   :  { %v12264_v17 = vadd.f32 %v7532_v52, %v12050_v61  ;;  %16430 = vst [vmem:[#allocation104_spill] sm:$0xff] %v12272_v57  ;;  %v12280_v61 = vmul.f32 %v12214_v11, %v12130_v8  ;;  %16434 = vst [vmem:[#allocation96_spill] sm:$0xff] %v12288_v3  ;;  %v12303_v52 = vmul.f32 %v12261_v60, %v12058_v54 }
 0x7f5   :  { %v4022_v21 = vpop.f32.mrf.mxu0 }
 0x7f6   :  { %v12128_v45 = vadd.f32 %v4022_v21, %v3787_v22  ;;  %v12192_v21 = vmul.f32 %v12142_v49, %v12152_v15  ;;  %16432 = vst [vmem:[#allocation165_spill] sm:$0xff] %v12280_v61  ;;  %16438 = vst [vmem:[#allocation167_spill] sm:$0xff] %v12303_v52 }
 0x7f7   :  { %v7533_v31 = vpop.f32.mrf.mxu0 }
 0x7f8   :  { %16408 = vst [vmem:[#allocation144_spill] sm:$0xff] %v12128_v45  ;;  %v12136_v42 = vcombine.high %v12128_v45, %v12128_v45  ;;  %v12140_v9 = vadd.f32 %v12128_v45, %v12056_v27  ;;  %16417 = vst [vmem:[#allocation145_spill] sm:$0xff] %v12192_v21  ;;  %v12245_v21 = vmul.f32 %v12156_v19, %v12080_v33 }
 0x7f9   :  { %v4025_v32 = vpop.f32.mrf.mxu0 }
 0x7fa   :  { %16409 = vst [vmem:[#allocation117_spill] sm:$0xff] %v12136_v42  ;;  %16410 = vst [vmem:[#allocation5_spill] sm:$0xff] %v12140_v9  ;;  %v12144_v50 = vadd.f32 %v4025_v32, %v3792_v36  ;;  %v12148_v58 = vadd.f32 %v12136_v42, %v12062_v43  ;;  %v12196_v32 = vcombine.high %v12080_v33, %v12080_v33 }
 0x7fb   :  { %v7536_v1 = vpop.f32.mrf.mxu0  ;;  %16425 = vst [vmem:[#allocation150_spill] sm:$0xff] %v12245_v21 }
 0x7fc   :  { %16412 = vst [vmem:[#allocation112_spill] sm:$0xff] %v12144_v50  ;;  %16413 = vst [vmem:[#allocation107_spill] sm:$0xff] %v12148_v58  ;;  %v12163_v36 = vcombine.high %v12144_v50, %v12144_v50  ;;  %v12167_v39 = vadd.f32 %v12144_v50, %v12058_v54  ;;  %v12169_v10 = vadd.f32 %v7536_v1, %v3817_v14 }
 0x7fd   :  { %16418 = vst [vmem:[#allocation118_spill] sm:$0xff] %v12196_v32  ;;  %v12202_v1 = vmul.f32 %v12142_v49, %v12132_v44  ;;  %v12276_v56 = vmul.f32 %v12196_v32, %v12130_v8  ;;  %v12284_v63 = vmul.f32 %v12196_v32, %v12152_v15  ;;  %v12323_v54 = vmul.f32 %v12261_v60, %v12132_v44 }
 0x7fe   :  { %16414 = vst [vmem:[#allocation125_spill] sm:$0xff] %v12163_v36  ;;  %16415 = vst [vmem:[#allocation80_spill] sm:$0xff] %v12167_v39  ;;  %v4185_v51 = vmul.f32 %v12169_v10, %v12128_v45  ;;  %v4193_v5 = vmul.f32 %v12136_v42, %v12169_v10  ;;  %v4201_v22 = vmul.f32 %v12169_v10, %v12144_v50 }
 0x7ff   :  { %v4209_v14 = vmul.f32 %v12163_v36, %v12169_v10  ;;  %16419 = vst [vmem:[#allocation126_spill] sm:$0xff] %v12202_v1  ;;  %v12218_v0 = vadd.f32 %v12163_v36, %v12066_v24  ;;  %v12221_v37 = vadd.f32 %v12169_v10, %v3999_v25  ;;  %v12241_v1 = vmul.f32 %v12080_v33, %v12132_v44 }
 0x800   :  { %v4329_v28 = vsub.f32 %v12069_v35, %v4185_v51  ;;  %v4337_v6 = vsub.f32 %v12072_v53, %v4193_v5  ;;  %v4345_v40 = vsub.f32 %v12075_v13, %v4201_v22  ;;  %16431 = vst [vmem:[#allocation131_spill] sm:$0xff] %v12276_v56  ;;  %16433 = vst [vmem:[#allocation77_spill] sm:$0xff] %v12284_v63 }
 0x801   :  { %16422 = vst [vmem:[#allocation127_spill] sm:$0xff] %v12218_v0  ;;  %v4353_v2 = vsub.f32 %v12078_v30, %v4209_v14  ;;  %v4265_v59 = vmul.f32 %v12221_v37, %v12140_v9  ;;  %v4273_v29 = vmul.f32 %v12221_v37, %v12148_v58  ;;  %v4281_v48 = vmul.f32 %v12221_v37, %v12167_v39 }
 0x802   :  { %v4289_v25 = vmul.f32 %v12221_v37, %v12218_v0  ;;  %16424 = vst [vmem:[#allocation7_spill] sm:$0xff] %v12241_v1  ;;  %16442 = vst [vmem:[#allocation164_spill] sm:$0xff] %v12323_v54 }
 0x803   :  { %v4393_v21 = vsub.f32 %v4265_v59, %v12069_v35  ;;  %v4401_v1 = vsub.f32 %v4273_v29, %v12072_v53  ;;  %v4409_v7 = vsub.f32 %v4281_v48, %v12075_v13  ;;  %v12292_v48 = vmul.f32 %v12261_v60, %v12056_v27 }
 0x804   :  { %v4417_v20 = vsub.f32 %v4289_v25, %v12078_v30  ;;  %v12296_v29 = vmul.f32 %v12062_v43, %v12261_v60  ;;  %v12299_v59 = vadd.f32 %v7533_v31, %v12048_v55  ;;  %v4537_v55 = vmul.f32 %v4345_v40, %v4345_v40  ;;  %v4038_v40 = vpop.f32.mrf.mxu0 }
 0x805   :  { %v4457_v35 = vsub.f32 %v4393_v21, %v4185_v51  ;;  %v4465_v53 = vsub.f32 %v4401_v1, %v4193_v5  ;;  %v4473_v13 = vsub.f32 %v4409_v7, %v4201_v22  ;;  %16435 = vst [vmem:[#allocation3_spill] sm:$0xff] %v12292_v48  ;;  %v12311_v7 = vmul.f32 %v12261_v60, %v12130_v8 }
 0x806   :  { %v4481_v30 = vsub.f32 %v4417_v20, %v4209_v14  ;;  %16436 = vst [vmem:[#allocation102_spill] sm:$0xff] %v12296_v29  ;;  %16437 = vst [vmem:[#allocation132_spill] sm:$0xff] %v12299_v59  ;;  %v12307_v20 = vmul.f32 %v12066_v24, %v12261_v60  ;;  %v12315_v51 = vcombine.high %v12264_v17, %v12264_v17 }
 0x807   :  { %16440 = vst [vmem:[#allocation133_spill] sm:$0xff] %v12311_v7  ;;  %v4521_v5 = vmul.f32 %v4329_v28, %v4329_v28  ;;  %v4529_v22 = vmul.f32 %v4337_v6, %v4337_v6  ;;  %v4545_v31 = vmul.f32 %v4353_v2, %v4353_v2  ;;  %v4585_v21 = vmul.f32 %v4457_v35, %v4457_v35 }
 0x808   :  { %16439 = vst [vmem:[#allocation76_spill] sm:$0xff] %v12307_v20  ;;  %v4593_v14 = vmul.f32 %v4465_v53, %v4465_v53  ;;  %v4601_v1 = vmul.f32 %v4473_v13, %v4473_v13  ;;  %v4609_v25 = vmul.f32 %v4481_v30, %v4481_v30  ;;  %v12319_v24 = vmul.f32 %v12152_v15, %v12261_v60 }
 0x809   :  { %v12327_v43 = vmul.f32 %v12156_v19, %v12261_v60  ;;  %v12331_v6 = vcombine.high %v12299_v59, %v12299_v59  ;;  %v12333_v28 = vadd.f32 %v4585_v21, %v4521_v5  ;;  %v12343_v13 = vadd.f32 %v12264_v17, %v12130_v8 }
 0x80a   :  { %16441 = vst [vmem:[#allocation99_spill] sm:$0xff] %v12319_v24  ;;  %v12335_v2 = vadd.f32 %v4593_v14, %v4529_v22  ;;  %v12337_v35 = vadd.f32 %v4601_v1, %v4537_v55  ;;  %v12339_v53 = vadd.f32 %v4609_v25, %v4545_v31  ;;  %v12347_v30 = vadd.f32 %v12315_v51, %v12152_v15 }
 0x80b   :  { %16443 = vst [vmem:[#allocation105_spill] sm:$0xff] %v12327_v43  ;;  %16444 = vst [vmem:[#allocation166_spill] sm:$0xff] %v12331_v6  ;;  %v12351_v27 = vmul.f32 %v12288_v3, %v12130_v8  ;;  %v12355_v5 = vmul.f32 %v12288_v3, %v12152_v15  ;;  %v12359_v22 = vadd.f32 %v12299_v59, %v12132_v44  ;;  %7989 = vrsqrt.f32 %v12333_v28 }
 0x80c   :  { %16445 = vst [vmem:[#allocation134_spill] sm:$0xff] %v12333_v28  ;;  %16446 = vst [vmem:[#allocation97_spill] sm:$0xff] %v12335_v2  ;;  %v12362_v55 = vadd.f32 %v4038_v40, %v12054_v18  ;;  %v12366_v31 = vmul.f32 %v12214_v11, %v12152_v15  ;;  %v12370_v21 = vmul.f32 %v12196_v32, %v12132_v44  ;;  %7991 = vrsqrt.f32 %v12335_v2  ;;  %v16482_v2 = vld [vmem:[#allocation127_spill] sm:$0xff] }
 0x80d   :  { %16447 = vst [vmem:[#allocation135_spill] sm:$0xff] %v12337_v35  ;;  %16448 = vst [vmem:[#allocation136_spill] sm:$0xff] %v12339_v53  ;;  %v12374_v8 = vadd.f32 %v12331_v6, %v12156_v19  ;;  %v4297_v14 = vmul.f32 %v12221_v37, %v12343_v13  ;;  %v4305_v1 = vmul.f32 %v12221_v37, %v12347_v30 }
 0x80e   :  { %16449 = vst [vmem:[#allocation138_spill] sm:$0xff] %v12351_v27  ;;  %16450 = vst [vmem:[#allocation100_spill] sm:$0xff] %v12355_v5  ;;  %v12382_v18 = vmul.f32 %v12288_v3, %v12132_v44  ;;  %v4313_v15 = vmul.f32 %v12221_v37, %v12359_v22  ;;  %v4181_v25 = vmul.f32 %v12362_v55, %v12128_v45 }
 0x80f   :  { %16451 = vst [vmem:[#allocation139_spill] sm:$0xff] %v12359_v22  ;;  %16452 = vst [vmem:[#allocation168_spill] sm:$0xff] %v12366_v31  ;;  %v4189_v40 = vmul.f32 %v12136_v42, %v12362_v55  ;;  %v12392_v53 = vmul.f32 %v12214_v11, %v12132_v44  ;;  %v4321_v35 = vmul.f32 %v12221_v37, %v12374_v8 }
 0x810   :  { %16453 = vst [vmem:[#allocation169_spill] sm:$0xff] %v12370_v21  ;;  %16454 = vst [vmem:[#allocation170_spill] sm:$0xff] %v12374_v8  ;;  %v4197_v21 = vmul.f32 %v12362_v55, %v12144_v50  ;;  %v12402_v31 = vmul.f32 %v12196_v32, %v12156_v19  ;;  %v4217_v5 = vmul.f32 %v12169_v10, %v12264_v17 }
 0x811   :  { %16455 = vst [vmem:[#allocation171_spill] sm:$0xff] %v12382_v18  ;;  %16456 = vst [vmem:[#allocation172_spill] sm:$0xff] %v12392_v53  ;;  %v4205_v18 = vmul.f32 %v12163_v36, %v12362_v55  ;;  %v4225_v44 = vmul.f32 %v12315_v51, %v12169_v10  ;;  %v4233_v53 = vmul.f32 %v12169_v10, %v12299_v59 }
 0x812   :  { %16457 = vst [vmem:[#allocation173_spill] sm:$0xff] %v12402_v31  ;;  %v4241_v37 = vmul.f32 %v12331_v6, %v12169_v10  ;;  %v4425_v63 = vsub.f32 %v4297_v14, %v12159_v62  ;;  %v4433_v61 = vsub.f32 %v4305_v1, %v12172_v23  ;;  %v12416_v27 = vadd.f32 %v12362_v55, %v12080_v33 }
 0x813   :  { %v4325_v31 = vsub.f32 %v12088_v38, %v4181_v25  ;;  %v4441_v56 = vsub.f32 %v4313_v15, %v12175_v34  ;;  %v4333_v43 = vsub.f32 %v12092_v26, %v4189_v40  ;;  %v4341_v54 = vsub.f32 %v12096_v12, %v4197_v21 }
 0x814   :  { %v4349_v24 = vsub.f32 %v12100_v41, %v4205_v18  ;;  %v4449_v7 = vsub.f32 %v4321_v35, %v12178_v4  ;;  %v4261_v14 = vmul.f32 %v12416_v27, %v12140_v9  ;;  %v4269_v1 = vmul.f32 %v12416_v27, %v12148_v58  ;;  %v7537_v58 = vpop.f32.mrf.mxu0 }
 0x815   :  { %v4277_v33 = vmul.f32 %v12416_v27, %v12167_v39  ;;  %v12432_v15 = vcombine.high %v12169_v10, %v12169_v10  ;;  %v4361_v57 = vsub.f32 %v12159_v62, %v4217_v5  ;;  %v4369_v20 = vsub.f32 %v12172_v23, %v4225_v44  ;;  %v3822_v39 = vpop.permute.xlu1 %3821 }
 0x816   :  { %v4285_v35 = vmul.f32 %v12416_v27, %v12218_v0  ;;  %v4377_v52 = vsub.f32 %v12175_v34, %v4233_v53  ;;  %v4385_v29 = vsub.f32 %v12178_v4, %v4241_v37  ;;  %v4489_v48 = vsub.f32 %v4425_v63, %v4217_v5 }
 0x817   :  { %16458 = vst [vmem:[#allocation174_spill] sm:$0xff] %v12432_v15  ;;  %v4497_v60 = vsub.f32 %v4433_v61, %v4225_v44  ;;  %v4505_v32 = vsub.f32 %v4441_v56, %v4233_v53  ;;  %v4389_v6 = vsub.f32 %v4261_v14, %v12088_v38  ;;  %v4397_v59 = vsub.f32 %v4269_v1, %v12092_v26 }
 0x818   :  { %v4405_v10 = vsub.f32 %v4277_v33, %v12096_v12  ;;  %v4513_v62 = vsub.f32 %v4449_v7, %v4241_v37  ;;  %v4413_v23 = vsub.f32 %v4285_v35, %v12100_v41  ;;  %v12446_v0 = vmul.f32 %v12288_v3, %v12156_v19  ;;  %v4041_v33 = vpop.f32.mrf.mxu0 }
 0x819   :  { %v12450_v34 = vmul.f32 %v12214_v11, %v12156_v19  ;;  %v12454_v38 = vadd.f32 %v12432_v15, %v12142_v49  ;;  %v4453_v26 = vsub.f32 %v4389_v6, %v4181_v25  ;;  %v4461_v56 = vsub.f32 %v4397_v59, %v4189_v40  ;;  %v12458_v59 = vpop.permute.xlu1 %3831  ;;  %v3827_v11 = vpop.permute.xlu0 %3826 }
 0x81a   :  { %16459 = vst [vmem:[#allocation175_spill] sm:$0xff] %v12446_v0  ;;  %v4469_v12 = vsub.f32 %v4405_v10, %v4197_v21  ;;  %v4553_v4 = vmul.f32 %v4361_v57, %v4361_v57  ;;  %v4617_v61 = vmul.f32 %v4489_v48, %v4489_v48  ;;  %v4625_v63 = vmul.f32 %v4497_v60, %v4497_v60 }
 0x81b   :  { %16460 = vst [vmem:[#allocation176_spill] sm:$0xff] %v12450_v34  ;;  %16461 = vst [vmem:[#allocation83_spill] sm:$0xff] %v12454_v38  ;;  %v4477_v41 = vsub.f32 %v4413_v23, %v4205_v18  ;;  %v4561_v7 = vmul.f32 %v4369_v20, %v4369_v20  ;;  %v4569_v53 = vmul.f32 %v4377_v52, %v4377_v52 }
 0x81c   :  { %v4577_v5 = vmul.f32 %v4385_v29, %v4385_v29  ;;  %v4633_v44 = vmul.f32 %v4505_v32, %v4505_v32  ;;  %v4641_v37 = vmul.f32 %v4513_v62, %v4513_v62  ;;  %v4517_v14 = vmul.f32 %v4325_v31, %v4325_v31  ;;  %16462 = vst [vmem:[#allocation119_spill] sm:$0xff] %v12458_v59 }
 0x81d   :  { %v4525_v1 = vmul.f32 %v4333_v43, %v4333_v43  ;;  %v12456_v19 = vadd.f32 %v7537_v58, %v3822_v39  ;;  %v4533_v35 = vmul.f32 %v4341_v54, %v4341_v54  ;;  %v4581_v49 = vmul.f32 %v4453_v26, %v4453_v26 }
 0x81e   :  { %v4589_v34 = vmul.f32 %v4461_v56, %v4461_v56  ;;  %v4597_v6 = vmul.f32 %v4469_v12, %v4469_v12  ;;  %v12460_v57 = vadd.f32 %v4617_v61, %v4553_v4  ;;  %v12462_v60 = vadd.f32 %v4625_v63, %v4561_v7  ;;  %v16472_v56 = vld [vmem:[#allocation82_spill] sm:$0xff]  ;;  %v16473_v4 = vld [vmem:[#allocation7_spill] sm:$0xff] }
 0x81f   :  { %v4541_v48 = vmul.f32 %v4349_v24, %v4349_v24  ;;  %v4605_v52 = vmul.f32 %v4477_v41, %v4477_v41  ;;  %v12464_v29 = vadd.f32 %v4633_v44, %v4569_v53  ;;  %v12466_v32 = vadd.f32 %v4581_v49, %v4517_v14  ;;  %v7540_v24 = vpop.f32.mrf.mxu0  ;;  %v16474_v7 = vld [vmem:[#allocation150_spill] sm:$0xff] }
 0x820   :  { %16463 = vst [vmem:[#allocation123_spill] sm:$0xff] %v12460_v57  ;;  %16464 = vst [vmem:[#allocation160_spill] sm:$0xff] %v12462_v60  ;;  %v12468_v43 = vadd.f32 %v4589_v34, %v4525_v1  ;;  %v12470_v58 = vadd.f32 %v4597_v6, %v4533_v35  ;;  %v4293_v54 = vmul.f32 %v12416_v27, %v12343_v13  ;;  %7993 = vrsqrt.f32 %v12460_v57  ;;  %v3837_v34 = vpop.permute.xlu1 %3836  ;;  %v16478_v6 = vld [vmem:[#allocation107_spill] sm:$0xff] }
 0x821   :  { %16465 = vst [vmem:[#allocation141_spill] sm:$0xff] %v12464_v29  ;;  %16466 = vst [vmem:[#allocation110_spill] sm:$0xff] %v12466_v32  ;;  %v4301_v39 = vmul.f32 %v12416_v27, %v12347_v30  ;;  %v4309_v20 = vmul.f32 %v12416_v27, %v12359_v22  ;;  %v12478_v31 = vadd.f32 %v4605_v52, %v4541_v48  ;;  %v4054_v41 = vpop.f32.mrf.mxu0  ;;  %7995 = vrsqrt.f32 %v12462_v60 }
 0x822   :  { %16467 = vst [vmem:[#allocation151_spill] sm:$0xff] %v12468_v43  ;;  %16468 = vst [vmem:[#allocation108_spill] sm:$0xff] %v12470_v58  ;;  %v12480_v21 = vadd.f32 %v4641_v37, %v4577_v5  ;;  %v4317_v49 = vmul.f32 %v12416_v27, %v12374_v8  ;;  %v4187_v18 = vmul.f32 %v12456_v19, %v12128_v45  ;;  %v16475_v5 = vld [vmem:[#allocation147_spill] sm:$0xff]  ;;  %v16476_v37 = vld [vmem:[#allocation4_spill] sm:$0xff]  ;;  %7997 = vrsqrt.f32 %v12464_v29 }
 0x823   :  { %16469 = vst [vmem:[#allocation75_spill] sm:$0xff] %v12478_v31  ;;  %v4195_v25 = vmul.f32 %v12136_v42, %v12456_v19  ;;  %v4203_v40 = vmul.f32 %v12456_v19, %v12144_v50  ;;  %v4211_v10 = vmul.f32 %v12163_v36, %v12456_v19  ;;  %v12497_v62 = vcombine.high %v12362_v55, %v12362_v55  ;;  %v16483_v58 = vld [vmem:[#allocation9_spill] sm:$0xff]  ;;  %v7541_v38 = vpop.f32.mrf.mxu0 }
 0x824   :  { %16470 = vst [vmem:[#allocation78_spill] sm:$0xff] %v12480_v21  ;;  %v4213_v27 = vmul.f32 %v12362_v55, %v12264_v17  ;;  %v12502_v23 = vadd.f32 %v4041_v33, %v12126_v47  ;;  %v4421_v26 = vsub.f32 %v4293_v54, %v12210_v16  ;;  %v4429_v12 = vsub.f32 %v4301_v39, %v16472_v56  ;;  %v16477_v47 = vld [vmem:[#allocation84_spill] sm:$0xff]  ;;  %v3842_v8 = vpop.permute.xlu1 %3841 }
 0x825   :  { %16471 = vst [vmem:[#allocation87_spill] sm:$0xff] %v12497_v62  ;;  %v4437_v61 = vsub.f32 %v4309_v20, %v16473_v4  ;;  %v12509_v63 = vadd.f32 %v12456_v19, %v12082_v46  ;;  %v4445_v53 = vsub.f32 %v4317_v49, %v16474_v7  ;;  %v4331_v44 = vsub.f32 %v16475_v5, %v4187_v18  ;;  %v16479_v46 = vld [vmem:[#allocation80_spill] sm:$0xff]  ;;  %v16481_v20 = vld [vmem:[#allocation166_spill] sm:$0xff] }
 0x826   :  { %v4339_v14 = vsub.f32 %v16476_v37, %v4195_v25  ;;  %v4347_v1 = vsub.f32 %v16477_v47, %v4203_v40  ;;  %v4221_v33 = vmul.f32 %v12315_v51, %v12362_v55  ;;  %v16480_v54 = vld [vmem:[#allocation132_spill] sm:$0xff]  ;;  %v4237_v49 = vmul.f32 %v16481_v20, %v12362_v55 }
 0x827   :  { %v4267_v35 = vmul.f32 %v12509_v63, %v12140_v9  ;;  %v4275_v48 = vmul.f32 %v12509_v63, %v16478_v6  ;;  %v4283_v52 = vmul.f32 %v12509_v63, %v16479_v46  ;;  %v4229_v39 = vmul.f32 %v12362_v55, %v16480_v54 }
 0x828   :  { %v4291_v28 = vmul.f32 %v12509_v63, %v16482_v2  ;;  %v4357_v31 = vsub.f32 %v12210_v16, %v4213_v27  ;;  %v4355_v57 = vsub.f32 %v16483_v58, %v4211_v10  ;;  %v12533_v0 = vadd.f32 %v7540_v24, %v3837_v34  ;;  %v16485_v16 = vld [vmem:[#allocation118_spill] sm:$0xff] }
 0x829   :  { %v4485_v15 = vsub.f32 %v4421_v26, %v4213_v27  ;;  %v4493_v60 = vsub.f32 %v4429_v12, %v4221_v33  ;;  %v4501_v59 = vsub.f32 %v4437_v61, %v4229_v39  ;;  %v4509_v3 = vsub.f32 %v4445_v53, %v4237_v49 }
 0x82a   :  { %16484 = vst [vmem:[#allocation149_spill] sm:$0xff] %v12533_v0  ;;  %v4395_v55 = vsub.f32 %v4267_v35, %v16475_v5  ;;  %v4403_v20 = vsub.f32 %v4275_v48, %v16476_v37  ;;  %v4411_v22 = vsub.f32 %v4283_v52, %v16477_v47  ;;  %v4419_v29 = vsub.f32 %v4291_v28, %v16483_v58  ;;  %v12551_v47 = vpop.eup %7989 }
 0x82b   :  { %7999 = vrsqrt.f32 %v12480_v21  ;;  %v12542_v24 = vadd.f32 %v12497_v62, %v16485_v16  ;;  %v12544_v27 = vadd.f32 %v4054_v41, %v3827_v11  ;;  %v12546_v34 = vadd.f32 %v7541_v38, %v3842_v8  ;;  %16489 = vst [vmem:[#allocation156_spill] sm:$0xff] %v12551_v47  ;;  %v12553_v41 = vpop.eup %7991 }
 0x82c   :  { %v4459_v26 = vsub.f32 %v4395_v55, %v4187_v18  ;;  %v4467_v12 = vsub.f32 %v4403_v20, %v4195_v25  ;;  %v4475_v61 = vsub.f32 %v4411_v22, %v4203_v40  ;;  %v4483_v53 = vsub.f32 %v4419_v29, %v4211_v10  ;;  %16490 = vst [vmem:[#allocation88_spill] sm:$0xff] %v12553_v41  ;;  %v16511_v41 = vld [vmem:[#allocation129_spill] sm:$0xff] }
 0x82d   :  { %16486 = vst [vmem:[#allocation122_spill] sm:$0xff] %v12542_v24  ;;  %16487 = vst [vmem:[#allocation98_spill] sm:$0xff] %v12544_v27  ;;  %v4365_v5 = vsub.f32 %v16472_v56, %v4221_v33  ;;  %v4373_v37 = vsub.f32 %v16473_v4, %v4229_v39  ;;  %v4381_v28 = vsub.f32 %v16474_v7, %v4237_v49  ;;  %v12555_v29 = vpop.eup %7993  ;;  %8001 = vrsqrt.f32 %v12466_v32 }
 0x82e   :  { %16488 = vst [vmem:[#allocation137_spill] sm:$0xff] %v12546_v34  ;;  %v4613_v58 = vmul.f32 %v4485_v15, %v4485_v15  ;;  %v4549_v35 = vmul.f32 %v4357_v31, %v4357_v31  ;;  %v4621_v48 = vmul.f32 %v4493_v60, %v4493_v60  ;;  %v4629_v52 = vmul.f32 %v4501_v59, %v4501_v59 }
 0x82f   :  { %v4637_v11 = vmul.f32 %v4509_v3, %v4509_v3  ;;  %v4523_v8 = vmul.f32 %v4331_v44, %v4331_v44  ;;  %v4531_v38 = vmul.f32 %v4339_v14, %v4339_v14  ;;  %v4539_v18 = vmul.f32 %v4347_v1, %v4347_v1  ;;  %16491 = vst [vmem:[#allocation91_spill] sm:$0xff] %v12555_v29  ;;  %v12574_v1 = vpop.eup %7995 }
 0x830   :  { %v4547_v22 = vmul.f32 %v4355_v57, %v4355_v57  ;;  %v4587_v25 = vmul.f32 %v4459_v26, %v4459_v26  ;;  %v4595_v40 = vmul.f32 %v4467_v12, %v4467_v12  ;;  %v4603_v10 = vmul.f32 %v4475_v61, %v4475_v61  ;;  %16500 = vst [vmem:[#allocation103_spill] sm:$0xff] %v12574_v1  ;;  %v12583_v55 = vpop.eup %7997 }
 0x831   :  { %v4611_v56 = vmul.f32 %v4483_v53, %v4483_v53  ;;  %v4557_v4 = vmul.f32 %v4365_v5, %v4365_v5  ;;  %v4565_v15 = vmul.f32 %v4373_v37, %v4373_v37  ;;  %v4573_v7 = vmul.f32 %v4381_v28, %v4381_v28  ;;  %16501 = vst [vmem:[#allocation115_spill] sm:$0xff] %v12583_v55  ;;  %v16503_v37 = vld [vmem:[#allocation114_spill] sm:$0xff]  ;;  %v16569_v55 = vld [vmem:[#allocation169_spill] sm:$0xff] }
 0x832   :  { %v12557_v33 = vadd.f32 %v4613_v58, %v4549_v35  ;;  %v12559_v60 = vadd.f32 %v4587_v25, %v4523_v8  ;;  %v12561_v3 = vadd.f32 %v4595_v40, %v4531_v38  ;;  %v12563_v59 = vadd.f32 %v4603_v10, %v4539_v18  ;;  %v16504_v58 = vld [vmem:[#allocation3_spill] sm:$0xff]  ;;  %v16507_v38 = vld [vmem:[#allocation76_spill] sm:$0xff] }
 0x833   :  { %v12565_v31 = vadd.f32 %v4611_v56, %v4547_v22  ;;  %v12567_v57 = vadd.f32 %v4621_v48, %v4557_v4  ;;  %v12569_v44 = vadd.f32 %v4629_v52, %v4565_v15  ;;  %v12571_v14 = vadd.f32 %v4637_v11, %v4573_v7  ;;  %v16505_v48 = vld [vmem:[#allocation102_spill] sm:$0xff]  ;;  %v16506_v11 = vld [vmem:[#allocation167_spill] sm:$0xff] }
 0x834   :  { %16492 = vst [vmem:[#allocation93_spill] sm:$0xff] %v12557_v33  ;;  %16493 = vst [vmem:[#allocation89_spill] sm:$0xff] %v12559_v60  ;;  %8003 = vrsqrt.f32 %v12468_v43  ;;  %v4183_v39 = vmul.f32 %v12502_v23, %v12128_v45  ;;  %v4191_v20 = vmul.f32 %v12136_v42, %v12502_v23  ;;  %v4199_v49 = vmul.f32 %v12502_v23, %v12144_v50  ;;  %v16509_v7 = vld [vmem:[#allocation139_spill] sm:$0xff] }
 0x835   :  { %16494 = vst [vmem:[#allocation101_spill] sm:$0xff] %v12561_v3  ;;  %16495 = vst [vmem:[#allocation159_spill] sm:$0xff] %v12563_v59  ;;  %8005 = vrsqrt.f32 %v12557_v33  ;;  %v12588_v26 = vcombine.high %v12456_v19, %v12456_v19  ;;  %v4219_v12 = vmul.f32 %v12456_v19, %v12264_v17  ;;  %v4207_v61 = vmul.f32 %v12163_v36, %v12502_v23  ;;  %v16512_v43 = vld [vmem:[#allocation95_spill] sm:$0xff] }
 0x836   :  { %16496 = vst [vmem:[#allocation140_spill] sm:$0xff] %v12565_v31  ;;  %16497 = vst [vmem:[#allocation116_spill] sm:$0xff] %v12567_v57  ;;  %v4299_v53 = vmul.f32 %v12509_v63, %v12343_v13  ;;  %v4307_v5 = vmul.f32 %v12509_v63, %v12347_v30  ;;  %v4255_v28 = vadd.f32 %v12502_v23, %v16503_v37  ;;  %8007 = vrsqrt.f32 %v12567_v57  ;;  %v16510_v31 = vld [vmem:[#allocation170_spill] sm:$0xff]  ;;  %v16573_v57 = vld [vmem:[#allocation173_spill] sm:$0xff] }
 0x837   :  { %16498 = vst [vmem:[#allocation92_spill] sm:$0xff] %v12569_v44  ;;  %16499 = vst [vmem:[#allocation94_spill] sm:$0xff] %v12571_v14  ;;  %v4327_v35 = vsub.f32 %v16504_v58, %v4183_v39  ;;  %v4335_v52 = vsub.f32 %v16505_v48, %v4191_v20  ;;  %v4343_v8 = vsub.f32 %v16506_v11, %v4199_v49  ;;  %8009 = vrsqrt.f32 %v12569_v44 }
 0x838   :  { %16502 = vst [vmem:[#allocation161_spill] sm:$0xff] %v12588_v26  ;;  %v4351_v18 = vsub.f32 %v16507_v38, %v4207_v61  ;;  %v12605_v22 = vpop.eup %7999  ;;  %v4263_v25 = vmul.f32 %v4255_v28, %v12140_v9  ;;  %v4271_v40 = vmul.f32 %v4255_v28, %v16478_v6  ;;  %v4279_v10 = vmul.f32 %v4255_v28, %v16479_v46  ;;  %v16513_v9 = vld [vmem:[#allocation166_spill] sm:$0xff] }
 0x839   :  { %16508 = vst [vmem:[#allocation142_spill] sm:$0xff] %v12605_v22  ;;  %v4287_v56 = vmul.f32 %v4255_v28, %v16482_v2  ;;  %v4227_v4 = vmul.f32 %v12315_v51, %v12456_v19  ;;  %v4235_v15 = vmul.f32 %v12456_v19, %v16480_v54  ;;  %v4315_v37 = vmul.f32 %v12509_v63, %v16509_v7 }
 0x83a   :  { %v4323_v59 = vmul.f32 %v12509_v63, %v16510_v31  ;;  %v4427_v3 = vsub.f32 %v4299_v53, %v16511_v41  ;;  %v4435_v47 = vsub.f32 %v4307_v5, %v16512_v43  ;;  %v4391_v60 = vsub.f32 %v4263_v25, %v16504_v58  ;;  %v16514_v63 = vld [vmem:[#allocation2_spill] sm:$0xff] }
 0x83b   :  { %v4295_v32 = vmul.f32 %v4255_v28, %v12343_v13  ;;  %v4399_v2 = vsub.f32 %v4271_v40, %v16505_v48  ;;  %v4407_v46 = vsub.f32 %v4279_v10, %v16506_v11  ;;  %v4415_v6 = vsub.f32 %v4287_v56, %v16507_v38  ;;  %v16516_v48 = vld [vmem:[#allocation113_spill] sm:$0xff]  ;;  %v16517_v56 = vld [vmem:[#allocation104_spill] sm:$0xff] }
 0x83c   :  { %8011 = vrsqrt.f32 %v12571_v14  ;;  %v4243_v36 = vmul.f32 %v16513_v9, %v12456_v19  ;;  %v12632_v53 = vadd.f32 %v12588_v26, %v16514_v63  ;;  %v4455_v5 = vsub.f32 %v4391_v60, %v4183_v39  ;;  %v16518_v63 = vld [vmem:[#allocation133_spill] sm:$0xff]  ;;  %v12641_v60 = vpop.eup %8001 }
 0x83d   :  { %v4363_v58 = vsub.f32 %v16511_v41, %v4219_v12  ;;  %v4463_v25 = vsub.f32 %v4399_v2, %v4191_v20  ;;  %v4471_v50 = vsub.f32 %v4407_v46, %v4199_v49  ;;  %v4479_v42 = vsub.f32 %v4415_v6, %v4207_v61  ;;  %16519 = vst [vmem:[#allocation124_spill] sm:$0xff] %v12641_v60 }
 0x83e   :  { %16515 = vst [vmem:[#allocation154_spill] sm:$0xff] %v12632_v53  ;;  %v4443_v40 = vsub.f32 %v4315_v37, %v16516_v48  ;;  %v4303_v11 = vmul.f32 %v4255_v28, %v12347_v30  ;;  %v4311_v38 = vmul.f32 %v4255_v28, %v16509_v7  ;;  %v4319_v10 = vmul.f32 %v4255_v28, %v16510_v31  ;;  %v16522_v28 = vld [vmem:[#allocation99_spill] sm:$0xff] }
 0x83f   :  { %v4451_v19 = vsub.f32 %v4323_v59, %v16517_v56  ;;  %v4491_v45 = vsub.f32 %v4427_v3, %v4219_v12  ;;  %v4499_v16 = vsub.f32 %v4435_v47, %v4227_v4  ;;  %v4423_v22 = vsub.f32 %v4295_v32, %v16518_v63  ;;  %v16523_v3 = vld [vmem:[#allocation164_spill] sm:$0xff]  ;;  %v16524_v12 = vld [vmem:[#allocation105_spill] sm:$0xff] }
 0x840   :  { %v4519_v41 = vmul.f32 %v4327_v35, %v4327_v35  ;;  %v4527_v2 = vmul.f32 %v4335_v52, %v4335_v52  ;;  %v4535_v46 = vmul.f32 %v4343_v8, %v4343_v8  ;;  %v4583_v6 = vmul.f32 %v4455_v5, %v4455_v5 }
 0x841   :  { %v12643_v39 = vpop.eup %8003  ;;  %v4543_v20 = vmul.f32 %v4351_v18, %v4351_v18  ;;  %v4591_v49 = vmul.f32 %v4463_v25, %v4463_v25  ;;  %v4599_v61 = vmul.f32 %v4471_v50, %v4471_v50  ;;  %v4607_v37 = vmul.f32 %v4479_v42, %v4479_v42 }
 0x842   :  { %16520 = vst [vmem:[#allocation152_spill] sm:$0xff] %v12643_v39  ;;  %v12645_v21 = vpop.eup %8005  ;;  %v4431_v59 = vsub.f32 %v4303_v11, %v16522_v28  ;;  %v4439_v47 = vsub.f32 %v4311_v38, %v16523_v3  ;;  %v4447_v32 = vsub.f32 %v4319_v10, %v16524_v12  ;;  %v12650_v14 = vadd.f32 %v4583_v6, %v4519_v41 }
 0x843   :  { %16521 = vst [vmem:[#allocation111_spill] sm:$0xff] %v12645_v21  ;;  %v4215_v35 = vmul.f32 %v12502_v23, %v12264_v17  ;;  %v12654_v52 = vadd.f32 %v4591_v49, %v4527_v2  ;;  %v12656_v8 = vadd.f32 %v4599_v61, %v4535_v46  ;;  %v12658_v18 = vadd.f32 %v4607_v37, %v4543_v20  ;;  %v12660_v42 = vpop.eup %8007  ;;  %v16576_v21 = vld [vmem:[#allocation176_spill] sm:$0xff] }
 0x844   :  { %16525 = vst [vmem:[#allocation162_spill] sm:$0xff] %v12650_v14  ;;  %16529 = vst [vmem:[#allocation14_spill] sm:$0xff] %v12660_v42  ;;  %v4507_v50 = vsub.f32 %v4443_v40, %v4235_v15  ;;  %v4223_v5 = vmul.f32 %v12315_v51, %v12502_v23  ;;  %v4231_v25 = vmul.f32 %v12502_v23, %v16480_v54  ;;  %v12670_v46 = vpop.eup %8009  ;;  %8013 = vrsqrt.f32 %v12650_v14 }
 0x845   :  { %16526 = vst [vmem:[#allocation90_spill] sm:$0xff] %v12654_v52  ;;  %16527 = vst [vmem:[#allocation143_spill] sm:$0xff] %v12656_v8  ;;  %v4239_v11 = vmul.f32 %v16513_v9, %v12502_v23  ;;  %v4371_v38 = vsub.f32 %v16512_v43, %v4227_v4  ;;  %v4379_v10 = vsub.f32 %v16516_v48, %v4235_v15 }
 0x846   :  { %16528 = vst [vmem:[#allocation10_spill] sm:$0xff] %v12658_v18  ;;  %v4515_v41 = vsub.f32 %v4451_v19, %v4243_v36  ;;  %v4487_v2 = vsub.f32 %v4423_v22, %v4215_v35  ;;  %16530 = vst [vmem:[#allocation27_spill] sm:$0xff] %v12670_v46  ;;  %v4387_v6 = vsub.f32 %v16517_v56, %v4243_v36  ;;  %v4057_v19 = vpop.f32.mrf.mxu0  ;;  %v16570_v46 = vld [vmem:[#allocation171_spill] sm:$0xff] }
 0x847   :  { %v4495_v40 = vsub.f32 %v4431_v59, %v4223_v5  ;;  %v4503_v20 = vsub.f32 %v4439_v47, %v4231_v25  ;;  %v4511_v49 = vsub.f32 %v4447_v32, %v4239_v11  ;;  %v4555_v61 = vmul.f32 %v4363_v58, %v4363_v58 }
 0x848   :  { %v4619_v37 = vmul.f32 %v4491_v45, %v4491_v45  ;;  %v4627_v39 = vmul.f32 %v4499_v16, %v4499_v16  ;;  %v4359_v18 = vsub.f32 %v16518_v63, %v4215_v35  ;;  %v4635_v8 = vmul.f32 %v4507_v50, %v4507_v50 }
 0x849   :  { %v4367_v60 = vsub.f32 %v16522_v28, %v4223_v5  ;;  %v4375_v43 = vsub.f32 %v16523_v3, %v4231_v25  ;;  %v4383_v4 = vsub.f32 %v16524_v12, %v4239_v11  ;;  %v12677_v22 = vpop.eup %8011  ;;  %v4563_v15 = vmul.f32 %v4371_v38, %v4371_v38  ;;  %v16540_v38 = vld [vmem:[#allocation119_spill] sm:$0xff] }
 0x84a   :  { %16531 = vst [vmem:[#allocation20_spill] sm:$0xff] %v12677_v22  ;;  %v4643_v48 = vmul.f32 %v4515_v41, %v4515_v41  ;;  %v12681_v36 = vcombine.high %v12502_v23, %v12502_v23  ;;  %v4615_v58 = vmul.f32 %v4487_v2, %v4487_v2  ;;  %v4571_v45 = vmul.f32 %v4379_v10, %v4379_v10  ;;  %v16537_v23 = vld [vmem:[#allocation96_spill] sm:$0xff] }
 0x84b   :  { %v4623_v16 = vmul.f32 %v4495_v40, %v4495_v40  ;;  %v4631_v56 = vmul.f32 %v4503_v20, %v4503_v20  ;;  %v4639_v63 = vmul.f32 %v4511_v49, %v4511_v49  ;;  %v4579_v59 = vmul.f32 %v4387_v6, %v4387_v6  ;;  %v16548_v20 = vld [vmem:[#allocation174_spill] sm:$0xff]  ;;  %v16568_v22 = vld [vmem:[#allocation168_spill] sm:$0xff] }
 0x84c   :  { %16532 = vst [vmem:[#allocation11_spill] sm:$0xff] %v12681_v36  ;;  %v12683_v28 = vadd.f32 %v4619_v37, %v4555_v61  ;;  %v12685_v3 = vadd.f32 %v4627_v39, %v4563_v15  ;;  %v4551_v47 = vmul.f32 %v4359_v18, %v4359_v18  ;;  %v12687_v12 = vadd.f32 %v4635_v8, %v4571_v45 }
 0x84d   :  { %v4559_v32 = vmul.f32 %v4367_v60, %v4367_v60  ;;  %v4567_v35 = vmul.f32 %v4375_v43, %v4375_v43  ;;  %v4575_v50 = vmul.f32 %v4383_v4, %v4383_v4  ;;  %v12689_v5 = vadd.f32 %v4643_v48, %v4579_v59 }
 0x84e   :  { %16533 = vst [vmem:[#allocation23_spill] sm:$0xff] %v12683_v28  ;;  %16534 = vst [vmem:[#allocation24_spill] sm:$0xff] %v12685_v3  ;;  %v12693_v25 = vadd.f32 %v12681_v36, %v16537_v23  ;;  %v12695_v11 = vadd.f32 %v4615_v58, %v4551_v47  ;;  %v12698_v10 = vadd.f32 %v4057_v19, %v16540_v38  ;;  %v16559_v47 = vld [vmem:[#allocation83_spill] sm:$0xff]  ;;  %v16565_v23 = vld [vmem:[#allocation100_spill] sm:$0xff] }
 0x84f   :  { %16535 = vst [vmem:[#allocation22_spill] sm:$0xff] %v12687_v12  ;;  %16536 = vst [vmem:[#allocation12_spill] sm:$0xff] %v12689_v5  ;;  %v12700_v41 = vadd.f32 %v4623_v16, %v4559_v32  ;;  %v12702_v39 = vadd.f32 %v4631_v56, %v4567_v35  ;;  %v12704_v8 = vadd.f32 %v4639_v63, %v4575_v50  ;;  %v16566_v5 = vld [vmem:[#allocation145_spill] sm:$0xff]  ;;  %v16571_v3 = vld [vmem:[#allocation126_spill] sm:$0xff] }
 0x850   :  { %16538 = vst [vmem:[#allocation15_spill] sm:$0xff] %v12693_v25  ;;  %16539 = vst [vmem:[#allocation18_spill] sm:$0xff] %v12695_v11  ;;  %v12709_v60 = vcombine.high %v12533_v0, %v12533_v0  ;;  %v12713_v18 = vcombine.high %v12544_v27, %v12544_v27  ;;  %v12717_v2 = vcombine.high %v12546_v34, %v12546_v34  ;;  %8015 = vrsqrt.f32 %v12695_v11  ;;  %v16560_v34 = vld [vmem:[#allocation131_spill] sm:$0xff]  ;;  %v16561_v0 = vld [vmem:[#allocation138_spill] sm:$0xff] }
 0x851   :  { %16541 = vst [vmem:[#allocation21_spill] sm:$0xff] %v12698_v10  ;;  %16542 = vst [vmem:[#allocation13_spill] sm:$0xff] %v12700_v41  ;;  %v4214_v6 = vmul.f32 %v12497_v62, %v12264_v17  ;;  %v12723_v40 = vmul.f32 %v12681_v36, %v12264_v17  ;;  %v12727_v49 = vmul.f32 %v16548_v20, %v12264_v17  ;;  %8017 = vrsqrt.f32 %v12700_v41  ;;  %v16564_v27 = vld [vmem:[#allocation77_spill] sm:$0xff]  ;;  %v16572_v41 = vld [vmem:[#allocation172_spill] sm:$0xff] }
 0x852   :  { %16543 = vst [vmem:[#allocation16_spill] sm:$0xff] %v12702_v39  ;;  %16544 = vst [vmem:[#allocation19_spill] sm:$0xff] %v12704_v8  ;;  %v12731_v61 = vmul.f32 %v12588_v26, %v12264_v17  ;;  %v12735_v37 = vmul.f32 %v12497_v62, %v12315_v51  ;;  %v12740_v43 = vcombine.high %v12698_v10, %v12698_v10  ;;  %8019 = vrsqrt.f32 %v12702_v39  ;;  %v16562_v10 = vld [vmem:[#allocation121_spill] sm:$0xff] }
 0x853   :  { %16545 = vst [vmem:[#allocation17_spill] sm:$0xff] %v12709_v60  ;;  %16546 = vst [vmem:[#allocation33_spill] sm:$0xff] %v12713_v18  ;;  %v12744_v4 = vmul.f32 %v12681_v36, %v12315_v51  ;;  %v12748_v15 = vmul.f32 %v16548_v20, %v12315_v51  ;;  %v12753_v17 = vmul.f32 %v12588_v26, %v12315_v51  ;;  %8021 = vrsqrt.f32 %v12704_v8  ;;  %v16563_v18 = vld [vmem:[#allocation165_spill] sm:$0xff]  ;;  %v12835_v8 = vpop.eup %8013 }
 0x854   :  { %16547 = vst [vmem:[#allocation31_spill] sm:$0xff] %v12717_v2  ;;  %16549 = vst [vmem:[#allocation28_spill] sm:$0xff] %v12740_v43  ;;  %v12757_v48 = vmul.f32 %v12497_v62, %v16480_v54  ;;  %v12761_v58 = vmul.f32 %v12681_v36, %v16480_v54  ;;  %v12766_v45 = vmul.f32 %v16548_v20, %v16480_v54  ;;  %v16575_v11 = vld [vmem:[#allocation81_spill] sm:$0xff] }
 0x855   :  { %16550 = vst [vmem:[#allocation29_spill] sm:$0xff] %v12753_v17  ;;  %v12770_v16 = vmul.f32 %v12588_v26, %v16480_v54  ;;  %v12774_v51 = vmul.f32 %v12497_v62, %v16513_v9  ;;  %v12779_v56 = vmul.f32 %v12681_v36, %v16513_v9  ;;  %v12783_v63 = vmul.f32 %v16548_v20, %v16513_v9 }
 0x856   :  { %16551 = vst [vmem:[#allocation25_spill] sm:$0xff] %v12757_v48  ;;  %16552 = vst [vmem:[#allocation26_spill] sm:$0xff] %v12761_v58  ;;  %v12787_v19 = vmul.f32 %v12588_v26, %v16513_v9  ;;  %v4294_v54 = vmul.f32 %v12542_v24, %v12343_v13  ;;  %v4296_v59 = vmul.f32 %v12693_v25, %v12343_v13 }
 0x857   :  { %16553 = vst [vmem:[#allocation32_spill] sm:$0xff] %v12766_v45  ;;  %16554 = vst [vmem:[#allocation30_spill] sm:$0xff] %v12770_v16  ;;  %v4298_v32 = vmul.f32 %v16559_v47, %v12343_v13  ;;  %v4300_v35 = vmul.f32 %v12632_v53, %v12343_v13  ;;  %v4302_v50 = vmul.f32 %v12542_v24, %v12347_v30 }
 0x858   :  { %16555 = vst [vmem:[#allocation34_spill] sm:$0xff] %v12774_v51  ;;  %16556 = vst [vmem:[#allocation35_spill] sm:$0xff] %v12779_v56  ;;  %v4304_v38 = vmul.f32 %v12693_v25, %v12347_v30  ;;  %v4306_v9 = vmul.f32 %v16559_v47, %v12347_v30  ;;  %v4308_v14 = vmul.f32 %v12632_v53, %v12347_v30 }
 0x859   :  { %16557 = vst [vmem:[#allocation37_spill] sm:$0xff] %v12783_v63  ;;  %16558 = vst [vmem:[#allocation36_spill] sm:$0xff] %v12787_v19  ;;  %v4310_v52 = vmul.f32 %v12542_v24, %v16509_v7  ;;  %v4312_v26 = vmul.f32 %v12693_v25, %v16509_v7  ;;  %v4314_v13 = vmul.f32 %v16559_v47, %v16509_v7 }
 0x85a   :  { %v4316_v20 = vmul.f32 %v12632_v53, %v16509_v7  ;;  %v4318_v36 = vmul.f32 %v12542_v24, %v16510_v31  ;;  %v4320_v62 = vmul.f32 %v12693_v25, %v16510_v31  ;;  %v4322_v30 = vmul.f32 %v16559_v47, %v16510_v31  ;;  %16567 = vst [vmem:[#allocation38_spill] sm:$0xff] %v12835_v8 }
 0x85b   :  { %v4324_v2 = vmul.f32 %v12632_v53, %v16510_v31  ;;  %v4358_v60 = vsub.f32 %v16560_v34, %v4214_v6  ;;  %v4360_v43 = vsub.f32 %v16561_v0, %v12723_v40  ;;  %v4362_v7 = vsub.f32 %v16562_v10, %v12727_v49 }
 0x85c   :  { %v4364_v24 = vsub.f32 %v16563_v18, %v12731_v61  ;;  %v4366_v25 = vsub.f32 %v16564_v27, %v12735_v37  ;;  %v4368_v47 = vsub.f32 %v16565_v23, %v12744_v4  ;;  %v4370_v31 = vsub.f32 %v16566_v5, %v12748_v15 }
 0x85d   :  { %v4422_v53 = vsub.f32 %v4294_v54, %v16560_v34  ;;  %v4372_v12 = vsub.f32 %v16568_v22, %v12753_v17  ;;  %v4374_v39 = vsub.f32 %v16569_v55, %v12757_v48  ;;  %v4376_v44 = vsub.f32 %v16570_v46, %v12761_v58  ;;  %v16574_v54 = vld [vmem:[#allocation175_spill] sm:$0xff]  ;;  %v12858_v48 = vpop.eup %8015 }
 0x85e   :  { %v4378_v1 = vsub.f32 %v16571_v3, %v12766_v45  ;;  %v4380_v42 = vsub.f32 %v16572_v41, %v12770_v16  ;;  %v4382_v34 = vsub.f32 %v16573_v57, %v12774_v51  ;;  %v4384_v8 = vsub.f32 %v16574_v54, %v12779_v56 }
 0x85f   :  { %v4424_v29 = vsub.f32 %v4296_v59, %v16561_v0  ;;  %v4386_v28 = vsub.f32 %v16575_v11, %v12783_v63  ;;  %v4388_v33 = vsub.f32 %v16576_v21, %v12787_v19  ;;  %v4426_v58 = vsub.f32 %v4298_v32, %v16562_v10  ;;  %v12863_v0 = vpop.eup %8017 }
 0x860   :  { %v4428_v45 = vsub.f32 %v4300_v35, %v16563_v18  ;;  %v4430_v16 = vsub.f32 %v4302_v50, %v16564_v27  ;;  %v4432_v51 = vsub.f32 %v4304_v38, %v16565_v23  ;;  %v4434_v56 = vsub.f32 %v4306_v9, %v16566_v5  ;;  %v12869_v18 = vpop.eup %8019 }
 0x861   :  { %v4486_v17 = vsub.f32 %v4422_v53, %v4214_v6  ;;  %v4436_v59 = vsub.f32 %v4308_v14, %v16568_v22  ;;  %v4438_v63 = vsub.f32 %v4310_v52, %v16569_v55  ;;  %v4440_v19 = vsub.f32 %v4312_v26, %v16570_v46  ;;  %v12875_v5 = vpop.eup %8021  ;;  %v16579_v6 = vld [vmem:[#allocation26_spill] sm:$0xff] }
 0x862   :  { %v4442_v10 = vsub.f32 %v4314_v13, %v16571_v3  ;;  %v4444_v32 = vsub.f32 %v4316_v20, %v16572_v41  ;;  %v4446_v27 = vsub.f32 %v4318_v36, %v16573_v57  ;;  %v4448_v23 = vsub.f32 %v4320_v62, %v16574_v54  ;;  %v16577_v62 = vld [vmem:[#allocation29_spill] sm:$0xff] }
 0x863   :  { %v4488_v53 = vsub.f32 %v4424_v29, %v12723_v40  ;;  %v4450_v14 = vsub.f32 %v4322_v30, %v16575_v11  ;;  %v4452_v55 = vsub.f32 %v4324_v2, %v16576_v21  ;;  %v4490_v26 = vsub.f32 %v4426_v58, %v12727_v49  ;;  %v16578_v29 = vld [vmem:[#allocation25_spill] sm:$0xff]  ;;  %v16580_v11 = vld [vmem:[#allocation32_spill] sm:$0xff]  ;;  %v16581_v21 = vld [vmem:[#allocation30_spill] sm:$0xff] }
 0x864   :  { %v4492_v52 = vsub.f32 %v4428_v45, %v12731_v61  ;;  %v4494_v46 = vsub.f32 %v4430_v16, %v12735_v37  ;;  %v4496_v22 = vsub.f32 %v4432_v51, %v12744_v4  ;;  %v4498_v57 = vsub.f32 %v4434_v56, %v12748_v15  ;;  %v16582_v49 = vld [vmem:[#allocation34_spill] sm:$0xff]  ;;  %v16583_v37 = vld [vmem:[#allocation35_spill] sm:$0xff]  ;;  %v16584_v4 = vld [vmem:[#allocation37_spill] sm:$0xff] }
 0x865   :  { %v4614_v36 = vmul.f32 %v4486_v17, %v4486_v17  ;;  %v4500_v3 = vsub.f32 %v4436_v59, %v16577_v62  ;;  %v4502_v41 = vsub.f32 %v4438_v63, %v16578_v29  ;;  %v4504_v40 = vsub.f32 %v4440_v19, %v16579_v6  ;;  %v16585_v15 = vld [vmem:[#allocation36_spill] sm:$0xff]  ;;  %v16589_v29 = vld [vmem:[#allocation18_spill] sm:$0xff] }
 0x866   :  { %v4506_v20 = vsub.f32 %v4442_v10, %v16580_v11  ;;  %v4508_v2 = vsub.f32 %v4444_v32, %v16581_v21  ;;  %v4510_v58 = vsub.f32 %v4446_v27, %v16582_v49  ;;  %v4550_v61 = vmul.f32 %v4358_v60, %v4358_v60  ;;  %v16591_v21 = vld [vmem:[#allocation91_spill] sm:$0xff] }
 0x867   :  { %v4616_v45 = vmul.f32 %v4488_v53, %v4488_v53  ;;  %v4512_v16 = vsub.f32 %v4448_v23, %v16583_v37  ;;  %v4514_v51 = vsub.f32 %v4450_v14, %v16584_v4  ;;  %v4516_v17 = vsub.f32 %v4452_v55, %v16585_v15 }
 0x868   :  { %v4552_v56 = vmul.f32 %v4360_v43, %v4360_v43  ;;  %v4554_v35 = vmul.f32 %v4362_v7, %v4362_v7  ;;  %v4556_v50 = vmul.f32 %v4364_v24, %v4364_v24  ;;  %v4618_v63 = vmul.f32 %v4490_v26, %v4490_v26 }
 0x869   :  { %v12893_v38 = vadd.f32 %v4614_v36, %v4550_v61  ;;  %v4558_v19 = vmul.f32 %v4366_v25, %v4366_v25  ;;  %v4560_v9 = vmul.f32 %v4368_v47, %v4368_v47  ;;  %v4562_v13 = vmul.f32 %v4370_v31, %v4370_v31  ;;  %v16588_v36 = vld [vmem:[#allocation23_spill] sm:$0xff] }
 0x86a   :  { %v4564_v30 = vmul.f32 %v4372_v12, %v4372_v12  ;;  %v4566_v54 = vmul.f32 %v4374_v39, %v4374_v39  ;;  %v4568_v59 = vmul.f32 %v4376_v44, %v4376_v44  ;;  %v4620_v60 = vmul.f32 %v4492_v52, %v4492_v52 }
 0x86b   :  { %v12895_v10 = vadd.f32 %v4616_v45, %v4552_v56  ;;  %v4570_v32 = vmul.f32 %v4378_v1, %v4378_v1  ;;  %v4572_v27 = vmul.f32 %v4380_v42, %v4380_v42  ;;  %v4574_v23 = vmul.f32 %v4382_v34, %v4382_v34 }
 0x86c   :  { %v4576_v53 = vmul.f32 %v4384_v8, %v4384_v8  ;;  %v4578_v14 = vmul.f32 %v4386_v28, %v4386_v28  ;;  %v4622_v43 = vmul.f32 %v4494_v46, %v4494_v46  ;;  %v12897_v7 = vadd.f32 %v4618_v63, %v4554_v35  ;;  %v16586_v46 = vld [vmem:[#allocation93_spill] sm:$0xff] }
 0x86d   :  { %8023 = vrsqrt.f32 %v12893_v38  ;;  %v4580_v24 = vmul.f32 %v4388_v33, %v4388_v33  ;;  %v4624_v25 = vmul.f32 %v4496_v22, %v4496_v22  ;;  %v4626_v47 = vmul.f32 %v4498_v57, %v4498_v57  ;;  %v16587_v22 = vld [vmem:[#allocation111_spill] sm:$0xff] }
 0x86e   :  { %v4628_v31 = vmul.f32 %v4500_v3, %v4500_v3  ;;  %v4630_v12 = vmul.f32 %v4502_v41, %v4502_v41  ;;  %v4632_v39 = vmul.f32 %v4504_v40, %v4504_v40  ;;  %v12900_v44 = vadd.f32 %v4620_v60, %v4556_v50 }
 0x86f   :  { %8025 = vrsqrt.f32 %v12895_v10  ;;  %v4634_v1 = vmul.f32 %v4506_v20, %v4506_v20  ;;  %v4636_v42 = vmul.f32 %v4508_v2, %v4508_v2  ;;  %v4638_v34 = vmul.f32 %v4510_v58, %v4510_v58  ;;  %v16590_v20 = vld [vmem:[#allocation123_spill] sm:$0xff] }
 0x870   :  { %v4640_v8 = vmul.f32 %v4512_v16, %v4512_v16  ;;  %v4642_v28 = vmul.f32 %v4514_v51, %v4514_v51  ;;  %v4644_v55 = vmul.f32 %v4516_v17, %v4516_v17  ;;  %v12903_v26 = vadd.f32 %v4622_v43, %v4558_v19  ;;  %v16592_v19 = vld [vmem:[#allocation116_spill] sm:$0xff] }
 0x871   :  { %8027 = vrsqrt.f32 %v12897_v7  ;;  %v12906_v33 = vadd.f32 %v4624_v25, %v4560_v9  ;;  %v12908_v52 = vadd.f32 %v4626_v47, %v4562_v13  ;;  %v4934_v57 = vmul.f32 %v16587_v22, %v16586_v46  ;;  %v16593_v9 = vld [vmem:[#allocation14_spill] sm:$0xff] }
 0x872   :  { %8029 = vrsqrt.f32 %v16588_v36  ;;  %v12913_v62 = vadd.f32 %v4628_v31, %v4564_v30  ;;  %v12915_v3 = vadd.f32 %v4630_v12, %v4566_v54  ;;  %v4948_v41 = vmul.f32 %v12858_v48, %v16589_v29 }
 0x873   :  { %8031 = vrsqrt.f32 %v12900_v44  ;;  %v12920_v6 = vadd.f32 %v4632_v39, %v4568_v59  ;;  %v12922_v40 = vadd.f32 %v4634_v1, %v4570_v32  ;;  %v12924_v11 = vadd.f32 %v4636_v42, %v4572_v27  ;;  %v16594_v59 = vld [vmem:[#allocation13_spill] sm:$0xff] }
 0x874   :  { %v4962_v2 = vmul.f32 %v16591_v21, %v16590_v20  ;;  %v12928_v49 = vadd.f32 %v4638_v34, %v4574_v23  ;;  %v12930_v58 = vadd.f32 %v4640_v8, %v4576_v53  ;;  %vm4935_vm11 = vcmp.eq.f32.partialorder %v16586_v46, inf  ;;  %v16595_v53 = vld [vmem:[#allocation160_spill] sm:$0xff] }
 0x875   :  { %8033 = vrsqrt.f32 %v12903_v26  ;;  %v12934_v48 = vadd.f32 %v4642_v28, %v4578_v14  ;;  %v12936_v61 = vadd.f32 %v4644_v55, %v4580_v24  ;;  %v4936_v45 = vsel %vm4935_vm11, %v16586_v46, %v4934_v57  ;;  %v16596_v14 = vld [vmem:[#allocation103_spill] sm:$0xff]  ;;  %v16597_v24 = vld [vmem:[#allocation24_spill] sm:$0xff] }
 0x876   :  { %vm4949_vm13 = vcmp.eq.f32.partialorder %v16589_v29, inf  ;;  %vm4937_vm5 = vcmp.eq.f32.partialorder %v16586_v46, 0.0  ;;  %v4938_v37 = vand.u32 2147483648, %v16586_v46  ;;  %vm4963_vm6 = vcmp.eq.f32.partialorder %v16590_v20, inf }
 0x877   :  { %v4950_v16 = vsel %vm4949_vm13, %v16589_v29, %v4948_v41  ;;  %vm4942_vm0 = vcmp.eq.f32.partialorder %v12893_v38, inf  ;;  %v4945_v4 = vand.u32 2147483648, %v12893_v38  ;;  %v4952_v51 = vand.u32 2147483648, %v16589_v29  ;;  %v16599_v41 = vld [vmem:[#allocation27_spill] sm:$0xff] }
 0x878   :  { %v4964_v15 = vsel %vm4963_vm6, %v16590_v20, %v4962_v2  ;;  %8035 = vrsqrt.f32 %v12906_v33  ;;  %v12949_v17 = vsel %vm4937_vm5, %v4938_v37, %v4936_v45  ;;  %vm4951_vm15 = vcmp.eq.f32.partialorder %v16589_v29, 0.0  ;;  %v16598_v29 = vld [vmem:[#allocation92_spill] sm:$0xff] }
 0x879   :  { %v4959_v56 = vand.u32 2147483648, %v12895_v10  ;;  %v4966_v35 = vand.u32 2147483648, %v16590_v20  ;;  %v12954_v63 = vsel %vm4951_vm15, %v4952_v51, %v4950_v16  ;;  %vm4956_vm4 = vcmp.eq.f32.partialorder %v12895_v10, inf }
 0x87a   :  { %v8024_v50 = vpop.eup %8023  ;;  %vm4965_vm1 = vcmp.eq.f32.partialorder %v16590_v20, 0.0  ;;  %v4990_v13 = vmul.f32 %v16593_v9, %v16592_v19  ;;  %8037 = vrsqrt.f32 %v12908_v52  ;;  %vm4944_vm3 = vcmp.eq.f32.partialorder %v12893_v38, 0.0 }
 0x87b   :  { %v12962_v30 = vsel %vm4965_vm1, %v4966_v35, %v4964_v15  ;;  %vm4970_vm2 = vcmp.eq.f32.partialorder %v12897_v7, inf  ;;  %v4973_v54 = vand.u32 2147483648, %v12897_v7  ;;  %v5004_v60 = vmul.f32 %v12863_v0, %v16594_v59 }
 0x87c   :  { %v8026_v32 = vpop.eup %8025  ;;  %vm4977_vm7 = vcmp.eq.f32.partialorder %v16588_v36, inf  ;;  %v4980_v27 = vand.u32 2147483648, %v16588_v36  ;;  %v4987_v23 = vand.u32 2147483648, %v12900_v44  ;;  %v5018_v43 = vmul.f32 %v16596_v14, %v16595_v53 }
 0x87d   :  { %8039 = vrsqrt.f32 %v16597_v24  ;;  %v4941_v25 = vmul.f32 %v8024_v50, %v12893_v38  ;;  %vm4958_vm10 = vcmp.eq.f32.partialorder %v12895_v10, 0.0  ;;  %vm4991_vm9 = vcmp.eq.f32.partialorder %v16592_v19, inf }
 0x87e   :  { %vm4993_vm8 = vcmp.eq.f32.partialorder %v16592_v19, 0.0  ;;  %v4994_v0 = vand.u32 2147483648, %v16592_v19  ;;  %v8028_v47 = vpop.eup %8027  ;;  %vm4972_vm11 = vcmp.eq.f32.partialorder %v12897_v7, 0.0  ;;  %vm4984_vm13 = vcmp.eq.f32.partialorder %v12900_v44, inf }
 0x87f   :  { %v4992_v31 = vsel %vm4991_vm9, %v16592_v19, %v4990_v13  ;;  %v5001_v12 = vand.u32 2147483648, %v12903_v26  ;;  %vm5005_vm5 = vcmp.eq.f32.partialorder %v16594_v59, inf  ;;  %8041 = vrsqrt.f32 %v12913_v62  ;;  %v8030_v39 = vpop.eup %8029 }
 0x880   :  { %v4955_v1 = vmul.f32 %v8026_v32, %v12895_v10  ;;  %vm4979_vm6 = vcmp.eq.f32.partialorder %v16588_v36, 0.0  ;;  %vm4998_vm15 = vcmp.eq.f32.partialorder %v12903_v26, inf  ;;  %v5006_v42 = vsel %vm5005_vm5, %v16594_v59, %v5004_v60  ;;  %v8032_v34 = vpop.eup %8031 }
 0x881   :  { %vm5007_vm1 = vcmp.eq.f32.partialorder %v16594_v59, 0.0  ;;  %vm5019_vm14 = vcmp.eq.f32.partialorder %v16595_v53, inf  ;;  %v4969_v8 = vmul.f32 %v8028_v47, %v12897_v7  ;;  %v5008_v28 = vand.u32 2147483648, %v16594_v59 }
 0x882   :  { %v5020_v55 = vsel %vm5019_vm14, %v16595_v53, %v5018_v43  ;;  %v5022_v46 = vand.u32 2147483648, %v16595_v53  ;;  %v4943_v22 = vsel %vm4942_vm0, %v12893_v38, %v4941_v25  ;;  %v4976_v57 = vmul.f32 %v8030_v39, %v16588_v36  ;;  %v8034_v21 = vpop.eup %8033 }
 0x883   :  { %vm4986_vm9 = vcmp.eq.f32.partialorder %v12900_v44, 0.0  ;;  %v5046_v20 = vmul.f32 %v16599_v41, %v16598_v29  ;;  %8043 = vrsqrt.f32 %v12915_v3  ;;  %v13005_v2 = vsel %vm4993_vm8, %v4994_v0, %v4992_v31 }
 0x884   :  { %vm5000_vm14 = vcmp.eq.f32.partialorder %v12903_v26, 0.0  ;;  %v13008_v45 = vsel %vm5007_vm1, %v5008_v28, %v5006_v42  ;;  %v5015_v37 = vand.u32 2147483648, %v12906_v33  ;;  %vm5021_vm0 = vcmp.eq.f32.partialorder %v16595_v53, 0.0  ;;  %v16600_v53 = vld [vmem:[#allocation16_spill] sm:$0xff] }
 0x885   :  { %v4957_v16 = vsel %vm4956_vm4, %v12895_v10, %v4955_v1  ;;  %v4983_v51 = vmul.f32 %v8032_v34, %v12900_v44  ;;  %vm5012_vm5 = vcmp.eq.f32.partialorder %v12906_v33, inf  ;;  %v13017_v15 = vsel %vm5021_vm0, %v5022_v46, %v5020_v55  ;;  %v8036_v13 = vpop.eup %8035 }
 0x886   :  { %v5029_v35 = vand.u32 2147483648, %v12908_v52  ;;  %v13024_v50 = vsel %vm4944_vm3, %v4945_v4, %v4943_v22  ;;  %v4971_v19 = vsel %vm4970_vm2, %v12897_v7, %v4969_v8  ;;  %v4997_v9 = vmul.f32 %v8034_v21, %v12903_v26 }
 0x887   :  { %vm5026_vm4 = vcmp.eq.f32.partialorder %v12908_v52, inf  ;;  %vm5047_vm8 = vcmp.eq.f32.partialorder %v16598_v29, inf  ;;  %v4978_v59 = vsel %vm4977_vm7, %v16588_v36, %v4976_v57  ;;  %vm5033_vm1 = vcmp.eq.f32.partialorder %v16597_v24, inf  ;;  %v8038_v43 = vpop.eup %8037  ;;  %v16601_v36 = vld [vmem:[#allocation141_spill] sm:$0xff] }
 0x888   :  { %v5036_v38 = vand.u32 2147483648, %v16597_v24  ;;  %v5048_v4 = vsel %vm5047_vm8, %v16598_v29, %v5046_v20  ;;  %8045 = vrsqrt.f32 %v12920_v6  ;;  %v13043_v60 = vsel %vm4958_vm10, %v4959_v56, %v4957_v16 }
 0x889   :  { %vm5014_vm3 = vcmp.eq.f32.partialorder %v12906_v33, 0.0  ;;  %vm5040_vm2 = vcmp.eq.f32.partialorder %v12913_v62, inf  ;;  %v5050_v32 = vand.u32 2147483648, %v16598_v29  ;;  %v5060_v14 = vmul.f32 %v12869_v18, %v16600_v53 }
 0x88a   :  { %v13054_v25 = vsel %vm4972_vm11, %v4973_v54, %v4971_v19  ;;  %v4985_v10 = vsel %vm4984_vm13, %v12900_v44, %v4983_v51  ;;  %vm5028_vm7 = vcmp.eq.f32.partialorder %v12908_v52, 0.0  ;;  %v5043_v56 = vand.u32 2147483648, %v12913_v62  ;;  %v8040_v47 = vpop.eup %8039  ;;  %v16603_v44 = vld [vmem:[#allocation22_spill] sm:$0xff] }
 0x88b   :  { %vm5049_vm10 = vcmp.eq.f32.partialorder %v16598_v29, 0.0  ;;  %v13066_v18 = vsel %vm4979_vm6, %v4980_v27, %v4978_v59  ;;  %v4999_v7 = vsel %vm4998_vm15, %v12903_v26, %v4997_v9  ;;  %v5011_v54 = vmul.f32 %v8036_v13, %v12906_v33  ;;  %v16602_v27 = vld [vmem:[#allocation115_spill] sm:$0xff]  ;;  %v16604_v9 = vld [vmem:[#allocation94_spill] sm:$0xff]  ;;  %v16605_v13 = vld [vmem:[#allocation20_spill] sm:$0xff] }
 0x88c   :  { %vm5035_vm11 = vcmp.eq.f32.partialorder %v16597_v24, 0.0  ;;  %v13073_v0 = vsel %vm5049_vm10, %v5050_v32, %v5048_v4  ;;  %v5025_v31 = vmul.f32 %v8038_v43, %v12908_v52  ;;  %vm5042_vm13 = vcmp.eq.f32.partialorder %v12913_v62, 0.0  ;;  %v8042_v28 = vpop.eup %8041 }
 0x88d   :  { %vm5054_vm0 = vcmp.eq.f32.partialorder %v12915_v3, inf  ;;  %vm5061_vm6 = vcmp.eq.f32.partialorder %v16600_v53, inf  ;;  %v5074_v39 = vmul.f32 %v16602_v27, %v16601_v36  ;;  %8047 = vrsqrt.f32 %v12922_v40 }
 0x88e   :  { %v13086_v1 = vsel %vm4986_vm9, %v4987_v23, %v4985_v10  ;;  %v5032_v42 = vmul.f32 %v8040_v47, %v16597_v24  ;;  %v5057_v34 = vand.u32 2147483648, %v12915_v3  ;;  %v5062_v8 = vsel %vm5061_vm6, %v16600_v53, %v5060_v14  ;;  %v16606_v14 = vld [vmem:[#allocation19_spill] sm:$0xff] }
 0x88f   :  { %v13095_v55 = vsel %vm5000_vm14, %v5001_v12, %v4999_v7  ;;  %vm5063_vm15 = vcmp.eq.f32.partialorder %v16600_v53, 0.0  ;;  %v5064_v46 = vand.u32 2147483648, %v16600_v53  ;;  %8049 = vrsqrt.f32 %v16603_v44  ;;  %v16607_v7 = vld [vmem:[#allocation78_spill] sm:$0xff] }
 0x890   :  { %v5013_v23 = vsel %vm5012_vm5, %v12906_v33, %v5011_v54  ;;  %v5039_v22 = vmul.f32 %v8042_v28, %v12913_v62  ;;  %vm5056_vm9 = vcmp.eq.f32.partialorder %v12915_v3, 0.0  ;;  %vm5068_vm8 = vcmp.eq.f32.partialorder %v12920_v6, inf  ;;  %v8044_v29 = vpop.eup %8043  ;;  %v16608_v54 = vld [vmem:[#allocation142_spill] sm:$0xff] }
 0x891   :  { %vm5075_vm10 = vcmp.eq.f32.partialorder %v16601_v36, inf  ;;  %v5027_v26 = vsel %vm5026_vm4, %v12908_v52, %v5025_v31  ;;  %v13110_v12 = vsel %vm5063_vm15, %v5064_v46, %v5062_v8  ;;  %8051 = vrsqrt.f32 %v12924_v11 }
 0x892   :  { %v5076_v57 = vsel %vm5075_vm10, %v16601_v36, %v5074_v39  ;;  %v5034_v41 = vsel %vm5033_vm1, %v16597_v24, %v5032_v42  ;;  %v5071_v20 = vand.u32 2147483648, %v12920_v6  ;;  %vm5077_vm14 = vcmp.eq.f32.partialorder %v16601_v36, 0.0 }
 0x893   :  { %v5078_v21 = vand.u32 2147483648, %v16601_v36  ;;  %v13124_v16 = vsel %vm5014_vm3, %v5015_v37, %v5013_v23  ;;  %v5041_v51 = vsel %vm5040_vm2, %v12913_v62, %v5039_v22  ;;  %v5053_v19 = vmul.f32 %v8044_v29, %v12915_v3 }
 0x894   :  { %vm5070_vm5 = vcmp.eq.f32.partialorder %v12920_v6, 0.0  ;;  %v5102_v59 = vmul.f32 %v16605_v13, %v16604_v9  ;;  %v13137_v4 = vsel %vm5028_vm7, %v5029_v35, %v5027_v26  ;;  %vm5082_vm4 = vcmp.eq.f32.partialorder %v12922_v40, inf }
 0x895   :  { %v13139_v33 = vsel %vm5077_vm14, %v5078_v21, %v5076_v57  ;;  %8053 = vrsqrt.f32 %v12928_v49  ;;  %v13145_v37 = vsel %vm5035_vm11, %v5036_v38, %v5034_v41  ;;  %vm5084_vm1 = vcmp.eq.f32.partialorder %v12922_v40, 0.0  ;;  %v8046_v35 = vpop.eup %8045  ;;  %v16609_v57 = vld [vmem:[#allocation12_spill] sm:$0xff] }
 0x896   :  { %v5085_v32 = vand.u32 2147483648, %v12922_v40  ;;  %v5092_v53 = vand.u32 2147483648, %v16603_v44  ;;  %v5116_v52 = vmul.f32 %v12875_v5, %v16606_v14  ;;  %v13154_v43 = vsel %vm5042_vm13, %v5043_v56, %v5041_v51 }
 0x897   :  { %v5055_v24 = vsel %vm5054_vm0, %v12915_v3, %v5053_v19  ;;  %vm5089_vm3 = vcmp.eq.f32.partialorder %v16603_v44, inf  ;;  %v5099_v38 = vand.u32 2147483648, %v12924_v11  ;;  %vm5103_vm2 = vcmp.eq.f32.partialorder %v16604_v9, inf }
 0x898   :  { %v5067_v10 = vmul.f32 %v8046_v35, %v12920_v6  ;;  %vm5091_vm7 = vcmp.eq.f32.partialorder %v16603_v44, 0.0  ;;  %v5104_v5 = vsel %vm5103_vm2, %v16604_v9, %v5102_v59  ;;  %vm5117_vm11 = vcmp.eq.f32.partialorder %v16606_v14, inf }
 0x899   :  { %8055 = vrsqrt.f32 %v12930_v58  ;;  %vm5096_vm13 = vcmp.eq.f32.partialorder %v12924_v11, inf  ;;  %vm5105_vm0 = vcmp.eq.f32.partialorder %v16604_v9, 0.0  ;;  %v5106_v62 = vand.u32 2147483648, %v16604_v9 }
 0x89a   :  { %v5118_v56 = vsel %vm5117_vm11, %v16606_v14, %v5116_v52  ;;  %v5130_v47 = vmul.f32 %v16608_v54, %v16607_v7  ;;  %v13175_v31 = vsel %vm5056_vm9, %v5057_v34, %v5055_v24  ;;  %v5069_v36 = vsel %vm5068_vm8, %v12920_v6, %v5067_v10  ;;  %v8048_v42 = vpop.eup %8047 }
 0x89b   :  { %vm5098_vm6 = vcmp.eq.f32.partialorder %v12924_v11, 0.0  ;;  %v5113_v27 = vand.u32 2147483648, %v12928_v49  ;;  %v5120_v39 = vand.u32 2147483648, %v16606_v14  ;;  %v13183_v8 = vsel %vm5105_vm0, %v5106_v62, %v5104_v5 }
 0x89c   :  { %vm5119_vm15 = vcmp.eq.f32.partialorder %v16606_v14, 0.0  ;;  %vm5131_vm10 = vcmp.eq.f32.partialorder %v16607_v7, inf  ;;  %8057 = vrsqrt.f32 %v12934_v48  ;;  %v5081_v3 = vmul.f32 %v8048_v42, %v12922_v40  ;;  %v8050_v23 = vpop.eup %8049 }
 0x89d   :  { %vm5110_vm9 = vcmp.eq.f32.partialorder %v12928_v49, inf  ;;  %v13190_v34 = vsel %vm5119_vm15, %v5120_v39, %v5118_v56  ;;  %v5127_v28 = vand.u32 2147483648, %v12930_v58  ;;  %v5132_v46 = vsel %vm5131_vm10, %v16607_v7, %v5130_v47 }
 0x89e   :  { %v13196_v22 = vsel %vm5070_vm5, %v5071_v20, %v5069_v36  ;;  %vm5112_vm8 = vcmp.eq.f32.partialorder %v12928_v49, 0.0  ;;  %vm5133_vm14 = vcmp.eq.f32.partialorder %v16607_v7, 0.0  ;;  %v5134_v26 = vand.u32 2147483648, %v16607_v7  ;;  %v8052_v6 = vpop.eup %8051 }
 0x89f   :  { %8059 = vrsqrt.f32 %v16609_v57  ;;  %v5083_v29 = vsel %vm5082_vm4, %v12922_v40, %v5081_v3  ;;  %v5088_v41 = vmul.f32 %v8050_v23, %v16603_v44  ;;  %v5141_v21 = vand.u32 2147483648, %v12934_v48 }
 0x8a0   :  { %8061 = vrsqrt.f32 %v12936_v61  ;;  %v13210_v20 = vsel %vm5084_vm1, %v5085_v32, %v5083_v29  ;;  %vm5124_vm5 = vcmp.eq.f32.partialorder %v12930_v58, inf  ;;  %v13213_v51 = vsel %vm5133_vm14, %v5134_v26, %v5132_v46 }
 0x8a1   :  { %v5148_v19 = vand.u32 2147483648, %v16609_v57  ;;  %v5155_v9 = vand.u32 2147483648, %v12936_v61  ;;  %v5090_v13 = vsel %vm5089_vm3, %v16603_v44, %v5088_v41  ;;  %v5095_v59 = vmul.f32 %v8052_v6, %v12924_v11 }
 0x8a2   :  { %vm5126_vm4 = vcmp.eq.f32.partialorder %v12930_v58, 0.0  ;;  %v5217_v40 = vsel %vm1772_vm12, %v12949_v17, -inf  ;;  %v5218_v32 = vsel %vm1772_vm12, %v13024_v50, -inf  ;;  %v13228_v14 = vsel %vm5091_vm7, %v5092_v53, %v5090_v13  ;;  %v8054_v10 = vpop.eup %8053 }
 0x8a3   :  { %v5219_v52 = vmax.f32 %v5217_v40, %v5218_v32  ;;  %v5220_v35 = vsel %vm1772_vm12, %v12954_v63, -inf  ;;  %v5222_v24 = vsel %vm1772_vm12, %v13043_v60, -inf  ;;  %v5097_v5 = vsel %vm5096_vm13, %v12924_v11, %v5095_v59 }
 0x8a4   :  { %vm5138_vm1 = vcmp.eq.f32.partialorder %v12934_v48, inf  ;;  %v5224_v62 = vsel %vm1772_vm12, %v12962_v30, -inf  ;;  %v5226_v44 = vsel %vm1772_vm12, %v13054_v25, -inf  ;;  %v5228_v53 = vsel %vm1772_vm12, %v13066_v18, -inf }
 0x8a5   :  { %v13246_v56 = vsel %vm5098_vm6, %v5099_v38, %v5097_v5  ;;  %v5109_v7 = vmul.f32 %v8054_v10, %v12928_v49  ;;  %vm5140_vm3 = vcmp.eq.f32.partialorder %v12934_v48, 0.0  ;;  %v5221_v54 = vmax.f32 %v5219_v52, %v5220_v35 }
 0x8a6   :  { %v5230_v47 = vsel %vm1772_vm12, %v13086_v1, -inf  ;;  %vm5145_vm2 = vcmp.eq.f32.partialorder %v16609_v57, inf  ;;  %v5232_v36 = vsel %vm1772_vm12, %v13005_v2, -inf  ;;  %v5233_v39 = vsel %vm1772_vm12, %v13095_v55, -inf  ;;  %v8056_v42 = vpop.eup %8055 }
 0x8a7   :  { %v5235_v11 = vsel %vm1772_vm12, %v13008_v45, -inf  ;;  %v5237_v38 = vsel %vm1772_vm12, %v13124_v16, -inf  ;;  %v5111_v3 = vsel %vm5110_vm9, %v12928_v49, %v5109_v7  ;;  %vm5147_vm7 = vcmp.eq.f32.partialorder %v16609_v57, 0.0 }
 0x8a8   :  { %vm5152_vm11 = vcmp.eq.f32.partialorder %v12936_v61, inf  ;;  %v5223_v46 = vmax.f32 %v5221_v54, %v5222_v24  ;;  %v5234_v23 = vmax.f32 %v5232_v36, %v5233_v39  ;;  %v5239_v26 = vsel %vm1772_vm12, %v13017_v15, -inf }
 0x8a9   :  { %v13270_v29 = vsel %vm5112_vm8, %v5113_v27, %v5111_v3  ;;  %v5123_v41 = vmul.f32 %v8056_v42, %v12930_v58  ;;  %vm5154_vm13 = vcmp.eq.f32.partialorder %v12936_v61, 0.0  ;;  %v5241_v6 = vsel %vm1772_vm12, %v13137_v4, -inf  ;;  %v8058_v27 = vpop.eup %8057 }
 0x8aa   :  { %v5243_v13 = vsel %vm1772_vm12, %v13145_v37, -inf  ;;  %v5225_v59 = vmax.f32 %v5223_v46, %v5224_v62  ;;  %v5236_v40 = vmax.f32 %v5234_v23, %v5235_v11  ;;  %v5245_v32 = vsel %vm1772_vm12, %v13154_v43, -inf }
 0x8ab   :  { %v5247_v49 = vsel %vm1772_vm12, %v13073_v0, -inf  ;;  %v5125_v52 = vsel %vm5124_vm5, %v12930_v58, %v5123_v41  ;;  %v5248_v35 = vsel %vm1772_vm12, %v13175_v31, -inf  ;;  %v5250_v24 = vsel %vm1772_vm12, %v13110_v12, -inf }
 0x8ac   :  { %v5252_v10 = vsel %vm1772_vm12, %v13196_v22, -inf  ;;  %v13295_v5 = vsel %vm5126_vm4, %v5127_v28, %v5125_v52  ;;  %v5137_v62 = vmul.f32 %v8058_v27, %v12934_v48  ;;  %v5227_v7 = vmax.f32 %v5225_v59, %v5226_v44  ;;  %v8060_v36 = vpop.eup %8059 }
 0x8ad   :  { %v5238_v54 = vmax.f32 %v5236_v40, %v5237_v38  ;;  %v5249_v39 = vmax.f32 %v5247_v49, %v5248_v35  ;;  %v5254_v11 = vsel %vm1772_vm12, %v13139_v33, -inf  ;;  %v5256_v42 = vsel %vm1772_vm12, %v13210_v20, -inf  ;;  %v8062_v46 = vpop.eup %8061 }
 0x8ae   :  { %v5258_v3 = vsel %vm1772_vm12, %v13228_v14, -inf  ;;  %v5139_v58 = vsel %vm5138_vm1, %v12934_v48, %v5137_v62  ;;  %v5144_v28 = vmul.f32 %v8060_v36, %v16609_v57  ;;  %v5229_v44 = vmax.f32 %v5227_v7, %v5228_v53 }
 0x8af   :  { %v5240_v38 = vmax.f32 %v5238_v54, %v5239_v26  ;;  %v13312_v23 = vsel %vm5140_vm3, %v5141_v21, %v5139_v58  ;;  %v5151_v41 = vmul.f32 %v8062_v46, %v12936_v61  ;;  %v5251_v59 = vmax.f32 %v5249_v39, %v5250_v24 }
 0x8b0   :  { %v5260_v40 = vsel %vm1772_vm12, %v13246_v56, -inf  ;;  %v5146_v49 = vsel %vm5145_vm2, %v16609_v57, %v5144_v28  ;;  %v5231_v27 = vmax.f32 %v5229_v44, %v5230_v47  ;;  %v5262_v53 = vsel %vm1772_vm12, %v13183_v8, -inf }
 0x8b1   :  { %v5242_v52 = vmax.f32 %v5240_v38, %v5241_v6  ;;  %v13326_v48 = vsel %vm5147_vm7, %v5148_v19, %v5146_v49  ;;  %v5153_v21 = vsel %vm5152_vm11, %v12936_v61, %v5151_v41  ;;  %v5253_v26 = vmax.f32 %v5251_v59, %v5252_v10 }
 0x8b2   :  { %v5263_v35 = vsel %vm1772_vm12, %v13270_v29, -inf  ;;  %v13337_v47 = vsel %vm5154_vm13, %v5155_v9, %v5153_v21  ;;  %v5265_v57 = vsel %vm1772_vm12, %v13190_v34, -inf  ;;  %v5267_v62 = vsel %vm1772_vm12, %v13295_v5, -inf }
 0x8b3   :  { %v5244_v6 = vmax.f32 %v5242_v52, %v5243_v13  ;;  %v5264_v24 = vmax.f32 %v5262_v53, %v5263_v35  ;;  %v5255_v19 = vmax.f32 %v5253_v26, %v5254_v11  ;;  %v5269_v10 = vsel %vm1772_vm12, %v13213_v51, -inf }
 0x8b4   :  { %v5271_v7 = vsel %vm1772_vm12, %v13312_v23, -inf  ;;  %v5273_v9 = vsel %vm1772_vm12, %v13326_v48, -inf  ;;  %v5275_v13 = vsel %vm1772_vm12, %v13337_v47, -inf  ;;  %v5309_v39 = vsub.f32 %v12949_v17, %v5231_v27 }
 0x8b5   :  { %v13347_v54 = vmax.f32 %v5244_v6, %v5245_v32  ;;  %v5266_v61 = vmax.f32 %v5264_v24, %v5265_v57  ;;  %v5257_v36 = vmax.f32 %v5255_v19, %v5256_v42  ;;  %v5310_v11 = vsub.f32 %v13024_v50, %v5231_v27 }
 0x8b6   :  { %v5311_v46 = vsub.f32 %v12954_v63, %v5231_v27  ;;  %v5312_v28 = vsub.f32 %v13043_v60, %v5231_v27  ;;  %v5313_v32 = vsub.f32 %v12962_v30, %v5231_v27  ;;  %v5314_v44 = vsub.f32 %v13054_v25, %v5231_v27 }
 0x8b7   :  { %v5268_v58 = vmax.f32 %v5266_v61, %v5267_v62  ;;  %v5259_v38 = vmax.f32 %v5257_v36, %v5258_v3  ;;  %v5315_v41 = vsub.f32 %v13066_v18, %v5231_v27  ;;  %v5316_v59 = vsub.f32 %v13086_v1, %v5231_v27 }
 0x8b8   :  { %v5317_v42 = vsub.f32 %v13005_v2, %v13347_v54  ;;  %v5318_v50 = vsub.f32 %v13095_v55, %v13347_v54  ;;  %v5319_v63 = vsub.f32 %v13008_v45, %v13347_v54  ;;  %v5320_v30 = vsub.f32 %v13124_v16, %v13347_v54 }
 0x8b9   :  { %v5270_v17 = vmax.f32 %v5268_v58, %v5269_v10  ;;  %v5261_v60 = vmax.f32 %v5259_v38, %v5260_v40  ;;  %v5321_v25 = vsub.f32 %v13017_v15, %v13347_v54  ;;  %v5322_v18 = vsub.f32 %v13137_v4, %v13347_v54  ;;  %v16610_v38 = vld [vmem:[#allocation106_spill] sm:$0xff] }
 0x8ba   :  { %v5323_v2 = vsub.f32 %v13145_v37, %v13347_v54  ;;  %v5324_v55 = vsub.f32 %v13154_v43, %v13347_v54  ;;  %v5405_v3 = vmul.f32 1.442695, %v5309_v39  ;;  %v5407_v49 = vmul.f32 1.442695, %v5310_v11 }
 0x8bb   :  { %v5272_v1 = vmax.f32 %v5270_v17, %v5271_v7  ;;  %v5325_v45 = vsub.f32 %v13073_v0, %v5261_v60  ;;  %v5326_v16 = vsub.f32 %v13175_v31, %v5261_v60  ;;  %v5327_v40 = vsub.f32 %v13110_v12, %v5261_v60  ;;  %v16613_v17 = vld [vmem:[#allocation96_spill] sm:$0xff] }
 0x8bc   :  { %v5328_v15 = vsub.f32 %v13196_v22, %v5261_v60  ;;  %v5329_v4 = vsub.f32 %v13139_v33, %v5261_v60  ;;  %v5330_v52 = vsub.f32 %v13210_v20, %v5261_v60  ;;  %v5331_v37 = vsub.f32 %v13228_v14, %v5261_v60 }
 0x8bd   :  { %v5274_v27 = vmax.f32 %v5272_v1, %v5273_v9  ;;  %v5332_v53 = vsub.f32 %v13246_v56, %v5261_v60  ;;  %8063 = vpow2.f32 %v5405_v3  ;;  %v5409_v43 = vmul.f32 1.442695, %v5311_v46  ;;  %v16615_v60 = vld [vmem:[#allocation2_spill] sm:$0xff] }
 0x8be   :  { %v5411_v21 = vmul.f32 1.442695, %v5312_v28  ;;  %8065 = vpow2.f32 %v5407_v49  ;;  %v5413_v0 = vmul.f32 1.442695, %v5313_v32  ;;  %v5415_v31 = vmul.f32 1.442695, %v5314_v44 }
 0x8bf   :  { %v5276_v26 = vmax.f32 %v5274_v27, %v5275_v13  ;;  %8067 = vpow2.f32 %v5409_v43  ;;  %v5417_v12 = vmul.f32 1.442695, %v5315_v41  ;;  %v5419_v35 = vmul.f32 1.442695, %v5316_v59  ;;  %v16611_v41 = vld [vmem:[#allocation118_spill] sm:$0xff] }
 0x8c0   :  { %v5421_v22 = vmul.f32 1.442695, %v5317_v42  ;;  %8069 = vpow2.f32 %v5411_v21  ;;  %v5423_v62 = vmul.f32 1.442695, %v5318_v50  ;;  %v5425_v10 = vmul.f32 1.442695, %v5319_v63 }
 0x8c1   :  { %v5333_v6 = vsub.f32 %v13183_v8, %v5276_v26  ;;  %v5334_v33 = vsub.f32 %v13270_v29, %v5276_v26  ;;  %v5335_v20 = vsub.f32 %v13190_v34, %v5276_v26  ;;  %v5336_v14 = vsub.f32 %v13295_v5, %v5276_v26  ;;  %v16614_v63 = vld [vmem:[#allocation130_spill] sm:$0xff] }
 0x8c2   :  { %v5337_v56 = vsub.f32 %v13213_v51, %v5276_v26  ;;  %v5338_v24 = vsub.f32 %v13312_v23, %v5276_v26  ;;  %v5339_v57 = vsub.f32 %v13326_v48, %v5276_v26  ;;  %v5340_v19 = vsub.f32 %v13337_v47, %v5276_v26  ;;  %v16617_v1 = vld [vmem:[#allocation98_spill] sm:$0xff] }
 0x8c3   :  { %v5427_v7 = vmul.f32 1.442695, %v5320_v30  ;;  %8071 = vpow2.f32 %v5413_v0  ;;  %v5429_v8 = vmul.f32 1.442695, %v5321_v25  ;;  %v5431_v54 = vmul.f32 1.442695, %v5322_v18 }
 0x8c4   :  { %v5433_v29 = vmul.f32 1.442695, %v5323_v2  ;;  %8073 = vpow2.f32 %v5415_v31  ;;  %v5435_v34 = vmul.f32 1.442695, %v5324_v55  ;;  %v5437_v61 = vmul.f32 1.442695, %v5325_v45 }
 0x8c5   :  { %v5439_v5 = vmul.f32 1.442695, %v5326_v16  ;;  %8075 = vpow2.f32 %v5417_v12  ;;  %v5441_v51 = vmul.f32 1.442695, %v5327_v40  ;;  %v5443_v9 = vmul.f32 1.442695, %v5328_v15 }
 0x8c6   :  { %v5445_v23 = vmul.f32 1.442695, %v5329_v4  ;;  %8077 = vpow2.f32 %v5419_v35  ;;  %v13393_v48 = vmul.f32 1.442695, %v5330_v52  ;;  %v13395_v47 = vmul.f32 1.442695, %v5331_v37 }
 0x8c7   :  { %v13397_v13 = vmul.f32 1.442695, %v5332_v53  ;;  %8079 = vpow2.f32 %v5421_v22  ;;  %v13399_v36 = vmul.f32 1.442695, %v5333_v6  ;;  %v13401_v39 = vmul.f32 1.442695, %v5334_v33 }
 0x8c8   :  { %v13403_v11 = vmul.f32 1.442695, %v5335_v20  ;;  %8081 = vpow2.f32 %v5423_v62  ;;  %v13405_v46 = vmul.f32 1.442695, %v5336_v14  ;;  %v13407_v58 = vmul.f32 1.442695, %v5337_v56 }
 0x8c9   :  { %v13409_v28 = vmul.f32 1.442695, %v5338_v24  ;;  %8083 = vpow2.f32 %v5425_v10  ;;  %v13411_v32 = vmul.f32 1.442695, %v5339_v57  ;;  %v13413_v44 = vmul.f32 1.442695, %v5340_v19 }
 0x8ca   :  { %v13417_v59 = vmul.f32 %v16611_v41, %v16610_v38  ;;  %v13419_v42 = vpop.eup %8063  ;;  %8085 = vpow2.f32 %v5427_v7  ;;  %v13423_v50 = vmul.f32 %v16613_v17, %v16610_v38  ;;  %v13427_v30 = vmul.f32 %v16614_v63, %v16610_v38  ;;  %v16618_v3 = vld [vmem:[#allocation146_spill] sm:$0xff]  ;;  %v16620_v40 = vld [vmem:[#allocation33_spill] sm:$0xff]  ;;  %v16624_v33 = vld [vmem:[#allocation28_spill] sm:$0xff] }
 0x8cb   :  { %16612 = vst [vmem:[#allocation39_spill] sm:$0xff] %v13419_v42  ;;  %v13431_v25 = vmul.f32 %v16615_v60, %v16610_v38  ;;  %v13433_v18 = vpop.eup %8065  ;;  %8087 = vpow2.f32 %v5429_v8  ;;  %v5529_v2 = vsel %vm1772_vm12, %v13419_v42, 0.0  ;;  %v5829_v55 = vmul.f32 %v13419_v42, %v16617_v1  ;;  %v16621_v37 = vld [vmem:[#allocation21_spill] sm:$0xff] }
 0x8cc   :  { %16616 = vst [vmem:[#allocation40_spill] sm:$0xff] %v13433_v18  ;;  %v13441_v49 = vmul.f32 %v16611_v41, %v16618_v3  ;;  %v13443_v45 = vpop.eup %8067  ;;  %8089 = vpow2.f32 %v5431_v54  ;;  %v5530_v16 = vsel %vm1772_vm12, %v13433_v18, 0.0  ;;  %v5830_v15 = vmul.f32 %v13433_v18, %v16620_v40  ;;  %v16626_v19 = vld [vmem:[#allocation149_spill] sm:$0xff] }
 0x8cd   :  { %16619 = vst [vmem:[#allocation41_spill] sm:$0xff] %v13443_v45  ;;  %v13451_v27 = vmul.f32 %v16613_v17, %v16618_v3  ;;  %8091 = vpow2.f32 %v5433_v29  ;;  %v5531_v4 = vadd.f32 %v5530_v16, %v5529_v2  ;;  %v5532_v52 = vsel %vm1772_vm12, %v13443_v45, 0.0  ;;  %v13463_v0 = vpop.eup %8069  ;;  %v16628_v8 = vld [vmem:[#allocation17_spill] sm:$0xff] }
 0x8ce   :  { %v5831_v53 = vmul.f32 %v13443_v45, %v16621_v37  ;;  %8093 = vpow2.f32 %v5435_v34  ;;  %v5921_v43 = vsel %vm1772_vm12, %v5829_v55, 0.0  ;;  %v5922_v21 = vsel %vm1772_vm12, %v5830_v15, 0.0  ;;  %16622 = vst [vmem:[#allocation42_spill] sm:$0xff] %v13463_v0  ;;  %v16632_v55 = vld [vmem:[#allocation31_spill] sm:$0xff] }
 0x8cf   :  { %v13461_v26 = vmul.f32 %v16614_v63, %v16618_v3  ;;  %8095 = vpow2.f32 %v5437_v61  ;;  %v5533_v31 = vadd.f32 %v5532_v52, %v5531_v4  ;;  %v5923_v12 = vadd.f32 %v5922_v21, %v5921_v43 }
 0x8d0   :  { %v5924_v35 = vsel %vm1772_vm12, %v5831_v53, 0.0  ;;  %v13466_v22 = vpop.eup %8071  ;;  %8097 = vpow2.f32 %v5439_v5  ;;  %v5534_v6 = vsel %vm1772_vm12, %v13463_v0, 0.0  ;;  %v5832_v20 = vmul.f32 %v13463_v0, %v16624_v33 }
 0x8d1   :  { %16623 = vst [vmem:[#allocation44_spill] sm:$0xff] %v13466_v22  ;;  %v13474_v14 = vmul.f32 %v16615_v60, %v16618_v3  ;;  %v13476_v56 = vpop.eup %8073  ;;  %8099 = vpow2.f32 %v5441_v51  ;;  %v5535_v24 = vadd.f32 %v5534_v6, %v5533_v31  ;;  %v5536_v57 = vsel %vm1772_vm12, %v13466_v22, 0.0  ;;  %v16630_v51 = vld [vmem:[#allocation137_spill] sm:$0xff] }
 0x8d2   :  { %16625 = vst [vmem:[#allocation43_spill] sm:$0xff] %v13476_v56  ;;  %v5833_v62 = vmul.f32 %v13466_v22, %v16626_v19  ;;  %v13482_v10 = vpop.eup %8075  ;;  %8101 = vpow2.f32 %v5443_v9  ;;  %v5538_v7 = vsel %vm1772_vm12, %v13476_v56, 0.0  ;;  %v13488_v54 = vmul.f32 %v13476_v56, %v16628_v8 }
 0x8d3   :  { %16627 = vst [vmem:[#allocation47_spill] sm:$0xff] %v13482_v10  ;;  %v5925_v29 = vadd.f32 %v5924_v35, %v5923_v12  ;;  %v13490_v34 = vpop.eup %8077  ;;  %8103 = vpow2.f32 %v5445_v23  ;;  %v5537_v61 = vadd.f32 %v5536_v57, %v5535_v24  ;;  %v5540_v5 = vsel %vm1772_vm12, %v13482_v10, 0.0 }
 0x8d4   :  { %16629 = vst [vmem:[#allocation45_spill] sm:$0xff] %v13490_v34  ;;  %v13496_v38 = vmul.f32 %v13482_v10, %v16630_v51  ;;  %v13498_v9 = vpop.eup %8079  ;;  %8105 = vpow2.f32 %v13393_v48  ;;  %v5542_v2 = vsel %vm1772_vm12, %v13490_v34, 0.0  ;;  %v13505_v3 = vmul.f32 %v13490_v34, %v16632_v55 }
 0x8d5   :  { %16631 = vst [vmem:[#allocation46_spill] sm:$0xff] %v13498_v9  ;;  %v5926_v23 = vsel %vm1772_vm12, %v5832_v20, 0.0  ;;  %v13508_v16 = vpop.eup %8081  ;;  %8107 = vpow2.f32 %v13395_v47  ;;  %v5539_v15 = vadd.f32 %v5538_v7, %v5537_v61  ;;  %v5544_v4 = vsel %vm1772_vm12, %v13498_v9, 0.0 }
 0x8d6   :  { %16633 = vst [vmem:[#allocation49_spill] sm:$0xff] %v13508_v16  ;;  %v13515_v48 = vmul.f32 %v13498_v9, %v16617_v1  ;;  %v13517_v52 = vpop.eup %8083  ;;  %8109 = vpow2.f32 %v13397_v13  ;;  %v5545_v53 = vsel %vm1772_vm12, %v13508_v16, 0.0  ;;  %v13524_v43 = vmul.f32 %v13508_v16, %v16620_v40 }
 0x8d7   :  { %16634 = vst [vmem:[#allocation48_spill] sm:$0xff] %v13517_v52  ;;  %v5927_v47 = vadd.f32 %v5926_v23, %v5925_v29  ;;  %v13526_v21 = vpop.eup %8085  ;;  %8111 = vpow2.f32 %v13399_v36  ;;  %v5541_v31 = vadd.f32 %v5540_v5, %v5539_v15  ;;  %v5546_v12 = vadd.f32 %v5545_v53, %v5544_v4 }
 0x8d8   :  { %16635 = vst [vmem:[#allocation51_spill] sm:$0xff] %v13526_v21  ;;  %v5547_v35 = vsel %vm1772_vm12, %v13517_v52, 0.0  ;;  %v13531_v6 = vpop.eup %8087  ;;  %8113 = vpow2.f32 %v13401_v39  ;;  %v5549_v13 = vsel %vm1772_vm12, %v13526_v21, 0.0  ;;  %v13538_v20 = vmul.f32 %v13517_v52, %v16621_v37 }
 0x8d9   :  { %16636 = vst [vmem:[#allocation50_spill] sm:$0xff] %v13531_v6  ;;  %v13542_v24 = vmul.f32 %v13526_v21, %v16624_v33  ;;  %v13544_v36 = vpop.eup %8089  ;;  %8115 = vpow2.f32 %v13403_v11  ;;  %v13547_v57 = vadd.f32 %v5542_v2, %v5541_v31  ;;  %v5548_v7 = vadd.f32 %v5547_v35, %v5546_v12 }
 0x8da   :  { %16637 = vst [vmem:[#allocation53_spill] sm:$0xff] %v13544_v36  ;;  %v5551_v39 = vsel %vm1772_vm12, %v13531_v6, 0.0  ;;  %v13551_v29 = vpop.eup %8091  ;;  %8117 = vpow2.f32 %v13405_v46  ;;  %v5553_v61 = vsel %vm1772_vm12, %v13544_v36, 0.0  ;;  %v13558_v5 = vmul.f32 %v13531_v6, %v16626_v19 }
 0x8db   :  { %16638 = vst [vmem:[#allocation52_spill] sm:$0xff] %v13551_v29  ;;  %v13562_v11 = vmul.f32 %v13544_v36, %v16628_v8  ;;  %v13564_v2 = vpop.eup %8093  ;;  %8119 = vpow2.f32 %v13407_v58  ;;  %v5550_v23 = vadd.f32 %v5549_v13, %v5548_v7  ;;  %v5555_v15 = vsel %vm1772_vm12, %v13551_v29, 0.0 }
 0x8dc   :  { %16639 = vst [vmem:[#allocation55_spill] sm:$0xff] %v13564_v2  ;;  %v13571_v46 = vmul.f32 %v13551_v29, %v16630_v51  ;;  %v13573_v4 = vpop.eup %8095  ;;  %8121 = vpow2.f32 %v13409_v28  ;;  %v5557_v53 = vsel %vm1772_vm12, %v13564_v2, 0.0  ;;  %v13580_v31 = vmul.f32 %v13564_v2, %v16632_v55 }
 0x8dd   :  { %16640 = vst [vmem:[#allocation54_spill] sm:$0xff] %v13573_v4  ;;  %v5928_v58 = vsel %vm1772_vm12, %v5833_v62, 0.0  ;;  %v13583_v12 = vpop.eup %8097  ;;  %8123 = vpow2.f32 %v13411_v32  ;;  %v5552_v35 = vadd.f32 %v5551_v39, %v5550_v23  ;;  %v5559_v13 = vsel %vm1772_vm12, %v13573_v4, 0.0 }
 0x8de   :  { %16641 = vst [vmem:[#allocation57_spill] sm:$0xff] %v13583_v12  ;;  %v13590_v28 = vmul.f32 %v13573_v4, %v16617_v1  ;;  %v13592_v7 = vpop.eup %8099  ;;  %8125 = vpow2.f32 %v13413_v44  ;;  %v5560_v2 = vsel %vm1772_vm12, %v13583_v12, 0.0  ;;  %v13599_v62 = vmul.f32 %v13583_v12, %v16620_v40 }
 0x8df   :  { %16642 = vst [vmem:[#allocation56_spill] sm:$0xff] %v13592_v7  ;;  %v5929_v32 = vadd.f32 %v5928_v58, %v5927_v47  ;;  %v13601_v39 = vpop.eup %8101  ;;  %v5554_v23 = vadd.f32 %v5553_v61, %v5552_v35  ;;  %v5561_v29 = vadd.f32 %v5560_v2, %v5559_v13  ;;  %v5562_v4 = vsel %vm1772_vm12, %v13592_v7, 0.0 }
 0x8e0   :  { %16643 = vst [vmem:[#allocation58_spill] sm:$0xff] %v13601_v39  ;;  %v13607_v36 = vmul.f32 %v13592_v7, %v16621_v37  ;;  %v13609_v44 = vpop.eup %8103  ;;  %v5564_v6 = vsel %vm1772_vm12, %v13601_v39, 0.0  ;;  %v13615_v12 = vmul.f32 %v13601_v39, %v16624_v33  ;;  %v5930_v47 = vsel %vm1772_vm12, %v13488_v54, 0.0 }
 0x8e1   :  { %16644 = vst [vmem:[#allocation62_spill] sm:$0xff] %v13609_v44  ;;  %v5932_v61 = vsel %vm1772_vm12, %v13496_v38, 0.0  ;;  %v13621_v2 = vpop.eup %8105  ;;  %v5556_v58 = vadd.f32 %v5555_v15, %v5554_v23  ;;  %v5563_v35 = vadd.f32 %v5562_v4, %v5561_v29  ;;  %v5566_v13 = vsel %vm1772_vm12, %v13609_v44, 0.0 }
 0x8e2   :  { %16645 = vst [vmem:[#allocation64_spill] sm:$0xff] %v13621_v2  ;;  %v13627_v7 = vmul.f32 %v13609_v44, %v16626_v19  ;;  %v13629_v21 = vpop.eup %8107  ;;  %v5568_v39 = vsel %vm1772_vm12, %v13621_v2, 0.0  ;;  %v13635_v54 = vmul.f32 %v13621_v2, %v16628_v8  ;;  %v5931_v38 = vadd.f32 %v5930_v47, %v5929_v32 }
 0x8e3   :  { %16646 = vst [vmem:[#allocation59_spill] sm:$0xff] %v13629_v21  ;;  %v5934_v29 = vsel %vm1772_vm12, %v13505_v3, 0.0  ;;  %v13639_v15 = vpop.eup %8109  ;;  %v13641_v4 = vadd.f32 %v5557_v53, %v5556_v58  ;;  %v5565_v23 = vadd.f32 %v5564_v6, %v5563_v35  ;;  %v5570_v44 = vsel %vm1772_vm12, %v13629_v21, 0.0 }
 0x8e4   :  { %16647 = vst [vmem:[#allocation60_spill] sm:$0xff] %v13639_v15  ;;  %v5851_v52 = vmul.f32 %v13629_v21, %v16630_v51  ;;  %v13647_v16 = vpop.eup %8111  ;;  %v5572_v2 = vsel %vm1772_vm12, %v13639_v15, 0.0  ;;  %v5852_v32 = vmul.f32 %v13639_v15, %v16632_v55  ;;  %v5933_v3 = vadd.f32 %v5932_v61, %v5931_v38 }
 0x8e5   :  { %16648 = vst [vmem:[#allocation63_spill] sm:$0xff] %v13647_v16  ;;  %v5936_v53 = vsel %vm1772_vm12, %v13515_v48, 0.0  ;;  %v13655_v47 = vpop.eup %8113  ;;  %v5567_v6 = vadd.f32 %v5566_v13, %v5565_v23  ;;  %v5574_v58 = vsel %vm1772_vm12, %v13647_v16, 0.0  ;;  %v5853_v35 = vmul.f32 %v13647_v16, %v16617_v1 }
 0x8e6   :  { %16649 = vst [vmem:[#allocation65_spill] sm:$0xff] %v13655_v47  ;;  %v5937_v21 = vsel %vm1772_vm12, %v13524_v43, 0.0  ;;  %v13663_v9 = vpop.eup %8115  ;;  %v5575_v61 = vsel %vm1772_vm12, %v13655_v47, 0.0  ;;  %v5854_v48 = vmul.f32 %v13655_v47, %v16620_v40  ;;  %v13669_v38 = vadd.f32 %v5934_v29, %v5933_v3 }
 0x8e7   :  { %16650 = vst [vmem:[#allocation61_spill] sm:$0xff] %v13663_v9  ;;  %v5938_v13 = vadd.f32 %v5937_v21, %v5936_v53  ;;  %v13671_v23 = vpop.eup %8117  ;;  %v5569_v15 = vadd.f32 %v5568_v39, %v5567_v6  ;;  %v5576_v34 = vadd.f32 %v5575_v61, %v5574_v58  ;;  %v5577_v16 = vsel %vm1772_vm12, %v13663_v9, 0.0 }
 0x8e8   :  { %16651 = vst [vmem:[#allocation73_spill] sm:$0xff] %v13671_v23  ;;  %v5855_v43 = vmul.f32 %v13663_v9, %v16621_v37  ;;  %v13677_v1 = vpop.eup %8119  ;;  %v5579_v10 = vsel %vm1772_vm12, %v13671_v23, 0.0  ;;  %v5856_v29 = vmul.f32 %v13671_v23, %v16624_v33  ;;  %v5939_v21 = vsel %vm1772_vm12, %v13538_v20, 0.0  ;;  %v16687_v33 = vld [vmem:[#allocation127_spill] sm:$0xff] }
 0x8e9   :  { %16652 = vst [vmem:[#allocation71_spill] sm:$0xff] %v13677_v1  ;;  %v5941_v39 = vsel %vm1772_vm12, %v13542_v24, 0.0  ;;  %v13687_v3 = vpop.eup %8121  ;;  %v5571_v53 = vadd.f32 %v5570_v44, %v5569_v15  ;;  %v5578_v6 = vadd.f32 %v5577_v16, %v5576_v34  ;;  %v5581_v58 = vsel %vm1772_vm12, %v13677_v1, 0.0 }
 0x8ea   :  { %16653 = vst [vmem:[#allocation68_spill] sm:$0xff] %v13687_v3  ;;  %v5857_v61 = vmul.f32 %v13677_v1, %v16626_v19  ;;  %v13693_v9 = vpop.eup %8123  ;;  %v5583_v23 = vsel %vm1772_vm12, %v13687_v3, 0.0  ;;  %v5858_v20 = vmul.f32 %v13687_v3, %v16628_v8  ;;  %v5940_v47 = vadd.f32 %v5939_v21, %v5938_v13 }
 0x8eb   :  { %16654 = vst [vmem:[#allocation69_spill] sm:$0xff] %v13693_v9  ;;  %v5943_v24 = vsel %vm1772_vm12, %v13558_v5, 0.0  ;;  %v13701_v44 = vpop.eup %8125  ;;  %v5573_v34 = vadd.f32 %v5572_v2, %v5571_v53  ;;  %v5580_v16 = vadd.f32 %v5579_v10, %v5578_v6  ;;  %v5585_v15 = vsel %vm1772_vm12, %v13693_v9, 0.0 }
 0x8ec   :  { %16655 = vst [vmem:[#allocation66_spill] sm:$0xff] %v13701_v44  ;;  %v5859_v1 = vmul.f32 %v13693_v9, %v16630_v51  ;;  %v5587_v19 = vsel %vm1772_vm12, %v13701_v44, 0.0  ;;  %v5860_v3 = vmul.f32 %v13701_v44, %v16632_v55  ;;  %v5942_v13 = vadd.f32 %v5941_v39, %v5940_v47 }
 0x8ed   :  { %v5945_v5 = vsel %vm1772_vm12, %v13562_v11, 0.0  ;;  %v5582_v21 = vadd.f32 %v5581_v58, %v5580_v16  ;;  %v5947_v10 = vsel %vm1772_vm12, %v13571_v46, 0.0  ;;  %v5949_v2 = vsel %vm1772_vm12, %v13580_v31, 0.0 }
 0x8ee   :  { %v5951_v53 = vsel %vm1772_vm12, %v13590_v28, 0.0  ;;  %v5944_v6 = vadd.f32 %v5943_v24, %v5942_v13  ;;  %v5952_v9 = vsel %vm1772_vm12, %v13599_v62, 0.0  ;;  %v5954_v47 = vsel %vm1772_vm12, %v13607_v36, 0.0 }
 0x8ef   :  { %v5956_v11 = vsel %vm1772_vm12, %v13615_v12, 0.0  ;;  %v5584_v39 = vadd.f32 %v5583_v23, %v5582_v21  ;;  %v5953_v58 = vadd.f32 %v5952_v9, %v5951_v53  ;;  %v5958_v46 = vsel %vm1772_vm12, %v13627_v7, 0.0 }
 0x8f0   :  { %v5960_v31 = vsel %vm1772_vm12, %v13635_v54, 0.0  ;;  %v5946_v16 = vadd.f32 %v5945_v5, %v5944_v6  ;;  %v5962_v28 = vsel %vm1772_vm12, %v5851_v52, 0.0  ;;  %v5964_v24 = vsel %vm1772_vm12, %v5852_v32, 0.0  ;;  %v16658_v6 = vld [vmem:[#allocation144_spill] sm:$0xff] }
 0x8f1   :  { %v5966_v62 = vsel %vm1772_vm12, %v5853_v35, 0.0  ;;  %v5586_v13 = vadd.f32 %v5585_v15, %v5584_v39  ;;  %v5955_v36 = vadd.f32 %v5954_v47, %v5953_v58  ;;  %v5967_v44 = vsel %vm1772_vm12, %v5854_v48, 0.0  ;;  %v16659_v47 = vld [vmem:[#allocation87_spill] sm:$0xff] }
 0x8f2   :  { %v5969_v12 = vsel %vm1772_vm12, %v5855_v43, 0.0  ;;  %v5948_v9 = vadd.f32 %v5947_v10, %v5946_v16  ;;  %v5968_v23 = vadd.f32 %v5967_v44, %v5966_v62  ;;  %v5971_v7 = vsel %vm1772_vm12, %v5856_v29, 0.0  ;;  %v16656_v43 = vld [vmem:[#allocation128_spill] sm:$0xff] }
 0x8f3   :  { %v5973_v21 = vsel %vm1772_vm12, %v5857_v61, 0.0  ;;  %v5588_v54 = vadd.f32 %v5587_v19, %v5586_v13  ;;  %v5957_v5 = vadd.f32 %v5956_v11, %v5955_v36  ;;  %v5975_v52 = vsel %vm1772_vm12, %v5858_v20, 0.0 }
 0x8f4   :  { %v5977_v32 = vsel %vm1772_vm12, %v5859_v1, 0.0  ;;  %v13738_v53 = vadd.f32 %v5949_v2, %v5948_v9  ;;  %v5970_v35 = vadd.f32 %v5969_v12, %v5968_v23  ;;  %v5979_v15 = vsel %vm1772_vm12, %v5860_v3, 0.0  ;;  %v16670_v9 = vld [vmem:[#allocation112_spill] sm:$0xff] }
 0x8f5   :  { %8127 = vrcp.f32 %v13547_v57  ;;  %v5959_v48 = vadd.f32 %v5958_v46, %v5957_v5  ;;  %v13745_v29 = vmul.f32 %v16611_v41, %v16656_v43  ;;  %v13749_v19 = vmul.f32 %v16613_v17, %v16656_v43  ;;  %v16675_v5 = vld [vmem:[#allocation125_spill] sm:$0xff] }
 0x8f6   :  { %8129 = vrcp.f32 %v13641_v4  ;;  %v5972_v61 = vadd.f32 %v5971_v7, %v5970_v35  ;;  %v13753_v1 = vmul.f32 %v16614_v63, %v16656_v43  ;;  %v13757_v57 = vmul.f32 %v16615_v60, %v16656_v43  ;;  %v16657_v4 = vld [vmem:[#allocation8_spill] sm:$0xff]  ;;  %v16679_v43 = vld [vmem:[#allocation5_spill] sm:$0xff] }
 0x8f7   :  { %8131 = vrcp.f32 %v5573_v34  ;;  %v5961_v3 = vadd.f32 %v5960_v31, %v5959_v48  ;;  %v13761_v20 = vmul.f32 %v16611_v41, %v16657_v4  ;;  %v13765_v44 = vmul.f32 %v16613_v17, %v16657_v4  ;;  %v16660_v41 = vld [vmem:[#allocation11_spill] sm:$0xff]  ;;  %v16661_v17 = vld [vmem:[#allocation174_spill] sm:$0xff] }
 0x8f8   :  { %8133 = vrcp.f32 %v5588_v54  ;;  %v5974_v10 = vadd.f32 %v5973_v21, %v5972_v61  ;;  %v13769_v34 = vmul.f32 %v16614_v63, %v16657_v4  ;;  %v13773_v2 = vmul.f32 %v16615_v60, %v16657_v4  ;;  %v16663_v63 = vld [vmem:[#allocation161_spill] sm:$0xff]  ;;  %v16680_v61 = vld [vmem:[#allocation122_spill] sm:$0xff] }
 0x8f9   :  { %v13777_v11 = vmul.f32 %v16659_v47, %v16658_v6  ;;  %v5963_v39 = vadd.f32 %v5962_v28, %v5961_v3  ;;  %v13781_v58 = vmul.f32 %v16660_v41, %v16658_v6  ;;  %v13785_v46 = vmul.f32 %v16661_v17, %v16658_v6  ;;  %v16665_v60 = vld [vmem:[#allocation117_spill] sm:$0xff] }
 0x8fa   :  { %v13789_v31 = vmul.f32 %v16663_v63, %v16658_v6  ;;  %v5976_v16 = vadd.f32 %v5975_v52, %v5974_v10  ;;  %v13793_v62 = vmul.f32 %v16659_v47, %v16665_v60  ;;  %v13797_v28 = vmul.f32 %v16660_v41, %v16665_v60  ;;  %v16681_v10 = vld [vmem:[#allocation15_spill] sm:$0xff] }
 0x8fb   :  { %16662 = vst [vmem:[#allocation67_spill] sm:$0xff] %v13785_v46  ;;  %v13801_v13 = vmul.f32 %v16661_v17, %v16665_v60  ;;  %v5965_v36 = vadd.f32 %v5964_v24, %v5963_v39  ;;  %v13805_v12 = vmul.f32 %v16663_v63, %v16665_v60  ;;  %v13809_v23 = vmul.f32 %v16659_v47, %v16670_v9  ;;  %v16684_v60 = vld [vmem:[#allocation107_spill] sm:$0xff] }
 0x8fc   :  { %16664 = vst [vmem:[#allocation72_spill] sm:$0xff] %v13789_v31  ;;  %16666 = vst [vmem:[#allocation70_spill] sm:$0xff] %v13793_v62  ;;  %v13813_v7 = vmul.f32 %v16660_v41, %v16670_v9  ;;  %v5978_v21 = vadd.f32 %v5977_v32, %v5976_v16  ;;  %v13817_v54 = vmul.f32 %v16661_v17, %v16670_v9 }
 0x8fd   :  { %16667 = vst [vmem:[#allocation74_spill] sm:$0xff] %v13797_v28  ;;  %16668 = vst [vmem:[#allocation82_spill] sm:$0xff] %v13801_v13  ;;  %v13821_v24 = vmul.f32 %v16663_v63, %v16670_v9  ;;  %v13825_v52 = vmul.f32 %v16659_v47, %v16675_v5  ;;  %v13829_v35 = vmul.f32 %v16660_v41, %v16675_v5  ;;  %v16682_v47 = vld [vmem:[#allocation83_spill] sm:$0xff]  ;;  %v16683_v41 = vld [vmem:[#allocation154_spill] sm:$0xff] }
 0x8fe   :  { %16669 = vst [vmem:[#allocation7_spill] sm:$0xff] %v13805_v12  ;;  %16671 = vst [vmem:[#allocation150_spill] sm:$0xff] %v13809_v23  ;;  %v13833_v48 = vmul.f32 %v16661_v17, %v16675_v5  ;;  %v13837_v32 = vmul.f32 %v16663_v63, %v16675_v5  ;;  %v4262_v3 = vmul.f32 %v16680_v61, %v16679_v43 }
 0x8ff   :  { %16672 = vst [vmem:[#allocation147_spill] sm:$0xff] %v13813_v7  ;;  %16673 = vst [vmem:[#allocation4_spill] sm:$0xff] %v13817_v54  ;;  %v5980_v4 = vadd.f32 %v5979_v15, %v5978_v21  ;;  %v4264_v6 = vmul.f32 %v16681_v10, %v16679_v43  ;;  %v4266_v39 = vmul.f32 %v16682_v47, %v16679_v43  ;;  %v16685_v21 = vld [vmem:[#allocation80_spill] sm:$0xff] }
 0x900   :  { %16674 = vst [vmem:[#allocation84_spill] sm:$0xff] %v13821_v24  ;;  %16676 = vst [vmem:[#allocation132_spill] sm:$0xff] %v13825_v52  ;;  %v4268_v16 = vmul.f32 %v16683_v41, %v16679_v43  ;;  %v4270_v17 = vmul.f32 %v16680_v61, %v16684_v60  ;;  %v4272_v63 = vmul.f32 %v16681_v10, %v16684_v60 }
 0x901   :  { %16677 = vst [vmem:[#allocation9_spill] sm:$0xff] %v13829_v35  ;;  %16678 = vst [vmem:[#allocation114_spill] sm:$0xff] %v13837_v32  ;;  %v4274_v9 = vmul.f32 %v16682_v47, %v16684_v60  ;;  %v4276_v15 = vmul.f32 %v16683_v41, %v16684_v60  ;;  %v4278_v5 = vmul.f32 %v16680_v61, %v16685_v21 }
 0x902   :  { %v4280_v55 = vmul.f32 %v16681_v10, %v16685_v21  ;;  %v4282_v43 = vmul.f32 %v16682_v47, %v16685_v21  ;;  %v4284_v51 = vmul.f32 %v16683_v41, %v16685_v21  ;;  %v13863_v8 = vpop.eup %8127  ;;  %v4286_v37 = vmul.f32 %v16680_v61, %v16687_v33 }
 0x903   :  { %16686 = vst [vmem:[#allocation3_spill] sm:$0xff] %v13863_v8  ;;  %v4288_v60 = vmul.f32 %v16681_v10, %v16687_v33  ;;  %v4290_v40 = vmul.f32 %v16682_v47, %v16687_v33  ;;  %v4292_v56 = vmul.f32 %v16683_v41, %v16687_v33  ;;  %v13873_v22 = vpop.eup %8129  ;;  %v6001_v0 = vmul.f32 %v13863_v8, %v13669_v38 }
 0x904   :  { %16688 = vst [vmem:[#allocation102_spill] sm:$0xff] %v13873_v22  ;;  %v4326_v21 = vsub.f32 %v13417_v59, %v13777_v11  ;;  %v4328_v61 = vsub.f32 %v13423_v50, %v13781_v58  ;;  %v4330_v10 = vsub.f32 %v13427_v30, %v13785_v46  ;;  %v13883_v45 = vpop.eup %8131  ;;  %v6002_v47 = vmul.f32 %v13873_v22, %v13738_v53 }
 0x905   :  { %16689 = vst [vmem:[#allocation167_spill] sm:$0xff] %v13883_v45  ;;  %v4332_v33 = vsub.f32 %v13431_v25, %v13789_v31  ;;  %v4334_v38 = vsub.f32 %v13441_v49, %v13793_v62  ;;  %v4336_v41 = vsub.f32 %v13451_v27, %v13797_v28  ;;  %v13893_v8 = vpop.eup %8133  ;;  %v6003_v18 = vmul.f32 %v13883_v45, %v5965_v36 }
 0x906   :  { %16690 = vst [vmem:[#allocation76_spill] sm:$0xff] %v13893_v8  ;;  %v4338_v42 = vsub.f32 %v13461_v26, %v13801_v13  ;;  %v4340_v46 = vsub.f32 %v13474_v14, %v13805_v12  ;;  %v4342_v53 = vsub.f32 %v13745_v29, %v13809_v23  ;;  %v6004_v22 = vmul.f32 %v13893_v8, %v5980_v4 }
 0x907   :  { %v6031_v31 = vcombine.low %v6001_v0, %v6002_v47  ;;  %v4344_v62 = vsub.f32 %v13749_v19, %v13813_v7  ;;  %v4346_v28 = vsub.f32 %v13753_v1, %v13817_v54  ;;  %v4348_v36 = vsub.f32 %v13757_v57, %v13821_v24 }
 0x908   :  { %v4350_v45 = vsub.f32 %v13761_v20, %v13825_v52  ;;  %v4352_v12 = vsub.f32 %v13765_v44, %v13829_v35  ;;  %v4354_v23 = vsub.f32 %v13769_v34, %v13833_v48  ;;  %v6032_v4 = vcombine.low %v6003_v18, %v6004_v22 }
 0x909   :  { %v4356_v0 = vsub.f32 %v13773_v2, %v13837_v32  ;;  %v4390_v47 = vsub.f32 %v4262_v3, %v13417_v59  ;;  %v4392_v8 = vsub.f32 %v4264_v6, %v13423_v50  ;;  %v4394_v54 = vsub.f32 %v4266_v39, %v13427_v30  ;;  %v16700_v39 = vld [vmem:[#allocation84_spill] sm:$0xff] }
 0x90a   :  { %v4396_v24 = vsub.f32 %v4268_v16, %v13431_v25  ;;  %v4398_v52 = vsub.f32 %v4270_v17, %v13441_v49  ;;  %v4400_v7 = vsub.f32 %v4272_v63, %v13451_v27  ;;  %v6048_v35 = vpack.c.bf16 %v6032_v4, %v6031_v31  ;;  %v16693_v31 = vld [vmem:[#allocation70_spill] sm:$0xff]  ;;  %v16702_v16 = vld [vmem:[#allocation9_spill] sm:$0xff] }
 0x90b   :  { %v4402_v13 = vsub.f32 %v4274_v9, %v13461_v26  ;;  %v4404_v18 = vsub.f32 %v4276_v15, %v13474_v14  ;;  %v4406_v22 = vsub.f32 %v4278_v5, %v13745_v29  ;;  %v4408_v32 = vsub.f32 %v4280_v55, %v13749_v19  ;;  %v16691_v29 = vld [vmem:[#allocation67_spill] sm:$0xff]  ;;  %v16692_v19 = vld [vmem:[#allocation72_spill] sm:$0xff]  ;;  %v16703_v17 = vld [vmem:[#allocation114_spill] sm:$0xff] }
 0x90c   :  { %v4410_v59 = vsub.f32 %v4282_v43, %v13753_v1  ;;  %v4412_v50 = vsub.f32 %v4284_v51, %v13757_v57  ;;  %v4414_v30 = vsub.f32 %v4286_v37, %v13761_v20  ;;  %7542 = vmatprep.subr.bf16.mxu1 %v6048_v35  ;;  %v4416_v25 = vsub.f32 %v4288_v60, %v13765_v44  ;;  %v16694_v57 = vld [vmem:[#allocation74_spill] sm:$0xff]  ;;  %v16696_v44 = vld [vmem:[#allocation7_spill] sm:$0xff] }
 0x90d   :  { %v4418_v49 = vsub.f32 %v4290_v40, %v13769_v34  ;;  %v4420_v27 = vsub.f32 %v4292_v56, %v13773_v2  ;;  %v4454_v26 = vsub.f32 %v4390_v47, %v13777_v11  ;;  %7543 = vmatpush3.bf16.msra.mxu1 %v6048_v35  ;;  %v4456_v14 = vsub.f32 %v4392_v8, %v13781_v58  ;;  %v16695_v20 = vld [vmem:[#allocation82_spill] sm:$0xff]  ;;  %v16698_v56 = vld [vmem:[#allocation147_spill] sm:$0xff]  ;;  %v16699_v11 = vld [vmem:[#allocation4_spill] sm:$0xff] }
 0x90e   :  { %v4458_v55 = vsub.f32 %v4394_v54, %v16691_v29  ;;  %v4460_v1 = vsub.f32 %v4396_v24, %v16692_v19  ;;  %v4462_v51 = vsub.f32 %v4398_v52, %v16693_v31  ;;  %v4464_v37 = vsub.f32 %v4400_v7, %v16694_v57  ;;  %v16697_v40 = vld [vmem:[#allocation150_spill] sm:$0xff]  ;;  %v16701_v58 = vld [vmem:[#allocation132_spill] sm:$0xff] }
 0x90f   :  { %v4466_v3 = vsub.f32 %v4402_v13, %v16695_v20  ;;  %v4468_v6 = vsub.f32 %v4404_v18, %v16696_v44  ;;  %v4470_v34 = vsub.f32 %v4406_v22, %v16697_v40  ;;  %v4472_v2 = vsub.f32 %v4408_v32, %v16698_v56  ;;  %v16704_v44 = vld [vmem:[#allocation135_spill] sm:$0xff]  ;;  %v16705_v56 = vld [vmem:[#allocation90_spill] sm:$0xff] }
 0x910   :  { %v4474_v35 = vsub.f32 %v4410_v59, %v16699_v11  ;;  %v4476_v8 = vsub.f32 %v4412_v50, %v16700_v39  ;;  %v4478_v54 = vsub.f32 %v4414_v30, %v16701_v58  ;;  %v4480_v24 = vsub.f32 %v4416_v25, %v16702_v16  ;;  %v16707_v11 = vld [vmem:[#allocation108_spill] sm:$0xff]  ;;  %v3782_v39 = vpop.permute.xlu1 %3781 }
 0x911   :  { %v4482_v52 = vsub.f32 %v4418_v49, %v13833_v48  ;;  %v4484_v7 = vsub.f32 %v4420_v27, %v16703_v17  ;;  %v4518_v63 = vmul.f32 %v4326_v21, %v4326_v21  ;;  %v4520_v13 = vmul.f32 %v4328_v61, %v4328_v61  ;;  %v3767_v48 = vpop.permute.xlu0 %3766  ;;  %v16712_v17 = vld [vmem:[#allocation86_spill] sm:$0xff] }
 0x912   :  { %v4522_v9 = vmul.f32 %v4330_v10, %v4330_v10  ;;  %v4524_v15 = vmul.f32 %v4332_v33, %v4332_v33  ;;  %v4526_v5 = vmul.f32 %v4334_v38, %v4334_v38  ;;  %v4528_v43 = vmul.f32 %v4336_v41, %v4336_v41 }
 0x913   :  { %v4530_v60 = vmul.f32 %v4338_v42, %v4338_v42  ;;  %v4532_v32 = vmul.f32 %v4340_v46, %v4340_v46  ;;  %v4534_v4 = vmul.f32 %v4342_v53, %v4342_v53  ;;  %v4536_v47 = vmul.f32 %v4344_v62, %v4344_v62 }
 0x914   :  { %v4538_v18 = vmul.f32 %v4346_v28, %v4346_v28  ;;  %v4540_v22 = vmul.f32 %v4348_v36, %v4348_v36  ;;  %v4542_v59 = vmul.f32 %v4350_v45, %v4350_v45  ;;  %v4544_v50 = vmul.f32 %v4352_v12, %v4352_v12 }
 0x915   :  { %v4546_v30 = vmul.f32 %v4354_v23, %v4354_v23  ;;  %v4548_v25 = vmul.f32 %v4356_v0, %v4356_v0  ;;  %v4582_v29 = vmul.f32 %v4454_v26, %v4454_v26  ;;  %v4584_v49 = vmul.f32 %v4456_v14, %v4456_v14 }
 0x916   :  { %v4586_v27 = vmul.f32 %v4458_v55, %v4458_v55  ;;  %v4588_v21 = vmul.f32 %v4460_v1, %v4460_v1  ;;  %v4590_v61 = vmul.f32 %v4462_v51, %v4462_v51  ;;  %v4592_v10 = vmul.f32 %v4464_v37, %v4464_v37  ;;  %v3772_v51 = vpop.permute.xlu0 %3771 }
 0x917   :  { %v4594_v33 = vmul.f32 %v4466_v3, %v4466_v3  ;;  %v4596_v38 = vmul.f32 %v4468_v6, %v4468_v6  ;;  %v4598_v41 = vmul.f32 %v4470_v34, %v4470_v34  ;;  %v4600_v42 = vmul.f32 %v4472_v2, %v4472_v2  ;;  %v16706_v2 = vld [vmem:[#allocation136_spill] sm:$0xff] }
 0x918   :  { %v4602_v46 = vmul.f32 %v4474_v35, %v4474_v35  ;;  %v4604_v53 = vmul.f32 %v4476_v8, %v4476_v8  ;;  %v4606_v62 = vmul.f32 %v4478_v54, %v4478_v54  ;;  %v4608_v28 = vmul.f32 %v4480_v24, %v4480_v24  ;;  %v16708_v8 = vld [vmem:[#allocation79_spill] sm:$0xff]  ;;  %v16709_v54 = vld [vmem:[#allocation85_spill] sm:$0xff]  ;;  %v16710_v24 = vld [vmem:[#allocation6_spill] sm:$0xff] }
 0x919   :  { %v4610_v36 = vmul.f32 %v4482_v52, %v4482_v52  ;;  %v4612_v45 = vmul.f32 %v4484_v7, %v4484_v7  ;;  %v13949_v12 = vadd.f32 %v4582_v29, %v4518_v63  ;;  %v13951_v23 = vadd.f32 %v4584_v49, %v4520_v13  ;;  %v16713_v63 = vld [vmem:[#allocation75_spill] sm:$0xff]  ;;  %v16714_v13 = vld [vmem:[#allocation110_spill] sm:$0xff] }
 0x91a   :  { %v13953_v0 = vadd.f32 %v4586_v27, %v4522_v9  ;;  %v13955_v26 = vadd.f32 %v4588_v21, %v4524_v15  ;;  %v13957_v14 = vadd.f32 %v4590_v61, %v4526_v5  ;;  %v13959_v55 = vadd.f32 %v4592_v10, %v4528_v43  ;;  %v3777_v35 = vpop.permute.xlu0 %3776  ;;  %v16715_v9 = vld [vmem:[#allocation124_spill] sm:$0xff]  ;;  %v16716_v5 = vld [vmem:[#allocation89_spill] sm:$0xff]  ;;  %v16717_v43 = vld [vmem:[#allocation143_spill] sm:$0xff] }
 0x91b   :  { %v13961_v19 = vadd.f32 %v4594_v33, %v4530_v60  ;;  %v13963_v1 = vadd.f32 %v4596_v38, %v4532_v32  ;;  %v13965_v31 = vadd.f32 %v4598_v41, %v4534_v4  ;;  %v13967_v57 = vadd.f32 %v4600_v42, %v4536_v47  ;;  %v16718_v60 = vld [vmem:[#allocation162_spill] sm:$0xff]  ;;  %v16724_v38 = vld [vmem:[#allocation151_spill] sm:$0xff]  ;;  %v16725_v41 = vld [vmem:[#allocation152_spill] sm:$0xff] }
 0x91c   :  { %v13969_v37 = vadd.f32 %v4602_v46, %v4538_v18  ;;  %v13971_v20 = vadd.f32 %v4604_v53, %v4540_v22  ;;  %v13973_v3 = vadd.f32 %v4606_v62, %v4542_v59  ;;  %8135 = vrsqrt.f32 %v16704_v44  ;;  %v16719_v32 = vld [vmem:[#allocation38_spill] sm:$0xff]  ;;  %v16721_v59 = vld [vmem:[#allocation156_spill] sm:$0xff] }
 0x91d   :  { %v13976_v6 = vadd.f32 %v4608_v28, %v4544_v50  ;;  %v13978_v40 = vadd.f32 %v4610_v36, %v4546_v30  ;;  %v13980_v34 = vadd.f32 %v4612_v45, %v4548_v25  ;;  %8137 = vrsqrt.f32 %v16705_v56  ;;  %v16720_v22 = vld [vmem:[#allocation134_spill] sm:$0xff] }
 0x91e   :  { %8139 = vrsqrt.f32 %v13949_v12  ;;  %v13988_v58 = vadd.f32 %v16708_v8, %v3777_v35  ;;  %v13991_v16 = vadd.f32 %v16709_v54, %v3767_v48  ;;  %v13995_v52 = vadd.f32 %v16710_v24, %v3782_v39  ;;  %v16723_v29 = vld [vmem:[#allocation10_spill] sm:$0xff] }
 0x91f   :  { %8141 = vrsqrt.f32 %v16706_v2  ;;  %v13998_v7 = vadd.f32 %v16712_v17, %v3772_v51  ;;  %v4710_v15 = vmul.f32 %v16715_v9, %v16714_v13  ;;  %v4724_v4 = vmul.f32 %v16719_v32, %v16718_v60  ;;  %v16726_v9 = vld [vmem:[#allocation101_spill] sm:$0xff] }
 0x920   :  { %8143 = vrsqrt.f32 %v16707_v11  ;;  %16711 = vst [vmem:[#allocation139_spill] sm:$0xff] %v13995_v52  ;;  %v14009_v47 = vcombine.high %v13988_v58, %v13988_v58  ;;  %v14013_v18 = vcombine.high %v13991_v16, %v13991_v16  ;;  %v4738_v50 = vmul.f32 %v16721_v59, %v16720_v22 }
 0x921   :  { %8145 = vrsqrt.f32 %v13951_v23  ;;  %v14020_v30 = vcombine.high %v13995_v52, %v13995_v52  ;;  %v14024_v25 = vcombine.high %v13998_v7, %v13998_v7  ;;  %vm4711_vm0 = vcmp.eq.f32.partialorder %v16714_v13, inf }
 0x922   :  { %8147 = vrsqrt.f32 %v13953_v0  ;;  %v4712_v48 = vsel %vm4711_vm0, %v16714_v13, %v4710_v15  ;;  %vm4713_vm6 = vcmp.eq.f32.partialorder %v16714_v13, 0.0  ;;  %vm4725_vm15 = vcmp.eq.f32.partialorder %v16718_v60, inf }
 0x923   :  { %8149 = vrsqrt.f32 %v16713_v63  ;;  %16722 = vst [vmem:[#allocation170_spill] sm:$0xff] %v14020_v30  ;;  %v4714_v27 = vand.u32 2147483648, %v16714_v13  ;;  %v4726_v21 = vsel %vm4725_vm15, %v16718_v60, %v4724_v4  ;;  %vm4739_vm10 = vcmp.eq.f32.partialorder %v16720_v22, inf  ;;  %v16727_v4 = vld [vmem:[#allocation97_spill] sm:$0xff] }
 0x924   :  { %8151 = vrsqrt.f32 %v16716_v5  ;;  %vm4718_vm9 = vcmp.eq.f32.partialorder %v13949_v12, inf  ;;  %v4728_v10 = vand.u32 2147483648, %v16718_v60  ;;  %v4740_v33 = vsel %vm4739_vm10, %v16720_v22, %v4738_v50 }
 0x925   :  { %8153 = vrsqrt.f32 %v16717_v43  ;;  %v4766_v42 = vmul.f32 %v16725_v41, %v16724_v38  ;;  %v14043_v53 = vsel %vm4713_vm6, %v4714_v27, %v4712_v48  ;;  %v4721_v62 = vand.u32 2147483648, %v13949_v12 }
 0x926   :  { %8155 = vrsqrt.f32 %v13955_v26  ;;  %vm4727_vm8 = vcmp.eq.f32.partialorder %v16718_v60, 0.0  ;;  %v4742_v28 = vand.u32 2147483648, %v16720_v22  ;;  %vm4720_vm14 = vcmp.eq.f32.partialorder %v13949_v12, 0.0 }
 0x927   :  { %8157 = vrsqrt.f32 %v13957_v14  ;;  %v14051_v45 = vsel %vm4727_vm8, %v4728_v10, %v4726_v21  ;;  %vm4732_vm5 = vcmp.eq.f32.partialorder %v13951_v23, inf  ;;  %v4735_v51 = vand.u32 2147483648, %v13951_v23 }
 0x928   :  { %8159 = vrsqrt.f32 %v16723_v29  ;;  %vm4741_vm4 = vcmp.eq.f32.partialorder %v16720_v22, 0.0  ;;  %vm4746_vm1 = vcmp.eq.f32.partialorder %v13953_v0, inf  ;;  %v4749_v8 = vand.u32 2147483648, %v13953_v0  ;;  %v16728_v22 = vld [vmem:[#allocation88_spill] sm:$0xff] }
 0x929   :  { %v14032_v49 = vpop.eup %8135  ;;  %8161 = vrsqrt.f32 %v13959_v55  ;;  %v14057_v39 = vsel %vm4741_vm4, %v4742_v28, %v4740_v33  ;;  %vm4767_vm3 = vcmp.eq.f32.partialorder %v16724_v38, inf  ;;  %vm4753_vm2 = vcmp.eq.f32.partialorder %v16716_v5, inf }
 0x92a   :  { %v8138_v61 = vpop.eup %8137  ;;  %8163 = vrsqrt.f32 %v13961_v19  ;;  %v4768_v13 = vsel %vm4767_vm3, %v16724_v38, %v4766_v42  ;;  %vm4734_vm7 = vcmp.eq.f32.partialorder %v13951_v23, 0.0  ;;  %v4756_v60 = vand.u32 2147483648, %v16716_v5 }
 0x92b   :  { %v8140_v46 = vpop.eup %8139  ;;  %v4780_v54 = vmul.f32 %v8138_v61, %v16705_v56  ;;  %8165 = vrsqrt.f32 %v16726_v9  ;;  %v4770_v32 = vand.u32 2147483648, %v16724_v38  ;;  %v4794_v59 = vmul.f32 %v16728_v22, %v16727_v4 }
 0x92c   :  { %v14048_v36 = vpop.eup %8141  ;;  %v4717_v17 = vmul.f32 %v8140_v46, %v13949_v12  ;;  %8167 = vrsqrt.f32 %v13963_v1  ;;  %vm4748_vm11 = vcmp.eq.f32.partialorder %v13953_v0, 0.0  ;;  %v4763_v48 = vand.u32 2147483648, %v13955_v26 }
 0x92d   :  { %v8144_v35 = vpop.eup %8143  ;;  %vm4769_vm13 = vcmp.eq.f32.partialorder %v16724_v38, 0.0  ;;  %v4777_v27 = vand.u32 2147483648, %v13957_v14  ;;  %vm4781_vm0 = vcmp.eq.f32.partialorder %v16705_v56, inf  ;;  %vm4755_vm6 = vcmp.eq.f32.partialorder %v16716_v5, 0.0 }
 0x92e   :  { %v8146_v24 = vpop.eup %8145  ;;  %vm4760_vm15 = vcmp.eq.f32.partialorder %v13955_v26, inf  ;;  %v14083_v10 = vsel %vm4769_vm13, %v4770_v32, %v4768_v13  ;;  %v4782_v33 = vsel %vm4781_vm0, %v16705_v56, %v4780_v54  ;;  %v4784_v41 = vand.u32 2147483648, %v16705_v56 }
 0x92f   :  { %v8148_v15 = vpop.eup %8147  ;;  %v4731_v61 = vmul.f32 %v8146_v24, %v13951_v23  ;;  %v4719_v38 = vsel %vm4718_vm9, %v13949_v12, %v4717_v17  ;;  %vm4774_vm10 = vcmp.eq.f32.partialorder %v13957_v14, inf  ;;  %vm4795_vm8 = vcmp.eq.f32.partialorder %v16727_v4, inf }
 0x930   :  { %v14073_v50 = vpop.eup %8149  ;;  %v4745_v46 = vmul.f32 %v8148_v15, %v13953_v0  ;;  %v4822_v28 = vmul.f32 %v8144_v35, %v16707_v11  ;;  %vm4783_vm4 = vcmp.eq.f32.partialorder %v16705_v56, 0.0  ;;  %v4796_v54 = vsel %vm4795_vm8, %v16727_v4, %v4794_v59 }
 0x931   :  { %v8152_v21 = vpop.eup %8151  ;;  %8169 = vrsqrt.f32 %v13965_v31  ;;  %v14098_v22 = vsel %vm4783_vm4, %v4784_v41, %v4782_v33  ;;  %vm4788_vm9 = vcmp.eq.f32.partialorder %v13959_v55, inf  ;;  %v4791_v17 = vand.u32 2147483648, %v13959_v55 }
 0x932   :  { %v8154_v42 = vpop.eup %8153  ;;  %v4752_v13 = vmul.f32 %v8152_v21, %v16716_v5  ;;  %vm4797_vm3 = vcmp.eq.f32.partialorder %v16727_v4, 0.0  ;;  %v4798_v35 = vand.u32 2147483648, %v16727_v4  ;;  %v14108_v56 = vsel %vm4720_vm14, %v4721_v62, %v4719_v38 }
 0x933   :  { %v8156_v24 = vpop.eup %8155  ;;  %v4733_v59 = vsel %vm4732_vm5, %v13951_v23, %v4731_v61  ;;  %vm4762_vm13 = vcmp.eq.f32.partialorder %v13955_v26, 0.0  ;;  %vm4776_vm0 = vcmp.eq.f32.partialorder %v13957_v14, 0.0  ;;  %vm4823_vm8 = vcmp.eq.f32.partialorder %v16707_v11, inf }
 0x934   :  { %v8158_v32 = vpop.eup %8157  ;;  %v4747_v4 = vsel %vm4746_vm1, %v13953_v0, %v4745_v46  ;;  %v4759_v12 = vmul.f32 %v8156_v24, %v13955_v26  ;;  %v14121_v62 = vsel %vm4797_vm3, %v4798_v35, %v4796_v54  ;;  %vm4802_vm14 = vcmp.eq.f32.partialorder %v13961_v19, inf }
 0x935   :  { %v14104_v15 = vpop.eup %8159  ;;  %v4824_v61 = vsel %vm4823_vm8, %v16707_v11, %v4822_v28  ;;  %v4754_v41 = vsel %vm4753_vm2, %v16716_v5, %v4752_v13  ;;  %v4773_v38 = vmul.f32 %v8158_v32, %v13957_v14  ;;  %vm4790_vm5 = vcmp.eq.f32.partialorder %v13959_v55, 0.0 }
 0x936   :  { %v8162_v33 = vpop.eup %8161  ;;  %v4836_v21 = vmul.f32 %v8154_v42, %v16717_v43  ;;  %8171 = vrsqrt.f32 %v13967_v57  ;;  %v14136_v46 = vsel %vm4734_vm7, %v4735_v51, %v4733_v59  ;;  %vm4809_vm1 = vcmp.eq.f32.partialorder %v16726_v9, inf }
 0x937   :  { %v4812_v28 = vand.u32 2147483648, %v16726_v9  ;;  %vm4816_vm2 = vcmp.eq.f32.partialorder %v13963_v1, inf  ;;  %v4826_v24 = vand.u32 2147483648, %v16707_v11  ;;  %v8164_v13 = vpop.eup %8163  ;;  %v14146_v42 = vsel %vm4748_vm11, %v4749_v8, %v4747_v4 }
 0x938   :  { %v4787_v54 = vmul.f32 %v8162_v33, %v13959_v55  ;;  %vm4804_vm7 = vcmp.eq.f32.partialorder %v13961_v19, 0.0  ;;  %v4819_v23 = vand.u32 2147483648, %v13963_v1  ;;  %vm4825_vm4 = vcmp.eq.f32.partialorder %v16707_v11, 0.0  ;;  %v8166_v32 = vpop.eup %8165 }
 0x939   :  { %v14156_v51 = vsel %vm4755_vm6, %v4756_v60, %v4754_v41  ;;  %v4761_v0 = vsel %vm4760_vm15, %v13955_v26, %v4759_v12  ;;  %v14161_v8 = vsel %vm4825_vm4, %v4826_v24, %v4824_v61  ;;  %vm4837_vm11 = vcmp.eq.f32.partialorder %v16717_v43, inf  ;;  %v8168_v60 = vpop.eup %8167  ;;  %v16729_v41 = vld [vmem:[#allocation159_spill] sm:$0xff] }
 0x93a   :  { %v4775_v35 = vsel %vm4774_vm10, %v13957_v14, %v4773_v38  ;;  %v4801_v11 = vmul.f32 %v8164_v13, %v13961_v19  ;;  %vm4811_vm3 = vcmp.eq.f32.partialorder %v16726_v9, 0.0  ;;  %vm4818_vm6 = vcmp.eq.f32.partialorder %v13963_v1, 0.0 }
 0x93b   :  { %v4838_v5 = vsel %vm4837_vm11, %v16717_v43, %v4836_v21  ;;  %8173 = vrsqrt.f32 %v13969_v37  ;;  %v4833_v59 = vand.u32 2147483648, %v13965_v31  ;;  %vm4839_vm15 = vcmp.eq.f32.partialorder %v16717_v43, 0.0 }
 0x93c   :  { %v4840_v33 = vand.u32 2147483648, %v16717_v43  ;;  %v4850_v4 = vmul.f32 %v14032_v49, %v16704_v44  ;;  %v4789_v12 = vsel %vm4788_vm9, %v13959_v55, %v4787_v54  ;;  %v4808_v61 = vmul.f32 %v8166_v32, %v16726_v9 }
 0x93d   :  { %v4815_v21 = vmul.f32 %v8168_v60, %v13963_v1  ;;  %vm4830_vm10 = vcmp.eq.f32.partialorder %v13965_v31, inf  ;;  %8175 = vrsqrt.f32 %v16729_v41  ;;  %v14188_v43 = vsel %vm4762_vm13, %v4763_v48, %v4761_v0 }
 0x93e   :  { %v14194_v49 = vsel %vm4776_vm0, %v4777_v27, %v4775_v35  ;;  %v14196_v38 = vsel %vm4839_vm15, %v4840_v33, %v4838_v5  ;;  %vm4844_vm9 = vcmp.eq.f32.partialorder %v13967_v57, inf  ;;  %v4803_v24 = vsel %vm4802_vm14, %v13961_v19, %v4801_v11  ;;  %v8170_v26 = vpop.eup %8169 }
 0x93f   :  { %v4847_v13 = vand.u32 2147483648, %v13967_v57  ;;  %vm4851_vm8 = vcmp.eq.f32.partialorder %v16704_v44, inf  ;;  %8177 = vrsqrt.f32 %v13971_v20  ;;  %v14209_v14 = vsel %vm4790_vm5, %v4791_v17, %v4789_v12 }
 0x940   :  { %vm4832_vm13 = vcmp.eq.f32.partialorder %v13965_v31, 0.0  ;;  %v4852_v48 = vsel %vm4851_vm8, %v16704_v44, %v4850_v4  ;;  %vm4853_vm0 = vcmp.eq.f32.partialorder %v16704_v44, 0.0  ;;  %v4878_v27 = vmul.f32 %v14073_v50, %v16713_v63 }
 0x941   :  { %v4810_v54 = vsel %vm4809_vm1, %v16726_v9, %v4808_v61  ;;  %v4817_v0 = vsel %vm4816_vm2, %v13963_v1, %v4815_v21  ;;  %vm4846_vm14 = vcmp.eq.f32.partialorder %v13967_v57, 0.0  ;;  %v4854_v55 = vand.u32 2147483648, %v16704_v44 }
 0x942   :  { %v4861_v17 = vand.u32 2147483648, %v13969_v37  ;;  %v16730_v32 = vand.u32 2147483648, %v13961_v19  ;;  %v4829_v50 = vmul.f32 %v8170_v26, %v13965_v31  ;;  %vm4858_vm5 = vcmp.eq.f32.partialorder %v13969_v37, inf }
 0x943   :  { %vm4879_vm1 = vcmp.eq.f32.partialorder %v16713_v63, inf  ;;  %8179 = vrsqrt.f32 %v13973_v3  ;;  %v14235_v11 = vsel %vm4853_vm0, %v4854_v55, %v4852_v48  ;;  %vm4860_vm2 = vcmp.eq.f32.partialorder %v13969_v37, 0.0  ;;  %v8172_v60 = vpop.eup %8171 }
 0x944   :  { %v14229_v35 = vsel %vm4804_vm7, %v16730_v32, %v4803_v24  ;;  %v4868_v44 = vand.u32 2147483648, %v16729_v41  ;;  %v4880_v5 = vsel %vm4879_vm1, %v16713_v63, %v4878_v27  ;;  %v4892_v19 = vmul.f32 %v14104_v15, %v16723_v29 }
 0x945   :  { %v14244_v33 = vsel %vm4811_vm3, %v4812_v28, %v4810_v54  ;;  %v14248_v4 = vsel %vm4818_vm6, %v4819_v23, %v4817_v0  ;;  %vm4865_vm7 = vcmp.eq.f32.partialorder %v16729_v41, inf  ;;  %v4875_v12 = vand.u32 2147483648, %v13971_v20 }
 0x946   :  { %v4882_v61 = vand.u32 2147483648, %v16713_v63  ;;  %v4843_v21 = vmul.f32 %v8172_v60, %v13967_v57  ;;  %vm4867_vm4 = vcmp.eq.f32.partialorder %v16729_v41, 0.0  ;;  %vm4881_vm11 = vcmp.eq.f32.partialorder %v16713_v63, 0.0 }
 0x947   :  { %vm4893_vm15 = vcmp.eq.f32.partialorder %v16723_v29, inf  ;;  %8181 = vrsqrt.f32 %v13976_v6  ;;  %v4831_v1 = vsel %vm4830_vm10, %v13965_v31, %v4829_v50  ;;  %vm4872_vm3 = vcmp.eq.f32.partialorder %v13971_v20, inf }
 0x948   :  { %v14262_v9 = vsel %vm4881_vm11, %v4882_v61, %v4880_v5  ;;  %v4894_v15 = vsel %vm4893_vm15, %v16723_v29, %v4892_v19  ;;  %v4906_v28 = vmul.f32 %v14048_v36, %v16706_v2  ;;  %v4845_v63 = vsel %vm4844_vm9, %v13967_v57, %v4843_v21  ;;  %v8174_v26 = vpop.eup %8173 }
 0x949   :  { %vm4874_vm6 = vcmp.eq.f32.partialorder %v13971_v20, 0.0  ;;  %v4889_v23 = vand.u32 2147483648, %v13973_v3  ;;  %v4896_v24 = vand.u32 2147483648, %v16723_v29  ;;  %vm4907_vm10 = vcmp.eq.f32.partialorder %v16706_v2, inf }
 0x94a   :  { %vm4895_vm8 = vcmp.eq.f32.partialorder %v16723_v29, 0.0  ;;  %v4908_v48 = vsel %vm4907_vm10, %v16706_v2, %v4906_v28  ;;  %v4910_v27 = vand.u32 2147483648, %v16706_v2  ;;  %8183 = vrsqrt.f32 %v13978_v40  ;;  %v8176_v29 = vpop.eup %8175 }
 0x94b   :  { %v14282_v36 = vsel %vm4832_vm13, %v4833_v59, %v4831_v1  ;;  %v4857_v54 = vmul.f32 %v8174_v26, %v13969_v37  ;;  %vm4886_vm9 = vcmp.eq.f32.partialorder %v13973_v3, inf  ;;  %v14286_v0 = vsel %vm4895_vm8, %v4896_v24, %v4894_v15  ;;  %v16731_v59 = vld [vmem:[#allocation140_spill] sm:$0xff] }
 0x94c   :  { %vm4909_vm0 = vcmp.eq.f32.partialorder %v16706_v2, 0.0  ;;  %v14291_v55 = vsel %vm4846_vm14, %v4847_v13, %v4845_v63  ;;  %vm4888_vm1 = vcmp.eq.f32.partialorder %v13973_v3, 0.0  ;;  %v4903_v32 = vand.u32 2147483648, %v13976_v6  ;;  %v8178_v57 = vpop.eup %8177 }
 0x94d   :  { %v14295_v31 = vsel %vm4909_vm0, %v4910_v27, %v4908_v48  ;;  %8185 = vrsqrt.f32 %v16731_v59  ;;  %v4859_v50 = vsel %vm4858_vm5, %v13969_v37, %v4857_v54  ;;  %v4864_v5 = vmul.f32 %v8176_v29, %v16729_v41 }
 0x94e   :  { %8187 = vrsqrt.f32 %v13980_v34  ;;  %v14306_v13 = vsel %vm4860_vm2, %v4861_v17, %v4859_v50  ;;  %vm4900_vm13 = vcmp.eq.f32.partialorder %v13976_v6, inf  ;;  %v5157_v61 = vsel %vm1772_vm12, %v14043_v53, -inf }
 0x94f   :  { %v4866_v21 = vsel %vm4865_vm7, %v16729_v41, %v4864_v5  ;;  %v4871_v1 = vmul.f32 %v8178_v57, %v13971_v20  ;;  %vm4902_vm14 = vcmp.eq.f32.partialorder %v13976_v6, 0.0  ;;  %v5158_v37 = vsel %vm1772_vm12, %v14108_v56, -inf }
 0x950   :  { %v5160_v17 = vsel %vm1772_vm12, %v14051_v45, -inf  ;;  %v14324_v15 = vsel %vm4867_vm4, %v4868_v44, %v4866_v21  ;;  %v5159_v28 = vmax.f32 %v5157_v61, %v5158_v37  ;;  %v5162_v63 = vsel %vm1772_vm12, %v14136_v46, -inf  ;;  %v8180_v26 = vpop.eup %8179 }
 0x951   :  { %v5164_v24 = vsel %vm1772_vm12, %v14057_v39, -inf  ;;  %v4873_v48 = vsel %vm4872_vm3, %v13971_v20, %v4871_v1  ;;  %vm4914_vm5 = vcmp.eq.f32.partialorder %v13978_v40, inf  ;;  %v5166_v27 = vsel %vm1772_vm12, %v14146_v42, -inf }
 0x952   :  { %v5168_v41 = vsel %vm1772_vm12, %v14156_v51, -inf  ;;  %v5170_v44 = vsel %vm1772_vm12, %v14188_v43, -inf  ;;  %v14342_v54 = vsel %vm4874_vm6, %v4875_v12, %v4873_v48  ;;  %v4885_v29 = vmul.f32 %v8180_v26, %v13973_v3 }
 0x953   :  { %vm4916_vm2 = vcmp.eq.f32.partialorder %v13978_v40, 0.0  ;;  %v5161_v50 = vmax.f32 %v5159_v28, %v5160_v17  ;;  %v5172_v5 = vsel %vm1772_vm12, %v14083_v10, -inf  ;;  %vm4921_vm7 = vcmp.eq.f32.partialorder %v16731_v59, inf }
 0x954   :  { %v5173_v57 = vsel %vm1772_vm12, %v14194_v49, -inf  ;;  %v5175_v61 = vsel %vm1772_vm12, %v14098_v22, -inf  ;;  %v5177_v20 = vsel %vm1772_vm12, %v14209_v14, -inf  ;;  %v5179_v12 = vsel %vm1772_vm12, %v14121_v62, -inf  ;;  %v8182_v21 = vpop.eup %8181 }
 0x955   :  { %v4887_v1 = vsel %vm4886_vm9, %v13973_v3, %v4885_v29  ;;  %vm4923_vm4 = vcmp.eq.f32.partialorder %v16731_v59, 0.0  ;;  %vm4928_vm11 = vcmp.eq.f32.partialorder %v13980_v34, inf  ;;  %v5163_v37 = vmax.f32 %v5161_v50, %v5162_v63 }
 0x956   :  { %v5174_v17 = vmax.f32 %v5172_v5, %v5173_v57  ;;  %v5181_v28 = vsel %vm1772_vm12, %v14229_v35, -inf  ;;  %v14366_v26 = vsel %vm4888_vm1, %v4889_v23, %v4887_v1  ;;  %v4899_v48 = vmul.f32 %v8182_v21, %v13976_v6 }
 0x957   :  { %vm4930_vm15 = vcmp.eq.f32.partialorder %v13980_v34, 0.0  ;;  %v5183_v29 = vsel %vm1772_vm12, %v14244_v33, -inf  ;;  %v5185_v60 = vsel %vm1772_vm12, %v14248_v4, -inf  ;;  %v5165_v19 = vmax.f32 %v5163_v37, %v5164_v24  ;;  %v8184_v23 = vpop.eup %8183 }
 0x958   :  { %v5176_v63 = vmax.f32 %v5174_v17, %v5175_v61  ;;  %v5187_v50 = vsel %vm1772_vm12, %v14161_v8, -inf  ;;  %v5188_v3 = vsel %vm1772_vm12, %v14282_v36, -inf  ;;  %v4901_v5 = vsel %vm4900_vm13, %v13976_v6, %v4899_v48 }
 0x959   :  { %v5189_v57 = vmax.f32 %v5187_v50, %v5188_v3  ;;  %v5190_v21 = vsel %vm1772_vm12, %v14196_v38, -inf  ;;  %v5192_v1 = vsel %vm1772_vm12, %v14291_v55, -inf  ;;  %v14387_v24 = vsel %vm4902_vm14, %v4903_v32, %v4901_v5 }
 0x95a   :  { %v4913_v61 = vmul.f32 %v8184_v23, %v13978_v40  ;;  %v5167_v37 = vmax.f32 %v5165_v19, %v5166_v27  ;;  %v5178_v17 = vmax.f32 %v5176_v63, %v5177_v20  ;;  %v8186_v2 = vpop.eup %8185  ;;  %v5194_v48 = vsel %vm1772_vm12, %v14235_v11, -inf }
 0x95b   :  { %v5191_v30 = vmax.f32 %v5189_v57, %v5190_v21  ;;  %v5196_v50 = vsel %vm1772_vm12, %v14306_v13, -inf  ;;  %v5198_v3 = vsel %vm1772_vm12, %v14324_v15, -inf  ;;  %v8188_v52 = vpop.eup %8187  ;;  %v4920_v32 = vmul.f32 %v8186_v2, %v16731_v59 }
 0x95c   :  { %v4915_v6 = vsel %vm4914_vm5, %v13978_v40, %v4913_v61  ;;  %v5169_v19 = vmax.f32 %v5167_v37, %v5168_v41  ;;  %v5180_v27 = vmax.f32 %v5178_v17, %v5179_v12  ;;  %v16732_v20 = vand.u32 2147483648, %v13978_v40 }
 0x95d   :  { %v4927_v23 = vmul.f32 %v8188_v52, %v13980_v34  ;;  %v5193_v5 = vmax.f32 %v5191_v30, %v5192_v1  ;;  %v5200_v57 = vsel %vm1772_vm12, %v14342_v54, -inf  ;;  %v4922_v21 = vsel %vm4921_vm7, %v16731_v59, %v4920_v32 }
 0x95e   :  { %v14404_v63 = vsel %vm4916_vm2, %v16732_v20, %v4915_v6  ;;  %v5171_v61 = vmax.f32 %v5169_v19, %v5170_v44  ;;  %v5182_v2 = vmax.f32 %v5180_v27, %v5181_v28  ;;  %v5202_v41 = vsel %vm1772_vm12, %v14262_v9, -inf }
 0x95f   :  { %v16733_v12 = vand.u32 2147483648, %v16731_v59  ;;  %v4929_v52 = vsel %vm4928_vm11, %v13980_v34, %v4927_v23  ;;  %v5195_v30 = vmax.f32 %v5193_v5, %v5194_v48  ;;  %v5203_v1 = vsel %vm1772_vm12, %v14366_v26, -inf }
 0x960   :  { %v16734_v44 = vand.u32 2147483648, %v13980_v34  ;;  %v5184_v37 = vmax.f32 %v5182_v2, %v5183_v29  ;;  %v5204_v17 = vmax.f32 %v5202_v41, %v5203_v1  ;;  %v5205_v59 = vsel %vm1772_vm12, %v14286_v0, -inf }
 0x961   :  { %v14418_v40 = vsel %vm4923_vm4, %v16733_v12, %v4922_v21  ;;  %v5197_v6 = vmax.f32 %v5195_v30, %v5196_v50  ;;  %v5207_v32 = vsel %vm1772_vm12, %v14387_v24, -inf  ;;  %v5209_v48 = vsel %vm1772_vm12, %v14295_v31, -inf }
 0x962   :  { %v14429_v28 = vsel %vm4930_vm15, %v16734_v44, %v4929_v52  ;;  %v5211_v19 = vsel %vm1772_vm12, %v14404_v63, -inf  ;;  %v14439_v27 = vmax.f32 %v5184_v37, %v5185_v60  ;;  %v5206_v34 = vmax.f32 %v5204_v17, %v5205_v59 }
 0x963   :  { %v5213_v29 = vsel %vm1772_vm12, %v14418_v40, -inf  ;;  %v5215_v20 = vsel %vm1772_vm12, %v14429_v28, -inf  ;;  %v5199_v23 = vmax.f32 %v5197_v6, %v5198_v3  ;;  %v5277_v50 = vsub.f32 %v14043_v53, %v5171_v61 }
 0x964   :  { %v5278_v5 = vsub.f32 %v14108_v56, %v5171_v61  ;;  %v5279_v21 = vsub.f32 %v14051_v45, %v5171_v61  ;;  %v5208_v2 = vmax.f32 %v5206_v34, %v5207_v32  ;;  %v5280_v41 = vsub.f32 %v14136_v46, %v5171_v61  ;;  %v7695_v34 = vld [vmem:[%s14466_s16] sm:$0xff]  }
 0x965   :  { %v5281_v60 = vsub.f32 %v14057_v39, %v5171_v61  ;;  %v5282_v12 = vsub.f32 %v14146_v42, %v5171_v61  ;;  %v14451_v52 = vmax.f32 %v5199_v23, %v5200_v57  ;;  %v5283_v30 = vsub.f32 %v14156_v51, %v5171_v61 }
 0x966   :  { %v5284_v1 = vsub.f32 %v14188_v43, %v5171_v61  ;;  %v5285_v53 = vsub.f32 %v14083_v10, %v14439_v27  ;;  %v5210_v3 = vmax.f32 %v5208_v2, %v5209_v48  ;;  %v5286_v45 = vsub.f32 %v14194_v49, %v14439_v27 }
 0x967   :  { %v5287_v56 = vsub.f32 %v14098_v22, %v14439_v27  ;;  %v5288_v39 = vsub.f32 %v14209_v14, %v14439_v27  ;;  %v5289_v46 = vsub.f32 %v14121_v62, %v14439_v27  ;;  %v5290_v10 = vsub.f32 %v14229_v35, %v14439_v27 }
 0x968   :  { %v5291_v42 = vsub.f32 %v14244_v33, %v14439_v27  ;;  %v5292_v22 = vsub.f32 %v14248_v4, %v14439_v27  ;;  %v5212_v51 = vmax.f32 %v5210_v3, %v5211_v19  ;;  %v5293_v43 = vsub.f32 %v14161_v8, %v14451_v52 }
 0x969   :  { %v5294_v49 = vsub.f32 %v14282_v36, %v14451_v52  ;;  %v5295_v14 = vsub.f32 %v14196_v38, %v14451_v52  ;;  %v5296_v62 = vsub.f32 %v14291_v55, %v14451_v52  ;;  %v5297_v35 = vsub.f32 %v14235_v11, %v14451_v52  ;;  %v16735_v55 = vld [vmem:[#allocation39_spill] sm:$0xff] }
 0x96a   :  { %v5298_v33 = vsub.f32 %v14306_v13, %v14451_v52  ;;  %v5299_v4 = vsub.f32 %v14324_v15, %v14451_v52  ;;  %v5214_v57 = vmax.f32 %v5212_v51, %v5213_v29  ;;  %v5300_v8 = vsub.f32 %v14342_v54, %v14451_v52  ;;  %v16739_v51 = vld [vmem:[#allocation42_spill] sm:$0xff] }
 0x96b   :  { %v5341_v36 = vmul.f32 1.442695, %v5277_v50  ;;  %v5343_v61 = vmul.f32 1.442695, %v5278_v5  ;;  %v5345_v44 = vmul.f32 1.442695, %v5279_v21  ;;  %v14494_v17 = vmul.f32 %v16735_v55, %v13991_v16 }
 0x96c   :  { %v5347_v38 = vmul.f32 1.442695, %v5280_v41  ;;  %v5349_v37 = vmul.f32 1.442695, %v5281_v60  ;;  %v5216_v11 = vmax.f32 %v5214_v57, %v5215_v20  ;;  %v5351_v13 = vmul.f32 1.442695, %v5282_v12 }
 0x96d   :  { %8189 = vpow2.f32 %v5341_v36  ;;  %v5353_v59 = vmul.f32 1.442695, %v5283_v30  ;;  %v5355_v15 = vmul.f32 1.442695, %v5284_v1  ;;  %v5357_v6 = vmul.f32 1.442695, %v5285_v53 }
 0x96e   :  { %8191 = vpow2.f32 %v5343_v61  ;;  %v5359_v32 = vmul.f32 1.442695, %v5286_v45  ;;  %v5301_v54 = vsub.f32 %v14262_v9, %v5216_v11  ;;  %v5302_v48 = vsub.f32 %v14366_v26, %v5216_v11  ;;  %v16744_v57 = vld [vmem:[#allocation47_spill] sm:$0xff]  ;;  %v16745_v36 = vld [vmem:[#allocation170_spill] sm:$0xff]  ;;  %v16746_v61 = vld [vmem:[#allocation45_spill] sm:$0xff] }
 0x96f   :  { %v5303_v19 = vsub.f32 %v14286_v0, %v5216_v11  ;;  %v5304_v27 = vsub.f32 %v14387_v24, %v5216_v11  ;;  %v5305_v29 = vsub.f32 %v14295_v31, %v5216_v11  ;;  %v5306_v20 = vsub.f32 %v14404_v63, %v5216_v11 }
 0x970   :  { %v5307_v23 = vsub.f32 %v14418_v40, %v5216_v11  ;;  %v5308_v50 = vsub.f32 %v14429_v28, %v5216_v11  ;;  %8193 = vpow2.f32 %v5345_v44  ;;  %v5361_v5 = vmul.f32 1.442695, %v5287_v56 }
 0x971   :  { %v5363_v21 = vmul.f32 1.442695, %v5288_v39  ;;  %v5365_v2 = vmul.f32 1.442695, %v5289_v46  ;;  %vm16736_vm3 = vcmask 523264   ;;  %8195 = vpow2.f32 %v5347_v38  ;;  %v16737_v46 = vld [vmem:[#allocation40_spill] sm:$0xff] }
 0x972   :  { %7550 = vmatprep.mubr.msk.bf16.mxu1 %vm16736_vm3, %v7695_v34  ;;  %v5367_v9 = vmul.f32 1.442695, %v5290_v10  ;;  %v5369_v0 = vmul.f32 1.442695, %v5291_v42  ;;  %v5371_v26 = vmul.f32 1.442695, %v5292_v22  ;;  %8197 = vpow2.f32 %v5349_v37  ;;  %vm16842_vm6 = vmmov %vm16736_vm3 }
 0x973   :  { %v5373_v24 = vmul.f32 1.442695, %v5293_v43  ;;  %v5375_v41 = vmul.f32 1.442695, %v5294_v49  ;;  %v5377_v31 = vmul.f32 1.442695, %v5295_v14  ;;  %8199 = vpow2.f32 %v5351_v13  ;;  %vm16843_vm10 = vmmov %vm16736_vm3 }
 0x974   :  { %v5379_v63 = vmul.f32 1.442695, %v5296_v62  ;;  %v14506_v60 = vmul.f32 1.442695, %v5297_v35  ;;  %v14508_v40 = vmul.f32 1.442695, %v5298_v33  ;;  %8201 = vpow2.f32 %v5353_v59  ;;  %vm16844_vm8 = vmmov %vm16736_vm3 }
 0x975   :  { %v14510_v28 = vmul.f32 1.442695, %v5299_v4  ;;  %v14512_v12 = vmul.f32 1.442695, %v5300_v8  ;;  %v14514_v52 = vmul.f32 1.442695, %v5301_v54  ;;  %8203 = vpow2.f32 %v5355_v15 }
 0x976   :  { %v14516_v30 = vmul.f32 1.442695, %v5302_v48  ;;  %v14518_v1 = vmul.f32 1.442695, %v5303_v19  ;;  %v14520_v53 = vmul.f32 1.442695, %v5304_v27  ;;  %8205 = vpow2.f32 %v5357_v6 }
 0x977   :  { %v14522_v3 = vmul.f32 1.442695, %v5305_v29  ;;  %v14524_v45 = vmul.f32 1.442695, %v5306_v20  ;;  %v14526_v56 = vmul.f32 1.442695, %v5307_v23  ;;  %8207 = vpow2.f32 %v5359_v32 }
 0x978   :  { %v14528_v39 = vmul.f32 1.442695, %v5308_v50  ;;  %v14532_v10 = vmul.f32 %v16737_v46, %v14013_v18  ;;  %v16738_v42 = vld [vmem:[#allocation41_spill] sm:$0xff]  ;;  %8209 = vpow2.f32 %v5361_v5  ;;  %v14540_v43 = vmul.f32 %v16739_v51, %v14024_v25  ;;  %v16740_v49 = vld [vmem:[#allocation44_spill] sm:$0xff]  ;;  %v16741_v62 = vld [vmem:[#allocation43_spill] sm:$0xff] }
 0x979   :  { %v14536_v22 = vmul.f32 %v16738_v42, %v13998_v7  ;;  %v14544_v14 = vmul.f32 %v16740_v49, %v13988_v58  ;;  %v14548_v35 = vmul.f32 %v16741_v62, %v14009_v47  ;;  %8211 = vpow2.f32 %v5363_v21  ;;  %v16743_v4 = vld [vmem:[#allocation139_spill] sm:$0xff]  ;;  %v16747_v38 = vld [vmem:[#allocation46_spill] sm:$0xff]  ;;  %v16750_v15 = vld [vmem:[#allocation49_spill] sm:$0xff] }
 0x97a   :  { %v14550_v33 = vpop.eup %8189  ;;  %v14554_v8 = vmul.f32 %v16744_v57, %v16743_v4  ;;  %v14558_v44 = vmul.f32 %v16746_v61, %v16745_v36  ;;  %v14562_v37 = vmul.f32 %v16747_v38, %v13991_v16  ;;  %8213 = vpow2.f32 %v5365_v2  ;;  %v16749_v13 = vld [vmem:[#allocation98_spill] sm:$0xff]  ;;  %v16751_v54 = vld [vmem:[#allocation33_spill] sm:$0xff]  ;;  %v16752_v19 = vld [vmem:[#allocation48_spill] sm:$0xff] }
 0x97b   :  { %16742 = vst [vmem:[#allocation129_spill] sm:$0xff] %v14550_v33  ;;  %v14564_v55 = vpop.eup %8191  ;;  %v5469_v11 = vsel %vm1772_vm12, %v14550_v33, 0.0  ;;  %v5797_v59 = vmul.f32 %v14550_v33, %v16749_v13  ;;  %v14572_v6 = vmul.f32 %v16750_v15, %v14013_v18  ;;  %8215 = vpow2.f32 %v5367_v9  ;;  %v16753_v20 = vld [vmem:[#allocation51_spill] sm:$0xff]  ;;  %v16756_v21 = vld [vmem:[#allocation50_spill] sm:$0xff]  ;;  %v16758_v9 = vld [vmem:[#allocation53_spill] sm:$0xff] }
 0x97c   :  { %16748 = vst [vmem:[#allocation95_spill] sm:$0xff] %v14564_v55  ;;  %v5470_v32 = vsel %vm1772_vm12, %v14564_v55, 0.0  ;;  %v5798_v48 = vmul.f32 %v14564_v55, %v16751_v54  ;;  %v14580_v27 = vmul.f32 %v16752_v19, %v13998_v7  ;;  %8217 = vpow2.f32 %v5369_v0  ;;  %v16761_v51 = vld [vmem:[#allocation21_spill] sm:$0xff]  ;;  %v16763_v38 = vld [vmem:[#allocation28_spill] sm:$0xff] }
 0x97d   :  { %v5471_v34 = vadd.f32 %v5470_v32, %v5469_v11  ;;  %v5861_v29 = vsel %vm1772_vm12, %v5797_v59, 0.0  ;;  %v14585_v23 = vmul.f32 %v16753_v20, %v14024_v25  ;;  %v14587_v50 = vpop.eup %8193  ;;  %8219 = vpow2.f32 %v5371_v26  ;;  %v16765_v15 = vld [vmem:[#allocation149_spill] sm:$0xff] }
 0x97e   :  { %16755 = vst [vmem:[#allocation113_spill] sm:$0xff] %v14587_v50  ;;  %v5862_v5 = vsel %vm1772_vm12, %v5798_v48, 0.0  ;;  %v14592_v2 = vmul.f32 %v16756_v21, %v13988_v58  ;;  %v14596_v46 = vmul.f32 %v16758_v9, %v14009_v47  ;;  %v14598_v0 = vpop.eup %8195  ;;  %8221 = vpow2.f32 %v5373_v24  ;;  %v16769_v21 = vld [vmem:[#allocation137_spill] sm:$0xff] }
 0x97f   :  { %16754 = vst [vmem:[#allocation166_spill] sm:$0xff] %v14585_v23  ;;  %16760 = vst [vmem:[#allocation99_spill] sm:$0xff] %v14598_v0  ;;  %v5472_v42 = vsel %vm1772_vm12, %v14587_v50, 0.0  ;;  %v5799_v49 = vmul.f32 %v14587_v50, %v16761_v51  ;;  %v5863_v26 = vadd.f32 %v5862_v5, %v5861_v29  ;;  %v14604_v62 = vpop.eup %8197  ;;  %8223 = vpow2.f32 %v5375_v41  ;;  %v16767_v29 = vld [vmem:[#allocation17_spill] sm:$0xff] }
 0x980   :  { %16757 = vst [vmem:[#allocation104_spill] sm:$0xff] %v14592_v2  ;;  %16759 = vst [vmem:[#allocation133_spill] sm:$0xff] %v14596_v46  ;;  %v5473_v57 = vadd.f32 %v5472_v42, %v5471_v34  ;;  %v5474_v61 = vsel %vm1772_vm12, %v14598_v0, 0.0  ;;  %v5800_v11 = vmul.f32 %v14598_v0, %v16763_v38  ;;  %v14610_v59 = vpop.eup %8199  ;;  %8225 = vpow2.f32 %v5377_v31 }
 0x981   :  { %16762 = vst [vmem:[#allocation164_spill] sm:$0xff] %v14604_v62  ;;  %16764 = vst [vmem:[#allocation105_spill] sm:$0xff] %v14610_v59  ;;  %v5476_v24 = vsel %vm1772_vm12, %v14604_v62, 0.0  ;;  %v14616_v32 = vmul.f32 %v14604_v62, %v16765_v15  ;;  %v5864_v48 = vsel %vm1772_vm12, %v5799_v49, 0.0  ;;  %v14619_v41 = vpop.eup %8201  ;;  %8227 = vpow2.f32 %v5379_v63 }
 0x982   :  { %16766 = vst [vmem:[#allocation119_spill] sm:$0xff] %v14619_v41  ;;  %v5475_v19 = vadd.f32 %v5474_v61, %v5473_v57  ;;  %v5478_v34 = vsel %vm1772_vm12, %v14610_v59, 0.0  ;;  %v14625_v20 = vmul.f32 %v14610_v59, %v16767_v29  ;;  %v14627_v31 = vpop.eup %8203  ;;  %8229 = vpow2.f32 %v14506_v60  ;;  %v16771_v61 = vld [vmem:[#allocation31_spill] sm:$0xff] }
 0x983   :  { %16768 = vst [vmem:[#allocation131_spill] sm:$0xff] %v14627_v31  ;;  %v5480_v5 = vsel %vm1772_vm12, %v14619_v41, 0.0  ;;  %v14634_v9 = vmul.f32 %v14619_v41, %v16769_v21  ;;  %v5865_v63 = vadd.f32 %v5864_v48, %v5863_v26  ;;  %v14636_v42 = vpop.eup %8205  ;;  %8231 = vpow2.f32 %v14508_v40 }
 0x984   :  { %16770 = vst [vmem:[#allocation138_spill] sm:$0xff] %v14636_v42  ;;  %v5477_v49 = vadd.f32 %v5476_v24, %v5475_v19  ;;  %v5482_v57 = vsel %vm1772_vm12, %v14627_v31, 0.0  ;;  %v14643_v59 = vmul.f32 %v14627_v31, %v16771_v61  ;;  %v14645_v60 = vpop.eup %8207  ;;  %8233 = vpow2.f32 %v14510_v28 }
 0x985   :  { %16772 = vst [vmem:[#allocation121_spill] sm:$0xff] %v14645_v60  ;;  %v5484_v41 = vsel %vm1772_vm12, %v14636_v42, 0.0  ;;  %v14652_v26 = vmul.f32 %v14636_v42, %v16749_v13  ;;  %v5866_v40 = vsel %vm1772_vm12, %v5800_v11, 0.0  ;;  %v14655_v24 = vpop.eup %8209  ;;  %8235 = vpow2.f32 %v14512_v12 }
 0x986   :  { %16773 = vst [vmem:[#allocation165_spill] sm:$0xff] %v14655_v24  ;;  %v5479_v48 = vadd.f32 %v5478_v34, %v5477_v49  ;;  %v5485_v19 = vsel %vm1772_vm12, %v14645_v60, 0.0  ;;  %v14662_v28 = vmul.f32 %v14645_v60, %v16751_v54  ;;  %v14664_v31 = vpop.eup %8211  ;;  %8237 = vpow2.f32 %v14514_v52 }
 0x987   :  { %16774 = vst [vmem:[#allocation77_spill] sm:$0xff] %v14664_v31  ;;  %v5486_v42 = vadd.f32 %v5485_v19, %v5484_v41  ;;  %v5487_v11 = vsel %vm1772_vm12, %v14655_v24, 0.0  ;;  %v14671_v62 = vmul.f32 %v14655_v24, %v16761_v51  ;;  %v14673_v12 = vpop.eup %8213  ;;  %8239 = vpow2.f32 %v14516_v30 }
 0x988   :  { %16775 = vst [vmem:[#allocation100_spill] sm:$0xff] %v14673_v12  ;;  %v5481_v34 = vadd.f32 %v5480_v5, %v5479_v48  ;;  %v5489_v49 = vsel %vm1772_vm12, %v14664_v31, 0.0  ;;  %v14680_v60 = vmul.f32 %v14664_v31, %v16763_v38  ;;  %v14682_v52 = vpop.eup %8215  ;;  %8241 = vpow2.f32 %v14518_v1 }
 0x989   :  { %16776 = vst [vmem:[#allocation145_spill] sm:$0xff] %v14682_v52  ;;  %v5488_v41 = vadd.f32 %v5487_v11, %v5486_v42  ;;  %v5491_v19 = vsel %vm1772_vm12, %v14673_v12, 0.0  ;;  %v14689_v24 = vmul.f32 %v14673_v12, %v16765_v15  ;;  %v14691_v30 = vpop.eup %8217  ;;  %8243 = vpow2.f32 %v14520_v53 }
 0x98a   :  { %16777 = vst [vmem:[#allocation168_spill] sm:$0xff] %v14691_v30  ;;  %v14694_v5 = vadd.f32 %v5482_v57, %v5481_v34  ;;  %v5493_v48 = vsel %vm1772_vm12, %v14682_v52, 0.0  ;;  %v14700_v1 = vmul.f32 %v14682_v52, %v16767_v29  ;;  %v14702_v42 = vpop.eup %8219  ;;  %8245 = vpow2.f32 %v14522_v3 }
 0x98b   :  { %16778 = vst [vmem:[#allocation169_spill] sm:$0xff] %v14702_v42  ;;  %v5490_v11 = vadd.f32 %v5489_v49, %v5488_v41  ;;  %v5495_v12 = vsel %vm1772_vm12, %v14691_v30, 0.0  ;;  %v14709_v53 = vmul.f32 %v14691_v30, %v16769_v21  ;;  %v14711_v57 = vpop.eup %8221  ;;  %8247 = vpow2.f32 %v14524_v45 }
 0x98c   :  { %16779 = vst [vmem:[#allocation171_spill] sm:$0xff] %v14711_v57  ;;  %v5497_v34 = vsel %vm1772_vm12, %v14702_v42, 0.0  ;;  %v14718_v52 = vmul.f32 %v14702_v42, %v16771_v61  ;;  %v5867_v3 = vadd.f32 %v5866_v40, %v5865_v63  ;;  %v14720_v49 = vpop.eup %8223  ;;  %8249 = vpow2.f32 %v14526_v56 }
 0x98d   :  { %16780 = vst [vmem:[#allocation126_spill] sm:$0xff] %v14720_v49  ;;  %v5492_v41 = vadd.f32 %v5491_v19, %v5490_v11  ;;  %v5499_v30 = vsel %vm1772_vm12, %v14711_v57, 0.0  ;;  %v14727_v31 = vmul.f32 %v14711_v57, %v16749_v13  ;;  %v14729_v45 = vpop.eup %8225  ;;  %8251 = vpow2.f32 %v14528_v39 }
 0x98e   :  { %16781 = vst [vmem:[#allocation172_spill] sm:$0xff] %v14729_v45  ;;  %v5500_v42 = vsel %vm1772_vm12, %v14720_v49, 0.0  ;;  %v14736_v63 = vmul.f32 %v14720_v49, %v16751_v54  ;;  %v5868_v56 = vsel %vm1772_vm12, %v14616_v32, 0.0  ;;  %v14740_v40 = vpop.eup %8227  ;;  %v5502_v57 = vsel %vm1772_vm12, %v14729_v45, 0.0 }
 0x98f   :  { %16782 = vst [vmem:[#allocation173_spill] sm:$0xff] %v14740_v40  ;;  %v5494_v19 = vadd.f32 %v5493_v48, %v5492_v41  ;;  %v5501_v11 = vadd.f32 %v5500_v42, %v5499_v30  ;;  %v14746_v39 = vmul.f32 %v14729_v45, %v16761_v51  ;;  %v14748_v0 = vpop.eup %8229  ;;  %v5504_v49 = vsel %vm1772_vm12, %v14740_v40, 0.0 }
 0x990   :  { %16783 = vst [vmem:[#allocation175_spill] sm:$0xff] %v14748_v0  ;;  %v14754_v50 = vmul.f32 %v14740_v40, %v16763_v38  ;;  %v5869_v32 = vadd.f32 %v5868_v56, %v5867_v3  ;;  %v5870_v30 = vsel %vm1772_vm12, %v14625_v20, 0.0  ;;  %v14758_v48 = vpop.eup %8231  ;;  %v5506_v45 = vsel %vm1772_vm12, %v14748_v0, 0.0 }
 0x991   :  { %16784 = vst [vmem:[#allocation81_spill] sm:$0xff] %v14758_v48  ;;  %v5496_v42 = vadd.f32 %v5495_v12, %v5494_v19  ;;  %v5503_v41 = vadd.f32 %v5502_v57, %v5501_v11  ;;  %v14764_v55 = vmul.f32 %v14748_v0, %v16765_v15  ;;  %v14766_v33 = vpop.eup %8233  ;;  %v5508_v40 = vsel %vm1772_vm12, %v14758_v48, 0.0 }
 0x992   :  { %16785 = vst [vmem:[#allocation176_spill] sm:$0xff] %v14766_v33  ;;  %v14772_v3 = vmul.f32 %v14758_v48, %v16767_v29  ;;  %v5871_v20 = vadd.f32 %v5870_v30, %v5869_v32  ;;  %v5872_v12 = vsel %vm1772_vm12, %v14634_v9, 0.0  ;;  %v14776_v57 = vpop.eup %8235  ;;  %v5510_v11 = vsel %vm1772_vm12, %v14766_v33, 0.0 }
 0x993   :  { %16786 = vst [vmem:[#allocation29_spill] sm:$0xff] %v14776_v57  ;;  %v14778_v56 = vadd.f32 %v5497_v34, %v5496_v42  ;;  %v5505_v19 = vadd.f32 %v5504_v49, %v5503_v41  ;;  %v5819_v0 = vmul.f32 %v14766_v33, %v16769_v21  ;;  %v14784_v46 = vpop.eup %8237  ;;  %v5512_v48 = vsel %vm1772_vm12, %v14776_v57, 0.0 }
 0x994   :  { %16787 = vst [vmem:[#allocation25_spill] sm:$0xff] %v14784_v46  ;;  %v5820_v32 = vmul.f32 %v14776_v57, %v16771_v61  ;;  %v5873_v9 = vadd.f32 %v5872_v12, %v5871_v20  ;;  %v5874_v34 = vsel %vm1772_vm12, %v14643_v59, 0.0  ;;  %v14792_v30 = vpop.eup %8239  ;;  %v5514_v42 = vsel %vm1772_vm12, %v14784_v46, 0.0 }
 0x995   :  { %16788 = vst [vmem:[#allocation26_spill] sm:$0xff] %v14792_v30  ;;  %v5507_v49 = vadd.f32 %v5506_v45, %v5505_v19  ;;  %v5821_v41 = vmul.f32 %v14784_v46, %v16749_v13  ;;  %v5876_v33 = vsel %vm1772_vm12, %v14652_v26, 0.0  ;;  %v14800_v2 = vpop.eup %8241  ;;  %v5515_v20 = vsel %vm1772_vm12, %v14792_v30, 0.0 }
 0x996   :  { %16789 = vst [vmem:[#allocation32_spill] sm:$0xff] %v14800_v2  ;;  %v5822_v59 = vmul.f32 %v14792_v30, %v16751_v54  ;;  %v14806_v12 = vadd.f32 %v5874_v34, %v5873_v9  ;;  %v5877_v45 = vsel %vm1772_vm12, %v14662_v28, 0.0  ;;  %v14810_v19 = vpop.eup %8243  ;;  %v5516_v13 = vadd.f32 %v5515_v20, %v5514_v42 }
 0x997   :  { %v5509_v57 = vadd.f32 %v5508_v40, %v5507_v49  ;;  %v5517_v26 = vsel %vm1772_vm12, %v14800_v2, 0.0  ;;  %v5823_v46 = vmul.f32 %v14800_v2, %v16761_v51  ;;  %v14816_v23 = vpop.eup %8245  ;;  %v5519_v54 = vsel %vm1772_vm12, %v14810_v19, 0.0 }
 0x998   :  { %v5824_v9 = vmul.f32 %v14810_v19, %v16763_v38  ;;  %v5878_v34 = vadd.f32 %v5877_v45, %v5876_v33  ;;  %v5879_v28 = vsel %vm1772_vm12, %v14671_v62, 0.0  ;;  %v14824_v40 = vpop.eup %8247  ;;  %v5518_v42 = vadd.f32 %v5517_v26, %v5516_v13 }
 0x999   :  { %v5511_v49 = vadd.f32 %v5510_v11, %v5509_v57  ;;  %v5521_v20 = vsel %vm1772_vm12, %v14816_v23, 0.0  ;;  %v5825_v51 = vmul.f32 %v14816_v23, %v16765_v15  ;;  %v14830_v2 = vpop.eup %8249  ;;  %v5523_v30 = vsel %vm1772_vm12, %v14824_v40, 0.0 }
 0x99a   :  { %v5826_v33 = vmul.f32 %v14824_v40, %v16767_v29  ;;  %v5880_v38 = vadd.f32 %v5879_v28, %v5878_v34  ;;  %v5881_v62 = vsel %vm1772_vm12, %v14680_v60, 0.0  ;;  %v14838_v57 = vpop.eup %8251  ;;  %v5520_v45 = vadd.f32 %v5519_v54, %v5518_v42 }
 0x99b   :  { %v5513_v11 = vadd.f32 %v5512_v48, %v5511_v49  ;;  %v5525_v13 = vsel %vm1772_vm12, %v14830_v2, 0.0  ;;  %v5827_v15 = vmul.f32 %v14830_v2, %v16769_v21  ;;  %v5527_v26 = vsel %vm1772_vm12, %v14838_v57, 0.0 }
 0x99c   :  { %v5828_v29 = vmul.f32 %v14838_v57, %v16771_v61  ;;  %v5882_v34 = vadd.f32 %v5881_v62, %v5880_v38  ;;  %v5883_v60 = vsel %vm1772_vm12, %v14689_v24, 0.0  ;;  %v5522_v28 = vadd.f32 %v5521_v20, %v5520_v45 }
 0x99d   :  { %v5885_v48 = vsel %vm1772_vm12, %v14700_v1, 0.0  ;;  %v5887_v54 = vsel %vm1772_vm12, %v14709_v53, 0.0  ;;  %v5889_v21 = vsel %vm1772_vm12, %v14718_v52, 0.0  ;;  %v5891_v42 = vsel %vm1772_vm12, %v14727_v31, 0.0 }
 0x99e   :  { %v5884_v49 = vadd.f32 %v5883_v60, %v5882_v34  ;;  %v5892_v61 = vsel %vm1772_vm12, %v14736_v63, 0.0  ;;  %v5894_v24 = vsel %vm1772_vm12, %v14746_v39, 0.0  ;;  %v5524_v20 = vadd.f32 %v5523_v30, %v5522_v28 }
 0x99f   :  { %v5893_v38 = vadd.f32 %v5892_v61, %v5891_v42  ;;  %v5896_v1 = vsel %vm1772_vm12, %v14754_v50, 0.0  ;;  %v5898_v53 = vsel %vm1772_vm12, %v14764_v55, 0.0  ;;  %v5900_v52 = vsel %vm1772_vm12, %v14772_v3, 0.0 }
 0x9a0   :  { %v5886_v62 = vadd.f32 %v5885_v48, %v5884_v49  ;;  %v5902_v31 = vsel %vm1772_vm12, %v5819_v0, 0.0  ;;  %v5904_v45 = vsel %vm1772_vm12, %v5820_v32, 0.0  ;;  %v5526_v63 = vadd.f32 %v5525_v13, %v5524_v20  ;;  %v16795_v20 = vld [vmem:[#allocation58_spill] sm:$0xff] }
 0x9a1   :  { %v5895_v34 = vadd.f32 %v5894_v24, %v5893_v38  ;;  %v5906_v39 = vsel %vm1772_vm12, %v5821_v41, 0.0  ;;  %v5907_v30 = vsel %vm1772_vm12, %v5822_v59, 0.0  ;;  %v5909_v50 = vsel %vm1772_vm12, %v5823_v46, 0.0  ;;  %v16790_v46 = vld [vmem:[#allocation52_spill] sm:$0xff] }
 0x9a2   :  { %v5888_v60 = vadd.f32 %v5887_v54, %v5886_v62  ;;  %v5908_v28 = vadd.f32 %v5907_v30, %v5906_v39  ;;  %v5911_v55 = vsel %vm1772_vm12, %v5824_v9, 0.0  ;;  %v5528_v48 = vadd.f32 %v5527_v26, %v5526_v63  ;;  %v16791_v9 = vld [vmem:[#allocation55_spill] sm:$0xff] }
 0x9a3   :  { %v5897_v49 = vadd.f32 %v5896_v1, %v5895_v34  ;;  %v5913_v3 = vsel %vm1772_vm12, %v5825_v51, 0.0  ;;  %v5915_v0 = vsel %vm1772_vm12, %v5826_v33, 0.0  ;;  %v5917_v13 = vsel %vm1772_vm12, %v5827_v15, 0.0  ;;  %v16792_v51 = vld [vmem:[#allocation54_spill] sm:$0xff]  ;;  %v16798_v39 = vld [vmem:[#allocation59_spill] sm:$0xff] }
 0x9a4   :  { %v14876_v42 = vadd.f32 %v5889_v21, %v5888_v60  ;;  %v5910_v32 = vadd.f32 %v5909_v50, %v5908_v28  ;;  %v5919_v41 = vsel %vm1772_vm12, %v5828_v29, 0.0  ;;  %8253 = vrcp.f32 %v14694_v5  ;;  %v16793_v21 = vld [vmem:[#allocation57_spill] sm:$0xff]  ;;  %v16794_v29 = vld [vmem:[#allocation56_spill] sm:$0xff]  ;;  %v16800_v60 = vld [vmem:[#allocation63_spill] sm:$0xff] }
 0x9a5   :  { %v5899_v59 = vadd.f32 %v5898_v53, %v5897_v49  ;;  %v5647_v54 = vmul.f32 %v16790_v46, %v16743_v4  ;;  %v5648_v26 = vmul.f32 %v16791_v9, %v16745_v36  ;;  %8255 = vrcp.f32 %v14778_v56  ;;  %v16796_v53 = vld [vmem:[#allocation62_spill] sm:$0xff]  ;;  %v16797_v56 = vld [vmem:[#allocation64_spill] sm:$0xff]  ;;  %v16802_v49 = vld [vmem:[#allocation61_spill] sm:$0xff] }
 0x9a6   :  { %v5912_v61 = vadd.f32 %v5911_v55, %v5910_v32  ;;  %v5649_v33 = vmul.f32 %v16792_v51, %v13991_v16  ;;  %v5650_v15 = vmul.f32 %v16793_v21, %v14013_v18  ;;  %8257 = vrcp.f32 %v5513_v11  ;;  %v16799_v11 = vld [vmem:[#allocation60_spill] sm:$0xff]  ;;  %v16801_v55 = vld [vmem:[#allocation65_spill] sm:$0xff]  ;;  %v16804_v46 = vld [vmem:[#allocation71_spill] sm:$0xff] }
 0x9a7   :  { %v5901_v24 = vadd.f32 %v5900_v52, %v5899_v59  ;;  %v5651_v5 = vmul.f32 %v16794_v29, %v13998_v7  ;;  %v5652_v38 = vmul.f32 %v16795_v20, %v14024_v25  ;;  %8259 = vrcp.f32 %v5528_v48  ;;  %v16803_v32 = vld [vmem:[#allocation73_spill] sm:$0xff]  ;;  %v16807_v29 = vld [vmem:[#allocation66_spill] sm:$0xff] }
 0x9a8   :  { %v5914_v1 = vadd.f32 %v5913_v3, %v5912_v61  ;;  %v5653_v62 = vmul.f32 %v16796_v53, %v13988_v58  ;;  %v5654_v63 = vmul.f32 %v16797_v56, %v14009_v47  ;;  %v5655_v30 = vmul.f32 %v16798_v39, %v16743_v4  ;;  %v16805_v61 = vld [vmem:[#allocation68_spill] sm:$0xff]  ;;  %v16806_v21 = vld [vmem:[#allocation69_spill] sm:$0xff] }
 0x9a9   :  { %v5903_v34 = vadd.f32 %v5902_v31, %v5901_v24  ;;  %v5656_v52 = vmul.f32 %v16799_v11, %v16745_v36  ;;  %v5657_v28 = vmul.f32 %v16800_v60, %v13991_v16  ;;  %v5658_v48 = vmul.f32 %v16801_v55, %v14013_v18  ;;  %v16809_v55 = vld [vmem:[#allocation104_spill] sm:$0xff] }
 0x9aa   :  { %v5916_v50 = vadd.f32 %v5915_v0, %v5914_v1  ;;  %v5659_v3 = vmul.f32 %v16802_v49, %v13998_v7  ;;  %v5660_v59 = vmul.f32 %v16803_v32, %v14024_v25  ;;  %v5661_v9 = vmul.f32 %v16804_v46, %v13988_v58  ;;  %v16810_v49 = vld [vmem:[#allocation133_spill] sm:$0xff] }
 0x9ab   :  { %v5905_v31 = vadd.f32 %v5904_v45, %v5903_v34  ;;  %v5662_v51 = vmul.f32 %v16805_v61, %v14009_v47  ;;  %v14916_v24 = vmul.f32 %v16806_v21, %v16743_v4  ;;  %v14920_v20 = vmul.f32 %v16807_v29, %v16745_v36 }
 0x9ac   :  { %v5918_v0 = vadd.f32 %v5917_v13, %v5916_v50  ;;  %v5725_v1 = vsel %vm1772_vm12, %v14494_v17, 0.0  ;;  %v5726_v45 = vsel %vm1772_vm12, %v14532_v10, 0.0  ;;  %v5728_v56 = vsel %vm1772_vm12, %v14536_v22, 0.0  ;;  %v16808_v50 = vld [vmem:[#allocation166_spill] sm:$0xff] }
 0x9ad   :  { %v5727_v53 = vadd.f32 %v5726_v45, %v5725_v1  ;;  %v5730_v34 = vsel %vm1772_vm12, %v14540_v43, 0.0  ;;  %v5732_v13 = vsel %vm1772_vm12, %v14544_v14, 0.0  ;;  %v5734_v11 = vsel %vm1772_vm12, %v14548_v35, 0.0 }
 0x9ae   :  { %v5920_v39 = vadd.f32 %v5919_v41, %v5918_v0  ;;  %v5736_v17 = vsel %vm1772_vm12, %v14554_v8, 0.0  ;;  %v5738_v10 = vsel %vm1772_vm12, %v14558_v44, 0.0  ;;  %v5740_v22 = vsel %vm1772_vm12, %v14562_v37, 0.0 }
 0x9af   :  { %v5729_v60 = vadd.f32 %v5728_v56, %v5727_v53  ;;  %v5741_v43 = vsel %vm1772_vm12, %v14572_v6, 0.0  ;;  %v5743_v14 = vsel %vm1772_vm12, %v14580_v27, 0.0  ;;  %v5745_v35 = vsel %vm1772_vm12, %v16808_v50, 0.0 }
 0x9b0   :  { %v5742_v41 = vadd.f32 %v5741_v43, %v5740_v22  ;;  %v5747_v8 = vsel %vm1772_vm12, %v16809_v55, 0.0  ;;  %v5749_v44 = vsel %vm1772_vm12, %v16810_v49, 0.0  ;;  %v5751_v46 = vsel %vm1772_vm12, %v5647_v54, 0.0 }
 0x9b1   :  { %v5731_v32 = vadd.f32 %v5730_v34, %v5729_v60  ;;  %v5753_v37 = vsel %vm1772_vm12, %v5648_v26, 0.0  ;;  %v5755_v6 = vsel %vm1772_vm12, %v5649_v33, 0.0  ;;  %v14953_v61 = vpop.eup %8253  ;;  %v5756_v21 = vsel %vm1772_vm12, %v5650_v15, 0.0 }
 0x9b2   :  { %v5744_v27 = vadd.f32 %v5743_v14, %v5742_v41  ;;  %v5758_v0 = vsel %vm1772_vm12, %v5651_v5, 0.0  ;;  %v5760_v29 = vsel %vm1772_vm12, %v5652_v38, 0.0  ;;  %v14958_v1 = vpop.eup %8255  ;;  %v5997_v45 = vmul.f32 %v14953_v61, %v14806_v12 }
 0x9b3   :  { %v5733_v53 = vadd.f32 %v5732_v13, %v5731_v32  ;;  %v5757_v54 = vadd.f32 %v5756_v21, %v5755_v6  ;;  %v5762_v26 = vsel %vm1772_vm12, %v5653_v62, 0.0  ;;  %v14963_v56 = vpop.eup %8257  ;;  %v5998_v33 = vmul.f32 %v14958_v1, %v14876_v42 }
 0x9b4   :  { %v5746_v34 = vadd.f32 %v5745_v35, %v5744_v27  ;;  %v5764_v15 = vsel %vm1772_vm12, %v5654_v63, 0.0  ;;  %v5766_v5 = vsel %vm1772_vm12, %v5655_v30, 0.0  ;;  %v14969_v38 = vpop.eup %8259  ;;  %v5999_v60 = vmul.f32 %v14963_v56, %v5905_v31 }
 0x9b5   :  { %v5735_v22 = vadd.f32 %v5734_v11, %v5733_v53  ;;  %v5759_v12 = vadd.f32 %v5758_v0, %v5757_v54  ;;  %v5768_v13 = vsel %vm1772_vm12, %v5656_v52, 0.0  ;;  %v6000_v62 = vmul.f32 %v14969_v38, %v5920_v39 }
 0x9b6   :  { %v6029_v43 = vcombine.low %v5997_v45, %v5998_v33  ;;  %v5748_v14 = vadd.f32 %v5747_v8, %v5746_v34  ;;  %v5770_v41 = vsel %vm1772_vm12, %v5657_v28, 0.0  ;;  %v5771_v63 = vsel %vm1772_vm12, %v5658_v48, 0.0  ;;  %v16815_v45 = vld [vmem:[#allocation99_spill] sm:$0xff] }
 0x9b7   :  { %v5737_v42 = vadd.f32 %v5736_v17, %v5735_v22  ;;  %v5761_v50 = vadd.f32 %v5760_v29, %v5759_v12  ;;  %v5773_v30 = vsel %vm1772_vm12, %v5659_v3, 0.0  ;;  %v6030_v35 = vcombine.low %v5999_v60, %v6000_v62  ;;  %v16819_v60 = vld [vmem:[#allocation119_spill] sm:$0xff] }
 0x9b8   :  { %v5750_v55 = vadd.f32 %v5749_v44, %v5748_v14  ;;  %v5772_v49 = vadd.f32 %v5771_v63, %v5770_v41  ;;  %v5775_v31 = vsel %vm1772_vm12, %v5660_v59, 0.0  ;;  %v5777_v52 = vsel %vm1772_vm12, %v5661_v9, 0.0  ;;  %v16811_v44 = vld [vmem:[#allocation3_spill] sm:$0xff]  ;;  %v16812_v59 = vld [vmem:[#allocation129_spill] sm:$0xff] }
 0x9b9   :  { %v5739_v11 = vadd.f32 %v5738_v10, %v5737_v42  ;;  %v5763_v32 = vadd.f32 %v5762_v26, %v5761_v50  ;;  %v5779_v39 = vsel %vm1772_vm12, %v5662_v51, 0.0  ;;  %v6047_v8 = vpack.c.bf16 %v6030_v35, %v6029_v43  ;;  %v16813_v51 = vld [vmem:[#allocation95_spill] sm:$0xff]  ;;  %v16817_v26 = vld [vmem:[#allocation105_spill] sm:$0xff]  ;;  %v16821_v43 = vld [vmem:[#allocation138_spill] sm:$0xff] }
 0x9ba   :  { %v5752_v6 = vadd.f32 %v5751_v46, %v5750_v55  ;;  %v5774_v28 = vadd.f32 %v5773_v30, %v5772_v49  ;;  %v5781_v17 = vsel %vm1772_vm12, %v14916_v24, 0.0  ;;  %v5783_v3 = vsel %vm1772_vm12, %v14920_v20, 0.0  ;;  %v16814_v46 = vld [vmem:[#allocation113_spill] sm:$0xff]  ;;  %v16816_v20 = vld [vmem:[#allocation164_spill] sm:$0xff]  ;;  %v16820_v12 = vld [vmem:[#allocation131_spill] sm:$0xff] }
 0x9bb   :  { %v5765_v48 = vadd.f32 %v5764_v15, %v5763_v32  ;;  %v5993_v27 = vmul.f32 %v16811_v44, %v5739_v11  ;;  %v5601_v10 = vmul.f32 %v16812_v59, %v13991_v16  ;;  %7544 = vmatprep.subr.bf16.mxu1 %v6047_v8  ;;  %v5602_v0 = vmul.f32 %v16813_v51, %v14013_v18  ;;  %v16822_v41 = vld [vmem:[#allocation121_spill] sm:$0xff]  ;;  %v16826_v32 = vld [vmem:[#allocation167_spill] sm:$0xff]  ;;  %v16832_v51 = vld [vmem:[#allocation172_spill] sm:$0xff] }
 0x9bc   :  { %v5754_v21 = vadd.f32 %v5753_v37, %v5752_v6  ;;  %v5776_v9 = vadd.f32 %v5775_v31, %v5774_v28  ;;  %v5603_v29 = vmul.f32 %v16814_v46, %v13998_v7  ;;  %7545 = vmatpush3.bf16.msra.mxu1 %v6047_v8  ;;  %v5604_v53 = vmul.f32 %v16815_v45, %v14024_v25  ;;  %v16818_v37 = vld [vmem:[#allocation102_spill] sm:$0xff]  ;;  %v16823_v50 = vld [vmem:[#allocation165_spill] sm:$0xff]  ;;  %v16825_v31 = vld [vmem:[#allocation100_spill] sm:$0xff] }
 0x9bd   :  { %v5767_v24 = vadd.f32 %v5766_v5, %v5765_v48  ;;  %v5605_v54 = vmul.f32 %v16816_v20, %v13988_v58  ;;  %v5606_v33 = vmul.f32 %v16817_v26, %v14009_v47  ;;  %v15000_v22 = vmul.f32 %v16819_v60, %v16743_v4  ;;  %v16824_v55 = vld [vmem:[#allocation77_spill] sm:$0xff]  ;;  %v16828_v6 = vld [vmem:[#allocation168_spill] sm:$0xff]  ;;  %v16834_v20 = vld [vmem:[#allocation175_spill] sm:$0xff] }
 0x9be   :  { %v5778_v34 = vadd.f32 %v5777_v52, %v5776_v9  ;;  %v5994_v15 = vmul.f32 %v16818_v37, %v5754_v21  ;;  %v15004_v62 = vmul.f32 %v16820_v12, %v16745_v36  ;;  %v5609_v14 = vmul.f32 %v16821_v43, %v13991_v16  ;;  %v16829_v48 = vld [vmem:[#allocation169_spill] sm:$0xff]  ;;  %v16831_v21 = vld [vmem:[#allocation126_spill] sm:$0xff] }
 0x9bf   :  { %v5769_v5 = vadd.f32 %v5768_v13, %v5767_v24  ;;  %v5610_v42 = vmul.f32 %v16822_v41, %v14013_v18  ;;  %v5611_v63 = vmul.f32 %v16823_v50, %v13998_v7  ;;  %v5612_v49 = vmul.f32 %v16824_v55, %v14024_v25  ;;  %v16827_v13 = vld [vmem:[#allocation145_spill] sm:$0xff]  ;;  %v16839_v50 = vld [vmem:[#allocation26_spill] sm:$0xff]  ;;  %v16840_v55 = vld [vmem:[#allocation32_spill] sm:$0xff] }
 0x9c0   :  { %v5780_v30 = vadd.f32 %v5779_v39, %v5778_v34  ;;  %v6015_v35 = vcombine.low %v5993_v27, %v5994_v15  ;;  %v5613_v11 = vmul.f32 %v16825_v31, %v13988_v58  ;;  %v5614_v8 = vmul.f32 %v16827_v13, %v14009_v47  ;;  %v16830_v27 = vld [vmem:[#allocation171_spill] sm:$0xff]  ;;  %v16833_v24 = vld [vmem:[#allocation173_spill] sm:$0xff] }
 0x9c1   :  { %v5995_v52 = vmul.f32 %v16826_v32, %v5769_v5  ;;  %v15021_v28 = vmul.f32 %v16828_v6, %v16743_v4  ;;  %v15025_v44 = vmul.f32 %v16829_v48, %v16745_v36  ;;  %v5617_v59 = vmul.f32 %v16830_v27, %v13991_v16  ;;  %v16835_v34 = vld [vmem:[#allocation81_spill] sm:$0xff]  ;;  %v16841_v6 = vld [vmem:[#allocation76_spill] sm:$0xff] }
 0x9c2   :  { %v5782_v39 = vadd.f32 %v5781_v17, %v5780_v30  ;;  %v5618_v9 = vmul.f32 %v16831_v21, %v14013_v18  ;;  %v5619_v46 = vmul.f32 %v16832_v51, %v13998_v7  ;;  %v5620_v45 = vmul.f32 %v16833_v24, %v14024_v25  ;;  %v16836_v17 = vld [vmem:[#allocation176_spill] sm:$0xff]  ;;  %v16837_v12 = vld [vmem:[#allocation29_spill] sm:$0xff] }
 0x9c3   :  { %v5621_v26 = vmul.f32 %v16834_v20, %v13988_v58  ;;  %v5622_v37 = vmul.f32 %v16835_v34, %v14009_v47  ;;  %v15041_v15 = vmul.f32 %v16836_v17, %v16743_v4  ;;  %v15045_v5 = vmul.f32 %v16837_v12, %v16745_v36  ;;  %v16838_v43 = vld [vmem:[#allocation25_spill] sm:$0xff] }
 0x9c4   :  { %v5784_v60 = vadd.f32 %v5783_v3, %v5782_v39  ;;  %v5625_v41 = vmul.f32 %v16838_v43, %v13991_v16  ;;  %v5626_v30 = vmul.f32 %v16839_v50, %v14013_v18  ;;  %v5627_v31 = vmul.f32 %v16840_v55, %v13998_v7 }
 0x9c5   :  { %v5628_v32 = vmul.f32 %v14810_v19, %v14024_v25  ;;  %v5629_v13 = vmul.f32 %v14816_v23, %v13988_v58  ;;  %v5630_v3 = vmul.f32 %v14824_v40, %v14009_v47  ;;  %v15062_v16 = vmul.f32 %v14830_v2, %v16743_v4 }
 0x9c6   :  { %v5996_v48 = vmul.f32 %v16841_v6, %v5784_v60  ;;  %v15066_v18 = vmul.f32 %v14838_v57, %v16745_v36  ;;  %v5665_v7 = vsel %vm1772_vm12, %v5601_v10, 0.0  ;;  %v5666_v25 = vsel %vm1772_vm12, %v5602_v0, 0.0 }
 0x9c7   :  { %v5667_v39 = vadd.f32 %v5666_v25, %v5665_v7  ;;  %v5668_v58 = vsel %vm1772_vm12, %v5603_v29, 0.0  ;;  %v5680_v47 = vsel %vm1772_vm12, %v5609_v14, 0.0  ;;  %v5681_v23 = vsel %vm1772_vm12, %v5610_v42, 0.0 }
 0x9c8   :  { %v6016_v19 = vcombine.low %v5995_v52, %v5996_v48  ;;  %v5682_v4 = vadd.f32 %v5681_v23, %v5680_v47  ;;  %v5670_v2 = vsel %vm1772_vm12, %v5604_v53, 0.0  ;;  %v5683_v36 = vsel %vm1772_vm12, %v5611_v63, 0.0 }
 0x9c9   :  { %v5669_v27 = vadd.f32 %v5668_v58, %v5667_v39  ;;  %v5695_v0 = vsel %vm1772_vm12, %v5617_v59, 0.0  ;;  %v5696_v52 = vsel %vm1772_vm12, %v5618_v9, 0.0  ;;  %v5672_v29 = vsel %vm1772_vm12, %v5605_v54, 0.0 }
 0x9ca   :  { %v6046_v40 = vpack.c.bf16 %v6016_v19, %v6015_v35  ;;  %v5684_v10 = vadd.f32 %v5683_v36, %v5682_v4  ;;  %v5685_v14 = vsel %vm1772_vm12, %v5612_v49, 0.0  ;;  %v5697_v42 = vadd.f32 %v5696_v52, %v5695_v0  ;;  %v6065_v36 = vpop.permute.xlu1 %6064 }
 0x9cb   :  { %v5671_v57 = vadd.f32 %v5670_v2, %v5669_v27  ;;  %v5674_v21 = vsel %vm1772_vm12, %v5606_v33, 0.0  ;;  %v5698_v53 = vsel %vm1772_vm12, %v5619_v46, 0.0  ;;  %v5687_v63 = vsel %vm1772_vm12, %v5613_v11, 0.0  ;;  %v7696_v2 = vld [vmem:[%s14466_s16 + $0x8] sm:$0xff]  }
 0x9cc   :  { %7546 = vmatprep.subr.bf16.mxu1 %v6046_v40  ;;  %v5686_v51 = vadd.f32 %v5685_v14, %v5684_v10  ;;  %v5699_v24 = vadd.f32 %v5698_v53, %v5697_v42  ;;  %v5710_v20 = vsel %vm1772_vm12, %v5625_v41, 0.0  ;;  %v5711_v59 = vsel %vm1772_vm12, %v5626_v30, 0.0 }
 0x9cd   :  { %7547 = vmatpush3.bf16.msra.mxu1 %v6046_v40  ;;  %v5673_v35 = vadd.f32 %v5672_v29, %v5671_v57  ;;  %v5700_v54 = vsel %vm1772_vm12, %v5620_v45, 0.0  ;;  %v5712_v17 = vadd.f32 %v5711_v59, %v5710_v20  ;;  %v5676_v49 = vsel %vm1772_vm12, %v15000_v22, 0.0 }
 0x9ce   :  { %v5688_v34 = vadd.f32 %v5687_v63, %v5686_v51  ;;  %v5689_v33 = vsel %vm1772_vm12, %v5614_v8, 0.0  ;;  %v5701_v60 = vadd.f32 %v5700_v54, %v5699_v24  ;;  %v5713_v46 = vsel %vm1772_vm12, %v5627_v31, 0.0  ;;  %v6085_v0 = vpop.permute.xlu1 %6084  ;;  %v16846_v51 = vld [vmem:[#allocation109_spill] sm:$0xff]  ;;  %v16848_v54 = vld [vmem:[#allocation158_spill] sm:$0xff] }
 0x9cf   :  { %v5675_v9 = vadd.f32 %v5674_v21, %v5673_v35  ;;  %v5702_v43 = vsel %vm1772_vm12, %v5621_v26, 0.0  ;;  %v5714_v41 = vadd.f32 %v5713_v46, %v5712_v17  ;;  %v5678_v50 = vsel %vm1772_vm12, %v15004_v62, 0.0 }
 0x9d0   :  { %v5690_v11 = vadd.f32 %v5689_v33, %v5688_v34  ;;  %v5691_v45 = vsel %vm1772_vm12, %v15021_v28, 0.0  ;;  %v5703_v30 = vadd.f32 %v5702_v43, %v5701_v60  ;;  %v5715_v55 = vsel %vm1772_vm12, %v5628_v32, 0.0  ;;  %v16850_v60 = vld [vmem:[#allocation148_spill] sm:$0xff] }
 0x9d1   :  { %v5677_v12 = vadd.f32 %v5676_v49, %v5675_v9  ;;  %v5704_v8 = vsel %vm1772_vm12, %v5622_v37, 0.0  ;;  %v5716_v48 = vadd.f32 %v5715_v55, %v5714_v41  ;;  %v5693_v31 = vsel %vm1772_vm12, %v15025_v44, 0.0  ;;  %v16847_v9 = vld [vmem:[#allocation163_spill] sm:$0xff] }
 0x9d2   :  { %v5692_v6 = vadd.f32 %v5691_v45, %v5690_v11  ;;  %v5705_v7 = vadd.f32 %v5704_v8, %v5703_v30  ;;  %v5717_v26 = vsel %vm1772_vm12, %v5629_v13, 0.0  ;;  %v5706_v62 = vsel %vm1772_vm12, %v15041_v15, 0.0  ;;  %v6090_v20 = vpop.permute.xlu1 %6089  ;;  %v16854_v8 = vld [vmem:[#allocation120_spill] sm:$0xff] }
 0x9d3   :  { %v5679_v22 = vadd.f32 %v5678_v50, %v5677_v12  ;;  %v5718_v19 = vadd.f32 %v5717_v26, %v5716_v48  ;;  %v5719_v32 = vsel %vm1772_vm12, %v5630_v3, 0.0  ;;  %v5708_v37 = vsel %vm1772_vm12, %v15045_v5, 0.0 }
 0x9d4   :  { %v5694_v25 = vadd.f32 %v5693_v31, %v5692_v6  ;;  %v5707_v39 = vadd.f32 %v5706_v62, %v5705_v7  ;;  %v5721_v13 = vsel %vm1772_vm12, %v15062_v16, 0.0  ;;  %v7698_v16 = vld [vmem:[%s14466_s16 + $0x18] sm:$0xff]   ;;  %vm16849_vm9 = vcmask 130048  }
 0x9d5   :  { %v5989_v28 = vmul.f32 %v14953_v61, %v5679_v22  ;;  %v5720_v58 = vadd.f32 %v5719_v32, %v5718_v19  ;;  %v5723_v61 = vsel %vm1772_vm12, %v15066_v18, 0.0  ;;  %vm16845_vm12 = vmmov %vm16736_vm3  ;;  %v16856_v19 = vld [vmem:[#allocation153_spill] sm:$0xff] }
 0x9d6   :  { %v5990_v44 = vmul.f32 %v14958_v1, %v5694_v25  ;;  %v5709_v47 = vadd.f32 %v5708_v37, %v5707_v39  ;;  %v7697_v1 = vld [vmem:[%s14466_s16 + $0x10] sm:$0xff]   ;;  %vm16851_vm0 = vmmov %vm16849_vm9  ;;  %v6095_v30 = vpop.permute.xlu1 %6094  ;;  %v16855_v25 = vld [vmem:[#allocation155_spill] sm:$0xff] }
 0x9d7   :  { %v5722_v15 = vadd.f32 %v5721_v13, %v5720_v58  ;;  %vm16852_vm1 = vmmov %vm16851_vm0  ;;  %v16858_v37 = vld [vmem:[#allocation157_spill] sm:$0xff] }
 0x9d8   :  { %v6013_v23 = vcombine.low %v5989_v28, %v5990_v44  ;;  %v5991_v40 = vmul.f32 %v14963_v56, %v5709_v47  ;;  %v7699_v56 = vld [vmem:[%s15121_s20] sm:$0xff]   ;;  %vm16853_vm13 = vmmov %vm16851_vm0 }
 0x9d9   :  { %v5724_v3 = vadd.f32 %v5723_v61, %v5722_v15  ;;  %vm16857_vm14 = vmmov %vm16851_vm0 }
 0x9da   :  { %vm16859_vm5 = vmmov %vm16851_vm0 }
 0x9db   :  { %v5992_v27 = vmul.f32 %v14969_v38, %v5724_v3  ;;  %v6060_v38 = vpop.permute.xlu0 %6059  ;;  %vm16860_vm2 = vmmov %vm16851_vm0 }
 0x9dc   :  { %vm16861_vm7 = vmmov %vm16851_vm0 }
 0x9dd   :  { %v6014_v5 = vcombine.low %v5991_v40, %v5992_v27  ;;  %vm16862_vm4 = vmmov %vm16851_vm0 }
 0x9de   :  { %vm16863_vm11 = vmmov %vm16851_vm0 }
 0x9df   :  { %v6045_v4 = vpack.c.bf16 %v6014_v5, %v6013_v23  ;;  %v6080_v18 = vpop.permute.xlu0 %6079  ;;  %vm16864_vm15 = vmmov %vm16851_vm0 }
 0x9e0   :  { %vm16865_vm3 = vmmov %vm16851_vm0 }
 0x9e1   :  { %7548 = vmatprep.subr.bf16.mxu1 %v6045_v4 }
 0x9e2   :  { %7549 = vmatpush3.bf16.msra.mxu1 %v6045_v4 }
 0x9e3   :  { %v6070_v57 = vpop.permute.xlu0 %6069 }
 0x9e5   :  { %7551 = vmatmul.mubr.msk.bf16.vlgmr.msra.gmra.mxu1 %vm16842_vm6, %v7696_v2 }
 0x9e6   :  { %7554 = vmatprep.mubr.msk.bf16.mxu1 %vm16843_vm10, %v7697_v1  ;;  %vm16866_vm10 = vmmov %vm16842_vm6 }
 0x9e7   :  { %v6075_v35 = vpop.permute.xlu0 %6074 }
 0x9ed   :  { %7555 = vmatmul.mubr.msk.bf16.gmra.mxu1 %vm16844_vm8, %v7698_v16  ;;  %vm16867_vm8 = vmmov %vm16842_vm6 }
 0x9ee   :  { %7566 = vmatprep.mubr.msk.bf16.mxu1 %vm16845_vm12, %v7699_v56  ;;  %vm16868_vm12 = vmmov %vm16842_vm6 }
 0xaa5   :  { %v7552_v10 = vpop.f32.mrf.mxu1 }
 0xaa6   :  { %v6172_v42 = vadd.f32 %v7552_v10, %v6070_v57 }
 0xaa7   :  { %v6163_v52 = vpop.f32.mrf.mxu1 }
 0xaa8   :  { %v6164_v29 = vadd.f32 %v6163_v52, %v6060_v38  ;;  %v6196_v34 = vadd.f32 %v6172_v42, %v16847_v9 }
 0xaa9   :  { %v7553_v14 = vpop.f32.mrf.mxu1 }
 0xaaa   :  { %v6194_v53 = vadd.f32 %v6164_v29, %v16846_v51  ;;  %v6175_v63 = vadd.f32 %v7553_v14, %v6075_v35  ;;  %v6205_v50 = vsel %vm16852_vm1, %v6196_v34, 0.0 }
 0xaab   :  { %v6166_v21 = vpop.f32.mrf.mxu1 }
 0xaac   :  { %v6167_v24 = vadd.f32 %v6166_v21, %v6065_v36  ;;  %v6202_v33 = vsel %vm16849_vm9, %v6194_v53, 0.0  ;;  %v6197_v46 = vadd.f32 %v6175_v63, %v16850_v60  ;;  %vm16869_vm9 = vmmov %vm16842_vm6 }
 0xaad   :  { %v7556_v59 = vpop.f32.mrf.mxu1 }
 0xaae   :  { %v6195_v17 = vadd.f32 %v6167_v24, %v16848_v54  ;;  %v6188_v45 = vadd.f32 %v7556_v59, %v6090_v20  ;;  %v6207_v6 = vsel %vm16853_vm13, %v6197_v46, 0.0 }
 0xaaf   :  { %v6179_v49 = vpop.f32.mrf.mxu1 }
 0xab0   :  { %v6203_v12 = vsel %vm16851_vm0, %v6195_v17, 0.0  ;;  %v6180_v11 = vadd.f32 %v6179_v49, %v6080_v18  ;;  %v6200_v62 = vadd.f32 %v6188_v45, %v16855_v25  ;;  %v6299_v45 = vpop.permute.xlu1 %6298  ;;  %vm16870_vm0 = vmmov %vm16842_vm6 }
 0xab1   :  { %v6204_v43 = vadd.f32 %v6203_v12, %v6202_v33  ;;  %v7557_v41 = vpop.f32.mrf.mxu1  ;;  %vm16871_vm1 = vmmov %vm16870_vm0 }
 0xab2   :  { %v6198_v48 = vadd.f32 %v6180_v11, %v16854_v8  ;;  %v6191_v31 = vadd.f32 %v7557_v41, %v6095_v30  ;;  %v6219_v15 = vsel %vm16860_vm2, %v6200_v62, 0.0  ;;  %v6294_v30 = vpop.permute.xlu0 %6293  ;;  %vm16872_vm13 = vmmov %vm16870_vm0 }
 0xab3   :  { %v6206_v55 = vadd.f32 %v6205_v50, %v6204_v43  ;;  %v6182_v22 = vpop.f32.mrf.mxu1 }
 0xab4   :  { %v6183_v7 = vadd.f32 %v6182_v22, %v6085_v0  ;;  %v6216_v32 = vsel %vm16857_vm14, %v6198_v48, 0.0  ;;  %v6201_v58 = vadd.f32 %v6191_v31, %v16858_v37  ;;  %v6323_v8 = vpop.permute.xlu1 %6322  ;;  %vm16873_vm14 = vmmov %vm16860_vm2 }
 0xab5   :  { %v6208_v26 = vadd.f32 %v6207_v6, %v6206_v55 }
 0xab6   :  { %v6199_v28 = vadd.f32 %v6183_v7, %v16856_v19  ;;  %v6221_v40 = vsel %vm16861_vm7, %v6201_v58, 0.0  ;;  %vm16875_vm7 = vmmov %vm16860_vm2 }
 0xab7   :  { %v6209_v39 = vrot.slane %v6208_v26, 4 }
 0xab8   :  { %v6217_v44 = vsel %vm16859_vm5, %v6199_v28, 0.0  ;;  %v6289_v25 = vpop.permute.xlu1 %6288  ;;  %vm16874_vm5 = vmmov %vm16860_vm2 }
 0xab9   :  { %v6210_v47 = vadd.f32 %v6209_v39, %v6208_v26  ;;  %v6218_v13 = vadd.f32 %v6217_v44, %v6216_v32 }
 0xabb   :  { %v6211_v23 = vrot.slane %v6210_v47, 2  ;;  %v6220_v61 = vadd.f32 %v6219_v15, %v6218_v13 }
 0xabd   :  { %v6212_v3 = vadd.f32 %v6211_v23, %v6210_v47  ;;  %v6222_v27 = vadd.f32 %v6221_v40, %v6220_v61 }
 0xabf   :  { %v6213_v5 = vrot.slane %v6212_v3, 1  ;;  %v6223_v4 = vrot.slane %v6222_v27, 4 }
 0xac1   :  { %v6224_v2 = vadd.f32 %v6223_v4, %v6222_v27  ;;  %v6214_v1 = vadd.f32 %v6213_v5, %v6212_v3 }
 0xac3   :  { %v6225_v16 = vrot.slane %v6224_v2, 2  ;;  %v6215_v38 = vmul.f32 0.03125, %v6214_v1 }
 0xac5   :  { %v6226_v56 = vadd.f32 %v6225_v16, %v6224_v2  ;;  %v6231_v57 = vsub.f32 %v6195_v17, %v6215_v38  ;;  %v6230_v10 = vsub.f32 %v6194_v53, %v6215_v38  ;;  %v6232_v0 = vsub.f32 %v6196_v34, %v6215_v38 }
 0xac6   :  { %v6233_v29 = vsub.f32 %v6197_v46, %v6215_v38 }
 0xac7   :  { %v6227_v18 = vrot.slane %v6226_v56, 1  ;;  %v6239_v51 = vmul.f32 %v6231_v57, %v6231_v57  ;;  %v6238_v63 = vmul.f32 %v6230_v10, %v6230_v10  ;;  %v6240_v24 = vmul.f32 %v6232_v0, %v6232_v0 }
 0xac8   :  { %v6241_v49 = vmul.f32 %v6233_v29, %v6233_v29 }
 0xac9   :  { %v6228_v36 = vadd.f32 %v6227_v18, %v6226_v56 }
 0xacb   :  { %v6229_v52 = vmul.f32 0.03125, %v6228_v36 }
 0xacd   :  { %v6234_v14 = vsub.f32 %v6198_v48, %v6229_v52  ;;  %v6235_v42 = vsub.f32 %v6199_v28, %v6229_v52  ;;  %v6236_v35 = vsub.f32 %v6200_v62, %v6229_v52  ;;  %v6237_v21 = vsub.f32 %v6201_v58, %v6229_v52  ;;  %v6318_v48 = vpop.permute.xlu0 %6317  ;;  %v6313_v28 = vpop.permute.xlu1 %6312 }
 0xacf   :  { %v6242_v20 = vmul.f32 %v6234_v14, %v6234_v14  ;;  %v6243_v59 = vmul.f32 %v6235_v42, %v6235_v42  ;;  %v6244_v9 = vmul.f32 %v6236_v35, %v6236_v35  ;;  %v6245_v54 = vmul.f32 %v6237_v21, %v6237_v21 }
 0xad1   :  { %v6246_v33 = vadd.f32 %v6242_v20, %v6238_v63  ;;  %v6247_v60 = vadd.f32 %v6243_v59, %v6239_v51  ;;  %v6248_v12 = vadd.f32 %v6244_v9, %v6240_v24  ;;  %v6249_v17 = vadd.f32 %v6245_v54, %v6241_v49  ;;  %v6284_v62 = vpop.permute.xlu0 %6283  ;;  %v6391_v32 = vpop.permute.xlu1 %6390 }
 0xad3   :  { %v6250_v53 = vsel %vm16862_vm4, %v6246_v33, 0.0  ;;  %v6251_v34 = vsel %vm16863_vm11, %v6247_v60, 0.0  ;;  %v6253_v11 = vsel %vm16864_vm15, %v6248_v12, 0.0  ;;  %v6255_v41 = vsel %vm16865_vm3, %v6249_v17, 0.0  ;;  %vm16876_vm4 = vmmov %vm16860_vm2 }
 0xad4   :  { %v6252_v46 = vadd.f32 %v6251_v34, %v6250_v53  ;;  %vm16877_vm11 = vmmov %vm16860_vm2 }
 0xad5   :  { %v6308_v39 = vpop.permute.xlu0 %6307  ;;  %v6381_v27 = vpop.permute.xlu1 %6380  ;;  %vm16878_vm15 = vmmov %vm16860_vm2 }
 0xad6   :  { %v6254_v43 = vadd.f32 %v6253_v11, %v6252_v46  ;;  %vm16879_vm3 = vmmov %vm16860_vm2 }
 0xad8   :  { %v6256_v50 = vadd.f32 %v6255_v41, %v6254_v43 }
 0xad9   :  { %v6386_v37 = vpop.permute.xlu0 %6385  ;;  %v6371_v49 = vpop.permute.xlu1 %6370 }
 0xada   :  { %v6257_v55 = vrot.slane %v6256_v50, 4 }
 0xadc   :  { %v6258_v22 = vadd.f32 %v6257_v55, %v6256_v50 }
 0xadd   :  { %v6376_v5 = vpop.permute.xlu0 %6375  ;;  %v6361_v41 = vpop.permute.xlu1 %6360 }
 0xade   :  { %v6259_v6 = vrot.slane %v6258_v22, 2 }
 0xae0   :  { %v6260_v31 = vadd.f32 %v6259_v6, %v6258_v22  ;;  %v7700_v6 = vld [vmem:[%s15121_s20 + $0x8] sm:$0xff]  }
 0xae1   :  { %v6366_v33 = vpop.permute.xlu0 %6365 }
 0xae2   :  { %v6261_v7 = vrot.slane %v6260_v31, 1 }
 0xae4   :  { %v6262_v26 = vadd.f32 %v6261_v7, %v6260_v31  ;;  %v7703_v31 = vld [vmem:[%s15121_s20 + $0x20] sm:$0xff]   ;;  %v7704_v7 = vld [vmem:[%s15121_s20 + $0x28] sm:$0xff]  }
 0xae5   :  { %v6356_v50 = vpop.permute.xlu0 %6355 }
 0xae6   :  { %v6263_v19 = vmul.f32 0.032258064, %v6262_v26  ;;  %v7705_v26 = vld [vmem:[%s15121_s20 + $0x30] sm:$0xff]  }
 0xae8   :  { %8261 = vrsqrt.f32 %v6263_v19 }
 0xaf5   :  { %v8262_v58 = vpop.eup %8261 }
 0xaf6   :  { %v6270_v44 = vmul.f32 %v8262_v58, %v6235_v42  ;;  %v6267_v47 = vmul.f32 %v8262_v58, %v6232_v0  ;;  %v6268_v13 = vmul.f32 %v8262_v58, %v6233_v29  ;;  %v6271_v15 = vmul.f32 %v8262_v58, %v6236_v35 }
 0xaf7   :  { %v6272_v23 = vmul.f32 %v8262_v58, %v6237_v21  ;;  %v6265_v61 = vmul.f32 %v8262_v58, %v6230_v10  ;;  %v6266_v40 = vmul.f32 %v8262_v58, %v6231_v57  ;;  %v6269_v3 = vmul.f32 %v8262_v58, %v6234_v14 }
 0xaf8   :  { %v6326_v4 = vmul.f32 %v6313_v28, %v6270_v44  ;;  %v6338_v2 = vmul.f32 %v6289_v25, %v6270_v44  ;;  %v6335_v1 = vmul.f32 %v6318_v48, %v6267_v47  ;;  %v6336_v16 = vmul.f32 %v6323_v8, %v6268_v13  ;;  %v6510_v44 = vpop.permute.xlu0 %6509 }
 0xaf9   :  { %v6339_v56 = vmul.f32 %v6294_v30, %v6271_v15  ;;  %v6340_v38 = vmul.f32 %v6299_v45, %v6272_v23  ;;  %v6333_v18 = vmul.f32 %v6308_v39, %v6265_v61  ;;  %v6334_v36 = vmul.f32 %v6313_v28, %v6266_v40 }
 0xafa   :  { %v6337_v52 = vmul.f32 %v6284_v62, %v6269_v3  ;;  %v6303_v51 = vmul.f32 %v6294_v30, %v6267_v47  ;;  %v6304_v42 = vmul.f32 %v6299_v45, %v6268_v13  ;;  %v6327_v0 = vmul.f32 %v6318_v48, %v6271_v15  ;;  %v7702_v48 = vld [vmem:[%s15121_s20 + $0x18] sm:$0xff]  }
 0xafb   :  { %v6343_v29 = vadd.f32 %v6339_v56, %v6335_v1  ;;  %v6344_v35 = vadd.f32 %v6340_v38, %v6336_v16  ;;  %v6342_v21 = vadd.f32 %v6338_v2, %v6334_v36  ;;  %v6328_v10 = vmul.f32 %v6323_v8, %v6272_v23  ;;  %v7701_v8 = vld [vmem:[%s15121_s20 + $0x10] sm:$0xff]  }
 0xafc   :  { %v6341_v57 = vadd.f32 %v6337_v52, %v6333_v18  ;;  %v6331_v14 = vsub.f32 %v6303_v51, %v6327_v0  ;;  %v6301_v63 = vmul.f32 %v6284_v62, %v6265_v61  ;;  %v6302_v24 = vmul.f32 %v6289_v25, %v6266_v40  ;;  %v7706_v25 = vld [vmem:[%s15121_s20 + $0x38] sm:$0xff]   ;;  %v7707_v62 = vld [vmem:[%s15186_s26] sm:$0xff]   ;;  %v6500_v61 = vpop.permute.xlu0 %6499 }
 0xafd   :  { %v15145_v20 = vadd.f32 %v6386_v37, %v6343_v29  ;;  %v15147_v59 = vadd.f32 %v6391_v32, %v6344_v35  ;;  %v15149_v9 = vadd.f32 %v6381_v27, %v6342_v21  ;;  %v6332_v54 = vsub.f32 %v6304_v42, %v6328_v10  ;;  %7598 = vmatprep.mubr.bf16.mxu0 %v7707_v62  ;;  %v6515_v37 = vpop.permute.xlu1 %6514 }
 0xafe   :  { %v15151_v60 = vadd.f32 %v6376_v5, %v6341_v57  ;;  %v6325_v12 = vmul.f32 %v6308_v39, %v6269_v3  ;;  %v15155_v53 = vadd.f32 %v6366_v33, %v6331_v14  ;;  %v6330_v43 = vsub.f32 %v6302_v24, %v6326_v4 }
 0xaff   :  { %v6420_v17 = vpack.c.bf16 %v15147_v59, %v15145_v20  ;;  %v15159_v46 = vadd.f32 %v6371_v49, %v6332_v54 }
 0xb00   :  { %v6419_v34 = vpack.c.bf16 %v15149_v9, %v15151_v60  ;;  %v6329_v11 = vsub.f32 %v6301_v63, %v6325_v12  ;;  %v15165_v55 = vadd.f32 %v6361_v41, %v6330_v43  ;;  %v6490_v4 = vpop.permute.xlu0 %6489 }
 0xb01   :  { %7558 = vmatprep.subr.bf16.mxu1 %v6420_v17  ;;  %v6418_v45 = vpack.c.bf16 %v15159_v46, %v15155_v53  ;;  %v6505_v15 = vpop.permute.xlu1 %6504 }
 0xb02   :  { %7559 = vmatpush3.bf16.msra.mxu1 %v6420_v17  ;;  %v15163_v30 = vadd.f32 %v6356_v50, %v6329_v11 }
 0xb03   :  { %7560 = vmatprep.subr.bf16.mxu1 %v6419_v34 }
 0xb04   :  { %v6417_v22 = vpack.c.bf16 %v15165_v55, %v15163_v30  ;;  %v6480_v18 = vpop.permute.xlu0 %6479 }
 0xb05   :  { %v6495_v27 = vpop.permute.xlu1 %6494 }
 0xb06   :  { %7561 = vmatpush3.bf16.msra.mxu1 %v6419_v34 }
 0xb07   :  { %7562 = vmatprep.subr.bf16.mxu1 %v6418_v45 }
 0xb08   :  { %v6470_v54 = vpop.permute.xlu0 %6469 }
 0xb09   :  { %v6485_v16 = vpop.permute.xlu1 %6484 }
 0xb0a   :  { %7563 = vmatpush3.bf16.msra.mxu1 %v6418_v45 }
 0xb0b   :  { %7564 = vmatprep.subr.bf16.mxu1 %v6417_v22 }
 0xb0c   :  { %v6460_v45 = vpop.permute.xlu0 %6459 }
 0xb0d   :  { %v6475_v10 = vpop.permute.xlu1 %6474 }
 0xb0e   :  { %7565 = vmatpush3.bf16.msra.mxu1 %v6417_v22 }
 0xb10   :  { %v6450_v62 = vpop.permute.xlu0 %6449 }
 0xb11   :  { %7567 = vmatmul.mubr.msk.bf16.vlgmr.msra.gmra.mxu1 %vm16842_vm6, %v7700_v6  ;;  %v6465_v11 = vpop.permute.xlu1 %6464  ;;  %vm16880_vm6 = vmmov %vm16860_vm2 }
 0xb12   :  { %7570 = vmatprep.mubr.msk.bf16.mxu1 %vm16866_vm10, %v7701_v8  ;;  %vm16881_vm10 = vmmov %vm16860_vm2 }
 0xb19   :  { %7571 = vmatmul.mubr.msk.bf16.gmra.mxu1 %vm16867_vm8, %v7702_v48  ;;  %vm16882_vm8 = vmmov %vm16860_vm2 }
 0xb1a   :  { %7574 = vmatprep.mubr.msk.bf16.mxu1 %vm16868_vm12, %v7703_v31  ;;  %vm16883_vm12 = vmmov %vm16860_vm2 }
 0xb21   :  { %7575 = vmatmul.mubr.msk.bf16.gmra.mxu1 %vm16869_vm9, %v7704_v7  ;;  %v6455_v7 = vpop.permute.xlu1 %6454  ;;  %vm16884_vm9 = vmmov %vm16870_vm0 }
 0xb22   :  { %7578 = vmatprep.mubr.msk.bf16.mxu1 %vm16870_vm0, %v7705_v26  ;;  %vm7143_vm0 = vcmask 123904  }
 0xb29   :  { %7579 = vmatmul.mubr.msk.bf16.gmra.mxu1 %vm16871_vm1, %v7706_v25  ;;  %vm16885_vm1 = vmmov %vm16860_vm2 }
 0xbd1   :  { %v15189_v19 = vpop.f32.mrf.mxu1 }
 0xbd3   :  { %v15191_v28 = vpop.f32.mrf.mxu1 }
 0xbd5   :  { %v7569_v39 = vpop.f32.mrf.mxu1 }
 0xbd7   :  { %v15193_v32 = vpop.f32.mrf.mxu1 }
 0xbd9   :  { %v7572_v58 = vpop.f32.mrf.mxu1 }
 0xbda   :  { %v6640_v22 = vadd.f32 %v7572_v58, %v6470_v54  ;;  %v6445_v58 = vpop.permute.xlu1 %6444 }
 0xbdb   :  { %v6631_v47 = vpop.f32.mrf.mxu1 }
 0xbdc   :  { %v6684_v26 = vmax.f32 %v6640_v22, 0.0  ;;  %v6632_v25 = vadd.f32 %v6631_v47, %v6460_v45 }
 0xbdd   :  { %v7573_v13 = vpop.f32.mrf.mxu1 }
 0xbde   :  { %v6643_v43 = vadd.f32 %v7573_v13, %v6475_v10  ;;  %v6624_v13 = vadd.f32 %v15189_v19, %v6450_v62 }
 0xbdf   :  { %v6634_v23 = vpop.f32.mrf.mxu1 }
 0xbe0   :  { %v6685_v8 = vmax.f32 %v6643_v43, 0.0  ;;  %v6635_v48 = vadd.f32 %v6634_v23, %v6465_v11  ;;  %v6619_v23 = vadd.f32 %v15193_v32, %v6445_v58  ;;  %v6680_v47 = vmax.f32 %v6624_v13, 0.0  ;;  %v7709_v32 = vld [vmem:[%s15186_s26 + $0x10] sm:$0xff]  }
 0xbe1   :  { %v7576_v40 = vpop.f32.mrf.mxu1 }
 0xbe2   :  { %v6656_v57 = vadd.f32 %v7576_v40, %v6490_v4  ;;  %v6679_v4 = vmax.f32 %v6619_v23, 0.0 }
 0xbe3   :  { %v6647_v3 = vpop.f32.mrf.mxu1 }
 0xbe4   :  { %v6688_v17 = vmax.f32 %v6656_v57, 0.0  ;;  %v6648_v34 = vadd.f32 %v6647_v3, %v6480_v18  ;;  %v6726_v18 = vpop.permute.xlu1 %6725 }
 0xbe5   :  { %v7577_v5 = vpop.f32.mrf.mxu1 }
 0xbe6   :  { %v6659_v0 = vadd.f32 %v7577_v5, %v6495_v27  ;;  %v6686_v6 = vmax.f32 %v6648_v34, 0.0  ;;  %v6440_v27 = vpop.permute.xlu0 %6439 }
 0xbe7   :  { %v6650_v2 = vpop.f32.mrf.mxu1 }
 0xbe8   :  { %v6689_v49 = vmax.f32 %v6659_v0, 0.0  ;;  %v6651_v33 = vadd.f32 %v6650_v2, %v6485_v16  ;;  %v7710_v16 = vld [vmem:[%s15186_s26 + $0x18] sm:$0xff]  }
 0xbe9   :  { %v7580_v1 = vpop.f32.mrf.mxu1 }
 0xbea   :  { %v6672_v38 = vadd.f32 %v7580_v1, %v6510_v44  ;;  %v6707_v41 = vpack.c.bf16 %v6689_v49, %v6688_v17  ;;  %v6687_v50 = vmax.f32 %v6651_v33, 0.0  ;;  %v6705_v44 = vpack.c.bf16 %v6685_v8, %v6684_v26  ;;  %v7708_v1 = vld [vmem:[%s15186_s26 + $0x8] sm:$0xff]  }
 0xbeb   :  { %v6663_v56 = vpop.f32.mrf.mxu1 }
 0xbec   :  { %v6664_v52 = vadd.f32 %v6663_v56, %v6500_v61  ;;  %v6692_v29 = vmax.f32 %v6672_v38, 0.0  ;;  %v6706_v31 = vpack.c.bf16 %v6687_v50, %v6686_v6  ;;  %v6682_v61 = vmax.f32 %v6632_v25, 0.0  ;;  %v6721_v56 = vpop.permute.xlu0 %6720 }
 0xbed   :  { %v7581_v36 = vpop.f32.mrf.mxu1 }
 0xbee   :  { %v6675_v51 = vadd.f32 %v7581_v36, %v6515_v37  ;;  %v6690_v14 = vmax.f32 %v6664_v52, 0.0  ;;  %v6627_v37 = vadd.f32 %v7569_v39, %v6455_v7  ;;  %v6616_v39 = vadd.f32 %v15191_v28, %v6440_v27  ;;  %v7711_v28 = vld [vmem:[%s15204_s30] sm:$0xff]  }
 0xbef   :  { %v6666_v42 = vpop.f32.mrf.mxu1  ;;  %7614 = vmatprep.mubr.msk.bf16.mxu1 %vm16872_vm13, %v7711_v28  ;;  %vm16886_vm13 = vmmov %vm16885_vm1 }
 0xbf0   :  { %v6693_v35 = vmax.f32 %v6675_v51, 0.0  ;;  %v6667_v21 = vadd.f32 %v6666_v42, %v6505_v15  ;;  %v6683_v15 = vmax.f32 %v6635_v48, 0.0  ;;  %v6681_v40 = vmax.f32 %v6627_v37, 0.0  ;;  %v6741_v38 = vpop.permute.xlu0 %6740  ;;  %v6746_v51 = vpop.permute.xlu1 %6745 }
 0xbf1   :  { %v6678_v19 = vmax.f32 %v6616_v39, 0.0 }
 0xbf2   :  { %v6709_v63 = vpack.c.bf16 %v6693_v35, %v6692_v29  ;;  %v6691_v24 = vmax.f32 %v6667_v21, 0.0  ;;  %v6704_v3 = vpack.c.bf16 %v6683_v15, %v6682_v61  ;;  %v6703_v5 = vpack.c.bf16 %v6681_v40, %v6680_v47 }
 0xbf3   :  { %v6702_v2 = vpack.c.bf16 %v6679_v4, %v6678_v19 }
 0xbf4   :  { %v6708_v12 = vpack.c.bf16 %v6691_v24, %v6690_v14  ;;  %7582 = vmatprep.subr.bf16.mxu0 %v6709_v63  ;;  %v6731_v36 = vpop.permute.xlu0 %6730  ;;  %v6751_v24 = vpop.permute.xlu1 %6750 }
 0xbf5   :  { %7583 = vmatpush3.bf16.msra.mxu0 %v6709_v63 }
 0xbf6   :  { %7584 = vmatprep.subr.bf16.mxu0 %v6708_v12 }
 0xbf8   :  { %v6736_v21 = vpop.permute.xlu0 %6735  ;;  %v6756_v22 = vpop.permute.xlu1 %6755 }
 0xbf9   :  { %7585 = vmatpush3.bf16.msra.mxu0 %v6708_v12 }
 0xbfa   :  { %7586 = vmatprep.subr.bf16.mxu0 %v6707_v41 }
 0xbfd   :  { %7587 = vmatpush3.bf16.msra.mxu0 %v6707_v41 }
 0xbfe   :  { %7588 = vmatprep.subr.bf16.mxu0 %v6706_v31 }
 0xc01   :  { %7589 = vmatpush3.bf16.msra.mxu0 %v6706_v31 }
 0xc02   :  { %7590 = vmatprep.subr.bf16.mxu0 %v6705_v44 }
 0xc05   :  { %7591 = vmatpush3.bf16.msra.mxu0 %v6705_v44 }
 0xc06   :  { %7592 = vmatprep.subr.bf16.mxu0 %v6704_v3 }
 0xc09   :  { %7593 = vmatpush3.bf16.msra.mxu0 %v6704_v3 }
 0xc0a   :  { %7594 = vmatprep.subr.bf16.mxu0 %v6703_v5 }
 0xc0d   :  { %7595 = vmatpush3.bf16.msra.mxu0 %v6703_v5 }
 0xc0e   :  { %7596 = vmatprep.subr.bf16.mxu0 %v6702_v2 }
 0xc11   :  { %7597 = vmatpush3.bf16.msra.mxu0 %v6702_v2 }
 0xc14   :  { %7599 = vmatmul.mubr.bf16.vlgmr.msra.gmra.mxu0 %v7708_v1 }
 0xc15   :  { %7602 = vmatprep.mubr.bf16.mxu0 %v7709_v32 }
 0xc1c   :  { %7603 = vmatmul.mubr.bf16.gmra.mxu0 %v7710_v16 }
 0xcd4   :  { %v7600_v52 = vpop.f32.mrf.mxu0 }
 0xcd5   :  { %v6825_v35 = vadd.f32 %v7600_v52, %v6731_v36 }
 0xcd6   :  { %v6816_v42 = vpop.f32.mrf.mxu0 }
 0xcd7   :  { %v6817_v0 = vadd.f32 %v6816_v42, %v6721_v56  ;;  %v6849_v49 = vadd.f32 %v6825_v35, %v15155_v53 }
 0xcd8   :  { %v7601_v29 = vpop.f32.mrf.mxu0 }
 0xcd9   :  { %v6847_v57 = vadd.f32 %v6817_v0, %v15163_v30  ;;  %v6828_v14 = vadd.f32 %v7601_v29, %v6736_v21  ;;  %v6858_v30 = vsel %vm16860_vm2, %v6849_v49, 0.0 }
 0xcda   :  { %v6819_v10 = vpop.f32.mrf.mxu0 }
 0xcdb   :  { %v6820_v63 = vadd.f32 %v6819_v10, %v6726_v18  ;;  %v6855_v17 = vsel %vm16873_vm14, %v6847_v57, 0.0  ;;  %v6850_v34 = vadd.f32 %v6828_v14, %v15159_v46 }
 0xcdc   :  { %v7604_v54 = vpop.f32.mrf.mxu0 }
 0xcdd   :  { %v6848_v33 = vadd.f32 %v6820_v63, %v15165_v55  ;;  %v6841_v45 = vadd.f32 %v7604_v54, %v6751_v24  ;;  %v6860_v53 = vsel %vm16875_vm7, %v6850_v34, 0.0 }
 0xcde   :  { %v6832_v12 = vpop.f32.mrf.mxu0 }
 0xcdf   :  { %v6856_v11 = vsel %vm16874_vm5, %v6848_v33, 0.0  ;;  %v6833_v43 = vadd.f32 %v6832_v12, %v6741_v38  ;;  %v6853_v46 = vadd.f32 %v6841_v45, %v15145_v20 }
 0xce0   :  { %v6857_v41 = vadd.f32 %v6856_v11, %v6855_v17  ;;  %v7605_v50 = vpop.f32.mrf.mxu0 }
 0xce1   :  { %v6851_v55 = vadd.f32 %v6833_v43, %v15151_v60  ;;  %v6844_v48 = vadd.f32 %v7605_v50, %v6756_v22  ;;  %v6872_v61 = vsel %vm16878_vm15, %v6853_v46, 0.0  ;;  %v6952_v43 = vpop.permute.xlu1 %6951 }
 0xce2   :  { %v6859_v6 = vadd.f32 %v6858_v30, %v6857_v41  ;;  %v6835_v8 = vpop.f32.mrf.mxu0  ;;  %v6947_v41 = vpop.permute.xlu0 %6946 }
 0xce3   :  { %v6836_v31 = vadd.f32 %v6835_v8, %v6746_v51  ;;  %v6869_v62 = vsel %vm16876_vm4, %v6851_v55, 0.0  ;;  %v6854_v37 = vadd.f32 %v6844_v48, %v15147_v59 }
 0xce4   :  { %v6861_v7 = vadd.f32 %v6860_v53, %v6859_v6 }
 0xce5   :  { %v6852_v26 = vadd.f32 %v6836_v31, %v15149_v9  ;;  %v6874_v40 = vsel %vm16879_vm3, %v6854_v37, 0.0  ;;  %v6976_v22 = vpop.permute.xlu1 %6975 }
 0xce6   :  { %v6862_v25 = vrot.slane %v6861_v7, 4  ;;  %v6971_v6 = vpop.permute.xlu0 %6970 }
 0xce7   :  { %v6870_v44 = vsel %vm16877_vm11, %v6852_v26, 0.0 }
 0xce8   :  { %v6863_v15 = vadd.f32 %v6862_v25, %v6861_v7  ;;  %v6871_v13 = vadd.f32 %v6870_v44, %v6869_v62 }
 0xce9   :  { %v6942_v48 = vpop.permute.xlu1 %6941 }
 0xcea   :  { %v6864_v58 = vrot.slane %v6863_v15, 2  ;;  %v6873_v60 = vadd.f32 %v6872_v61, %v6871_v13  ;;  %v6937_v31 = vpop.permute.xlu0 %6936 }
 0xcec   :  { %v6865_v23 = vadd.f32 %v6864_v58, %v6863_v15  ;;  %v6875_v3 = vadd.f32 %v6874_v40, %v6873_v60 }
 0xcee   :  { %v6866_v20 = vrot.slane %v6865_v23, 1  ;;  %v6876_v27 = vrot.slane %v6875_v3, 4 }
 0xcf0   :  { %v6877_v9 = vadd.f32 %v6876_v27, %v6875_v3  ;;  %v6867_v47 = vadd.f32 %v6866_v20, %v6865_v23 }
 0xcf2   :  { %v6878_v39 = vrot.slane %v6877_v9, 2  ;;  %v6868_v4 = vmul.f32 0.03125, %v6867_v47 }
 0xcf4   :  { %v6879_v5 = vadd.f32 %v6878_v39, %v6877_v9  ;;  %v6884_v2 = vsub.f32 %v6848_v33, %v6868_v4  ;;  %v6883_v1 = vsub.f32 %v6847_v57, %v6868_v4  ;;  %v6885_v32 = vsub.f32 %v6849_v49, %v6868_v4 }
 0xcf5   :  { %v6886_v28 = vsub.f32 %v6850_v34, %v6868_v4 }
 0xcf6   :  { %v6880_v59 = vrot.slane %v6879_v5, 1  ;;  %v6892_v52 = vmul.f32 %v6884_v2, %v6884_v2  ;;  %v6891_v51 = vmul.f32 %v6883_v1, %v6883_v1  ;;  %v6893_v42 = vmul.f32 %v6885_v32, %v6885_v32 }
 0xcf7   :  { %v6894_v10 = vmul.f32 %v6886_v28, %v6886_v28 }
 0xcf8   :  { %v6881_v19 = vadd.f32 %v6880_v59, %v6879_v5 }
 0xcfa   :  { %v6882_v16 = vmul.f32 0.03125, %v6881_v19 }
 0xcfc   :  { %v6887_v56 = vsub.f32 %v6851_v55, %v6882_v16  ;;  %v6888_v38 = vsub.f32 %v6852_v26, %v6882_v16  ;;  %v6889_v18 = vsub.f32 %v6853_v46, %v6882_v16  ;;  %v6890_v36 = vsub.f32 %v6854_v37, %v6882_v16  ;;  %v6966_v46 = vpop.permute.xlu1 %6965  ;;  %v6961_v26 = vpop.permute.xlu0 %6960 }
 0xcfe   :  { %v6895_v0 = vmul.f32 %v6887_v56, %v6887_v56  ;;  %v6896_v29 = vmul.f32 %v6888_v38, %v6888_v38  ;;  %v6897_v35 = vmul.f32 %v6889_v18, %v6889_v18  ;;  %v6898_v21 = vmul.f32 %v6890_v36, %v6890_v36 }
 0xd00   :  { %v6899_v14 = vadd.f32 %v6895_v0, %v6891_v51  ;;  %v6900_v63 = vadd.f32 %v6896_v29, %v6892_v52  ;;  %v6901_v24 = vadd.f32 %v6897_v35, %v6893_v42  ;;  %v6902_v54 = vadd.f32 %v6898_v21, %v6894_v10  ;;  %v7044_v25 = vpop.permute.xlu1 %7043  ;;  %v7039_v62 = vpop.permute.xlu0 %7038 }
 0xd02   :  { %v6903_v57 = vsel %vm16880_vm6, %v6899_v14, 0.0  ;;  %v6904_v49 = vsel %vm16881_vm10, %v6900_v63, 0.0  ;;  %v6906_v12 = vsel %vm16882_vm8, %v6901_v24, 0.0  ;;  %v6908_v34 = vsel %vm16883_vm12, %v6902_v54, 0.0 }
 0xd03   :  { %v6905_v33 = vadd.f32 %v6904_v49, %v6903_v57 }
 0xd04   :  { %v7034_v3 = vpop.permute.xlu1 %7033  ;;  %v7029_v20 = vpop.permute.xlu0 %7028 }
 0xd05   :  { %v6907_v17 = vadd.f32 %v6906_v12, %v6905_v33 }
 0xd07   :  { %v6909_v11 = vadd.f32 %v6908_v34, %v6907_v17 }
 0xd08   :  { %v7024_v10 = vpop.permute.xlu1 %7023  ;;  %v7019_v14 = vpop.permute.xlu0 %7018 }
 0xd09   :  { %v6910_v50 = vrot.slane %v6909_v11, 4 }
 0xd0b   :  { %v6911_v30 = vadd.f32 %v6910_v50, %v6909_v11 }
 0xd0c   :  { %v7014_v34 = vpop.permute.xlu1 %7013  ;;  %v7009_v11 = vpop.permute.xlu0 %7008 }
 0xd0d   :  { %v6912_v45 = vrot.slane %v6911_v30, 2 }
 0xd0f   :  { %v6913_v8 = vadd.f32 %v6912_v45, %v6911_v30  ;;  %v7712_v45 = vld [vmem:[%s15204_s30 + $0x8] ss:$0 sps:$4 sm:$0x11]  }
 0xd11   :  { %v6914_v53 = vrot.slane %v6913_v8, 1 }
 0xd13   :  { %v6915_v55 = vadd.f32 %v6914_v53, %v6913_v8 }
 0xd15   :  { %v6916_v7 = vmul.f32 0.032258064, %v6915_v55 }
 0xd17   :  { %8263 = vrsqrt.f32 %v6916_v7  ;;  %v7072_v7 = vpop.permute.xlu1 %7071 }
 0xd24   :  { %v8264_v37 = vpop.eup %8263 }
 0xd25   :  { %v6923_v44 = vmul.f32 %v8264_v37, %v6888_v38  ;;  %v6920_v15 = vmul.f32 %v8264_v37, %v6885_v32  ;;  %v6921_v13 = vmul.f32 %v8264_v37, %v6886_v28  ;;  %v6924_v61 = vmul.f32 %v8264_v37, %v6889_v18 }
 0xd26   :  { %v6925_v58 = vmul.f32 %v8264_v37, %v6890_v36  ;;  %v6918_v60 = vmul.f32 %v8264_v37, %v6883_v1  ;;  %v6919_v40 = vmul.f32 %v8264_v37, %v6884_v2  ;;  %v6922_v23 = vmul.f32 %v8264_v37, %v6887_v56 }
 0xd27   :  { %v6979_v27 = vmul.f32 %v6966_v46, %v6923_v44  ;;  %v6991_v9 = vmul.f32 %v6942_v48, %v6923_v44  ;;  %v6988_v47 = vmul.f32 %v6971_v6, %v6920_v15  ;;  %v6989_v39 = vmul.f32 %v6976_v22, %v6921_v13 }
 0xd28   :  { %v6992_v5 = vmul.f32 %v6947_v41, %v6924_v61  ;;  %v6993_v4 = vmul.f32 %v6952_v43, %v6925_v58  ;;  %v6986_v59 = vmul.f32 %v6961_v26, %v6918_v60  ;;  %v6987_v19 = vmul.f32 %v6966_v46, %v6919_v40 }
 0xd29   :  { %v6990_v16 = vmul.f32 %v6937_v31, %v6922_v23  ;;  %v6956_v52 = vmul.f32 %v6947_v41, %v6920_v15  ;;  %v6957_v38 = vmul.f32 %v6952_v43, %v6921_v13  ;;  %v6980_v32 = vmul.f32 %v6971_v6, %v6924_v61 }
 0xd2a   :  { %v6996_v28 = vadd.f32 %v6992_v5, %v6988_v47  ;;  %v6997_v18 = vadd.f32 %v6993_v4, %v6989_v39  ;;  %v6995_v36 = vadd.f32 %v6991_v9, %v6987_v19  ;;  %v6981_v1 = vmul.f32 %v6976_v22, %v6925_v58  ;;  %v7067_v22 = vpop.permute.xlu0 %7066 }
 0xd2b   :  { %v6994_v2 = vadd.f32 %v6990_v16, %v6986_v59  ;;  %v6984_v56 = vsub.f32 %v6956_v52, %v6980_v32  ;;  %v6954_v51 = vmul.f32 %v6937_v31, %v6918_v60  ;;  %v6955_v42 = vmul.f32 %v6942_v48, %v6919_v40 }
 0xd2c   :  { %v7052_v0 = vadd.f32 %v7039_v62, %v6996_v28  ;;  %v7053_v29 = vadd.f32 %v7044_v25, %v6997_v18  ;;  %v7051_v35 = vadd.f32 %v7034_v3, %v6995_v36  ;;  %v6985_v21 = vsub.f32 %v6957_v38, %v6981_v1 }
 0xd2d   :  { %v7050_v63 = vadd.f32 %v7029_v20, %v6994_v2  ;;  %v6978_v24 = vmul.f32 %v6961_v26, %v6922_v23  ;;  %v7048_v57 = vadd.f32 %v7019_v14, %v6984_v56  ;;  %v6983_v17 = vsub.f32 %v6955_v42, %v6979_v27 }
 0xd2e   :  { %v7060_v54 = vpack.c.bf16 %v7053_v29, %v7052_v0  ;;  %v7049_v33 = vadd.f32 %v7024_v10, %v6985_v21  ;;  %v7077_v6 = vpop.permute.xlu0 %7076 }
 0xd2f   :  { %v7059_v49 = vpack.c.bf16 %v7051_v35, %v7050_v63  ;;  %v6982_v12 = vsub.f32 %v6954_v51, %v6978_v24  ;;  %v7047_v50 = vadd.f32 %v7014_v34, %v6983_v17 }
 0xd30   :  { %7606 = vmatprep.subr.bf16.mxu1 %v7060_v54  ;;  %v7058_v43 = vpack.c.bf16 %v7049_v33, %v7048_v57 }
 0xd31   :  { %7607 = vmatpush3.bf16.msra.mxu1 %v7060_v54  ;;  %v7046_v41 = vadd.f32 %v7009_v11, %v6982_v12 }
 0xd32   :  { %7608 = vmatprep.subr.bf16.mxu1 %v7059_v49 }
 0xd33   :  { %v7057_v30 = vpack.c.bf16 %v7047_v50, %v7046_v41 }
 0xd35   :  { %7609 = vmatpush3.bf16.msra.mxu1 %v7059_v49 }
 0xd36   :  { %7610 = vmatprep.subr.bf16.mxu1 %v7058_v43 }
 0xd39   :  { %7611 = vmatpush3.bf16.msra.mxu1 %v7058_v43 }
 0xd3a   :  { %7612 = vmatprep.subr.bf16.mxu1 %v7057_v30 }
 0xd3d   :  { %7613 = vmatpush3.bf16.msra.mxu1 %v7057_v30 }
 0xd40   :  { %7615 = vmatmul.mubr.msk.bf16.vlgmr.msra.gmra.mxu1 %vm16884_vm9, %v7712_v45 }
 0xe00   :  { %v7616_v8 = vpop.f32.mrf.mxu1 }
 0xe01   :  { %v7136_v53 = vadd.f32 %v7616_v8, %v7077_v6 }
 0xe02   :  { %v7127_v55 = vpop.f32.mrf.mxu1 }
 0xe03   :  { %7144 = vst.msk [vmem:[%s7177_s4 + $0x10] sm:$0x3] %vm7143_vm0, %v7136_v53  ;;  %v7128_v48 = vadd.f32 %v7127_v55, %v7067_v22 }
 0xe04   :  { %v7617_v31 = vpop.f32.mrf.mxu1 }
 0xe05   :  { %7141 = vst.msk [vmem:[%s7177_s4] sm:$0xff] %vm16885_vm1, %v7128_v48 }
 0xe06   :  { %v7130_v46 = vpop.f32.mrf.mxu1 }
 0xe07   :  { %v7131_v26 = vadd.f32 %v7130_v46, %v7072_v7 }
 0xe09   :  { %7142 = vst.msk [vmem:[%s7177_s4 + $0x8] sm:$0xff] %vm16886_vm13, %v7131_v26 }

</bundles_post_ra>
